<compile_context>
chip_gen: v5e
topology: v5e:2x2
jax: 0.10.0
libtpu: 0.0.40
codegen_flags: <defaults>
</compile_context>

<pallas_src>
import math
from functools import partial

import jax
import jax.numpy as jnp
from jax.experimental import pallas as pl
from jax.experimental.pallas import tpu as pltpu

# ---------------- config (matches the module's __init__ at small scale) ----------------
NUM_FEATURES = 4
EMBED_DIM = 8
VOCAB = 10
DIMS = NUM_FEATURES * EMBED_DIM          # 32  (sum of feature embed dims)
NUM_DOMAINS = 2
N_CROSS = 2                              # n_cross_layers
K = 16                                   # adapter rank k
KK = K * K                               # 256
H_HID = 64                               # hyper_dims[0]
M_HID = 64                               # mlp_params['dims'][0]
M_OUT = 32                               # mlp_params['dims'][-1]
ADP_MID = 32                             # literal "32" in the module's adapter (u[1]/v[0])
BN_EPS = 1e-5                            # nn.BatchNorm1d default eps
LN_EPS = 1e-5                            # self.eps
BATCH = 1000
TILE_B = 256                             # batch tile (256..1024 ok); VMEM use << 32 MiB -> v7x safe
MM_DTYPE = jnp.bfloat16                  # matmul operand dtype (f32 accumulation); jnp.float32 for bit-exact f32

# ---------------- packed parameter layout (all column slots 128-aligned) ----------------
# buffer A: matrices with 32 rows
A_U0R, A_U1R, A_HW1, A_MW1, A_CW = 0, KK, 2 * KK, 2 * KK + 128, 2 * KK + 256
WA = 2 * KK + 384                        # 896
# buffer B: matrices with 64 rows
B_HW2, B_MW2 = 0, KK
WB = KK + 128                            # 384
# buffer C: matrices with 256 rows
C_SV0, C_SV1 = 0, 128
WC = 256
# f32 bias / vector rows
V_HB1, V_MB1, V_HB2, V_MB2, V_BADP0, V_BADP1, V_CB = 0, 1, 2, 3, 4, 5, 6   # cb rows 6..6+N_CROSS-1
VEC_ROWS, VEC_W = 8, 256
# lane-dense intermediate produced by pass 1
F_XC, F_MLP, F_A2, FEAT_W = 0, DIMS, DIMS + M_OUT, 128
# pass-2 per-feature parameter rows
P_GAMMA, P_BETA, P_MEAN, P_INVSTD, P_LRB = 0, 1, 2, 3, 4


# =============================== kernels ===============================
def _dcn_feat_kernel(x_ref, wa_ref, wb_ref, wc_ref, vec_ref, feat_ref):
    """Pass 1: heavy per-sample compute for one batch tile.

    Writes a lane-dense (TILE_B, 128) block:
      [:, 0:32]  cross-network output, [:, 32:64] MLP output,
      [:, 64:96] adapter output *before* the batch-wise normalization, [:, 96:128] zeros.
    """
    x = x_ref[...]                                           # (Tb, DIMS) f32
    x_mm = x.astype(MM_DTYPE)

    # (Linear -> BN(eval) -> ReLU -> Dropout(0)); BN scale pre-folded into w/b.
    def dense_relu(h_mm, w, b):
        z = jnp.dot(h_mm, w, preferred_element_type=jnp.float32) + b
        return jnp.maximum(z, 0.0)

    # ---- hyper_net ----
    h1 = dense_relu(x_mm, wa_ref[:, A_HW1:A_HW1 + H_HID],
                    vec_ref[V_HB1:V_HB1 + 1, :H_HID])                      # (Tb, 64)
    hyper = dense_relu(h1.astype(MM_DTYPE), wb_ref[:, B_HW2:B_HW2 + KK],
                       vec_ref[V_HB2:V_HB2 + 1, :KK])                      # (Tb, 256)

    # ---- MLP trunk (output_layer=False) ----
    m1 = dense_relu(x_mm, wa_ref[:, A_MW1:A_MW1 + M_HID],
                    vec_ref[V_MB1:V_MB1 + 1, :M_HID])                      # (Tb, 64)
    mlp_out = dense_relu(m1.astype(MM_DTYPE), wb_ref[:, B_MW2:B_MW2 + M_OUT],
                         vec_ref[V_MB2:V_MB2 + 1, :M_OUT])                 # (Tb, 32)

    # ---- CrossNetwork: x_{l+1} = x0 * (x_l @ w_l) + b_l + x_l (standard formulation) ----
    x0 = x
    xc = x
    for l in range(N_CROSS):
        w_col = wa_ref[:, A_CW + l:A_CW + l + 1]                           # (DIMS, 1)
        b_row = vec_ref[V_CB + l:V_CB + l + 1, :DIMS]                      # (1, DIMS)
        xw = jnp.dot(xc.astype(MM_DTYPE), w_col,
                     preferred_element_type=jnp.float32)                   # (Tb, 1) on MXU
        xc = x0 * xw + b_row + xc

    # ---- adapter, refactored onto the MXU (R/S selection matrices folded into u/v) ----
    t1 = jnp.dot(mlp_out.astype(MM_DTYPE), wa_ref[:, A_U0R:A_U0R + KK],
                 preferred_element_type=jnp.float32)                       # (Tb, 256)
    a1 = jax.nn.sigmoid(
        jnp.dot((t1 * hyper).astype(MM_DTYPE), wc_ref[:, C_SV0:C_SV0 + ADP_MID],
                preferred_element_type=jnp.float32)
        + vec_ref[V_BADP0:V_BADP0 + 1, :ADP_MID])                          # (Tb, 32)
    t2 = jnp.dot(a1.astype(MM_DTYPE), wa_ref[:, A_U1R:A_U1R + KK],
                 preferred_element_type=jnp.float32)                       # (Tb, 256)
    a2 = (jnp.dot((t2 * hyper).astype(MM_DTYPE), wc_ref[:, C_SV1:C_SV1 + M_OUT],
                  preferred_element_type=jnp.float32)
          + vec_ref[V_BADP1:V_BADP1 + 1, :M_OUT])                          # (Tb, 32)

    pad = jnp.zeros((x.shape[0], FEAT_W - (DIMS + 2 * M_OUT)), jnp.float32)
    feat_ref[...] = jnp.concatenate([xc, mlp_out, a2, pad], axis=1)        # full-lane store


def _dcn_head_kernel(feat_ref, dom_ref, p2_ref, lrw_ref, out_ref):
    """Pass 2: batch-wise normalization (full-batch stats supplied), residual add,
    LR head, sigmoid and domain-validity masking for one batch tile."""
    xc = feat_ref[:, F_XC:F_XC + DIMS]
    mlp_out = feat_ref[:, F_MLP:F_MLP + M_OUT]
    a2 = feat_ref[:, F_A2:F_A2 + M_OUT]

    gamma = p2_ref[P_GAMMA:P_GAMMA + 1, :]
    beta = p2_ref[P_BETA:P_BETA + 1, :]
    mean = p2_ref[P_MEAN:P_MEAN + 1, :]
    inv_std = p2_ref[P_INVSTD:P_INVSTD + 1, :]
    lrb = p2_ref[P_LRB:P_LRB + 1, 0:1]

    adp = gamma * ((a2 - mean) * inv_std) + beta
    mlp_res = adp + mlp_out

    # LR head on [cn_out, mlp_res] without materializing the concat: split lrw rows.
    y = (jnp.dot(xc, lrw_ref[0:DIMS, :], preferred_element_type=jnp.float32)
         + jnp.dot(mlp_res, lrw_ref[DIMS:DIMS + M_OUT, :],
                   preferred_element_type=jnp.float32)
         + lrb)                                                            # (Tb, 1)
    prob = jax.nn.sigmoid(y)

    d = dom_ref[...]                                                       # (Tb, 1) int32
    valid = jnp.logical_and(d >= 0, d < NUM_DOMAINS)
    out_ref[...] = jnp.where(valid, prob, jnp.zeros_like(prob))


# =============================== wrapper ===============================
@jax.jit
def dcn_md_adp_forward(embed_x, domain_id, packed):
    """embed_x: (B, DIMS) f32, domain_id: (B,) int. Returns (B,) f32 probabilities."""
    b = embed_x.shape[0]
    nt = pl.cdiv(b, TILE_B)
    b_pad = nt * TILE_B

    x = jnp.pad(embed_x.astype(jnp.float32), ((0, b_pad - b), (0, 0)))
    dom = jnp.pad(domain_id.astype(jnp.int32), (0, b_pad - b),
                  constant_values=-1).reshape(b_pad, 1)

    cparams = pltpu.CompilerParams(dimension_semantics=("parallel",),
                                   vmem_limit_bytes=32 * 1024 * 1024)

    feat = pl.pallas_call(
        _dcn_feat_kernel,
        out_shape=jax.ShapeDtypeStruct((b_pad, FEAT_W), jnp.float32),
        grid=(nt,),
        in_specs=[
            pl.BlockSpec((TILE_B, DIMS), lambda i: (i, 0)),        # batch-tiled activations
            pl.BlockSpec((DIMS, WA), lambda i: (0, 0)),            # packed weights stay resident
            pl.BlockSpec((H_HID, WB), lambda i: (0, 0)),
            pl.BlockSpec((KK, WC), lambda i: (0, 0)),
            pl.BlockSpec((VEC_ROWS, VEC_W), lambda i: (0, 0)),
        ],
        out_specs=pl.BlockSpec((TILE_B, FEAT_W), lambda i: (i, 0)),
        compiler_params=cparams,
    )(x, packed["wA"], packed["wB"], packed["wC"], packed["vecs"])

    # Full-batch statistics for the manual normalization (torch.var default: unbiased).
    # Kept between the two passes so batch tiling preserves the module's semantics.
    a2 = feat[:b, F_A2:F_A2 + M_OUT]
    mean = jnp.mean(a2, axis=0)
    var = jnp.sum(jnp.square(a2 - mean), axis=0) / (b - 1)
    inv_std = jax.lax.rsqrt(var + LN_EPS)

    p2 = jnp.zeros((8, M_OUT), jnp.float32)
    p2 = (p2.at[P_GAMMA].set(packed["gamma"])
            .at[P_BETA].set(packed["beta"])
            .at[P_MEAN].set(mean)
            .at[P_INVSTD].set(inv_std)
            .at[P_LRB, 0].set(packed["lrb"]))

    out = pl.pallas_call(
        _dcn_head_kernel,
        out_shape=jax.ShapeDtypeStruct((b_pad, 1), jnp.float32),
        grid=(nt,),
        in_specs=[
            pl.BlockSpec((TILE_B, FEAT_W), lambda i: (i, 0)),
            pl.BlockSpec((TILE_B, 1), lambda i: (i, 0)),
            pl.BlockSpec((8, M_OUT), lambda i: (0, 0)),
            pl.BlockSpec((DIMS + M_OUT, 1), lambda i: (0, 0)),
        ],
        out_specs=pl.BlockSpec((TILE_B, 1), lambda i: (i, 0)),
        compiler_params=cparams,
    )(feat, dom, p2, packed["lrw"])

    return out[:b, 0]                                             # .squeeze(1)


# =============================== parameters ===============================
def init_params(key):
    """Synthetic parameters with the shapes of the module's __init__."""
    def linear_init(k, fan_in, fan_out):
        k1, k2 = jax.random.split(k)
        bound = 1.0 / math.sqrt(fan_in)
        w = jax.random.uniform(k1, (fan_in, fan_out), jnp.float32, -bound, bound)
        b = jax.random.uniform(k2, (1, fan_out), jnp.float32, -bound, bound)
        return w, b

    keys = jax.random.split(key, 8)
    hw1, hb1 = linear_init(keys[0], DIMS, H_HID)
    hw2, hb2 = linear_init(keys[1], H_HID, KK)
    mw1, mb1 = linear_init(keys[2], DIMS, M_HID)
    mw2, mb2 = linear_init(keys[3], M_HID, M_OUT)
    lrw, lrb = linear_init(keys[4], DIMS + M_OUT, 1)
    cw_bound = 1.0 / math.sqrt(DIMS)
    cw = jax.random.uniform(keys[5], (N_CROSS, DIMS), jnp.float32, -cw_bound, cw_bound)
    # The module initializes cross-network biases to zero; use nonzero values here so the
    # corrected bias placement x_{l+1} = x0*(x_l.w) + b + x_l is actually exercised.
    cb = 0.05 * jax.random.normal(keys[7], (N_CROSS, DIMS), jnp.float32)
    emb = 0.1 * jax.random.normal(keys[6], (NUM_FEATURES, VOCAB, EMBED_DIM), jnp.float32)
    return dict(
        hw1=hw1, hb1=hb1, hw2=hw2, hb2=hb2,
        cw=cw, cb=cb,
        mw1=mw1, mb1=mb1, mw2=mw2, mb2=mb2,
        u0=jnp.ones((M_OUT, K), jnp.float32),          # self.u[0]
        u1=jnp.ones((ADP_MID, K), jnp.float32),        # self.u[1]
        v0=jnp.ones((K, ADP_MID), jnp.float32),        # self.v[0]
        v1=jnp.ones((K, M_OUT), jnp.float32),          # self.v[1]
        badp0=jnp.zeros((1, ADP_MID), jnp.float32),    # self.b_list[0]
        badp1=jnp.zeros((1, M_OUT), jnp.float32),      # self.b_list[1]
        gamma1=jnp.ones((1, M_OUT), jnp.float32),
        bias1=jnp.zeros((1, M_OUT), jnp.float32),
        lrw=lrw, lrb=lrb,
        emb=emb,
    )


def pack_params(p):
    """One-time host-side parameter preparation:
      * fold the eval-mode BatchNorm scale 1/sqrt(1+eps) into the linear weights/biases,
      * fold the adapter's constant 0/1 selection matrices R/S into u/v (adapter == MXU matmuls),
      * pack everything into a few lane-aligned buffers (matmul weights in MM_DTYPE)."""
    assert M_OUT == DIMS and ADP_MID == DIMS and H_HID == M_HID  # packed-buffer row groups
    s = 1.0 / math.sqrt(1.0 + BN_EPS)

    c = jnp.arange(KK)
    R = (c[None, :] // K == jnp.arange(K)[:, None]).astype(jnp.float32)    # (K, K*K)
    S = (c[:, None] % K == jnp.arange(K)[None, :]).astype(jnp.float32)     # (K*K, K)
    u0R = p["u0"] @ R
    u1R = p["u1"] @ R
    Sv0 = S @ p["v0"]
    Sv1 = S @ p["v1"]

    wa = jnp.zeros((DIMS, WA), jnp.float32)
    wa = (wa.at[:, A_U0R:A_U0R + KK].set(u0R)
            .at[:, A_U1R:A_U1R + KK].set(u1R)
            .at[:, A_HW1:A_HW1 + H_HID].set(p["hw1"] * s)
            .at[:, A_MW1:A_MW1 + M_HID].set(p["mw1"] * s)
            .at[:, A_CW:A_CW + N_CROSS].set(p["cw"].T))
    wb = jnp.zeros((H_HID, WB), jnp.float32)
    wb = (wb.at[:, B_HW2:B_HW2 + KK].set(p["hw2"] * s)
            .at[:, B_MW2:B_MW2 + M_OUT].set(p["mw2"] * s))
    wc = jnp.zeros((KK, WC), jnp.float32)
    wc = (wc.at[:, C_SV0:C_SV0 + ADP_MID].set(Sv0)
            .at[:, C_SV1:C_SV1 + M_OUT].set(Sv1))

    vecs = jnp.zeros((VEC_ROWS, VEC_W), jnp.float32)
    vecs = (vecs.at[V_HB1, :H_HID].set(p["hb1"].reshape(-1) * s)
                .at[V_MB1, :M_HID].set(p["mb1"].reshape(-1) * s)
                .at[V_HB2, :KK].set(p["hb2"].reshape(-1) * s)
                .at[V_MB2, :M_OUT].set(p["mb2"].reshape(-1) * s)
                .at[V_BADP0, :ADP_MID].set(p["badp0"].reshape(-1))
                .at[V_BADP1, :M_OUT].set(p["badp1"].reshape(-1)))
    for l in range(N_CROSS):
        vecs = vecs.at[V_CB + l, :DIMS].set(p["cb"][l])

    return dict(
        wA=wa.astype(MM_DTYPE), wB=wb.astype(MM_DTYPE), wC=wc.astype(MM_DTYPE),
        vecs=vecs,
        lrw=p["lrw"].astype(jnp.float32),
        gamma=p["gamma1"].reshape(-1).astype(jnp.float32),
        beta=p["bias1"].reshape(-1).astype(jnp.float32),
        lrb=p["lrb"].reshape(()).astype(jnp.float32),
    )


# =============================== demo ===============================
if __name__ == "__main__":
    key = jax.random.PRNGKey(0)
    pkey, ikey, dkey = jax.random.split(key, 3)
    params = init_params(pkey)
    packed = pack_params(params)

    feat_ids = jax.random.randint(ikey, (BATCH, NUM_FEATURES), 0, VOCAB)
    domain_id = jax.random.randint(dkey, (BATCH,), 0, NUM_DOMAINS)

    # EmbeddingLayer(..., squeeze_dim=True): concat per-feature embeddings.
    # TODO(synk): the embedding gather stays in XLA glue (data-dependent gather; a Pallas
    # version would need manual DMA gathers and is not the hot path here).
    embed_x = jnp.concatenate(
        [params["emb"][f][feat_ids[:, f]] for f in range(NUM_FEATURES)], axis=1
    ).astype(jnp.float32)                                        # (B, DIMS)

    out = dcn_md_adp_forward(embed_x, domain_id, packed)
    jax.block_until_ready(out)
    assert out.shape == (BATCH,) and out.dtype == jnp.float32
    assert bool(jnp.all(jnp.isfinite(out)))
    print("KERNEL_OK")
</pallas_src>

<mosaic_0001>
module attributes {stable_mosaic.version = 11 : i64} {
  func.func @_dcn_feat_kernel(%arg0: i32, %arg1: memref<256x32xf32, #tpu.memory_space<vmem>>, %arg2: memref<32x896xbf16, #tpu.memory_space<vmem>>, %arg3: memref<64x384xbf16, #tpu.memory_space<vmem>>, %arg4: memref<256x256xbf16, #tpu.memory_space<vmem>>, %arg5: memref<8x256xf32, #tpu.memory_space<vmem>>, %arg6: memref<256x128xf32, #tpu.memory_space<vmem>>) attributes {dimension_semantics = [#tpu.dimension_semantics<parallel>], iteration_bounds = array<i64: 4>, scalar_prefetch = 0 : i64, scratch_operands = 0 : i64, tpu.core_type = #tpu.core_type<tc>, window_params = [{transform_indices = @transform_0, window_bounds = array<i64: 256, 32>}, {pipeline_mode = #tpu.pipeline_mode<synchronous>, transform_indices = @transform_1, window_bounds = array<i64: 32, 896>}, {pipeline_mode = #tpu.pipeline_mode<synchronous>, transform_indices = @transform_2, window_bounds = array<i64: 64, 384>}, {pipeline_mode = #tpu.pipeline_mode<synchronous>, transform_indices = @transform_3, window_bounds = array<i64: 256, 256>}, {pipeline_mode = #tpu.pipeline_mode<synchronous>, transform_indices = @transform_4, window_bounds = array<i64: 8, 256>}, {transform_indices = @transform_5, window_bounds = array<i64: 256, 128>}]} {
    %c0 = arith.constant 0 : index
    %c0_0 = arith.constant 0 : index
    %0 = vector.load %arg1[%c0, %c0_0] : memref<256x32xf32, #tpu.memory_space<vmem>>, vector<256x32xf32>
    %1 = arith.truncf %0 : vector<256x32xf32> to vector<256x32xbf16>
    %c0_1 = arith.constant 0 : index
    %c512 = arith.constant 512 : index
    %2 = vector.load %arg2[%c0_1, %c512] : memref<32x896xbf16, #tpu.memory_space<vmem>>, vector<32x64xbf16>
    %c0_2 = arith.constant 0 : index
    %c0_3 = arith.constant 0 : index
    %3 = vector.load %arg5[%c0_2, %c0_3] : memref<8x256xf32, #tpu.memory_space<vmem>>, vector<1x64xf32>
    %cst = arith.constant dense<0.000000e+00> : vector<256x64xf32>
    %4 = tpu.matmul %1, %2, %cst {dimension_numbers = #tpu.dot_dimension_numbers<[1], [0], [0], [1], [0, 0, 1, 1], [], []>} : vector<256x32xbf16>, vector<32x64xbf16>, vector<256x64xf32> -> vector<256x64xf32>
    %5 = vector.broadcast %3 : vector<1x64xf32> to vector<256x64xf32>
    %6 = arith.addf %4, %5 : vector<256x64xf32>
    %cst_4 = arith.constant 0.000000e+00 : f32
    %7 = vector.broadcast %cst_4 : f32 to vector<256x64xf32>
    %8 = arith.maximumf %6, %7 : vector<256x64xf32>
    %9 = arith.truncf %8 : vector<256x64xf32> to vector<256x64xbf16>
    %c0_5 = arith.constant 0 : index
    %c0_6 = arith.constant 0 : index
    %10 = vector.load %arg3[%c0_5, %c0_6] : memref<64x384xbf16, #tpu.memory_space<vmem>>, vector<64x256xbf16>
    %c2 = arith.constant 2 : index
    %c0_7 = arith.constant 0 : index
    %11 = vector.load %arg5[%c2, %c0_7] : memref<8x256xf32, #tpu.memory_space<vmem>>, vector<1x256xf32>
    %cst_8 = arith.constant dense<0.000000e+00> : vector<256x256xf32>
    %12 = tpu.matmul %9, %10, %cst_8 {dimension_numbers = #tpu.dot_dimension_numbers<[1], [0], [0], [1], [0, 0, 1, 1], [], []>} : vector<256x64xbf16>, vector<64x256xbf16>, vector<256x256xf32> -> vector<256x256xf32>
    %13 = vector.broadcast %11 : vector<1x256xf32> to vector<256x256xf32>
    %14 = arith.addf %12, %13 : vector<256x256xf32>
    %cst_9 = arith.constant 0.000000e+00 : f32
    %15 = vector.broadcast %cst_9 : f32 to vector<256x256xf32>
    %16 = arith.maximumf %14, %15 : vector<256x256xf32>
    %c0_10 = arith.constant 0 : index
    %c640 = arith.constant 640 : index
    %17 = vector.load %arg2[%c0_10, %c640] : memref<32x896xbf16, #tpu.memory_space<vmem>>, vector<32x64xbf16>
    %c1 = arith.constant 1 : index
    %c0_11 = arith.constant 0 : index
    %18 = vector.load %arg5[%c1, %c0_11] : memref<8x256xf32, #tpu.memory_space<vmem>>, vector<1x64xf32>
    %cst_12 = arith.constant dense<0.000000e+00> : vector<256x64xf32>
    %19 = tpu.matmul %1, %17, %cst_12 {dimension_numbers = #tpu.dot_dimension_numbers<[1], [0], [0], [1], [0, 0, 1, 1], [], []>} : vector<256x32xbf16>, vector<32x64xbf16>, vector<256x64xf32> -> vector<256x64xf32>
    %20 = vector.broadcast %18 : vector<1x64xf32> to vector<256x64xf32>
    %21 = arith.addf %19, %20 : vector<256x64xf32>
    %cst_13 = arith.constant 0.000000e+00 : f32
    %22 = vector.broadcast %cst_13 : f32 to vector<256x64xf32>
    %23 = arith.maximumf %21, %22 : vector<256x64xf32>
    %24 = arith.truncf %23 : vector<256x64xf32> to vector<256x64xbf16>
    %c0_14 = arith.constant 0 : index
    %c256 = arith.constant 256 : index
    %25 = vector.load %arg3[%c0_14, %c256] : memref<64x384xbf16, #tpu.memory_space<vmem>>, vector<64x32xbf16>
    %c3 = arith.constant 3 : index
    %c0_15 = arith.constant 0 : index
    %26 = vector.load %arg5[%c3, %c0_15] : memref<8x256xf32, #tpu.memory_space<vmem>>, vector<1x32xf32>
    %cst_16 = arith.constant dense<0.000000e+00> : vector<256x32xf32>
    %27 = tpu.matmul %24, %25, %cst_16 {dimension_numbers = #tpu.dot_dimension_numbers<[1], [0], [0], [1], [0, 0, 1, 1], [], []>} : vector<256x64xbf16>, vector<64x32xbf16>, vector<256x32xf32> -> vector<256x32xf32>
    %28 = vector.broadcast %26 : vector<1x32xf32> to vector<256x32xf32>
    %29 = arith.addf %27, %28 : vector<256x32xf32>
    %cst_17 = arith.constant 0.000000e+00 : f32
    %30 = vector.broadcast %cst_17 : f32 to vector<256x32xf32>
    %31 = arith.maximumf %29, %30 : vector<256x32xf32>
    %c0_18 = arith.constant 0 : index
    %c768 = arith.constant 768 : index
    %32 = vector.load %arg2[%c0_18, %c768] : memref<32x896xbf16, #tpu.memory_space<vmem>>, vector<32x1xbf16>
    %c6 = arith.constant 6 : index
    %c0_19 = arith.constant 0 : index
    %33 = vector.load %arg5[%c6, %c0_19] : memref<8x256xf32, #tpu.memory_space<vmem>>, vector<1x32xf32>
    %34 = arith.truncf %0 : vector<256x32xf32> to vector<256x32xbf16>
    %cst_20 = arith.constant dense<0.000000e+00> : vector<256x1xf32>
    %35 = tpu.matmul %34, %32, %cst_20 {dimension_numbers = #tpu.dot_dimension_numbers<[1], [0], [0], [1], [0, 0, 1, 1], [], []>} : vector<256x32xbf16>, vector<32x1xbf16>, vector<256x1xf32> -> vector<256x1xf32>
    %36 = vector.broadcast %35 : vector<256x1xf32> to vector<256x32xf32>
    %37 = arith.mulf %0, %36 : vector<256x32xf32>
    %38 = vector.broadcast %33 : vector<1x32xf32> to vector<256x32xf32>
    %39 = arith.addf %37, %38 : vector<256x32xf32>
    %40 = arith.addf %39, %0 : vector<256x32xf32>
    %c0_21 = arith.constant 0 : index
    %c769 = arith.constant 769 : index
    %41 = vector.load %arg2[%c0_21, %c769] : memref<32x896xbf16, #tpu.memory_space<vmem>>, vector<32x1xbf16>
    %c7 = arith.constant 7 : index
    %c0_22 = arith.constant 0 : index
    %42 = vector.load %arg5[%c7, %c0_22] : memref<8x256xf32, #tpu.memory_space<vmem>>, vector<1x32xf32>
    %43 = arith.truncf %40 : vector<256x32xf32> to vector<256x32xbf16>
    %cst_23 = arith.constant dense<0.000000e+00> : vector<256x1xf32>
    %44 = tpu.matmul %43, %41, %cst_23 {dimension_numbers = #tpu.dot_dimension_numbers<[1], [0], [0], [1], [0, 0, 1, 1], [], []>} : vector<256x32xbf16>, vector<32x1xbf16>, vector<256x1xf32> -> vector<256x1xf32>
    %45 = vector.broadcast %44 : vector<256x1xf32> to vector<256x32xf32>
    %46 = arith.mulf %0, %45 : vector<256x32xf32>
    %47 = vector.broadcast %42 : vector<1x32xf32> to vector<256x32xf32>
    %48 = arith.addf %46, %47 : vector<256x32xf32>
    %49 = arith.addf %48, %40 : vector<256x32xf32>
    %50 = arith.truncf %31 : vector<256x32xf32> to vector<256x32xbf16>
    %c0_24 = arith.constant 0 : index
    %c0_25 = arith.constant 0 : index
    %51 = vector.load %arg2[%c0_24, %c0_25] : memref<32x896xbf16, #tpu.memory_space<vmem>>, vector<32x256xbf16>
    %cst_26 = arith.constant dense<0.000000e+00> : vector<256x256xf32>
    %52 = tpu.matmul %50, %51, %cst_26 {dimension_numbers = #tpu.dot_dimension_numbers<[1], [0], [0], [1], [0, 0, 1, 1], [], []>} : vector<256x32xbf16>, vector<32x256xbf16>, vector<256x256xf32> -> vector<256x256xf32>
    %53 = arith.mulf %52, %16 : vector<256x256xf32>
    %54 = arith.truncf %53 : vector<256x256xf32> to vector<256x256xbf16>
    %c0_27 = arith.constant 0 : index
    %c0_28 = arith.constant 0 : index
    %55 = vector.load %arg4[%c0_27, %c0_28] : memref<256x256xbf16, #tpu.memory_space<vmem>>, vector<256x32xbf16>
    %cst_29 = arith.constant dense<0.000000e+00> : vector<256x32xf32>
    %56 = tpu.matmul %54, %55, %cst_29 {dimension_numbers = #tpu.dot_dimension_numbers<[1], [0], [0], [1], [0, 0, 1, 1], [], []>} : vector<256x256xbf16>, vector<256x32xbf16>, vector<256x32xf32> -> vector<256x32xf32>
    %c4 = arith.constant 4 : index
    %c0_30 = arith.constant 0 : index
    %57 = vector.load %arg5[%c4, %c0_30] : memref<8x256xf32, #tpu.memory_space<vmem>>, vector<1x32xf32>
    %58 = vector.broadcast %57 : vector<1x32xf32> to vector<256x32xf32>
    %59 = arith.addf %56, %58 : vector<256x32xf32>
    %60 = arith.negf %59 : vector<256x32xf32>
    %61 = math.exp %60 : vector<256x32xf32>
    %cst_31 = arith.constant 1.000000e+00 : f32
    %62 = vector.broadcast %cst_31 : f32 to vector<256x32xf32>
    %63 = arith.addf %62, %61 : vector<256x32xf32>
    %64 = arith.divf %62, %63 : vector<256x32xf32>
    %65 = arith.truncf %64 : vector<256x32xf32> to vector<256x32xbf16>
    %c0_32 = arith.constant 0 : index
    %c256_33 = arith.constant 256 : index
    %66 = vector.load %arg2[%c0_32, %c256_33] : memref<32x896xbf16, #tpu.memory_space<vmem>>, vector<32x256xbf16>
    %cst_34 = arith.constant dense<0.000000e+00> : vector<256x256xf32>
    %67 = tpu.matmul %65, %66, %cst_34 {dimension_numbers = #tpu.dot_dimension_numbers<[1], [0], [0], [1], [0, 0, 1, 1], [], []>} : vector<256x32xbf16>, vector<32x256xbf16>, vector<256x256xf32> -> vector<256x256xf32>
    %68 = arith.mulf %67, %16 : vector<256x256xf32>
    %69 = arith.truncf %68 : vector<256x256xf32> to vector<256x256xbf16>
    %c0_35 = arith.constant 0 : index
    %c128 = arith.constant 128 : index
    %70 = vector.load %arg4[%c0_35, %c128] : memref<256x256xbf16, #tpu.memory_space<vmem>>, vector<256x32xbf16>
    %cst_36 = arith.constant dense<0.000000e+00> : vector<256x32xf32>
    %71 = tpu.matmul %69, %70, %cst_36 {dimension_numbers = #tpu.dot_dimension_numbers<[1], [0], [0], [1], [0, 0, 1, 1], [], []>} : vector<256x256xbf16>, vector<256x32xbf16>, vector<256x32xf32> -> vector<256x32xf32>
    %c5 = arith.constant 5 : index
    %c0_37 = arith.constant 0 : index
    %72 = vector.load %arg5[%c5, %c0_37] : memref<8x256xf32, #tpu.memory_space<vmem>>, vector<1x32xf32>
    %73 = vector.broadcast %72 : vector<1x32xf32> to vector<256x32xf32>
    %74 = arith.addf %71, %73 : vector<256x32xf32>
    %cst_38 = arith.constant 0.000000e+00 : f32
    %75 = vector.broadcast %cst_38 : f32 to vector<256x32xf32>
    %76 = tpu.concatenate %49, %31, %74, %75 in 1 : vector<256x32xf32>, vector<256x32xf32>, vector<256x32xf32>, vector<256x32xf32> -> vector<256x128xf32>
    %c0_39 = arith.constant 0 : index
    %c0_40 = arith.constant 0 : index
    %77 = vector.load %arg6[%c0_39, %c0_40] : memref<256x128xf32, #tpu.memory_space<vmem>>, vector<256x128xf32>
    tpu.vector_store %arg6[%c0_39, %c0_40], %76 {strides = array<i32>} : memref<256x128xf32, #tpu.memory_space<vmem>>, vector<256x128xf32>,
    return
  }
  func.func @transform_0(%arg0: i32) -> (i32, i32) {
    %c0_i32 = arith.constant 0 : i32
    %c0_i32_0 = arith.constant 0 : i32
    return %arg0, %c0_i32 : i32, i32
  }
  func.func @transform_1(%arg0: i32) -> (i32, i32) {
    %c0_i32 = arith.constant 0 : i32
    %c0_i32_0 = arith.constant 0 : i32
    %c0_i32_1 = arith.constant 0 : i32
    return %c0_i32, %c0_i32_0 : i32, i32
  }
  func.func @transform_2(%arg0: i32) -> (i32, i32) {
    %c0_i32 = arith.constant 0 : i32
    %c0_i32_0 = arith.constant 0 : i32
    %c0_i32_1 = arith.constant 0 : i32
    return %c0_i32, %c0_i32_0 : i32, i32
  }
  func.func @transform_3(%arg0: i32) -> (i32, i32) {
    %c0_i32 = arith.constant 0 : i32
    %c0_i32_0 = arith.constant 0 : i32
    %c0_i32_1 = arith.constant 0 : i32
    return %c0_i32, %c0_i32_0 : i32, i32
  }
  func.func @transform_4(%arg0: i32) -> (i32, i32) {
    %c0_i32 = arith.constant 0 : i32
    %c0_i32_0 = arith.constant 0 : i32
    %c0_i32_1 = arith.constant 0 : i32
    return %c0_i32, %c0_i32_0 : i32, i32
  }
  func.func @transform_5(%arg0: i32) -> (i32, i32) {
    %c0_i32 = arith.constant 0 : i32
    %c0_i32_0 = arith.constant 0 : i32
    return %arg0, %c0_i32 : i32, i32
  }
}

module attributes {stable_mosaic.version = 11 : i64} {
  func.func @_dcn_head_kernel(%arg0: i32, %arg1: memref<256x128xf32, #tpu.memory_space<vmem>>, %arg2: memref<256x1xi32, #tpu.memory_space<vmem>>, %arg3: memref<8x32xf32, #tpu.memory_space<vmem>>, %arg4: memref<64x1xf32, #tpu.memory_space<vmem>>, %arg5: memref<256x1xf32, #tpu.memory_space<vmem>>) attributes {dimension_semantics = [#tpu.dimension_semantics<parallel>], iteration_bounds = array<i64: 4>, scalar_prefetch = 0 : i64, scratch_operands = 0 : i64, tpu.core_type = #tpu.core_type<tc>, window_params = [{transform_indices = @transform_0, window_bounds = array<i64: 256, 128>}, {transform_indices = @transform_1, window_bounds = array<i64: 256, 1>}, {pipeline_mode = #tpu.pipeline_mode<synchronous>, transform_indices = @transform_2, window_bounds = array<i64: 8, 32>}, {pipeline_mode = #tpu.pipeline_mode<synchronous>, transform_indices = @transform_3, window_bounds = array<i64: 64, 1>}, {transform_indices = @transform_4, window_bounds = array<i64: 256, 1>}]} {
    %c0 = arith.constant 0 : index
    %c0_0 = arith.constant 0 : index
    %0 = vector.load %arg1[%c0, %c0_0] : memref<256x128xf32, #tpu.memory_space<vmem>>, vector<256x32xf32>
    %c0_1 = arith.constant 0 : index
    %c32 = arith.constant 32 : index
    %1 = vector.load %arg1[%c0_1, %c32] : memref<256x128xf32, #tpu.memory_space<vmem>>, vector<256x32xf32>
    %c0_2 = arith.constant 0 : index
    %c64 = arith.constant 64 : index
    %2 = vector.load %arg1[%c0_2, %c64] : memref<256x128xf32, #tpu.memory_space<vmem>>, vector<256x32xf32>
    %c0_3 = arith.constant 0 : index
    %c0_4 = arith.constant 0 : index
    %3 = vector.load %arg3[%c0_3, %c0_4] : memref<8x32xf32, #tpu.memory_space<vmem>>, vector<1x32xf32>
    %c1 = arith.constant 1 : index
    %c0_5 = arith.constant 0 : index
    %4 = vector.load %arg3[%c1, %c0_5] : memref<8x32xf32, #tpu.memory_space<vmem>>, vector<1x32xf32>
    %c2 = arith.constant 2 : index
    %c0_6 = arith.constant 0 : index
    %5 = vector.load %arg3[%c2, %c0_6] : memref<8x32xf32, #tpu.memory_space<vmem>>, vector<1x32xf32>
    %c3 = arith.constant 3 : index
    %c0_7 = arith.constant 0 : index
    %6 = vector.load %arg3[%c3, %c0_7] : memref<8x32xf32, #tpu.memory_space<vmem>>, vector<1x32xf32>
    %c4 = arith.constant 4 : index
    %c0_8 = arith.constant 0 : index
    %7 = vector.load %arg3[%c4, %c0_8] : memref<8x32xf32, #tpu.memory_space<vmem>>, vector<1x1xf32>
    %8 = vector.broadcast %5 : vector<1x32xf32> to vector<256x32xf32>
    %9 = arith.subf %2, %8 : vector<256x32xf32>
    %10 = vector.broadcast %6 : vector<1x32xf32> to vector<256x32xf32>
    %11 = arith.mulf %9, %10 : vector<256x32xf32>
    %12 = vector.broadcast %3 : vector<1x32xf32> to vector<256x32xf32>
    %13 = arith.mulf %12, %11 : vector<256x32xf32>
    %14 = vector.broadcast %4 : vector<1x32xf32> to vector<256x32xf32>
    %15 = arith.addf %13, %14 : vector<256x32xf32>
    %16 = arith.addf %15, %1 : vector<256x32xf32>
    %c0_9 = arith.constant 0 : index
    %c0_10 = arith.constant 0 : index
    %17 = vector.load %arg4[%c0_9, %c0_10] : memref<64x1xf32, #tpu.memory_space<vmem>>, vector<32x1xf32>
    %cst = arith.constant dense<0.000000e+00> : vector<256x1xf32>
    %18 = tpu.matmul %0, %17, %cst {dimension_numbers = #tpu.dot_dimension_numbers<[1], [0], [0], [1], [0, 0, 1, 1], [], []>} : vector<256x32xf32>, vector<32x1xf32>, vector<256x1xf32> -> vector<256x1xf32>
    %c32_11 = arith.constant 32 : index
    %c0_12 = arith.constant 0 : index
    %19 = vector.load %arg4[%c32_11, %c0_12] : memref<64x1xf32, #tpu.memory_space<vmem>>, vector<32x1xf32>
    %cst_13 = arith.constant dense<0.000000e+00> : vector<256x1xf32>
    %20 = tpu.matmul %16, %19, %cst_13 {dimension_numbers = #tpu.dot_dimension_numbers<[1], [0], [0], [1], [0, 0, 1, 1], [], []>} : vector<256x32xf32>, vector<32x1xf32>, vector<256x1xf32> -> vector<256x1xf32>
    %21 = arith.addf %18, %20 : vector<256x1xf32>
    %22 = vector.broadcast %7 : vector<1x1xf32> to vector<256x1xf32>
    %23 = arith.addf %21, %22 : vector<256x1xf32>
    %24 = arith.negf %23 : vector<256x1xf32>
    %25 = math.exp %24 : vector<256x1xf32>
    %cst_14 = arith.constant 1.000000e+00 : f32
    %26 = vector.broadcast %cst_14 : f32 to vector<256x1xf32>
    %27 = arith.addf %26, %25 : vector<256x1xf32>
    %28 = arith.divf %26, %27 : vector<256x1xf32>
    %c0_15 = arith.constant 0 : index
    %c0_16 = arith.constant 0 : index
    %29 = vector.load %arg2[%c0_15, %c0_16] : memref<256x1xi32, #tpu.memory_space<vmem>>, vector<256x1xi32>
    %c0_i32 = arith.constant 0 : i32
    %30 = vector.broadcast %c0_i32 : i32 to vector<256x1xi32>
    %31 = arith.cmpi sge, %29, %30 : vector<256x1xi32>
    %c2_i32 = arith.constant 2 : i32
    %32 = vector.broadcast %c2_i32 : i32 to vector<256x1xi32>
    %33 = arith.cmpi slt, %29, %32 : vector<256x1xi32>
    %34 = arith.andi %31, %33 : vector<256x1xi1>
    %cst_17 = arith.constant 0.000000e+00 : f32
    %35 = vector.broadcast %cst_17 : f32 to vector<256x1xf32>
    %36 = arith.select %34, %28, %35 : vector<256x1xi1>, vector<256x1xf32>
    %c0_18 = arith.constant 0 : index
    %c0_19 = arith.constant 0 : index
    %37 = vector.load %arg5[%c0_18, %c0_19] : memref<256x1xf32, #tpu.memory_space<vmem>>, vector<256x1xf32>
    tpu.vector_store %arg5[%c0_18, %c0_19], %36 {strides = array<i32>} : memref<256x1xf32, #tpu.memory_space<vmem>>, vector<256x1xf32>,
    return
  }
  func.func @transform_0(%arg0: i32) -> (i32, i32) {
    %c0_i32 = arith.constant 0 : i32
    %c0_i32_0 = arith.constant 0 : i32
    return %arg0, %c0_i32 : i32, i32
  }
  func.func @transform_1(%arg0: i32) -> (i32, i32) {
    %c0_i32 = arith.constant 0 : i32
    %c0_i32_0 = arith.constant 0 : i32
    return %arg0, %c0_i32 : i32, i32
  }
  func.func @transform_2(%arg0: i32) -> (i32, i32) {
    %c0_i32 = arith.constant 0 : i32
    %c0_i32_0 = arith.constant 0 : i32
    %c0_i32_1 = arith.constant 0 : i32
    return %c0_i32, %c0_i32_0 : i32, i32
  }
  func.func @transform_3(%arg0: i32) -> (i32, i32) {
    %c0_i32 = arith.constant 0 : i32
    %c0_i32_0 = arith.constant 0 : i32
    %c0_i32_1 = arith.constant 0 : i32
    return %c0_i32, %c0_i32_0 : i32, i32
  }
  func.func @transform_4(%arg0: i32) -> (i32, i32) {
    %c0_i32 = arith.constant 0 : i32
    %c0_i32_0 = arith.constant 0 : i32
    return %arg0, %c0_i32 : i32, i32
  }
}

</mosaic_0001>

<bundles_post_ra>
// kernel: dcn_md_adp_forward.3
= control target key start
LH: loop header
LB: loop body
LE: loop exit
PB: predicated region body
PF: predicated region fallthrough
CT: control target
= control target key end

     0   :  { %s2281_s15 = smov 0   ;;  %s3731_s0 = inlined_call_operand.vmem [shape: f32[1024,128], index: 0, kind: input, shape index: {}]   ;;  %s3732_s1 = inlined_call_operand.vmem [shape: s32[1024,1], index: 1, kind: input, shape index: {}]   ;;  %s3733_s2 = inlined_call_operand.vmem [shape: f32[8,32], index: 2, kind: input, shape index: {}]   ;;  %s3734_s3 = inlined_call_operand.vmem [shape: f32[64,1], index: 3, kind: input, shape index: {}]   ;;  %s3735_s4 = inlined_call_operand.vmem [shape: f32[1024,1], index: 4, kind: output, shape index: {}]  }
   0x1 LB: > { %s1985_s16 = sadd.s32 4294967295, %s2252_s15   ;;  %p1989_p0 = scmp.ge.s32.totalorder %s2252_s15, 1  ;;  %s2252_s15 = sphi %s2281_s15, %s14_s15  }
   0x2   : > { %p174_p1 = scmp.lt.s32.totalorder %s2252_s15, 5 }
   0x4   : > { %p175_p2 = pnand %p1989_p0, %p174_p1 }
   0x5   : > { %s1990_s19 = sshll.u32 (!%p175_p2), %s1985_s16, 5  ;;  %s2254_s20 = smov (!%p175_p2), 64  }
   0x6   : > { %178 = sbr.rel (%p175_p2) target bundleno = 569 (0x239), region = 36  ;;  %p206_p3 = scmp.lt.s32.totalorder (!%p175_p2), %s1990_s19, 127 }
   0x7   : > { %s2255_s27 = smov (!%p175_p2), 96  }
   0xb   : > { %v2112_v0 = vld [vmem:[%s3733_s2 + $0x2] ss:$0 sm:$0xff]  ;;  %s3829_s19 = smov (!%p206_p3, %s1990_s19), 127  ;;  %v2113_v1 = vld [vmem:[%s3733_s2 + $0x3] ss:$0 sm:$0xff]  ;;  %vm696_vm0 = vcmask 261120  }
   0xc   : > { %262 = vrot.lane.b32.xlu0 %v2112_v0, %s2254_s20  ;;  %s2293_s21 = sshll.u32 %s3829_s19, 3  ;;  %vm1884_vm8 = vcmask 7168  }
   0xd   : > { %s2302_s26 = scalar_lea.vmem %s3731_s0, %s2293_s21  ;;  %s2904_s28 = scalar_lea.vmem %s3732_s1, %s2293_s21 }
   0xe   : > { %v2305_v2 = vld [vmem:[%s2302_s26 + $0x80] sm:$0xff]  ;;  %v2308_v3 = vld [vmem:[%s2302_s26 + $0x90] sm:$0xff]  ;;  %v2316_v4 = vld [vmem:[%s2302_s26 + $0x88] sm:$0xff]  ;;  %s2918_s5 = scalar_lea.vmem %s3735_s4, %s2293_s21 }
   0xf   : > { %592 = vrot.lane.b32.xlu1 %v2305_v2, %s2255_s27  ;;  %596 = vrot.lane.b32.xlu2 %v2308_v3, %s2255_s27  ;;  %v2319_v5 = vld [vmem:[%s2302_s26 + $0x10] sm:$0xff]  ;;  %v2322_v6 = vld [vmem:[%s2302_s26] sm:$0xff] }
  0x10   : > { %v2331_v7 = vld [vmem:[%s2302_s26 + $0x8] sm:$0xff]  ;;  %v2337_v9 = vld [vmem:[%s2302_s26 + $0x98] sm:$0xff]  ;;  %v2346_v10 = vld [vmem:[%s2302_s26 + $0xa0] sm:$0xff] }
  0x11   : > { %v2334_v8 = vld [vmem:[%s2302_s26 + $0xa8] sm:$0xff]  ;;  %v2349_v11 = vld [vmem:[%s2302_s26 + $0x18] sm:$0xff]  ;;  %v2356_v12 = vld [vmem:[%s2302_s26 + $0xb0] sm:$0xff] }
  0x12   : > { %v2361_v13 = vld [vmem:[%s2302_s26 + $0x28] sm:$0xff]  ;;  %v2364_v14 = vld [vmem:[%s2302_s26 + $0x20] sm:$0xff]  ;;  %v2371_v15 = vld [vmem:[%s2302_s26 + $0x30] sm:$0xff] }
  0x13   : > { %v2378_v17 = vld [vmem:[%s2302_s26 + $0x38] sm:$0xff]  ;;  %v2381_v18 = vld [vmem:[%s2302_s26 + $0xc8] sm:$0xff]  ;;  %v2384_v19 = vld [vmem:[%s2302_s26 + $0xd0] sm:$0xff] }
  0x14   : > { %299 = vrot.lane.b32.xlu0 %v2113_v1, %s2254_s20  ;;  %v2387_v20 = vld [vmem:[%s2302_s26 + $0x48] sm:$0xff]  ;;  %v2396_v24 = vld [vmem:[%s2302_s26 + $0x50] sm:$0xff]  ;;  %v2399_v25 = vld [vmem:[%s2302_s26 + $0xd8] sm:$0xff] }
  0x15   : > { %v2402_v26 = vld [vmem:[%s2302_s26 + $0x58] sm:$0xff]  ;;  %v2413_v31 = vld [vmem:[%s2302_s26 + $0xe0] sm:$0xff]  ;;  %v2419_v33 = vld [vmem:[%s2302_s26 + $0xf0] sm:$0xff] }
  0x16   : > { %v2416_v32 = vld [vmem:[%s2302_s26 + $0x60] sm:$0xff]  ;;  %v2427_v38 = vld [vmem:[%s2302_s26 + $0xe8] sm:$0xff]  ;;  %v2430_v39 = vld [vmem:[%s2302_s26 + $0x70] sm:$0xff] }
  0x17   : > { %594 = vrot.lane.b32.xlu1 %v2316_v4, %s2255_s27  ;;  %564 = vrot.lane.b32.xlu2 %v2319_v5, %s2255_s27  ;;  %v2433_v40 = vld [vmem:[%s2302_s26 + $0x68] sm:$0xff]  ;;  %v2444_v45 = vld [vmem:[%s2302_s26 + $0xf8] sm:$0xff] }
  0x18   : > { %v2447_v46 = vld [vmem:[%s2302_s26 + $0x78] sm:$0xff] }
  0x1c   : > { %560 = vrot.lane.b32.xlu0 %v2322_v6, %s2255_s27 }
  0x1f   : > { %562 = vrot.lane.b32.xlu1 %v2331_v7, %s2255_s27  ;;  %602 = vrot.lane.b32.xlu2 %v2334_v8, %s2255_s27 }
  0x24   : > { %598 = vrot.lane.b32.xlu0 %v2337_v9, %s2255_s27 }
  0x27   : > { %600 = vrot.lane.b32.xlu1 %v2346_v10, %s2255_s27  ;;  %570 = vrot.lane.b32.xlu2 %v2361_v13, %s2255_s27 }
  0x2c   : > { %566 = vrot.lane.b32.xlu0 %v2349_v11, %s2255_s27 }
  0x2f   : > { %568 = vrot.lane.b32.xlu1 %v2364_v14, %s2255_s27 }
  0x34   : > { %604 = vrot.lane.b32.xlu0 %v2356_v12, %s2255_s27 }
  0x3c   : > { %572 = vrot.lane.b32.xlu0 %v2371_v15, %s2255_s27 }
  0x7e   : > { %v2375_v16 = vpop.permute.xlu0 %262 }
  0x7f   : > { %v281_v21 = vsub.f32 %v2305_v2, %v2375_v16  ;;  %v283_v22 = vsub.f32 %v2308_v3, %v2375_v16  ;;  %v265_v23 = vsub.f32 %v2322_v6, %v2375_v16  ;;  %v267_v28 = vsub.f32 %v2319_v5, %v2375_v16 }
  0x80   : > { %v282_v29 = vsub.f32 %v2316_v4, %v2375_v16  ;;  %v272_v30 = vsub.f32 %v2378_v17, %v2375_v16  ;;  %v290_v37 = vsub.f32 %v2381_v18, %v2375_v16  ;;  %v291_v41 = vsub.f32 %v2384_v19, %v2375_v16 }
  0x81   : > { %v274_v42 = vsub.f32 %v2387_v20, %v2375_v16  ;;  %v275_v43 = vsub.f32 %v2396_v24, %v2375_v16  ;;  %v292_v44 = vsub.f32 %v2399_v25, %v2375_v16  ;;  %v276_v47 = vsub.f32 %v2402_v26, %v2375_v16 }
  0x82   : > { %v293_v48 = vsub.f32 %v2413_v31, %v2375_v16  ;;  %v277_v49 = vsub.f32 %v2416_v32, %v2375_v16  ;;  %v295_v50 = vsub.f32 %v2419_v33, %v2375_v16  ;;  %v294_v51 = vsub.f32 %v2427_v38, %v2375_v16 }
  0x83   : > { %v279_v52 = vsub.f32 %v2430_v39, %v2375_v16  ;;  %v278_v53 = vsub.f32 %v2433_v40, %v2375_v16  ;;  %v296_v56 = vsub.f32 %v2444_v45, %v2375_v16  ;;  %v280_v57 = vsub.f32 %v2447_v46, %v2375_v16 }
  0x86   : > { %v2404_v27 = vpop.permute.xlu0 %299 }
  0x87   : > { %v318_v34 = vmul.f32 %v2404_v27, %v281_v21  ;;  %v320_v35 = vmul.f32 %v2404_v27, %v283_v22  ;;  %v302_v36 = vmul.f32 %v2404_v27, %v265_v23  ;;  %v2467_v54 = vmul.f32 %v2404_v27, %v292_v44 }
  0x88   : > { %v2470_v55 = vmul.f32 %v2404_v27, %v272_v30  ;;  %v2477_v58 = vmul.f32 %v2404_v27, %v290_v37  ;;  %v2480_v59 = vmul.f32 %v2404_v27, %v276_v47  ;;  %v2483_v60 = vmul.f32 %v2404_v27, %v274_v42  ;;  %v2541_v47 = vld [vmem:[%s2302_s26 + $0xc0] sm:$0xff] }
  0x89   : > { %399 = vrot.lane.b32.xlu1 %v318_v34, %s2254_s20  ;;  %403 = vrot.lane.b32.xlu0 %v320_v35, %s2254_s20  ;;  %v2486_v61 = vmul.f32 %v2404_v27, %v291_v41  ;;  %v2489_v62 = vmul.f32 %v2404_v27, %v293_v48  ;;  %v2492_v63 = vmul.f32 %v2404_v27, %v275_v43 }
  0x8a   : > { %367 = vrot.lane.b32.xlu2 %v302_v36, %s2254_s20  ;;  %v2495_v0 = vmul.f32 %v2404_v27, %v277_v49  ;;  %v2498_v1 = vmul.f32 %v2404_v27, %v295_v50  ;;  %v2501_v21 = vmul.f32 %v2404_v27, %v279_v52  ;;  %v2504_v22 = vmul.f32 %v2404_v27, %v294_v51  ;;  %v2517_v36 = vld [vmem:[%s2302_s26 + $0xb8] sm:$0xff] }
  0x8b   : > { %v2507_v23 = vmul.f32 %v2404_v27, %v278_v53  ;;  %v2510_v30 = vmul.f32 %v2404_v27, %v296_v56  ;;  %v304_v34 = vmul.f32 %v2404_v27, %v267_v28  ;;  %v2514_v35 = vmul.f32 %v2404_v27, %v280_v57 }
  0x8c   : > { %v319_v37 = vmul.f32 %v2404_v27, %v282_v29  ;;  %v266_v41 = vsub.f32 %v2331_v7, %v2375_v16  ;;  %v284_v29 = vsub.f32 %v2337_v9, %v2375_v16  ;;  %v286_v42 = vsub.f32 %v2334_v8, %v2375_v16 }
  0x8d   : > { %v270_v48 = vsub.f32 %v2361_v13, %v2375_v16  ;;  %v268_v49 = vsub.f32 %v2349_v11, %v2375_v16  ;;  %v285_v50 = vsub.f32 %v2346_v10, %v2375_v16  ;;  %v269_v56 = vsub.f32 %v2364_v14, %v2375_v16 }
  0x8e   : > { %v303_v28 = vmul.f32 %v2404_v27, %v266_v41  ;;  %v321_v43 = vmul.f32 %v2404_v27, %v284_v29  ;;  %v323_v44 = vmul.f32 %v2404_v27, %v286_v42  ;;  %v2574_v29 = vld [vmem:[%s2302_s26 + $0x40] sm:$0xff]  ;;  %v2578_v42 = vpop.permute.xlu2 %596 }
  0x8f   : > { %v305_v51 = vmul.f32 %v2404_v27, %v268_v49  ;;  %v307_v52 = vmul.f32 %v2404_v27, %v270_v48  ;;  %v322_v53 = vmul.f32 %v2404_v27, %v285_v50  ;;  %v306_v57 = vmul.f32 %v2404_v27, %v269_v56  ;;  %v690_v56 = vld [vmem:[%s3734_s3 + $0x10] sm:$0xff] }
  0x90   : > { %v288_v48 = vsub.f32 %v2517_v36, %v2375_v16 }
  0x91   : > { %606 = vrot.lane.b32.xlu1 %v2517_v36, %s2255_s27  ;;  %371 = vrot.lane.b32.xlu0 %v304_v34, %s2254_s20  ;;  %v289_v34 = vsub.f32 %v2541_v47, %v2375_v16 }
  0x92   : > { %401 = vrot.lane.b32.xlu2 %v319_v37, %s2254_s20  ;;  %v287_v37 = vsub.f32 %v2356_v12, %v2375_v16 }
  0x94   : > { %v324_v41 = vmul.f32 %v2404_v27, %v287_v37  ;;  %v2616_v37 = vpop.permute.xlu1 %592 }
  0x99   : > { %574 = vrot.lane.b32.xlu1 %v2378_v17, %s2255_s27  ;;  %610 = vrot.lane.b32.xlu0 %v2381_v18, %s2255_s27 }
  0x9a   : > { %369 = vrot.lane.b32.xlu2 %v303_v28, %s2254_s20  ;;  %v326_v28 = vmul.f32 %v2404_v27, %v289_v34  ;;  %v689_v34 = vld [vmem:[%s3734_s3 + $0x8] sm:$0xff] }
  0xa1   : > { %405 = vrot.lane.b32.xlu1 %v321_v43, %s2254_s20  ;;  %409 = vrot.lane.b32.xlu0 %v323_v44, %s2254_s20  ;;  %v271_v43 = vsub.f32 %v2371_v15, %v2375_v16  ;;  %v273_v44 = vsub.f32 %v2574_v29, %v2375_v16  ;;  %v691_v16 = vld [vmem:[%s3734_s3 + $0x18] sm:$0xff] }
  0xa2   : > { %608 = vrot.lane.b32.xlu2 %v2541_v47, %s2255_s27  ;;  %982 = vmatpush.msra.mxu1 %v691_v16 }
  0xa3   : > { %v308_v49 = vmul.f32 %v2404_v27, %v271_v43  ;;  %v310_v50 = vmul.f32 %v2404_v27, %v273_v44  ;;  %2098 = vmatpush.msra.mxu3 %v691_v16  ;;  %v688_v43 = vld [vmem:[%s3734_s3] sm:$0xff] }
  0xa4   : > { %983 = vmatpush.msra.mxu1 %v690_v56 }
  0xa5   : > { %2099 = vmatpush.msra.mxu3 %v690_v56 }
  0xa6   : > { %984 = vmatpush.msra.mxu1 %v689_v34 }
  0xa7   : > { %2100 = vmatpush.msra.mxu3 %v689_v34 }
  0xa8   : > { %985 = vmatpush.msra.mxu1 %v688_v43 }
  0xa9   : > { %373 = vrot.lane.b32.xlu1 %v305_v51, %s2254_s20  ;;  %377 = vrot.lane.b32.xlu0 %v307_v52, %s2254_s20  ;;  %v325_v51 = vmul.f32 %v2404_v27, %v288_v48  ;;  %v695_v52 = vld [vmem:[%s3734_s3 + $0x38] sm:$0xff]  ;;  %v694_v27 = vld [vmem:[%s3734_s3 + $0x30] sm:$0xff] }
  0xaa   : > { %407 = vrot.lane.b32.xlu2 %v322_v53, %s2254_s20  ;;  %805 = vmatpush.msra.mxu0 %v695_v52  ;;  %v2598_v53 = vpop.permute.xlu2 %564 }
  0xab   : > { %2094 = vmatpush.msra.mxu2 %v695_v52  ;;  %2028 = vmatmul.msk.f32.vlgmr.msra.gmra.mxu1 %vm696_vm0, %v2322_v6 }
  0xac   : > { %806 = vmatpush.msra.mxu0 %v694_v27  ;;  %2101 = vmatpush.msra.mxu3 %v688_v43 }
  0xad   : > { %2095 = vmatpush.msra.mxu2 %v694_v27  ;;  %2044 = vmatmul.msk.f32.vlgmr.msra.gmra.mxu3 %vm696_vm0, %v2305_v2 }
  0xb1   : > { %612 = vrot.lane.b32.xlu1 %v2384_v19, %s2255_s27  ;;  %578 = vrot.lane.b32.xlu0 %v2387_v20, %s2255_s27 }
  0xb2   : > { %375 = vrot.lane.b32.xlu2 %v306_v57, %s2254_s20  ;;  %v693_v57 = vld [vmem:[%s3734_s3 + $0x28] sm:$0xff] }
  0xb3   : > { %807 = vmatpush.msra.mxu0 %v693_v57  ;;  %2096 = vmatpush.msra.mxu2 %v693_v57 }
  0xb4   : > { %2029 = vmatmul.msk.f32.gmra.mxu1 %vm696_vm0, %v2331_v7  ;;  %v2665_v7 = vld [vmem:[%s3733_s2] ss:$0 sm:$0xff] }
  0xb5   : > { %2045 = vmatmul.msk.f32.gmra.mxu3 %vm696_vm0, %v2316_v4  ;;  %v2674_v4 = vld [vmem:[%s3733_s2 + $0x1] ss:$0 sm:$0xff] }
  0xb9   : > { %411 = vrot.lane.b32.xlu1 %v324_v41, %s2254_s20  ;;  %415 = vrot.lane.b32.xlu0 %v326_v28, %s2254_s20  ;;  %v561_v41 = vpop.permute.xlu0 %560  ;;  %v692_v28 = vld [vmem:[%s3734_s3 + $0x20] sm:$0xff] }
  0xba   : > { %576 = vrot.lane.b32.xlu2 %v2574_v29, %s2255_s27  ;;  %808 = vmatpush.msra.mxu0 %v692_v28 }
  0xbb   : > { %2097 = vmatpush.msra.mxu2 %v692_v28 }
  0xbc   : > { %2030 = vmatmul.msk.f32.gmra.mxu1 %vm696_vm0, %v2319_v5 }
  0xbd   : > { %2046 = vmatmul.msk.f32.gmra.mxu3 %vm696_vm0, %v2308_v3 }
  0xc1   : > { %379 = vrot.lane.b32.xlu1 %v308_v49, %s2254_s20  ;;  %383 = vrot.lane.b32.xlu0 %v310_v50, %s2254_s20  ;;  %v2640_v6 = vpop.permute.xlu0 %598 }
  0xc2   : > { %413 = vrot.lane.b32.xlu2 %v325_v51, %s2254_s20 }
  0xc4   : > { %2031 = vmatmul.msk.f32.gmra.mxu1 %vm696_vm0, %v2349_v11 }
  0xc5   : > { %2047 = vmatmul.msk.f32.gmra.mxu3 %vm696_vm0, %v2337_v9 }
  0xc9   : > { %580 = vrot.lane.b32.xlu1 %v2396_v24, %s2255_s27  ;;  %421 = vrot.lane.b32.xlu0 %v2467_v54, %s2254_s20  ;;  %v2628_v54 = vpop.permute.xlu2 %602 }
  0xca   : > { %381 = vrot.lane.b32.xlu2 %v2470_v55, %s2254_s20  ;;  %v2638_v55 = vpop.permute.xlu1 %594 }
  0xcc   : > { %2032 = vmatmul.msk.f32.gmra.mxu1 %vm696_vm0, %v2364_v14 }
  0xcd   : > { %2048 = vmatmul.msk.f32.gmra.mxu3 %vm696_vm0, %v2346_v10 }
  0xd1   : > { %417 = vrot.lane.b32.xlu1 %v2477_v58, %s2254_s20  ;;  %389 = vrot.lane.b32.xlu0 %v2480_v59, %s2254_s20  ;;  %v2650_v58 = vpop.permute.xlu2 %570  ;;  %v2654_v59 = vpop.permute.xlu0 %566 }
  0xd2   : > { %614 = vrot.lane.b32.xlu2 %v2399_v25, %s2255_s27  ;;  %v563_v2 = vpop.permute.xlu1 %562 }
  0xd4   : > { %2033 = vmatmul.msk.f32.gmra.mxu1 %vm696_vm0, %v2361_v13 }
  0xd5   : > { %2049 = vmatmul.msk.f32.gmra.mxu3 %vm696_vm0, %v2334_v8 }
  0xd9   : > { %385 = vrot.lane.b32.xlu1 %v2483_v60, %s2254_s20  ;;  %616 = vrot.lane.b32.xlu0 %v2413_v31, %s2255_s27  ;;  %v2682_v44 = vpop.permute.xlu0 %604 }
  0xda   : > { %419 = vrot.lane.b32.xlu2 %v2486_v61, %s2254_s20 }
  0xdc   : > { %2034 = vmatmul.msk.f32.gmra.mxu1 %vm696_vm0, %v2371_v15 }
  0xdd   : > { %2050 = vmatmul.msk.f32.gmra.mxu3 %vm696_vm0, %v2356_v12 }
  0xe1   : > { %423 = vrot.lane.b32.xlu1 %v2489_v62, %s2254_s20  ;;  %584 = vrot.lane.b32.xlu0 %v2416_v32, %s2255_s27  ;;  %v2680_v62 = vpop.permute.xlu1 %600 }
  0xe2   : > { %387 = vrot.lane.b32.xlu2 %v2492_v63, %s2254_s20 }
  0xe4   : > { %v368_v5 = vpop.permute.xlu2 %367  ;;  %2035 = vmatmul.msk.f32.gmra.mxu1 %vm696_vm0, %v2378_v17 }
  0xe5   : > { %v463_v60 = vmul.f32 %v2665_v7, %v368_v5  ;;  %2051 = vmatmul.msk.f32.gmra.mxu3 %vm696_vm0, %v2517_v36 }
  0xe7   : > { %v496_v61 = vadd.f32 %v2674_v4, %v463_v60 }
  0xe9   : > { %391 = vrot.lane.b32.xlu1 %v2495_v0, %s2254_s20  ;;  %427 = vrot.lane.b32.xlu0 %v2498_v1, %s2254_s20  ;;  %v656_v3 = vadd.f32 %v561_v41, %v496_v61  ;;  %v2699_v63 = vpop.permute.xlu1 %568  ;;  %v2701_v0 = vpop.permute.xlu0 %572 }
  0xea   : > { %582 = vrot.lane.b32.xlu2 %v2402_v26, %s2255_s27 }
  0xeb   : > { %1996 = vmatmul.msk.f32.vlgmr.msra.gmra.mxu0 %vm696_vm0, %v656_v3 }
  0xec   : > { %v402_v11 = vpop.permute.xlu2 %401  ;;  %2036 = vmatmul.msk.f32.gmra.mxu1 %vm696_vm0, %v2574_v29 }
  0xed   : > { %v480_v50 = vmul.f32 %v2665_v7, %v402_v11  ;;  %2052 = vmatmul.msk.f32.gmra.mxu3 %vm696_vm0, %v2541_v47 }
  0xef   : > { %v513_v15 = vadd.f32 %v2674_v4, %v480_v50 }
  0xf1   : > { %618 = vrot.lane.b32.xlu1 %v2427_v38, %s2255_s27  ;;  %395 = vrot.lane.b32.xlu0 %v2501_v21, %s2254_s20  ;;  %v673_v57 = vadd.f32 %v2638_v55, %v513_v15 }
  0xf2   : > { %425 = vrot.lane.b32.xlu2 %v2504_v22, %s2254_s20 }
  0xf4   : > { %v370_v9 = vpop.permute.xlu2 %369  ;;  %2037 = vmatmul.msk.f32.gmra.mxu1 %vm696_vm0, %v2387_v20 }
  0xf5   : > { %v464_v1 = vmul.f32 %v2665_v7, %v370_v9  ;;  %2053 = vmatmul.msk.f32.gmra.mxu3 %vm696_vm0, %v2381_v18 }
  0xf7   : > { %v497_v14 = vadd.f32 %v2674_v4, %v464_v1 }
  0xf9   : > { %586 = vrot.lane.b32.xlu1 %v2433_v40, %s2255_s27  ;;  %v657_v21 = vadd.f32 %v563_v2, %v497_v14  ;;  %622 = vrot.lane.b32.xlu0 %v2444_v45, %s2255_s27 }
  0xfa   : > { %393 = vrot.lane.b32.xlu2 %v2507_v23, %s2254_s20 }
  0xfb   : > { %1997 = vmatmul.msk.f32.gmra.mxu0 %vm696_vm0, %v657_v21  ;;  %v400_v10 = vpop.permute.xlu1 %399  ;;  %v404_v22 = vpop.permute.xlu0 %403 }
  0xfc   : > { %v479_v13 = vmul.f32 %v2665_v7, %v400_v10  ;;  %v2721_v48 = vpop.permute.xlu2 %608  ;;  %2038 = vmatmul.msk.f32.gmra.mxu1 %vm696_vm0, %v2396_v24 }
  0xfd   : > { %2054 = vmatmul.msk.f32.gmra.mxu3 %vm696_vm0, %v2384_v19 }
  0xfe   : > { %v512_v49 = vadd.f32 %v2674_v4, %v479_v13 }
 0x100   : > { %v672_v23 = vadd.f32 %v2616_v37, %v512_v49 }
 0x101   : > { %429 = vrot.lane.b32.xlu1 %v2510_v30, %s2254_s20  ;;  %v481_v30 = vmul.f32 %v2665_v7, %v404_v22 }
 0x102   : > { %2012 = vmatmul.msk.f32.vlgmr.msra.gmra.mxu2 %vm696_vm0, %v672_v23  ;;  %620 = vrot.lane.b32.xlu2 %v2419_v33, %s2255_s27 }
 0x103   : > { %v2733_v8 = vpop.permute.xlu1 %606  ;;  %v372_v51 = vpop.permute.xlu0 %371  ;;  %v514_v17 = vadd.f32 %v2674_v4, %v481_v30 }
 0x104   : > { %v465_v52 = vmul.f32 %v2665_v7, %v372_v51  ;;  %v408_v16 = vpop.permute.xlu2 %407  ;;  %2039 = vmatmul.msk.f32.gmra.mxu1 %vm696_vm0, %v2402_v26 }
 0x105   : > { %v483_v29 = vmul.f32 %v2665_v7, %v408_v16  ;;  %2055 = vmatmul.msk.f32.gmra.mxu3 %vm696_vm0, %v2399_v25 }
 0x106   : > { %v498_v27 = vadd.f32 %v2674_v4, %v465_v52 }
 0x107   : > { %v516_v47 = vadd.f32 %v2674_v4, %v483_v29 }
 0x108   : > { %v658_v56 = vadd.f32 %v2598_v53, %v498_v27 }
 0x109   : > { %397 = vrot.lane.b32.xlu1 %v2514_v35, %s2254_s20  ;;  %v674_v35 = vadd.f32 %v2578_v42, %v514_v17  ;;  %v676_v11 = vadd.f32 %v2680_v62, %v516_v47 }
 0x10a   : > { %1998 = vmatmul.msk.f32.gmra.mxu0 %vm696_vm0, %v658_v56  ;;  %2013 = vmatmul.msk.f32.gmra.mxu2 %vm696_vm0, %v673_v57 }
 0x10b   : > { %v2749_v12 = vpop.permute.xlu1 %574  ;;  %v2751_v34 = vpop.permute.xlu0 %610  ;;  %588 = vrot.lane.b32.xlu2 %v2430_v39, %s2255_s27 }
 0x10c   : > { %v376_v53 = vpop.permute.xlu2 %375  ;;  %2040 = vmatmul.msk.f32.gmra.mxu1 %vm696_vm0, %v2416_v32 }
 0x10d   : > { %v467_v20 = vmul.f32 %v2665_v7, %v376_v53  ;;  %2056 = vmatmul.msk.f32.gmra.mxu3 %vm696_vm0, %v2413_v31 }
 0x10f   : > { %v500_v24 = vadd.f32 %v2674_v4, %v467_v20 }
 0x111   : > { %v660_v62 = vadd.f32 %v2699_v63, %v500_v24 }
 0x112   : > { %2014 = vmatmul.msk.f32.gmra.mxu2 %vm696_vm0, %v674_v35 }
 0x113   : > { %v406_v37 = vpop.permute.xlu1 %405  ;;  %v410_v41 = vpop.permute.xlu0 %409  ;;  %590 = vrot.lane.b32.xlu2 %v2447_v46, %s2255_s27 }
 0x114   : > { %v482_v36 = vmul.f32 %v2665_v7, %v406_v37  ;;  %v2767_v28 = vpop.permute.xlu2 %576  ;;  %2041 = vmatmul.msk.f32.gmra.mxu1 %vm696_vm0, %v2433_v40 }
 0x115   : > { %2057 = vmatmul.msk.f32.gmra.mxu3 %vm696_vm0, %v2427_v38 }
 0x116   : > { %v515_v43 = vadd.f32 %v2674_v4, %v482_v36 }
 0x118   : > { %v675_v42 = vadd.f32 %v2640_v6, %v515_v43  ;;  %v484_v6 = vmul.f32 %v2665_v7, %v410_v41 }
 0x11a   : > { %2015 = vmatmul.msk.f32.gmra.mxu2 %vm696_vm0, %v675_v42  ;;  %v517_v1 = vadd.f32 %v2674_v4, %v484_v6 }
 0x11b   : > { %v374_v55 = vpop.permute.xlu1 %373  ;;  %v378_v2 = vpop.permute.xlu0 %377 }
 0x11c   : > { %v466_v5 = vmul.f32 %v2665_v7, %v374_v55  ;;  %v414_v60 = vpop.permute.xlu2 %413  ;;  %v677_v21 = vadd.f32 %v2628_v54, %v517_v1  ;;  %2042 = vmatmul.msk.f32.gmra.mxu1 %vm696_vm0, %v2430_v39 }
 0x11d   : > { %v486_v54 = vmul.f32 %v2665_v7, %v414_v60  ;;  %2058 = vmatmul.msk.f32.gmra.mxu3 %vm696_vm0, %v2419_v33 }
 0x11e   : > { %v499_v61 = vadd.f32 %v2674_v4, %v466_v5 }
 0x11f   : > { %v519_v51 = vadd.f32 %v2674_v4, %v486_v54  ;;  %v2882_v54 = vld [vmem:[%s3733_s2 + $0x4] ss:$0 sm:$0xff] }
 0x120   : > { %v659_v3 = vadd.f32 %v2654_v59, %v499_v61  ;;  %v468_v59 = vmul.f32 %v2665_v7, %v378_v2 }
 0x121   : > { %v679_v16 = vadd.f32 %v2733_v8, %v519_v51 }
 0x122   : > { %1999 = vmatmul.msk.f32.gmra.mxu0 %vm696_vm0, %v659_v3  ;;  %2016 = vmatmul.msk.f32.gmra.mxu2 %vm696_vm0, %v676_v11  ;;  %v501_v22 = vadd.f32 %v2674_v4, %v468_v59 }
 0x123   : > { %v2788_v18 = vpop.permute.xlu1 %612  ;;  %v2790_v9 = vpop.permute.xlu0 %578 }
 0x124   : > { %v382_v14 = vpop.permute.xlu2 %381  ;;  %v661_v49 = vadd.f32 %v2650_v58, %v501_v22  ;;  %2043 = vmatmul.msk.f32.gmra.mxu1 %vm696_vm0, %v2447_v46 }
 0x125   : > { %v470_v58 = vmul.f32 %v2665_v7, %v382_v14  ;;  %2059 = vmatmul.msk.f32.gmra.mxu3 %vm696_vm0, %v2444_v45 }
 0x127   : > { %v503_v40 = vadd.f32 %v2674_v4, %v470_v58 }
 0x129   : > { %v663_v8 = vadd.f32 %v2749_v12, %v503_v40 }
 0x12a   : > { %2000 = vmatmul.msk.f32.gmra.mxu0 %vm696_vm0, %v660_v62  ;;  %2017 = vmatmul.msk.f32.gmra.mxu2 %vm696_vm0, %v677_v21 }
 0x12b   : > { %v412_v10 = vpop.permute.xlu1 %411  ;;  %v416_v19 = vpop.permute.xlu0 %415 }
 0x12c   : > { %v485_v13 = vmul.f32 %v2665_v7, %v412_v10  ;;  %v2811_v63 = vpop.permute.xlu2 %614 }
 0x12e   : > { %v518_v26 = vadd.f32 %v2674_v4, %v485_v13 }
 0x130   : > { %v678_v50 = vadd.f32 %v2682_v44, %v518_v26  ;;  %v487_v44 = vmul.f32 %v2665_v7, %v416_v19  ;;  %v987_v26 = vpop.f32.mrf.mxu1 }
 0x132   : > { %2001 = vmatmul.msk.f32.gmra.mxu0 %vm696_vm0, %v661_v49  ;;  %2018 = vmatmul.msk.f32.gmra.mxu2 %vm696_vm0, %v678_v50  ;;  %v520_v56 = vadd.f32 %v2674_v4, %v487_v44 }
 0x133   : > { %v380_v25 = vpop.permute.xlu1 %379  ;;  %v384_v23 = vpop.permute.xlu0 %383 }
 0x134   : > { %v469_v32 = vmul.f32 %v2665_v7, %v380_v25  ;;  %v420_v27 = vpop.permute.xlu2 %419  ;;  %v680_v57 = vadd.f32 %v2721_v48, %v520_v56 }
 0x135   : > { %v489_v48 = vmul.f32 %v2665_v7, %v420_v27 }
 0x136   : > { %v502_v15 = vadd.f32 %v2674_v4, %v469_v32 }
 0x137   : > { %v522_v36 = vadd.f32 %v2674_v4, %v489_v48 }
 0x138   : > { %v662_v52 = vadd.f32 %v2701_v0, %v502_v15  ;;  %v471_v0 = vmul.f32 %v2665_v7, %v384_v23 }
 0x139   : > { %v682_v2 = vadd.f32 %v2788_v18, %v522_v36 }
 0x13a   : > { %2002 = vmatmul.msk.f32.gmra.mxu0 %vm696_vm0, %v662_v52  ;;  %2019 = vmatmul.msk.f32.gmra.mxu2 %vm696_vm0, %v679_v16  ;;  %v504_v38 = vadd.f32 %v2674_v4, %v471_v0 }
 0x13b   : > { %v581_v31 = vpop.permute.xlu1 %580  ;;  %v422_v30 = vpop.permute.xlu0 %421 }
 0x13c   : > { %v388_v53 = vpop.permute.xlu2 %387  ;;  %v664_v12 = vadd.f32 %v2767_v28, %v504_v38  ;;  %v490_v28 = vmul.f32 %v2665_v7, %v422_v30 }
 0x13e   : > { %v523_v47 = vadd.f32 %v2674_v4, %v490_v28 }
 0x140   : > { %v683_v3 = vadd.f32 %v2811_v63, %v523_v47 }
 0x142   : > { %2003 = vmatmul.msk.f32.gmra.mxu0 %vm696_vm0, %v663_v8  ;;  %2020 = vmatmul.msk.f32.gmra.mxu2 %vm696_vm0, %v680_v57 }
 0x143   : > { %v418_v17 = vpop.permute.xlu1 %417  ;;  %v390_v39 = vpop.permute.xlu0 %389 }
 0x144   : > { %v488_v35 = vmul.f32 %v2665_v7, %v418_v17  ;;  %v583_v29 = vpop.permute.xlu2 %582  ;;  %v474_v60 = vmul.f32 %v2665_v7, %v390_v39  ;;  %v990_v39 = vpop.f32.mrf.mxu1 }
 0x146   : > { %v521_v37 = vadd.f32 %v2674_v4, %v488_v35 }
 0x148   : > { %v681_v41 = vadd.f32 %v2751_v34, %v521_v37  ;;  %v473_v34 = vmul.f32 %v2665_v7, %v388_v53 }
 0x14a   : > { %2004 = vmatmul.msk.f32.gmra.mxu0 %vm696_vm0, %v664_v12  ;;  %2021 = vmatmul.msk.f32.gmra.mxu2 %vm696_vm0, %v681_v41  ;;  %v506_v5 = vadd.f32 %v2674_v4, %v473_v34  ;;  %v1035_v12 = vpop.f32.mrf.mxu3 }
 0x14b   : > { %v386_v33 = vpop.permute.xlu1 %385  ;;  %v617_v42 = vpop.permute.xlu0 %616 }
 0x14c   : > { %v472_v43 = vmul.f32 %v2665_v7, %v386_v33  ;;  %v426_v61 = vpop.permute.xlu2 %425  ;;  %v666_v6 = vadd.f32 %v581_v31, %v506_v5 }
 0x14d   : > { %v492_v62 = vmul.f32 %v2665_v7, %v426_v61 }
 0x14e   : > { %v505_v46 = vadd.f32 %v2674_v4, %v472_v43 }
 0x14f   : > { %v525_v13 = vadd.f32 %v2674_v4, %v492_v62 }
 0x150   : > { %v665_v55 = vadd.f32 %v2790_v9, %v505_v46  ;;  %v507_v9 = vadd.f32 %v2674_v4, %v474_v60 }
 0x152   : > { %2005 = vmatmul.msk.f32.gmra.mxu0 %vm696_vm0, %v665_v55  ;;  %2022 = vmatmul.msk.f32.gmra.mxu2 %vm696_vm0, %v682_v2  ;;  %v667_v1 = vadd.f32 %v583_v29, %v507_v9  ;;  %v1724_v2 = vld [vmem:[%s2904_s28] sm:$0xff]  ;;  %v1038_v60 = vpop.f32.mrf.mxu3 }
 0x153   : > { %v424_v45 = vpop.permute.xlu1 %423  ;;  %v585_v11 = vpop.permute.xlu0 %584  ;;  %vm1756_vm1 = vcmp.ge.s32.totalorder %v1724_v2, 0  ;;  %vm1788_vm2 = vcmp.lt.s32.totalorder %v1724_v2, 2 }
 0x154   : > { %v491_v20 = vmul.f32 %v2665_v7, %v424_v45  ;;  %v394_v21 = vpop.permute.xlu2 %393  ;;  %vm2910_vm5 = vmand %vm1756_vm1, %vm1788_vm2 }
 0x155   : > { %v476_v51 = vmul.f32 %v2665_v7, %v394_v21 }
 0x156   : > { %v524_v24 = vadd.f32 %v2674_v4, %v491_v20 }
 0x157   : > { %v509_v27 = vadd.f32 %v2674_v4, %v476_v51 }
 0x158   : > { %v684_v59 = vadd.f32 %v617_v42, %v524_v24  ;;  %v993_v24 = vpop.f32.mrf.mxu1 }
 0x15a   : > { %2006 = vmatmul.msk.f32.gmra.mxu0 %vm696_vm0, %v666_v6  ;;  %2023 = vmatmul.msk.f32.gmra.mxu2 %vm696_vm0, %v683_v3 }
 0x15b   : > { %v392_v18 = vpop.permute.xlu1 %391  ;;  %v428_v10 = vpop.permute.xlu0 %427 }
 0x15c   : > { %v475_v14 = vmul.f32 %v2665_v7, %v392_v18  ;;  %v493_v63 = vmul.f32 %v2665_v7, %v428_v10  ;;  %v621_v32 = vpop.permute.xlu2 %620 }
 0x15e   : > { %v508_v22 = vadd.f32 %v2674_v4, %v475_v14  ;;  %v526_v44 = vadd.f32 %v2674_v4, %v493_v63 }
 0x160   : > { %v668_v25 = vadd.f32 %v585_v11, %v508_v22  ;;  %v686_v31 = vadd.f32 %v621_v32, %v526_v44 }
 0x162   : > { %2007 = vmatmul.msk.f32.gmra.mxu0 %vm696_vm0, %v667_v1  ;;  %2024 = vmatmul.msk.f32.gmra.mxu2 %vm696_vm0, %v684_v59 }
 0x163   : > { %v619_v19 = vpop.permute.xlu1 %618  ;;  %v396_v52 = vpop.permute.xlu0 %395 }
 0x164   : > { %v685_v49 = vadd.f32 %v619_v19, %v525_v13  ;;  %v477_v30 = vmul.f32 %v2665_v7, %v396_v52  ;;  %v1041_v13 = vpop.f32.mrf.mxu3 }
 0x165   : > { %v589_v17 = vpop.permute.xlu2 %588 }
 0x166   : > { %v510_v0 = vadd.f32 %v2674_v4, %v477_v30 }
 0x168   : > { %v810_v50 = vpop.f32.mrf.mxu0  ;;  %v670_v37 = vadd.f32 %v589_v17, %v510_v0 }
 0x169   : > { %v988_v23 = vadd.f32 %v987_v26, %v810_v50 }
 0x16a   : > { %2008 = vmatmul.msk.f32.gmra.mxu0 %vm696_vm0, %v668_v25  ;;  %2025 = vmatmul.msk.f32.gmra.mxu2 %vm696_vm0, %v685_v49 }
 0x16b   : > { %v1084_v15 = vadd.f32 %v2882_v54, %v988_v23  ;;  %v587_v58 = vpop.permute.xlu1 %586  ;;  %v623_v35 = vpop.permute.xlu0 %622  ;;  %v1725_v23 = vld [vmem:[%s2904_s28 + $0x8] sm:$0xff] }
 0x16c   : > { %v669_v40 = vadd.f32 %v587_v58, %v509_v27  ;;  %vm1757_vm9 = vcmp.ge.s32.totalorder %v1725_v23, 0  ;;  %vm1789_vm10 = vcmp.lt.s32.totalorder %v1725_v23, 2 }
 0x16d   : > { %v2060_v16 = vmul.f32 -1.442695, %v1084_v15  ;;  %v591_v42 = vpop.permute.xlu2 %590  ;;  %vm2930_vm13 = vmand %vm1757_vm9, %vm1789_vm10 }
 0x16f   : > { %2117 = vpow2.f32 %v2060_v16 }
 0x172   : > { %2009 = vmatmul.msk.f32.gmra.mxu0 %vm696_vm0, %v669_v40  ;;  %2026 = vmatmul.msk.f32.gmra.mxu2 %vm696_vm0, %v686_v31 }
 0x173   : > { %v430_v56 = vpop.permute.xlu1 %429 }
 0x174   : > { %v494_v8 = vmul.f32 %v2665_v7, %v430_v56 }
 0x175   : > { %v2118_v57 = vpop.eup %2117 }
 0x176   : > { %v1212_v38 = vadd.f32 1.0, %v2118_v57  ;;  %v527_v53 = vadd.f32 %v2674_v4, %v494_v8  ;;  %v1044_v8 = vpop.f32.mrf.mxu3 }
 0x178   : > { %2119 = vrcp.f32 %v1212_v38  ;;  %v813_v48 = vpop.f32.mrf.mxu0  ;;  %v687_v41 = vadd.f32 %v623_v35, %v527_v53  ;;  %v1255_v5 = vand.u32 2147483648, %v1212_v38  ;;  %vm1249_vm4 = vweird.f32 %v1212_v38 }
 0x179   : > { %v991_v33 = vadd.f32 %v990_v39, %v813_v48  ;;  %v1740_v39 = vld [vmem:[%s2904_s28 + $0x80] sm:$0xff] }
 0x17a   : > { %2010 = vmatmul.msk.f32.gmra.mxu0 %vm696_vm0, %v670_v37  ;;  %2027 = vmatmul.msk.f32.gmra.mxu2 %vm696_vm0, %v687_v41  ;;  %v1256_v11 = vor.u32 1.1754944e-38, %v1255_v5  ;;  %v996_v37 = vpop.f32.mrf.mxu1  ;;  %vm1804_vm1 = vcmp.lt.s32.totalorder %v1740_v39, 2 }
 0x17b   : > { %v1085_v36 = vadd.f32 %v2882_v54, %v991_v33  ;;  %v398_v43 = vpop.permute.xlu1 %397 }
 0x17c   : > { %v478_v29 = vmul.f32 %v2665_v7, %v398_v43  ;;  %v1253_v7 = vand.u32 2147483647, %v1212_v38  ;;  %v2948_v43 = vld [vmem:[%s2904_s28 + $0x88] sm:$0xff] }
 0x17d   : > { %v2061_v46 = vmul.f32 -1.442695, %v1085_v36 }
 0x17e   : > { %v2120_v28 = vpop.eup %2119  ;;  %v511_v34 = vadd.f32 %v2674_v4, %v478_v29  ;;  %vm1254_vm7 = vcmp.eq.f32.partialorder %v1253_v7, 8.507059e+37  ;;  %v1047_v7 = vpop.f32.mrf.mxu3 }
 0x17f   : > { %v1245_v55 = vmul.f32 %v2120_v28, %v1212_v38  ;;  %2121 = vpow2.f32 %v2061_v46  ;;  %vm1250_vm3 = vweird.f32 %v2120_v28 }
 0x180   : > { %v671_v45 = vadd.f32 %v591_v42, %v511_v34  ;;  %vm1251_vm6 = vmor %vm1249_vm4, %vm1250_vm3  ;;  %vm1773_vm4 = vcmp.ge.s32.totalorder %v2948_v43, 0 }
 0x181   : > { %v1246_v47 = vsub.f32 1.0, %v1245_v55 }
 0x182   : > { %2011 = vmatmul.msk.f32.gmra.mxu0 %vm696_vm0, %v671_v45  ;;  %vm1772_vm0 = vcmp.ge.s32.totalorder %v1740_v39, 0 }
 0x183   : > { %v1247_v61 = vmul.f32 %v2120_v28, %v1246_v47 }
 0x185   : > { %v2122_v20 = vpop.eup %2121  ;;  %v1248_v6 = vadd.f32 %v2120_v28, %v1247_v61  ;;  %v858_v3 = vpop.f32.mrf.mxu2 }
 0x186   : > { %v1213_v18 = vadd.f32 1.0, %v2122_v20  ;;  %v1036_v9 = vadd.f32 %v1035_v12, %v858_v3  ;;  %v1726_v12 = vld [vmem:[%s2904_s28 + $0x10] sm:$0xff] }
 0x187   : > { %v1252_v1 = vsel %vm1251_vm6, %v2120_v28, %v1248_v6  ;;  %v816_v14 = vpop.f32.mrf.mxu0  ;;  %vm1758_vm2 = vcmp.ge.s32.totalorder %v1726_v12, 0  ;;  %vm1790_vm3 = vcmp.lt.s32.totalorder %v1726_v12, 2  ;;  %vm1805_vm6 = vcmp.lt.s32.totalorder %v2948_v43, 2 }
 0x188   : > { %v1257_v59 = vsel %vm1254_vm7, %v1256_v11, %v1252_v1  ;;  %2123 = vrcp.f32 %v1213_v18  ;;  %v1100_v21 = vadd.f32 %v2882_v54, %v1036_v9  ;;  %v994_v10 = vadd.f32 %v993_v24, %v816_v14 }
 0x189   : > { %v1852_v62 = vsel %vm2910_vm5, %v1257_v59, 0.0  ;;  %v1270_v15 = vand.u32 2147483648, %v1213_v18  ;;  %v1268_v16 = vand.u32 2147483647, %v1213_v18  ;;  %vm1264_vm12 = vweird.f32 %v1213_v18 }
 0x18a   : > { %1885 = vst.msk [vmem:[%s2918_s5] sm:$0xff] %vm1884_vm8, %v1852_v62  ;;  %v2076_v19 = vmul.f32 -1.442695, %v1100_v21  ;;  %v1086_v22 = vadd.f32 %v2882_v54, %v994_v10  ;;  %v999_v21 = vpop.f32.mrf.mxu1 }
 0x18b   : > { %v1271_v0 = vor.u32 1.1754944e-38, %v1270_v15  ;;  %vm1269_vm15 = vcmp.eq.f32.partialorder %v1268_v16, 8.507059e+37 }
 0x18c   : > { %2125 = vpow2.f32 %v2076_v19  ;;  %v2062_v26 = vmul.f32 -1.442695, %v1086_v22 }
 0x18d   : > { %v861_v63 = vpop.f32.mrf.mxu2 }
 0x18e   : > { %v2124_v49 = vpop.eup %2123  ;;  %v1039_v50 = vadd.f32 %v1038_v60, %v861_v63  ;;  %2127 = vpow2.f32 %v2062_v26 }
 0x18f   : > { %v1260_v25 = vmul.f32 %v2124_v49, %v1213_v18  ;;  %vm1265_vm11 = vweird.f32 %v2124_v49 }
 0x190   : > { %v1101_v51 = vadd.f32 %v2882_v54, %v1039_v50  ;;  %vm1266_vm14 = vmor %vm1264_vm12, %vm1265_vm11 }
 0x191   : > { %v1261_v32 = vsub.f32 1.0, %v1260_v25  ;;  %vm2968_vm11 = vmand %vm1772_vm0, %vm1804_vm1 }
 0x192   : > { %v2077_v58 = vmul.f32 -1.442695, %v1101_v51  ;;  %v2126_v44 = vpop.eup %2125 }
 0x193   : > { %v1262_v52 = vmul.f32 %v2124_v49, %v1261_v32  ;;  %v2928_v27 = vadd.f32 1.0, %v2126_v44 }
 0x194   : > { %2129 = vpow2.f32 %v2077_v58  ;;  %v2128_v31 = vpop.eup %2127 }
 0x195   : > { %v1263_v30 = vadd.f32 %v2124_v49, %v1262_v52  ;;  %v864_v56 = vpop.f32.mrf.mxu2  ;;  %2131 = vrcp.f32 %v2928_v27  ;;  %v2935_v17 = vadd.f32 1.0, %v2128_v31  ;;  %v1493_v28 = vand.u32 2147483647, %v2928_v27 }
 0x196   : > { %v1042_v38 = vadd.f32 %v1041_v13, %v864_v56  ;;  %v1495_v34 = vand.u32 2147483648, %v2928_v27  ;;  %vm1489_vm5 = vweird.f32 %v2928_v27 }
 0x197   : > { %v1267_v57 = vsel %vm1266_vm14, %v2124_v49, %v1263_v30  ;;  %2133 = vrcp.f32 %v2935_v17  ;;  %v1283_v47 = vand.u32 2147483647, %v2935_v17  ;;  %v1285_v61 = vand.u32 2147483648, %v2935_v17 }
 0x198   : > { %v1272_v53 = vsel %vm1269_vm15, %v1271_v0, %v1267_v57  ;;  %v1102_v41 = vadd.f32 %v2882_v54, %v1042_v38  ;;  %vm2961_vm9 = vcmp.eq.f32.partialorder %v1493_v28, 8.507059e+37  ;;  %v1496_v11 = vor.u32 1.1754944e-38, %v1495_v34  ;;  %vm2987_vm15 = vmand %vm1758_vm2, %vm1790_vm3  ;;  %v1050_v57 = vpop.f32.mrf.mxu3 }
 0x199   : > { %v1853_v35 = vsel %vm2930_vm13, %v1272_v53, 0.0  ;;  %vm1279_vm10 = vweird.f32 %v2935_v17  ;;  %vm2972_vm12 = vcmp.eq.f32.partialorder %v1283_v47, 8.507059e+37  ;;  %v1286_v22 = vor.u32 1.1754944e-38, %v1285_v61  ;;  %vm3010_vm3 = vmand %vm1773_vm4, %vm1805_vm6  ;;  %v3032_v61 = vld [vmem:[%s2904_s28 + $0x18] sm:$0xff] }
 0x19a   : > { %v2130_v48 = vpop.eup %2129  ;;  %1886 = vst.msk [vmem:[%s2918_s5 + $0x8] sm:$0xff] %vm1884_vm8, %v1853_v35  ;;  %v2078_v29 = vmul.f32 -1.442695, %v1102_v41 }
 0x19b   : > { %v2945_v33 = vadd.f32 1.0, %v2130_v48  ;;  %v2132_v36 = vpop.eup %2131 }
 0x19c   : > { %v1485_v46 = vmul.f32 %v2132_v36, %v2928_v27  ;;  %vm1490_vm7 = vweird.f32 %v2132_v36 }
 0x19d   : > { %2135 = vrcp.f32 %v2945_v33  ;;  %v867_v42 = vpop.f32.mrf.mxu2  ;;  %v2134_v2 = vpop.eup %2133  ;;  %vm1491_vm13 = vmor %vm1489_vm5, %vm1490_vm7  ;;  %v1508_v44 = vand.u32 2147483647, %v2945_v33  ;;  %v1510_v52 = vand.u32 2147483648, %v2945_v33  ;;  %vm1504_vm2 = vweird.f32 %v2945_v33 }
 0x19e   : > { %2137 = vpow2.f32 %v2078_v29  ;;  %v1045_v55 = vadd.f32 %v1044_v8, %v867_v42  ;;  %v1486_v45 = vsub.f32 1.0, %v1485_v46  ;;  %v1275_v60 = vmul.f32 %v2134_v2, %v2935_v17  ;;  %v1742_v42 = vld [vmem:[%s2904_s28 + $0x90] sm:$0xff] }
 0x19f   : > { %v819_v5 = vpop.f32.mrf.mxu0  ;;  %vm1280_vm14 = vweird.f32 %v2134_v2  ;;  %v1511_v38 = vor.u32 1.1754944e-38, %v1510_v52  ;;  %vm1509_vm7 = vcmp.eq.f32.partialorder %v1508_v44, 8.507059e+37  ;;  %vm1774_vm4 = vcmp.ge.s32.totalorder %v1742_v42, 0 }
 0x1a0   : > { %v1487_v20 = vmul.f32 %v2132_v36, %v1486_v45  ;;  %v1103_v6 = vadd.f32 %v2882_v54, %v1045_v55  ;;  %v997_v4 = vadd.f32 %v996_v37, %v819_v5  ;;  %v1276_v18 = vsub.f32 1.0, %v1275_v60  ;;  %vm1281_vm0 = vmor %vm1279_vm10, %vm1280_vm14  ;;  %v1053_v1 = vpop.f32.mrf.mxu3 }
 0x1a1   : > { %vm1806_vm6 = vcmp.lt.s32.totalorder %v1742_v42, 2  ;;  %vm1759_vm14 = vcmp.ge.s32.totalorder %v3032_v61, 0 }
 0x1a2   : > { %v1488_v24 = vadd.f32 %v2132_v36, %v1487_v20  ;;  %v2079_v59 = vmul.f32 -1.442695, %v1103_v6  ;;  %v1087_v62 = vadd.f32 %v2882_v54, %v997_v4  ;;  %v1277_v19 = vmul.f32 %v2134_v2, %v1276_v18 }
 0x1a3   : > { %v2136_v9 = vpop.eup %2135 }
 0x1a4   : > { %v2138_v10 = vpop.eup %2137  ;;  %v1500_v13 = vmul.f32 %v2136_v9, %v2945_v33  ;;  %v1492_v26 = vsel %vm1491_vm13, %v2132_v36, %v1488_v24  ;;  %2139 = vpow2.f32 %v2079_v59  ;;  %v2063_v49 = vmul.f32 -1.442695, %v1087_v62  ;;  %v1002_v36 = vpop.f32.mrf.mxu1  ;;  %vm3040_vm13 = vmand %vm1774_vm4, %vm1806_vm6  ;;  %v3050_v62 = vld [vmem:[%s2904_s28 + $0xa0] sm:$0xff] }
 0x1a5   : > { %v2981_v63 = vadd.f32 1.0, %v2138_v10  ;;  %v870_v50 = vpop.f32.mrf.mxu2  ;;  %v1497_v25 = vsel %vm2961_vm9, %v1496_v11, %v1492_v26  ;;  %v1278_v23 = vadd.f32 %v2134_v2, %v1277_v19  ;;  %vm1505_vm1 = vweird.f32 %v2136_v9 }
 0x1a6   : > { %v1501_v32 = vsub.f32 1.0, %v1500_v13  ;;  %v1048_v15 = vadd.f32 %v1047_v7, %v870_v50  ;;  %v1868_v58 = vsel %vm2968_vm11, %v1497_v25, 0.0  ;;  %vm1506_vm5 = vmor %vm1504_vm2, %vm1505_vm1  ;;  %vm1791_vm1 = vcmp.lt.s32.totalorder %v3032_v61, 2 }
 0x1a7   : > { %2141 = vrcp.f32 %v2981_v63  ;;  %v822_v16 = vpop.f32.mrf.mxu0  ;;  %1901 = vst.msk [vmem:[%s2918_s5 + $0x80] sm:$0xff] %vm1884_vm8, %v1868_v58  ;;  %v1282_v27 = vsel %vm1281_vm0, %v2134_v2, %v1278_v23  ;;  %v1743_v2 = vld [vmem:[%s2904_s28 + $0x98] sm:$0xff]  ;;  %v1525_v60 = vand.u32 2147483648, %v2981_v63  ;;  %v1523_v20 = vand.u32 2147483647, %v2981_v63 }
 0x1a8   : > { %v1502_v31 = vmul.f32 %v2136_v9, %v1501_v32  ;;  %2143 = vpow2.f32 %v2063_v49  ;;  %v1287_v30 = vsel %vm2972_vm12, %v1286_v22, %v1282_v27  ;;  %v1104_v40 = vadd.f32 %v2882_v54, %v1048_v15 }
 0x1a9   : > { %v1854_v56 = vsel %vm2987_vm15, %v1287_v30, 0.0  ;;  %v1000_v35 = vadd.f32 %v999_v21, %v822_v16  ;;  %vm1775_vm10 = vcmp.ge.s32.totalorder %v1743_v2, 0  ;;  %vm1807_vm11 = vcmp.lt.s32.totalorder %v1743_v2, 2  ;;  %v3071_v16 = vld [vmem:[%s2904_s28 + $0x20] sm:$0xff]  ;;  %v3119_v2 = vld [vmem:[%s2904_s28 + $0xa8] sm:$0xff] }
 0x1aa   : > { %v1503_v0 = vadd.f32 %v2136_v9, %v1502_v31  ;;  %v2140_v17 = vpop.eup %2139  ;;  %1887 = vst.msk [vmem:[%s2918_s5 + $0x10] sm:$0xff] %vm1884_vm8, %v1854_v56  ;;  %v2080_v53 = vmul.f32 -1.442695, %v1104_v40  ;;  %vm1519_vm12 = vweird.f32 %v2981_v63  ;;  %v1526_v14 = vor.u32 1.1754944e-38, %v1525_v60  ;;  %vm3080_vm6 = vmand %vm1775_vm10, %vm1807_vm11 }
 0x1ab   : > { %v3016_v37 = vadd.f32 1.0, %v2140_v17  ;;  %v1088_v41 = vadd.f32 %v2882_v54, %v1000_v35  ;;  %vm1524_vm0 = vcmp.eq.f32.partialorder %v1523_v20, 8.507059e+37  ;;  %vm1776_vm2 = vcmp.ge.s32.totalorder %v3050_v62, 0 }
 0x1ac   : > { %v1507_v39 = vsel %vm1506_vm5, %v2136_v9, %v1503_v0  ;;  %2145 = vpow2.f32 %v2080_v53  ;;  %vm1808_vm5 = vcmp.lt.s32.totalorder %v3050_v62, 2 }
 0x1ad   : > { %v2142_v48 = vpop.eup %2141  ;;  %v1512_v12 = vsel %vm1509_vm7, %v1511_v38, %v1507_v39  ;;  %v873_v33 = vpop.f32.mrf.mxu2  ;;  %2147 = vrcp.f32 %v3016_v37  ;;  %v2064_v45 = vmul.f32 -1.442695, %v1088_v41  ;;  %v1538_v49 = vand.u32 2147483647, %v3016_v37 }
 0x1ae   : > { %v2144_v43 = vpop.eup %2143  ;;  %v1869_v29 = vsel %vm3010_vm3, %v1512_v12, 0.0  ;;  %v1515_v46 = vmul.f32 %v2142_v48, %v2981_v63  ;;  %v1051_v47 = vadd.f32 %v1050_v57, %v873_v33  ;;  %vm1520_vm9 = vweird.f32 %v2142_v48  ;;  %v1005_v38 = vpop.f32.mrf.mxu1 }
 0x1af   : > { %1902 = vst.msk [vmem:[%s2918_s5 + $0x88] sm:$0xff] %vm1884_vm8, %v1869_v29  ;;  %v3026_v28 = vadd.f32 1.0, %v2144_v43  ;;  %v825_v34 = vpop.f32.mrf.mxu0  ;;  %vm1521_vm15 = vmor %vm1519_vm12, %vm1520_vm9  ;;  %v1540_v23 = vand.u32 2147483648, %v3016_v37  ;;  %vm1534_vm7 = vweird.f32 %v3016_v37  ;;  %vm3074_vm4 = vcmp.eq.f32.partialorder %v1538_v49, 8.507059e+37  ;;  %v1056_v29 = vpop.f32.mrf.mxu3 }
 0x1b0   : > { %v1516_v55 = vsub.f32 1.0, %v1515_v46  ;;  %v1003_v5 = vadd.f32 %v1002_v36, %v825_v34  ;;  %v1105_v4 = vadd.f32 %v2882_v54, %v1051_v47 }
 0x1b1   : > { %2149 = vrcp.f32 %v3026_v28  ;;  %v1298_v32 = vand.u32 2147483647, %v3026_v28  ;;  %v1300_v52 = vand.u32 2147483648, %v3026_v28  ;;  %v1541_v0 = vor.u32 1.1754944e-38, %v1540_v23 }
 0x1b2   : > { %v1517_v7 = vmul.f32 %v2142_v48, %v1516_v55  ;;  %2151 = vpow2.f32 %v2064_v45  ;;  %v2146_v6 = vpop.eup %2145  ;;  %v1089_v3 = vadd.f32 %v2882_v54, %v1003_v5  ;;  %v2081_v21 = vmul.f32 -1.442695, %v1105_v4 }
 0x1b3   : > { %v2148_v11 = vpop.eup %2147  ;;  %v3045_v24 = vadd.f32 1.0, %v2146_v6  ;;  %vm1294_vm10 = vweird.f32 %v3026_v28  ;;  %vm3091_vm11 = vcmp.eq.f32.partialorder %v1298_v32, 8.507059e+37  ;;  %v1301_v41 = vor.u32 1.1754944e-38, %v1300_v52 }
 0x1b4   : > { %v1518_v18 = vadd.f32 %v2142_v48, %v1517_v7  ;;  %v1530_v59 = vmul.f32 %v2148_v11, %v3016_v37  ;;  %v2065_v10 = vmul.f32 -1.442695, %v1089_v3  ;;  %vm1535_vm3 = vweird.f32 %v2148_v11 }
 0x1b5   : > { %v876_v19 = vpop.f32.mrf.mxu2  ;;  %2153 = vrcp.f32 %v3045_v24  ;;  %vm1536_vm9 = vmor %vm1534_vm7, %vm1535_vm3  ;;  %v1553_v34 = vand.u32 2147483647, %v3045_v24  ;;  %v1555_v55 = vand.u32 2147483648, %v3045_v24  ;;  %vm1809_vm7 = vcmp.lt.s32.totalorder %v3119_v2, 2 }
 0x1b6   : > { %v1522_v22 = vsel %vm1521_vm15, %v2142_v48, %v1518_v18  ;;  %v1531_v63 = vsub.f32 1.0, %v1530_v59  ;;  %2155 = vpow2.f32 %v2081_v21  ;;  %v1054_v27 = vadd.f32 %v1053_v1, %v876_v19 }
 0x1b7   : > { %v3054_v13 = vpop.eup %2149  ;;  %v1527_v26 = vsel %vm1524_vm0, %v1526_v14, %v1522_v22  ;;  %2157 = vpow2.f32 %v2065_v10  ;;  %v828_v17 = vpop.f32.mrf.mxu0  ;;  %vm1792_vm15 = vcmp.lt.s32.totalorder %v3071_v16, 2  ;;  %vm3106_vm0 = vmand %vm1759_vm14, %vm1791_vm1  ;;  %vm1777_vm1 = vcmp.ge.s32.totalorder %v3119_v2, 0  ;;  %v3237_v22 = vld [vmem:[%s2904_s28 + $0xb8] sm:$0xff] }
 0x1b8   : > { %v2152_v50 = vpop.eup %2151  ;;  %v1870_v25 = vsel %vm3040_vm13, %v1527_v26, 0.0  ;;  %v1290_v51 = vmul.f32 %v3054_v13, %v3026_v28  ;;  %v1532_v15 = vmul.f32 %v2148_v11, %v1531_v63  ;;  %vm1295_vm12 = vweird.f32 %v3054_v13  ;;  %v1008_v26 = vpop.f32.mrf.mxu1 }
 0x1b9   : > { %1903 = vst.msk [vmem:[%s2918_s5 + $0x90] sm:$0xff] %vm1884_vm8, %v1870_v25  ;;  %v3066_v58 = vadd.f32 1.0, %v2152_v50  ;;  %v1106_v57 = vadd.f32 %v2882_v54, %v1054_v27  ;;  %vm1760_vm13 = vcmp.ge.s32.totalorder %v3071_v16, 0  ;;  %vm1296_vm3 = vmor %vm1294_vm10, %vm1295_vm12  ;;  %v1006_v5 = vadd.f32 %v1005_v38, %v828_v17  ;;  %v1059_v52 = vpop.f32.mrf.mxu3 }
 0x1ba   : > { %v1291_v44 = vsub.f32 1.0, %v1290_v51  ;;  %v1533_v31 = vadd.f32 %v2148_v11, %v1532_v15  ;;  %vm1554_vm12 = vcmp.eq.f32.partialorder %v1553_v34, 8.507059e+37  ;;  %v1556_v14 = vor.u32 1.1754944e-38, %v1555_v55 }
 0x1bb   : > { %2159 = vrcp.f32 %v3066_v58  ;;  %v3085_v56 = vpop.eup %2153  ;;  %v2082_v47 = vmul.f32 -1.442695, %v1106_v57  ;;  %v1313_v3 = vand.u32 2147483647, %v3066_v58  ;;  %v1315_v1 = vand.u32 2147483648, %v3066_v58 }
 0x1bc   : > { %v1292_v8 = vmul.f32 %v3054_v13, %v1291_v44  ;;  %v2156_v53 = vpop.eup %2155  ;;  %v1537_v35 = vsel %vm1536_vm9, %v2148_v11, %v1533_v31  ;;  %v1545_v37 = vmul.f32 %v3085_v56, %v3045_v24  ;;  %vm1550_vm14 = vweird.f32 %v3085_v56  ;;  %v3138_v11 = vld [vmem:[%s2904_s28 + $0x28] sm:$0xff] }
 0x1bd   : > { %v1542_v48 = vsel %vm3074_vm4, %v1541_v0, %v1537_v35  ;;  %v3110_v36 = vadd.f32 1.0, %v2156_v53  ;;  %v879_v43 = vpop.f32.mrf.mxu2  ;;  %v2158_v46 = vpop.eup %2157  ;;  %vm1549_vm4 = vweird.f32 %v3045_v24  ;;  %vm1309_vm10 = vweird.f32 %v3066_v58 }
 0x1be   : > { %v1293_v12 = vadd.f32 %v3054_v13, %v1292_v8  ;;  %v1871_v42 = vsel %vm3080_vm6, %v1542_v48, 0.0  ;;  %v1546_v28 = vsub.f32 1.0, %v1545_v37  ;;  %v3129_v20 = vadd.f32 1.0, %v2158_v46  ;;  %vm3148_vm6 = vmand %vm1776_vm2, %vm1808_vm5 }
 0x1bf   : > { %1904 = vst.msk [vmem:[%s2918_s5 + $0x98] sm:$0xff] %vm1884_vm8, %v1871_v42  ;;  %2161 = vrcp.f32 %v3110_v36  ;;  %vm1551_vm9 = vmor %vm1549_vm4, %vm1550_vm14  ;;  %vm1793_vm2 = vcmp.lt.s32.totalorder %v3138_v11, 2  ;;  %v1090_v24 = vadd.f32 %v2882_v54, %v1006_v5  ;;  %v1316_v49 = vor.u32 1.1754944e-38, %v1315_v1 }
 0x1c0   : > { %v1297_v45 = vsel %vm1296_vm3, %v3054_v13, %v1293_v12  ;;  %v1547_v7 = vmul.f32 %v3085_v56, %v1546_v28  ;;  %2163 = vrcp.f32 %v3129_v20  ;;  %v831_v13 = vpop.f32.mrf.mxu0  ;;  %vm3172_vm3 = vmand %vm1760_vm13, %vm1792_vm15  ;;  %vm1564_vm14 = vweird.f32 %v3110_v36  ;;  %v3274_v12 = vld [vmem:[%s2904_s28 + $0xc0] sm:$0xff] }
 0x1c1   : > { %v2160_v60 = vpop.eup %2159  ;;  %v1302_v61 = vsel %vm3091_vm11, %v1301_v41, %v1297_v45  ;;  %2165 = vpow2.f32 %v2082_v47  ;;  %vm1761_vm11 = vcmp.ge.s32.totalorder %v3138_v11, 0  ;;  %v2066_v25 = vmul.f32 -1.442695, %v1090_v24  ;;  %vm3197_vm15 = vmand %vm1777_vm1, %vm1809_vm7  ;;  %v1011_v47 = vpop.f32.mrf.mxu1 }
 0x1c2   : > { %v1855_v6 = vsel %vm3106_vm0, %v1302_v61, 0.0  ;;  %v1305_v4 = vmul.f32 %v2160_v60, %v3066_v58  ;;  %v1548_v18 = vadd.f32 %v3085_v56, %v1547_v7  ;;  %vm1310_vm5 = vweird.f32 %v2160_v60  ;;  %v1746_v61 = vld [vmem:[%s2904_s28 + $0xb0] sm:$0xff] }
 0x1c3   : > { %1888 = vst.msk [vmem:[%s2918_s5 + $0x18] sm:$0xff] %vm1884_vm8, %v1855_v6  ;;  %vm3159_vm0 = vcmp.eq.f32.partialorder %v1313_v3, 8.507059e+37  ;;  %v1570_v32 = vand.u32 2147483648, %v3110_v36  ;;  %v1057_v15 = vadd.f32 %v1056_v29, %v879_v43  ;;  %vm1311_vm4 = vmor %vm1309_vm10, %vm1310_vm5  ;;  %v1568_v30 = vand.u32 2147483647, %v3110_v36 }
 0x1c4   : > { %v1306_v59 = vsub.f32 1.0, %v1305_v4  ;;  %v1552_v21 = vsel %vm1551_vm9, %v3085_v56, %v1548_v18  ;;  %2167 = vpow2.f32 %v2066_v25  ;;  %v1009_v16 = vadd.f32 %v1008_v26, %v831_v13  ;;  %v1062_v4 = vpop.f32.mrf.mxu3 }
 0x1c5   : > { %v2162_v62 = vpop.eup %2161  ;;  %v1557_v10 = vsel %vm1554_vm12, %v1556_v14, %v1552_v21  ;;  %v882_v44 = vpop.f32.mrf.mxu2  ;;  %v1107_v8 = vadd.f32 %v2882_v54, %v1057_v15  ;;  %v1571_v35 = vor.u32 1.1754944e-38, %v1570_v32  ;;  %v1328_v41 = vand.u32 2147483647, %v3129_v20  ;;  %vm3212_vm12 = vmand %vm1761_vm11, %vm1793_vm2  ;;  %v3253_v15 = vld [vmem:[%s2904_s28 + $0x38] sm:$0xff] }
 0x1c6   : > { %v1307_v19 = vmul.f32 %v2160_v60, %v1306_v59  ;;  %v1872_v63 = vsel %vm3148_vm6, %v1557_v10, 0.0  ;;  %v1560_v50 = vmul.f32 %v2162_v62, %v3110_v36  ;;  %v2164_v27 = vpop.eup %2163  ;;  %vm1565_vm13 = vweird.f32 %v2162_v62  ;;  %v1730_v59 = vld [vmem:[%s2904_s28 + $0x30] sm:$0xff] }
 0x1c7   : > { %1905 = vst.msk [vmem:[%s2918_s5 + $0xa0] sm:$0xff] %vm1884_vm8, %v1872_v63  ;;  %v2166_v40 = vpop.eup %2165  ;;  %v1320_v0 = vmul.f32 %v2164_v27, %v3129_v20  ;;  %v1091_v58 = vadd.f32 %v2882_v54, %v1009_v16  ;;  %v2083_v37 = vmul.f32 -1.442695, %v1107_v8  ;;  %v1330_v33 = vand.u32 2147483648, %v3129_v20  ;;  %vm1566_vm6 = vmor %vm1564_vm14, %vm1565_vm13 }
 0x1c8   : > { %v1308_v23 = vadd.f32 %v2160_v60, %v1307_v19  ;;  %v1561_v31 = vsub.f32 1.0, %v1560_v50  ;;  %v3186_v38 = vadd.f32 1.0, %v2166_v40  ;;  %vm1325_vm9 = vweird.f32 %v2164_v27  ;;  %v834_v45 = vpop.f32.mrf.mxu0 }
 0x1c9   : > { %v1321_v39 = vsub.f32 1.0, %v1320_v0  ;;  %v2067_v29 = vmul.f32 -1.442695, %v1091_v58  ;;  %vm1569_vm1 = vcmp.eq.f32.partialorder %v1568_v30, 8.507059e+37  ;;  %v1060_v28 = vadd.f32 %v1059_v52, %v882_v44  ;;  %v1014_v16 = vpop.f32.mrf.mxu1 }
 0x1ca   : > { %v1312_v56 = vsel %vm1311_vm4, %v2160_v60, %v1308_v23  ;;  %v1562_v17 = vmul.f32 %v2162_v62, %v1561_v31  ;;  %2169 = vrcp.f32 %v3186_v38  ;;  %v2168_v46 = vpop.eup %2167  ;;  %vm1324_vm7 = vweird.f32 %v3129_v20 }
 0x1cb   : > { %v1317_v57 = vsel %vm3159_vm0, %v1316_v49, %v1312_v56  ;;  %v1322_v43 = vmul.f32 %v2164_v27, %v1321_v39  ;;  %2171 = vpow2.f32 %v2083_v37  ;;  %v3216_v2 = vadd.f32 1.0, %v2168_v46  ;;  %vm1326_vm10 = vmor %vm1324_vm7, %vm1325_vm9 }
 0x1cc   : > { %v1856_v53 = vsel %vm3172_vm3, %v1317_v57, 0.0  ;;  %v1563_v48 = vadd.f32 %v2162_v62, %v1562_v17  ;;  %v1331_v60 = vor.u32 1.1754944e-38, %v1330_v33  ;;  %2173 = vpow2.f32 %v2067_v29 }
 0x1cd   : > { %1889 = vst.msk [vmem:[%s2918_s5 + $0x20] sm:$0xff] %vm1884_vm8, %v1856_v53  ;;  %v1323_v55 = vadd.f32 %v2164_v27, %v1322_v43  ;;  %v1108_v7 = vadd.f32 %v2882_v54, %v1060_v28  ;;  %vm1329_vm11 = vcmp.eq.f32.partialorder %v1328_v41, 8.507059e+37  ;;  %2175 = vrcp.f32 %v3216_v2  ;;  %v885_v6 = vpop.f32.mrf.mxu2 }
 0x1ce   : > { %v1567_v42 = vsel %vm1566_vm6, %v2162_v62, %v1563_v48  ;;  %vm1778_vm2 = vcmp.ge.s32.totalorder %v1746_v61, 0  ;;  %v1583_v21 = vand.u32 2147483647, %v3186_v38  ;;  %v1012_v62 = vadd.f32 %v1011_v47, %v834_v45 }
 0x1cf   : > { %v1572_v34 = vsel %vm1569_vm1, %v1571_v35, %v1567_v42  ;;  %v1327_v20 = vsel %vm1326_vm10, %v2164_v27, %v1323_v55  ;;  %v2084_v18 = vmul.f32 -1.442695, %v1108_v7  ;;  %v1585_v19 = vand.u32 2147483648, %v3186_v38  ;;  %v1065_v35 = vpop.f32.mrf.mxu3 }
 0x1d0   : > { %v1873_v5 = vsel %vm3197_vm15, %v1572_v34, 0.0  ;;  %v2170_v3 = vpop.eup %2169  ;;  %v1332_v11 = vsel %vm1329_vm11, %v1331_v60, %v1327_v20  ;;  %vm1810_vm5 = vcmp.lt.s32.totalorder %v1746_v61, 2  ;;  %v1063_v13 = vadd.f32 %v1062_v4, %v885_v6  ;;  %v837_v30 = vpop.f32.mrf.mxu0 }
 0x1d1   : > { %1906 = vst.msk [vmem:[%s2918_s5 + $0xa8] sm:$0xff] %vm1884_vm8, %v1873_v5  ;;  %v2172_v9 = vpop.eup %2171  ;;  %v1857_v1 = vsel %vm3212_vm12, %v1332_v11, 0.0  ;;  %v1575_v14 = vmul.f32 %v2170_v3, %v3186_v38  ;;  %2177 = vpow2.f32 %v2084_v18  ;;  %vm1580_vm0 = vweird.f32 %v2170_v3  ;;  %vm3257_vm9 = vmand %vm1778_vm2, %vm1810_vm5 }
 0x1d2   : > { %1890 = vst.msk [vmem:[%s2918_s5 + $0x28] sm:$0xff] %vm1884_vm8, %v1857_v1  ;;  %v3233_v24 = vadd.f32 1.0, %v2172_v9  ;;  %v2174_v26 = vpop.eup %2173  ;;  %vm1762_vm3 = vcmp.ge.s32.totalorder %v1730_v59, 0  ;;  %vm1794_vm14 = vcmp.lt.s32.totalorder %v1730_v59, 2  ;;  %v1092_v25 = vadd.f32 %v2882_v54, %v1012_v62  ;;  %v1017_v62 = vpop.f32.mrf.mxu1 }
 0x1d3   : > { %v1576_v10 = vsub.f32 1.0, %v1575_v14  ;;  %v2176_v63 = vpop.eup %2175  ;;  %v3240_v50 = vadd.f32 1.0, %v2174_v26  ;;  %v1109_v23 = vadd.f32 %v2882_v54, %v1063_v13  ;;  %vm1579_vm4 = vweird.f32 %v3186_v38  ;;  %vm3288_vm5 = vmand %vm1762_vm3, %vm1794_vm14 }
 0x1d4   : > { %2179 = vrcp.f32 %v3233_v24  ;;  %vm3245_vm13 = vcmp.eq.f32.partialorder %v1583_v21, 8.507059e+37  ;;  %v1335_v32 = vmul.f32 %v2176_v63, %v3216_v2  ;;  %vm1779_vm15 = vcmp.ge.s32.totalorder %v3237_v22, 0  ;;  %vm1581_vm1 = vmor %vm1579_vm4, %vm1580_vm0 }
 0x1d5   : > { %v1577_v49 = vmul.f32 %v2170_v3, %v1576_v10  ;;  %vm1811_vm6 = vcmp.lt.s32.totalorder %v3237_v22, 2  ;;  %v1586_v52 = vor.u32 1.1754944e-38, %v1585_v19  ;;  %v1343_v31 = vand.u32 2147483647, %v3216_v2  ;;  %v888_v53 = vpop.f32.mrf.mxu2 }
 0x1d6   : > { %2181 = vrcp.f32 %v3240_v50  ;;  %v1336_v56 = vsub.f32 1.0, %v1335_v32  ;;  %vm1339_vm7 = vweird.f32 %v3216_v2  ;;  %v1345_v0 = vand.u32 2147483648, %v3216_v2 }
 0x1d7   : > { %v1578_v44 = vadd.f32 %v2170_v3, %v1577_v49  ;;  %v2178_v40 = vpop.eup %2177  ;;  %v2068_v8 = vmul.f32 -1.442695, %v1092_v25  ;;  %v1598_v17 = vand.u32 2147483647, %v3233_v24  ;;  %vm1763_vm12 = vcmp.ge.s32.totalorder %v3253_v15, 0 }
 0x1d8   : > { %vm1795_vm10 = vcmp.lt.s32.totalorder %v3253_v15, 2  ;;  %v3269_v38 = vadd.f32 1.0, %v2178_v40  ;;  %v2085_v58 = vmul.f32 -1.442695, %v1109_v23  ;;  %v1337_v48 = vmul.f32 %v2176_v63, %v1336_v56  ;;  %v840_v21 = vpop.f32.mrf.mxu0  ;;  %v1068_v23 = vpop.f32.mrf.mxu3  ;;  %v1732_v40 = vld [vmem:[%s2904_s28 + $0x40] sm:$0xff] }
 0x1d9   : > { %v1582_v57 = vsel %vm1581_vm1, %v2170_v3, %v1578_v44  ;;  %vm1340_vm11 = vweird.f32 %v2176_v63  ;;  %2183 = vpow2.f32 %v2068_v8  ;;  %vm3278_vm2 = vcmp.eq.f32.partialorder %v1343_v31, 8.507059e+37  ;;  %v3357_v56 = vld [vmem:[%s3733_s2 + $0x4] ss:$0 sm:$0xff] }
 0x1da   : > { %v2180_v39 = vpop.eup %2179  ;;  %v1587_v37 = vsel %vm3245_vm13, %v1586_v52, %v1582_v57  ;;  %2185 = vrcp.f32 %v3269_v38  ;;  %v1338_v29 = vadd.f32 %v2176_v63, %v1337_v48  ;;  %v1346_v46 = vor.u32 1.1754944e-38, %v1345_v0  ;;  %vm1341_vm4 = vmor %vm1339_vm7, %vm1340_vm11  ;;  %v1020_v42 = vpop.f32.mrf.mxu1 }
 0x1db   : > { %v1874_v41 = vsel %vm3257_vm9, %v1587_v37, 0.0  ;;  %v1590_v43 = vmul.f32 %v2180_v39, %v3233_v24  ;;  %vm1594_vm0 = vweird.f32 %v3233_v24  ;;  %v1600_v28 = vand.u32 2147483648, %v3233_v24  ;;  %vm3317_vm7 = vmand %vm1779_vm15, %vm1811_vm6 }
 0x1dc   : > { %1907 = vst.msk [vmem:[%s2918_s5 + $0xb0] sm:$0xff] %vm1884_vm8, %v1874_v41  ;;  %v2182_v34 = vpop.eup %2181  ;;  %v1358_v36 = vand.u32 2147483647, %v3240_v50  ;;  %vm1780_vm13 = vcmp.ge.s32.totalorder %v3274_v12, 0  ;;  %vm1812_vm9 = vcmp.lt.s32.totalorder %v3274_v12, 2  ;;  %2187 = vpow2.f32 %v2085_v58  ;;  %vm3339_vm15 = vmand %vm1763_vm12, %vm1795_vm10  ;;  %v1749_v12 = vld [vmem:[%s2904_s28 + $0xc8] sm:$0xff] }
 0x1dd   : > { %v1591_v55 = vsub.f32 1.0, %v1590_v43  ;;  %v1015_v45 = vadd.f32 %v1014_v16, %v837_v30  ;;  %v1342_v47 = vsel %vm1341_vm4, %v2176_v63, %v1338_v29  ;;  %vm3299_vm3 = vcmp.eq.f32.partialorder %v1598_v17, 8.507059e+37  ;;  %v891_v25 = vpop.f32.mrf.mxu2 }
 0x1de   : > { %v1350_v60 = vmul.f32 %v2182_v34, %v3240_v50  ;;  %v1360_v2 = vand.u32 2147483648, %v3240_v50  ;;  %v1347_v61 = vsel %vm3278_vm2, %v1346_v46, %v1342_v47  ;;  %vm1595_vm14 = vweird.f32 %v2180_v39 }
 0x1df   : > { %v1592_v7 = vmul.f32 %v2180_v39, %v1591_v55  ;;  %v1093_v20 = vadd.f32 %v2882_v54, %v1015_v45  ;;  %v2184_v6 = vpop.eup %2183  ;;  %v1858_v4 = vsel %vm3288_vm5, %v1347_v61, 0.0  ;;  %v1601_v3 = vor.u32 1.1754944e-38, %v1600_v28  ;;  %vm1596_vm2 = vmor %vm1594_vm0, %vm1595_vm14 }
 0x1e0   : > { %v1351_v11 = vsub.f32 1.0, %v1350_v60  ;;  %vm1354_vm1 = vweird.f32 %v3240_v50  ;;  %v2186_v18 = vpop.eup %2185  ;;  %1891 = vst.msk [vmem:[%s2918_s5 + $0x30] sm:$0xff] %vm1884_vm8, %v1858_v4  ;;  %vm3321_vm11 = vcmp.eq.f32.partialorder %v1358_v36, 8.507059e+37  ;;  %v3325_v14 = vadd.f32 1.0, %v2184_v6  ;;  %vm3370_vm0 = vmand %vm1780_vm13, %vm1812_vm9  ;;  %v843_v46 = vpop.f32.mrf.mxu0 }
 0x1e1   : > { %v1593_v9 = vadd.f32 %v2180_v39, %v1592_v7  ;;  %v2069_v59 = vmul.f32 -1.442695, %v1093_v20  ;;  %vm1355_vm5 = vweird.f32 %v2182_v34  ;;  %v1605_v19 = vmul.f32 %v2186_v18, %v3269_v38  ;;  %v1071_v5 = vpop.f32.mrf.mxu3 }
 0x1e2   : > { %v1352_v10 = vmul.f32 %v2182_v34, %v1351_v11  ;;  %v1066_v22 = vadd.f32 %v1065_v35, %v888_v53  ;;  %v2188_v13 = vpop.eup %2187  ;;  %v1361_v63 = vor.u32 1.1754944e-38, %v1360_v2  ;;  %v1613_v49 = vand.u32 2147483647, %v3269_v38  ;;  %vm1356_vm6 = vmor %vm1354_vm1, %vm1355_vm5 }
 0x1e3   : > { %v1597_v26 = vsel %vm1596_vm2, %v2180_v39, %v1593_v9  ;;  %2189 = vrcp.f32 %v3325_v14  ;;  %v1606_v44 = vsub.f32 1.0, %v1605_v19  ;;  %v1615_v52 = vand.u32 2147483648, %v3269_v38 }
 0x1e4   : > { %v1602_v24 = vsel %vm3299_vm3, %v1601_v3, %v1597_v26  ;;  %v1353_v51 = vadd.f32 %v2182_v34, %v1352_v10  ;;  %v3349_v31 = vadd.f32 1.0, %v2188_v13  ;;  %2191 = vpow2.f32 %v2069_v59 }
 0x1e5   : > { %v1875_v27 = vsel %vm3317_vm7, %v1602_v24, 0.0  ;;  %v1018_v30 = vadd.f32 %v1017_v62, %v840_v21  ;;  %v1607_v16 = vmul.f32 %v2186_v18, %v1606_v44  ;;  %vm1610_vm12 = vweird.f32 %v2186_v18  ;;  %v894_v47 = vpop.f32.mrf.mxu2  ;;  %v1023_v44 = vpop.f32.mrf.mxu1 }
 0x1e6   : > { %1908 = vst.msk [vmem:[%s2918_s5 + $0xb8] sm:$0xff] %vm1884_vm8, %v1875_v27  ;;  %v1357_v15 = vsel %vm1356_vm6, %v2182_v34, %v1353_v51  ;;  %v1110_v0 = vadd.f32 %v3357_v56, %v1066_v22  ;;  %2193 = vrcp.f32 %v3349_v31  ;;  %vm1609_vm10 = vweird.f32 %v3269_v38 }
 0x1e7   : > { %v1362_v50 = vsel %vm3321_vm11, %v1361_v63, %v1357_v15  ;;  %v1608_v57 = vadd.f32 %v2186_v18, %v1607_v16  ;;  %vm1611_vm4 = vmor %vm1609_vm10, %vm1610_vm12  ;;  %v1616_v35 = vor.u32 1.1754944e-38, %v1615_v52  ;;  %vm1764_vm3 = vcmp.ge.s32.totalorder %v1732_v40, 0 }
 0x1e8   : > { %v1859_v8 = vsel %vm3339_vm15, %v1362_v50, 0.0  ;;  %v2086_v58 = vmul.f32 -1.442695, %v1110_v0  ;;  %v1094_v39 = vadd.f32 %v3357_v56, %v1018_v30  ;;  %vm1614_vm14 = vcmp.eq.f32.partialorder %v1613_v49, 8.507059e+37  ;;  %v846_v32 = vpop.f32.mrf.mxu0 }
 0x1e9   : > { %v2190_v53 = vpop.eup %2189  ;;  %1892 = vst.msk [vmem:[%s2918_s5 + $0x38] sm:$0xff] %vm1884_vm8, %v1859_v8  ;;  %v1612_v37 = vsel %vm1611_vm4, %v2186_v18, %v1608_v57  ;;  %v1373_v48 = vand.u32 2147483647, %v3325_v14  ;;  %v1375_v43 = vand.u32 2147483648, %v3325_v14  ;;  %vm1796_vm13 = vcmp.lt.s32.totalorder %v1732_v40, 2  ;;  %v1750_v40 = vld [vmem:[%s2904_s28 + $0xd0] sm:$0xff] }
 0x1ea   : > { %v1365_v38 = vmul.f32 %v2190_v53, %v3325_v14  ;;  %v2192_v41 = vpop.eup %2191  ;;  %v1617_v33 = vsel %vm1614_vm14, %v1616_v35, %v1612_v37  ;;  %2195 = vpow2.f32 %v2086_v58  ;;  %v2070_v29 = vmul.f32 -1.442695, %v1094_v39  ;;  %vm3397_vm5 = vmand %vm1764_vm3, %vm1796_vm13  ;;  %v3432_v8 = vld [vmem:[%s2904_s28 + $0x50] sm:$0xff]  ;;  %v1074_v37 = vpop.f32.mrf.mxu3 }
 0x1eb   : > { %v1876_v28 = vsel %vm3370_vm0, %v1617_v33, 0.0  ;;  %v3383_v55 = vadd.f32 1.0, %v2192_v41  ;;  %vm1781_vm9 = vcmp.ge.s32.totalorder %v1749_v12, 0  ;;  %vm1813_vm1 = vcmp.lt.s32.totalorder %v1749_v12, 2  ;;  %v3449_v41 = vld [vmem:[%s2904_s28 + $0xd8] sm:$0xff] }
 0x1ec   : > { %v1366_v34 = vsub.f32 1.0, %v1365_v38  ;;  %v2194_v36 = vpop.eup %2193  ;;  %1909 = vst.msk [vmem:[%s2918_s5 + $0xc0] sm:$0xff] %vm1884_vm8, %v1876_v28  ;;  %2197 = vpow2.f32 %v2070_v29  ;;  %v1069_v45 = vadd.f32 %v1068_v23, %v891_v25  ;;  %vm1370_vm7 = vweird.f32 %v2190_v53  ;;  %vm3414_vm10 = vmand %vm1781_vm9, %vm1813_vm1  ;;  %v1733_v23 = vld [vmem:[%s2904_s28 + $0x48] sm:$0xff] }
 0x1ed   : > { %v1620_v2 = vmul.f32 %v2194_v36, %v3349_v31  ;;  %2199 = vrcp.f32 %v3383_v55  ;;  %vm1369_vm11 = vweird.f32 %v3325_v14  ;;  %vm3390_vm2 = vcmp.eq.f32.partialorder %v1373_v48, 8.507059e+37  ;;  %v897_v39 = vpop.f32.mrf.mxu2  ;;  %v1026_v61 = vpop.f32.mrf.mxu1 }
 0x1ee   : > { %v1367_v60 = vmul.f32 %v2190_v53, %v1366_v34  ;;  %v1376_v7 = vor.u32 1.1754944e-38, %v1375_v43  ;;  %v1111_v20 = vadd.f32 %v3357_v56, %v1069_v45  ;;  %v1021_v11 = vadd.f32 %v1020_v42, %v843_v46  ;;  %vm1371_vm15 = vmor %vm1369_vm11, %vm1370_vm7 }
 0x1ef   : > { %v1621_v3 = vsub.f32 1.0, %v1620_v2  ;;  %v1072_v18 = vadd.f32 %v1071_v5, %v894_v47  ;;  %vm1625_vm6 = vweird.f32 %v2194_v36  ;;  %v1628_v1 = vand.u32 2147483647, %v3349_v31 }
 0x1f0   : > { %v1368_v6 = vadd.f32 %v2190_v53, %v1367_v60  ;;  %v2196_v9 = vpop.eup %2195  ;;  %v1630_v54 = vand.u32 2147483648, %v3349_v31  ;;  %v2087_v14 = vmul.f32 -1.442695, %v1111_v20  ;;  %v1095_v10 = vadd.f32 %v3357_v56, %v1021_v11  ;;  %v849_v2 = vpop.f32.mrf.mxu0 }
 0x1f1   : > { %v1622_v21 = vmul.f32 %v2194_v36, %v1621_v3  ;;  %v3403_v62 = vadd.f32 1.0, %v2196_v9  ;;  %v1112_v13 = vadd.f32 %v3357_v56, %v1072_v18  ;;  %vm1624_vm12 = vweird.f32 %v3349_v31 }
 0x1f2   : > { %v1372_v59 = vsel %vm1371_vm15, %v2190_v53, %v1368_v6  ;;  %v2198_v19 = vpop.eup %2197  ;;  %2201 = vpow2.f32 %v2087_v14  ;;  %vm1626_vm0 = vmor %vm1624_vm12, %vm1625_vm6  ;;  %vm1629_vm4 = vcmp.eq.f32.partialorder %v1628_v1, 8.507059e+37  ;;  %v1631_v24 = vor.u32 1.1754944e-38, %v1630_v54  ;;  %v3482_v54 = vld [vmem:[%s2904_s28 + $0x58] sm:$0xff] }
 0x1f3   : > { %v1377_v22 = vsel %vm3390_vm2, %v1376_v7, %v1372_v59  ;;  %v2200_v26 = vpop.eup %2199  ;;  %v1623_v49 = vadd.f32 %v2194_v36, %v1622_v21  ;;  %2203 = vrcp.f32 %v3403_v62  ;;  %v3424_v27 = vadd.f32 1.0, %v2198_v19 }
 0x1f4   : > { %v1860_v63 = vsel %vm3397_vm5, %v1377_v22, 0.0  ;;  %v1380_v51 = vmul.f32 %v2200_v26, %v3383_v55  ;;  %v2071_v31 = vmul.f32 -1.442695, %v1095_v10  ;;  %v2088_v30 = vmul.f32 -1.442695, %v1112_v13 }
 0x1f5   : > { %1893 = vst.msk [vmem:[%s2918_s5 + $0x40] sm:$0xff] %vm1884_vm8, %v1860_v63  ;;  %v1627_v52 = vsel %vm1626_vm0, %v2194_v36, %v1623_v49  ;;  %vm1765_vm3 = vcmp.ge.s32.totalorder %v1733_v23, 0  ;;  %v1390_v50 = vand.u32 2147483648, %v3383_v55  ;;  %vm1797_vm14 = vcmp.lt.s32.totalorder %v1733_v23, 2  ;;  %v900_v25 = vpop.f32.mrf.mxu2  ;;  %v1077_v23 = vpop.f32.mrf.mxu3 }
 0x1f6   : > { %v1632_v15 = vsel %vm1629_vm4, %v1631_v24, %v1627_v52  ;;  %v1381_v16 = vsub.f32 1.0, %v1380_v51  ;;  %2205 = vrcp.f32 %v3424_v27  ;;  %vm1385_vm13 = vweird.f32 %v2200_v26  ;;  %vm3442_vm11 = vmand %vm1765_vm3, %vm1797_vm14 }
 0x1f7   : > { %v1877_v0 = vsel %vm3414_vm10, %v1632_v15, 0.0  ;;  %v1388_v58 = vand.u32 2147483647, %v3383_v55  ;;  %2207 = vpow2.f32 %v2071_v31  ;;  %vm1782_vm9 = vcmp.ge.s32.totalorder %v1750_v40, 0 }
 0x1f8   : > { %v2202_v57 = vpop.eup %2201  ;;  %1910 = vst.msk [vmem:[%s2918_s5 + $0xc8] sm:$0xff] %vm1884_vm8, %v1877_v0  ;;  %v1382_v17 = vmul.f32 %v2200_v26, %v1381_v16  ;;  %vm1814_vm1 = vcmp.lt.s32.totalorder %v1750_v40, 2  ;;  %2209 = vpow2.f32 %v2088_v30  ;;  %vm1384_vm7 = vweird.f32 %v3383_v55 }
 0x1f9   : > { %v2204_v53 = vpop.eup %2203  ;;  %v3437_v35 = vadd.f32 1.0, %v2202_v57  ;;  %vm1766_vm2 = vcmp.ge.s32.totalorder %v3432_v8, 0  ;;  %vm1386_vm5 = vmor %vm1384_vm7, %vm1385_vm13  ;;  %v1391_v33 = vor.u32 1.1754944e-38, %v1390_v50  ;;  %v1643_v43 = vand.u32 2147483647, %v3403_v62 }
 0x1fa   : > { %v1383_v38 = vadd.f32 %v2200_v26, %v1382_v17  ;;  %v1635_v12 = vmul.f32 %v2204_v53, %v3403_v62  ;;  %v1645_v29 = vand.u32 2147483648, %v3403_v62  ;;  %vm1389_vm15 = vcmp.eq.f32.partialorder %v1388_v58, 8.507059e+37  ;;  %vm3476_vm14 = vmand %vm1782_vm9, %vm1814_vm1 }
 0x1fb   : > { %2211 = vrcp.f32 %v3437_v35  ;;  %vm1798_vm6 = vcmp.lt.s32.totalorder %v3432_v8, 2  ;;  %vm1639_vm12 = vweird.f32 %v3403_v62  ;;  %vm1640_vm10 = vweird.f32 %v2204_v53 }
 0x1fc   : > { %v1387_v46 = vsel %vm1386_vm5, %v2200_v26, %v1383_v38  ;;  %v1636_v42 = vsub.f32 1.0, %v1635_v12  ;;  %v3456_v28 = vpop.eup %2205  ;;  %vm1783_vm0 = vcmp.ge.s32.totalorder %v3449_v41, 0  ;;  %vm1815_vm4 = vcmp.lt.s32.totalorder %v3449_v41, 2  ;;  %vm1641_vm13 = vmor %vm1639_vm12, %vm1640_vm10  ;;  %v3495_v26 = vld [vmem:[%s2904_s28 + $0xe0] sm:$0xff]  ;;  %v1029_v38 = vpop.f32.mrf.mxu1 }
 0x1fd   : > { %v1392_v34 = vsel %vm1389_vm15, %v1391_v33, %v1387_v46  ;;  %v1024_v55 = vadd.f32 %v1023_v44, %v846_v32  ;;  %v2208_v36 = vpop.eup %2207  ;;  %v1395_v5 = vmul.f32 %v3456_v28, %v3424_v27  ;;  %v1075_v60 = vadd.f32 %v1074_v37, %v897_v39  ;;  %vm3516_vm15 = vmand %vm1766_vm2, %vm1798_vm6  ;;  %v852_v37 = vpop.f32.mrf.mxu0  ;;  %v1753_v44 = vld [vmem:[%s2904_s28 + $0xe8] sm:$0xff] }
 0x1fe   : > { %v1861_v45 = vsel %vm3442_vm11, %v1392_v34, 0.0  ;;  %v1637_v47 = vmul.f32 %v2204_v53, %v1636_v42  ;;  %v2210_v7 = vpop.eup %2209  ;;  %vm3467_vm3 = vcmp.eq.f32.partialorder %v1643_v43, 8.507059e+37  ;;  %v1646_v6 = vor.u32 1.1754944e-38, %v1645_v29 }
 0x1ff   : > { %1894 = vst.msk [vmem:[%s2918_s5 + $0x48] sm:$0xff] %vm1884_vm8, %v1861_v45  ;;  %v1403_v4 = vand.u32 2147483647, %v3424_v27  ;;  %v3472_v3 = vadd.f32 1.0, %v2208_v36  ;;  %v1396_v9 = vsub.f32 1.0, %v1395_v5  ;;  %v1405_v1 = vand.u32 2147483648, %v3424_v27 }
 0x200   : > { %v1638_v11 = vadd.f32 %v2204_v53, %v1637_v47  ;;  %v3484_v14 = vadd.f32 1.0, %v2210_v7  ;;  %vm1400_vm7 = vweird.f32 %v3456_v28  ;;  %v1096_v21 = vadd.f32 %v3357_v56, %v1024_v55  ;;  %v1080_v7 = vpop.f32.mrf.mxu3 }
 0x201   : > { %v2212_v59 = vpop.eup %2211  ;;  %2213 = vrcp.f32 %v3472_v3  ;;  %v1027_v10 = vadd.f32 %v1026_v61, %v849_v2  ;;  %v1397_v22 = vmul.f32 %v3456_v28, %v1396_v9  ;;  %v1113_v63 = vadd.f32 %v3357_v56, %v1075_v60  ;;  %v903_v61 = vpop.f32.mrf.mxu2 }
 0x202   : > { %v1642_v19 = vsel %vm1641_vm13, %v2204_v53, %v1638_v11  ;;  %v1650_v13 = vmul.f32 %v2212_v59, %v3437_v35  ;;  %vm1399_vm9 = vweird.f32 %v3424_v27  ;;  %v1658_v49 = vand.u32 2147483647, %v3437_v35  ;;  %vm3542_vm13 = vmand %vm1783_vm0, %vm1815_vm4 }
 0x203   : > { %v1647_v62 = vsel %vm3467_vm3, %v1646_v6, %v1642_v19  ;;  %vm1767_vm1 = vcmp.ge.s32.totalorder %v3482_v54, 0  ;;  %vm1799_vm11 = vcmp.lt.s32.totalorder %v3482_v54, 2  ;;  %2215 = vrcp.f32 %v3484_v14  ;;  %vm1401_vm12 = vmor %vm1399_vm9, %vm1400_vm7 }
 0x204   : > { %v1878_v24 = vsel %vm3476_vm14, %v1647_v62, 0.0  ;;  %v1398_v51 = vadd.f32 %v3456_v28, %v1397_v22  ;;  %vm3508_vm5 = vcmp.eq.f32.partialorder %v1403_v4, 8.507059e+37  ;;  %v1651_v52 = vsub.f32 1.0, %v1650_v13 }
 0x205   : > { %1911 = vst.msk [vmem:[%s2918_s5 + $0xd0] sm:$0xff] %vm1884_vm8, %v1878_v24  ;;  %v1406_v27 = vor.u32 1.1754944e-38, %v1405_v1  ;;  %v1660_v31 = vand.u32 2147483648, %v3437_v35  ;;  %vm1784_vm10 = vcmp.ge.s32.totalorder %v3495_v26, 0  ;;  %vm1816_vm3 = vcmp.lt.s32.totalorder %v3495_v26, 2 }
 0x206   : > { %v2072_v30 = vmul.f32 -1.442695, %v1096_v21  ;;  %v1097_v15 = vadd.f32 %v3357_v56, %v1027_v10  ;;  %v1402_v16 = vsel %vm1401_vm12, %v3456_v28, %v1398_v51  ;;  %v1652_v40 = vmul.f32 %v2212_v59, %v1651_v52  ;;  %v1736_v51 = vld [vmem:[%s2904_s28 + $0x60] sm:$0xff] }
 0x207   : > { %vm1655_vm2 = vweird.f32 %v2212_v59  ;;  %v2089_v0 = vmul.f32 -1.442695, %v1113_v63  ;;  %v2214_v50 = vpop.eup %2213  ;;  %v1407_v8 = vsel %vm3508_vm5, %v1406_v27, %v1402_v16  ;;  %vm1654_vm6 = vweird.f32 %v3437_v35  ;;  %vm3567_vm5 = vmand %vm1767_vm1, %vm1799_vm11 }
 0x208   : > { %vm3532_vm14 = vcmp.eq.f32.partialorder %v1658_v49, 8.507059e+37  ;;  %2217 = vpow2.f32 %v2072_v30  ;;  %v1862_v17 = vsel %vm3516_vm15, %v1407_v8, 0.0  ;;  %v1653_v58 = vadd.f32 %v2212_v59, %v1652_v40  ;;  %vm1656_vm7 = vmor %vm1654_vm6, %vm1655_vm2  ;;  %v1737_v30 = vld [vmem:[%s2904_s28 + $0x68] sm:$0xff] }
 0x209   : > { %v1410_v39 = vmul.f32 %v2214_v50, %v3472_v3  ;;  %v1078_v35 = vadd.f32 %v1077_v23, %v900_v25  ;;  %v2216_v48 = vpop.eup %2215  ;;  %1895 = vst.msk [vmem:[%s2918_s5 + $0x50] sm:$0xff] %vm1884_vm8, %v1862_v17  ;;  %v1661_v12 = vor.u32 1.1754944e-38, %v1660_v31  ;;  %v1418_v33 = vand.u32 2147483647, %v3472_v3  ;;  %vm3583_vm1 = vmand %vm1784_vm10, %vm1816_vm3  ;;  %v855_v25 = vpop.f32.mrf.mxu0 }
 0x20a   : > { %2219 = vpow2.f32 %v2089_v0  ;;  %v2073_v41 = vmul.f32 -1.442695, %v1097_v15  ;;  %v1657_v43 = vsel %vm1656_vm7, %v2212_v59, %v1653_v58  ;;  %v1420_v46 = vand.u32 2147483648, %v3472_v3  ;;  %v1032_v23 = vpop.f32.mrf.mxu1 }
 0x20b   : > { %v1411_v29 = vsub.f32 1.0, %v1410_v39  ;;  %v1665_v42 = vmul.f32 %v2216_v48, %v3484_v14  ;;  %v1662_v28 = vsel %vm3532_vm14, %v1661_v12, %v1657_v43  ;;  %vm1415_vm0 = vweird.f32 %v2214_v50 }
 0x20c   : > { %v1673_v34 = vand.u32 2147483647, %v3484_v14  ;;  %2221 = vpow2.f32 %v2073_v41  ;;  %v1879_v55 = vsel %vm3542_vm13, %v1662_v28, 0.0  ;;  %v1114_v47 = vadd.f32 %v3357_v56, %v1078_v35 }
 0x20d   : > { %v1412_v36 = vmul.f32 %v2214_v50, %v1411_v29  ;;  %v1666_v45 = vsub.f32 1.0, %v1665_v42  ;;  %1912 = vst.msk [vmem:[%s2918_s5 + $0xd8] sm:$0xff] %vm1884_vm8, %v1879_v55  ;;  %vm1414_vm4 = vweird.f32 %v3472_v3  ;;  %vm1670_vm9 = vweird.f32 %v2216_v48 }
 0x20e   : > { %v2218_v5 = vpop.eup %2217  ;;  %v1675_v60 = vand.u32 2147483648, %v3484_v14  ;;  %v1030_v2 = vadd.f32 %v1029_v38, %v852_v37  ;;  %v2090_v18 = vmul.f32 -1.442695, %v1114_v47  ;;  %vm1416_vm15 = vmor %vm1414_vm4, %vm1415_vm0  ;;  %vm1419_vm12 = vcmp.eq.f32.partialorder %v1418_v33, 8.507059e+37 }
 0x20f   : > { %v1413_v20 = vadd.f32 %v2214_v50, %v1412_v36  ;;  %v1667_v4 = vmul.f32 %v2216_v48, %v1666_v45  ;;  %v3571_v11 = vadd.f32 1.0, %v2218_v5  ;;  %v1421_v9 = vor.u32 1.1754944e-38, %v1420_v46 }
 0x210   : > { %v2220_v3 = vpop.eup %2219  ;;  %vm1669_vm2 = vweird.f32 %v3484_v14  ;;  %vm3575_vm6 = vcmp.eq.f32.partialorder %v1673_v34, 8.507059e+37  ;;  %v1081_v10 = vadd.f32 %v1080_v7, %v903_v61  ;;  %v1676_v22 = vor.u32 1.1754944e-38, %v1675_v60 }
 0x211   : > { %v1417_v54 = vsel %vm1416_vm15, %v2214_v50, %v1413_v20  ;;  %v1668_v59 = vadd.f32 %v2216_v48, %v1667_v4  ;;  %2223 = vrcp.f32 %v3571_v11  ;;  %vm1671_vm11 = vmor %vm1669_vm2, %vm1670_vm9  ;;  %v3589_v13 = vadd.f32 1.0, %v2220_v3  ;;  %v1754_v20 = vld [vmem:[%s2904_s28 + $0xf0] sm:$0xff] }
 0x212   : > { %v2222_v14 = vpop.eup %2221  ;;  %v1422_v19 = vsel %vm1419_vm12, %v1421_v9, %v1417_v54  ;;  %v1098_v26 = vadd.f32 %v3357_v56, %v1030_v2  ;;  %2225 = vpow2.f32 %v2090_v18  ;;  %v1115_v52 = vadd.f32 %v3357_v56, %v1081_v10 }
 0x213   : > { %v1863_v63 = vsel %vm3567_vm5, %v1422_v19, 0.0  ;;  %v1672_v62 = vsel %vm1671_vm11, %v2216_v48, %v1668_v59  ;;  %v3594_v49 = vadd.f32 1.0, %v2222_v14  ;;  %2227 = vrcp.f32 %v3589_v13 }
 0x214   : > { %1896 = vst.msk [vmem:[%s2918_s5 + $0x58] sm:$0xff] %vm1884_vm8, %v1863_v63  ;;  %v1677_v24 = vsel %vm3575_vm6, %v1676_v22, %v1672_v62  ;;  %v1033_v27 = vadd.f32 %v1032_v23, %v855_v25  ;;  %vm1768_vm10 = vcmp.ge.s32.totalorder %v1736_v51, 0  ;;  %v2074_v15 = vmul.f32 -1.442695, %v1098_v26  ;;  %v1738_v23 = vld [vmem:[%s2904_s28 + $0x70] sm:$0xff] }
 0x215   : > { %v1880_v32 = vsel %vm3583_vm1, %v1677_v24, 0.0  ;;  %2229 = vrcp.f32 %v3594_v49  ;;  %v1433_v40 = vand.u32 2147483647, %v3571_v11  ;;  %vm1800_vm3 = vcmp.lt.s32.totalorder %v1736_v51, 2 }
 0x216   : > { %1913 = vst.msk [vmem:[%s2918_s5 + $0xe0] sm:$0xff] %vm1884_vm8, %v1880_v32  ;;  %vm1785_vm14 = vcmp.ge.s32.totalorder %v1753_v44, 0  ;;  %v1435_v50 = vand.u32 2147483648, %v3571_v11  ;;  %vm1817_vm13 = vcmp.lt.s32.totalorder %v1753_v44, 2  ;;  %2231 = vpow2.f32 %v2074_v15  ;;  %vm3627_vm12 = vmand %vm1768_vm10, %vm1800_vm3 }
 0x217   : > { %v2224_v31 = vpop.eup %2223  ;;  %v2091_v8 = vmul.f32 -1.442695, %v1115_v52  ;;  %vm1769_vm7 = vcmp.ge.s32.totalorder %v1737_v30, 0  ;;  %v1099_v53 = vadd.f32 %v3357_v56, %v1033_v27  ;;  %vm1429_vm0 = vweird.f32 %v3571_v11  ;;  %vm3643_vm1 = vmand %vm1785_vm14, %vm1817_vm13 }
 0x218   : > { %v1425_v16 = vmul.f32 %v2224_v31, %v3571_v11  ;;  %v2226_v0 = vpop.eup %2225  ;;  %vm1801_vm4 = vcmp.lt.s32.totalorder %v1737_v30, 2  ;;  %vm1430_vm9 = vweird.f32 %v2224_v31  ;;  %vm3618_vm5 = vcmp.eq.f32.partialorder %v1433_v40, 8.507059e+37  ;;  %v1755_v30 = vld [vmem:[%s2904_s28 + $0xf8] sm:$0xff] }
 0x219   : > { %v2228_v57 = vpop.eup %2227  ;;  %v3613_v58 = vadd.f32 1.0, %v2226_v0  ;;  %2233 = vpow2.f32 %v2091_v8  ;;  %v1436_v48 = vor.u32 1.1754944e-38, %v1435_v50  ;;  %vm1684_vm15 = vweird.f32 %v3589_v13  ;;  %vm1431_vm2 = vmor %vm1429_vm0, %vm1430_vm9 }
 0x21a   : > { %v1426_v17 = vsub.f32 1.0, %v1425_v16  ;;  %v1680_v39 = vmul.f32 %v2228_v57, %v3589_v13  ;;  %v1688_v43 = vand.u32 2147483647, %v3589_v13  ;;  %v1690_v29 = vand.u32 2147483648, %v3589_v13  ;;  %vm3659_vm13 = vmand %vm1769_vm7, %vm1801_vm4 }
 0x21b   : > { %v2230_v35 = vpop.eup %2229  ;;  %2235 = vrcp.f32 %v3613_v58  ;;  %v2075_v46 = vmul.f32 -1.442695, %v1099_v53  ;;  %vm1685_vm6 = vweird.f32 %v2228_v57  ;;  %v1448_v55 = vand.u32 2147483647, %v3594_v49 }
 0x21c   : > { %v1427_v37 = vmul.f32 %v2224_v31, %v1426_v17  ;;  %v1681_v12 = vsub.f32 1.0, %v1680_v39  ;;  %v1440_v56 = vmul.f32 %v2230_v35, %v3594_v49  ;;  %v2232_v42 = vpop.eup %2231  ;;  %v1450_v45 = vand.u32 2147483648, %v3594_v49  ;;  %vm1686_vm10 = vmor %vm1684_vm15, %vm1685_vm6  ;;  %v1739_v39 = vld [vmem:[%s2904_s28 + $0x78] sm:$0xff] }
 0x21d   : > { %v3637_v47 = vadd.f32 1.0, %v2232_v42  ;;  %2237 = vpow2.f32 %v2075_v46  ;;  %vm1445_vm11 = vweird.f32 %v2230_v35  ;;  %v1691_v11 = vor.u32 1.1754944e-38, %v1690_v29 }
 0x21e   : > { %v1428_v33 = vadd.f32 %v2224_v31, %v1427_v37  ;;  %v1682_v28 = vmul.f32 %v2228_v57, %v1681_v12  ;;  %v1441_v34 = vsub.f32 1.0, %v1440_v56  ;;  %vm1444_vm3 = vweird.f32 %v3594_v49 }
 0x21f   : > { %v2234_v5 = vpop.eup %2233  ;;  %2239 = vrcp.f32 %v3637_v47  ;;  %vm1689_vm14 = vcmp.eq.f32.partialorder %v1688_v43, 8.507059e+37  ;;  %vm1446_vm0 = vmor %vm1444_vm3, %vm1445_vm11  ;;  %v1451_v59 = vor.u32 1.1754944e-38, %v1450_v45  ;;  %vm1786_vm9 = vcmp.ge.s32.totalorder %v1754_v20, 0 }
 0x220   : > { %v1432_v36 = vsel %vm1431_vm2, %v2224_v31, %v1428_v33  ;;  %v1683_v2 = vadd.f32 %v2228_v57, %v1682_v28  ;;  %v1442_v7 = vmul.f32 %v2230_v35, %v1441_v34  ;;  %v3665_v21 = vadd.f32 1.0, %v2234_v5 }
 0x221   : > { %v1437_v60 = vsel %vm3618_vm5, %v1436_v48, %v1432_v36  ;;  %v2236_v6 = vpop.eup %2235  ;;  %vm1449_vm5 = vcmp.eq.f32.partialorder %v1448_v55, 8.507059e+37  ;;  %v1705_v26 = vand.u32 2147483648, %v3613_v58  ;;  %vm1818_vm7 = vcmp.lt.s32.totalorder %v1754_v20, 2 }
 0x222   : > { %v1864_v4 = vsel %vm3627_vm12, %v1437_v60, 0.0  ;;  %v1687_v18 = vsel %vm1686_vm10, %v2228_v57, %v1683_v2  ;;  %v1443_v3 = vadd.f32 %v2230_v35, %v1442_v7  ;;  %v1695_v1 = vmul.f32 %v2236_v6, %v3613_v58  ;;  %vm3683_vm12 = vmand %vm1786_vm9, %vm1818_vm7 }
 0x223   : > { %1897 = vst.msk [vmem:[%s2918_s5 + $0x60] sm:$0xff] %vm1884_vm8, %v1864_v4  ;;  %v1692_v54 = vsel %vm1689_vm14, %v1691_v11, %v1687_v18  ;;  %v2238_v22 = vpop.eup %2237  ;;  %2241 = vrcp.f32 %v3665_v21  ;;  %vm1700_vm4 = vweird.f32 %v2236_v6  ;;  %v1703_v49 = vand.u32 2147483647, %v3613_v58 }
 0x224   : > { %v1881_v10 = vsel %vm3643_vm1, %v1692_v54, 0.0  ;;  %v1447_v14 = vsel %vm1446_vm0, %v2230_v35, %v1443_v3  ;;  %v1696_v19 = vsub.f32 1.0, %v1695_v1  ;;  %v3679_v24 = vadd.f32 1.0, %v2238_v22 }
 0x225   : > { %1914 = vst.msk [vmem:[%s2918_s5 + $0xe8] sm:$0xff] %vm1884_vm8, %v1881_v10  ;;  %v1452_v13 = vsel %vm1449_vm5, %v1451_v59, %v1447_v14  ;;  %v2240_v25 = vpop.eup %2239  ;;  %vm1699_vm15 = vweird.f32 %v3613_v58  ;;  %v1706_v52 = vor.u32 1.1754944e-38, %v1705_v26  ;;  %vm1704_vm6 = vcmp.eq.f32.partialorder %v1703_v49, 8.507059e+37 }
 0x226   : > { %v1865_v63 = vsel %vm3659_vm13, %v1452_v13, 0.0  ;;  %v1697_v62 = vmul.f32 %v2236_v6, %v1696_v19  ;;  %v1455_v44 = vmul.f32 %v2240_v25, %v3637_v47  ;;  %vm1701_vm2 = vmor %vm1699_vm15, %vm1700_vm4  ;;  %2243 = vrcp.f32 %v3679_v24 }
 0x227   : > { %1898 = vst.msk [vmem:[%s2918_s5 + $0x68] sm:$0xff] %vm1884_vm8, %v1865_v63  ;;  %vm1770_vm1 = vcmp.ge.s32.totalorder %v1738_v23, 0  ;;  %v1463_v40 = vand.u32 2147483647, %v3637_v47  ;;  %v1465_v0 = vand.u32 2147483648, %v3637_v47  ;;  %vm1802_vm11 = vcmp.lt.s32.totalorder %v1738_v23, 2 }
 0x228   : > { %v1698_v51 = vadd.f32 %v2236_v6, %v1697_v62  ;;  %v1456_v31 = vsub.f32 1.0, %v1455_v44  ;;  %vm1460_vm10 = vweird.f32 %v2240_v25  ;;  %vm1787_vm3 = vcmp.ge.s32.totalorder %v1755_v30, 0  ;;  %vm3699_vm13 = vmand %vm1770_vm1, %vm1802_vm11 }
 0x229   : > { %v2242_v15 = vpop.eup %2241  ;;  %vm1459_vm14 = vweird.f32 %v3637_v47  ;;  %vm1819_vm0 = vcmp.lt.s32.totalorder %v1755_v30, 2  ;;  %vm1464_vm5 = vcmp.eq.f32.partialorder %v1463_v40, 8.507059e+37  ;;  %v1466_v37 = vor.u32 1.1754944e-38, %v1465_v0 }
 0x22a   : > { %v1702_v27 = vsel %vm1701_vm2, %v2236_v6, %v1698_v51  ;;  %v1457_v8 = vmul.f32 %v2240_v25, %v1456_v31  ;;  %v1710_v57 = vmul.f32 %v2242_v15, %v3665_v21  ;;  %vm1461_vm9 = vmor %vm1459_vm14, %vm1460_vm10  ;;  %v1718_v38 = vand.u32 2147483647, %v3665_v21 }
 0x22b   : > { %v1707_v16 = vsel %vm1704_vm6, %v1706_v52, %v1702_v27  ;;  %v1720_v48 = vand.u32 2147483648, %v3665_v21  ;;  %vm1715_vm7 = vweird.f32 %v2242_v15  ;;  %vm1771_vm4 = vcmp.ge.s32.totalorder %v1739_v39, 0 }
 0x22c   : > { %v1882_v50 = vsel %vm3683_vm12, %v1707_v16, 0.0  ;;  %v1458_v17 = vadd.f32 %v2240_v25, %v1457_v8  ;;  %v1711_v53 = vsub.f32 1.0, %v1710_v57  ;;  %v2244_v35 = vpop.eup %2243  ;;  %vm1714_vm15 = vweird.f32 %v3665_v21  ;;  %vm3712_vm12 = vmand %vm1787_vm3, %vm1819_vm0 }
 0x22d   : > { %1915 = vst.msk [vmem:[%s2918_s5 + $0xf0] sm:$0xff] %vm1884_vm8, %v1882_v50  ;;  %v1470_v33 = vmul.f32 %v2244_v35, %v3679_v24  ;;  %vm1716_vm2 = vmor %vm1714_vm15, %vm1715_vm7  ;;  %vm1719_vm6 = vcmp.eq.f32.partialorder %v1718_v38, 8.507059e+37  ;;  %v1721_v28 = vor.u32 1.1754944e-38, %v1720_v48  ;;  %v1480_v34 = vand.u32 2147483648, %v3679_v24 }
 0x22e   : > { %v1462_v12 = vsel %vm1461_vm9, %v2240_v25, %v1458_v17  ;;  %v1712_v56 = vmul.f32 %v2242_v15, %v1711_v53  ;;  %vm1803_vm1 = vcmp.lt.s32.totalorder %v1739_v39, 2  ;;  %vm1475_vm11 = vweird.f32 %v2244_v35 }
 0x22f   : > { %v1467_v41 = vsel %vm1464_vm5, %v1466_v37, %v1462_v12  ;;  %v1471_v42 = vsub.f32 1.0, %v1470_v33  ;;  %v1478_v45 = vand.u32 2147483647, %v3679_v24  ;;  %vm1474_vm10 = vweird.f32 %v3679_v24  ;;  %vm1835_vm3 = vmand %vm1771_vm4, %vm1803_vm1 }
 0x230   : > { %v1866_v43 = vsel %vm3699_vm13, %v1467_v41, 0.0  ;;  %v1713_v29 = vadd.f32 %v2242_v15, %v1712_v56  ;;  %vm1476_vm14 = vmor %vm1474_vm10, %vm1475_vm11  ;;  %v1481_v2 = vor.u32 1.1754944e-38, %v1480_v34 }
 0x231   : > { %1899 = vst.msk [vmem:[%s2918_s5 + $0x70] sm:$0xff] %vm1884_vm8, %v1866_v43  ;;  %v1472_v36 = vmul.f32 %v2244_v35, %v1471_v42  ;;  %vm1479_vm13 = vcmp.eq.f32.partialorder %v1478_v45, 8.507059e+37 }
 0x232   : > { %v1717_v55 = vsel %vm1716_vm2, %v2242_v15, %v1713_v29 }
 0x233   : > { %v1722_v47 = vsel %vm1719_vm6, %v1721_v28, %v1717_v55  ;;  %v1473_v60 = vadd.f32 %v2244_v35, %v1472_v36 }
 0x234   : > { %v1883_v5 = vsel %vm3712_vm12, %v1722_v47, 0.0 }
 0x235   : > { %1916 = vst.msk [vmem:[%s2918_s5 + $0xf8] sm:$0xff] %vm1884_vm8, %v1883_v5  ;;  %v1477_v61 = vsel %vm1476_vm14, %v2244_v35, %v1473_v60 }
 0x236   : > { %v1482_v7 = vsel %vm1479_vm13, %v1481_v2, %v1477_v61 }
 0x237   : > { %v1867_v20 = vsel %vm1835_vm3, %v1482_v7, 0.0 }
 0x238   : > { %1900 = vst.msk [vmem:[%s2918_s5 + $0x78] sm:$0xff] %vm1884_vm8, %v1867_v20 }
 0x239 PF: > { %s14_s15 = sadd.s32 1, %s2252_s15  }
 0x23a   : > { %p11_p4 = scmp.ge.s32.totalorder %s14_s15, 6  }
 0x23c   :  { %13 = sbr.rel (!%p11_p4) target bundleno = 1 (0x1), region = 69 }

// kernel: dcn_md_adp_forward.2
= control target key start
LH: loop header
LB: loop body
LE: loop exit
PB: predicated region body
PF: predicated region fallthrough
CT: control target
= control target key end

     0   :  { %s5105_s18 = smov 0   ;;  %s8057_s0 = inlined_call_operand.vmem [shape: f32[1024,32], index: 0, kind: input, shape index: {}]   ;;  %s8058_s1 = inlined_call_operand.vmem [shape: bf16[32,896], index: 1, kind: input, shape index: {}]   ;;  %s8059_s2 = inlined_call_operand.vmem [shape: bf16[64,384], index: 2, kind: input, shape index: {}]   ;;  %s8060_s3 = inlined_call_operand.vmem [shape: bf16[256,256], index: 3, kind: input, shape index: {}]   ;;  %s8061_s4 = inlined_call_operand.vmem [shape: f32[8,256], index: 4, kind: input, shape index: {}]   ;;  %s8062_s5 = inlined_call_operand.vmem [shape: f32[1024,128], index: 5, kind: output, shape index: {}]  }
   0x1 LB: > { %s4347_s19 = sadd.s32 4294967295, %s5069_s18   ;;  %p4351_p0 = scmp.ge.s32.totalorder %s5069_s18, 1  ;;  %s5069_s18 = sphi %s5105_s18, %s15_s18  }
   0x2   : > { %p188_p1 = scmp.lt.s32.totalorder %s5069_s18, 5 }
   0x4   : > { %p189_p2 = pnand %p4351_p0, %p188_p1 }
   0x6   : > { %192 = sbr.rel (%p189_p2) target bundleno = 2027 (0x7eb), region = 40 }
   0xb   : > { %v4362_v0 = vld [vmem:[%s8058_s1 + $0x48] sm:$0xf]  ;;  %v4800_v1 = vld [vmem:[%s8058_s1 + $0x60] sm:$0xf0]  ;;  %v4451_v2 = vld [vmem:[%s8058_s1 + $0x4c] sm:$0xf] }
   0xc   : > { %v4363_v3 = vor.u32 %v4800_v1, %v4362_v0  ;;  %v4810_v4 = vld [vmem:[%s8058_s1 + $0x64] sm:$0xf0]  ;;  %v4358_v5 = vld [vmem:[%s8058_s1 + $0x10] sm:$0xf]  ;;  %v4799_v6 = vld [vmem:[%s8058_s1 + $0x28] sm:$0xf0] }
   0xd   : > { %v5131_v7 = vor.u32 %v4810_v4, %v4451_v2  ;;  %v4447_v8 = vld [vmem:[%s8058_s1 + $0x14] sm:$0xf]  ;;  %v4809_v9 = vld [vmem:[%s8058_s1 + $0x2c] sm:$0xf0]  ;;  %s4352_s11 = sshll.u32 %s4347_s19, 5  ;;  %v4359_v10 = vor.u32 %v4799_v6, %v4358_v5  ;;  %vm294_vm0 = vcmask 261120  }
   0xe   : > { %349 = vmatpush.bf16.msra.mxu0 %v4363_v3  ;;  %p217_p3 = scmp.lt.s32.totalorder %s4352_s11, 127  ;;  %4857 = vmatpush.bf16.msra.mxu2 %v4363_v3  ;;  %v5140_v11 = vor.u32 %v4809_v9, %v4447_v8  ;;  %v4407_v41 = vld [vmem:[%s8059_s2 + $0x48] sm:$0xf]  ;;  %v4808_v42 = vld [vmem:[%s8059_s2 + $0x50] sm:$0xf0]  ;;  %vm535_vm1 = vcmask 523264  }
   0xf   : > { %4863 = vmatpush.bf16.msra.mxu3 %v5131_v7  ;;  %v4408_v43 = vor.u32 %v4808_v42, %v4407_v41  ;;  %v4399_v45 = vld [vmem:[%s8059_s2 + $0x30] sm:$0xf]  ;;  %v4806_v46 = vld [vmem:[%s8059_s2 + $0x38] sm:$0xf0]  ;;  %v4391_v48 = vld [vmem:[%s8059_s2 + $0x18] sm:$0xf] }
  0x10   : > { %s8575_s11 = smov (!%p217_p3, %s4352_s11), 127  ;;  %v4400_v47 = vor.u32 %v4806_v46, %v4399_v45  ;;  %v4804_v49 = vld [vmem:[%s8059_s2 + $0x20] sm:$0xf0]  ;;  %v4383_v51 = vld [vmem:[%s8059_s2] sm:$0xf]  ;;  %s5071_s24 = smov 127  }
  0x11   : > { %s4353_s12 = sshll.u32 %s8575_s11, 3  ;;  %588 = vmatpush.bf16.msra.mxu1 %v4408_v43  ;;  %v4392_v50 = vor.u32 %v4804_v49, %v4391_v48  ;;  %v4802_v52 = vld [vmem:[%s8059_s2 + $0x8] sm:$0xf0]  ;;  %v5305_v0 = vld [vmem:[%s8061_s4] ss:$0 sm:$0xff]  ;;  %s5073_s28 = smov 32  }
  0x12   : > { %350 = vmatpush.bf16.msra.mxu0 %v4359_v10  ;;  %4858 = vmatpush.bf16.msra.mxu2 %v4359_v10  ;;  %s5151_s15 = scalar_lea.vmem %s8057_s0, %s4353_s12  ;;  %v4384_v53 = vor.u32 %v4802_v52, %v4383_v51  ;;  %v5315_v4 = vld [vmem:[%s8061_s4 + $0x1] ss:$0 sm:$0xff]  ;;  %s5074_s26 = smov 64  }
  0x13   : > { %4864 = vmatpush.bf16.msra.mxu3 %v5140_v11  ;;  %v5154_v12 = vld [vmem:[%s5151_s15] sm:$0xff]  ;;  %v5157_v13 = vld [vmem:[%s5151_s15 + $0x8] sm:$0xff]  ;;  %v5160_v14 = vld [vmem:[%s5151_s15 + $0x30] sm:$0xff]  ;;  %s7858_s7 = scalar_lea.vmem %s8062_s5, %s4353_s12 }
  0x14   : > { %v5164_v15 = vpack.c.bf16 %v5157_v13, %v5154_v12  ;;  %v5167_v16 = vld [vmem:[%s5151_s15 + $0x38] sm:$0xff]  ;;  %v5178_v18 = vld [vmem:[%s5151_s15 + $0x10] sm:$0xff]  ;;  %v5184_v20 = vld [vmem:[%s5151_s15 + $0x40] sm:$0xff] }
  0x15   : > { %v5171_v17 = vpack.c.bf16 %v5167_v16, %v5160_v14  ;;  %v5181_v19 = vld [vmem:[%s5151_s15 + $0x18] sm:$0xff]  ;;  %v5187_v21 = vld [vmem:[%s5151_s15 + $0x48] sm:$0xff]  ;;  %v5202_v24 = vld [vmem:[%s5151_s15 + $0x20] sm:$0xff]  ;;  %589 = vmatpush.bf16.msra.mxu1 %v4400_v47 }
  0x16   : > { %4364 = vmatmul.msk.bf16.vlgmr.msra.gmra.mxu0 %vm294_vm0, %v5164_v15  ;;  %v5191_v22 = vpack.c.bf16 %v5181_v19, %v5178_v18  ;;  %v5195_v23 = vpack.c.bf16 %v5187_v21, %v5184_v20  ;;  %v5205_v25 = vld [vmem:[%s5151_s15 + $0x28] sm:$0xff]  ;;  %v5208_v26 = vld [vmem:[%s5151_s15 + $0x50] sm:$0xff]  ;;  %v5211_v27 = vld [vmem:[%s5151_s15 + $0x58] sm:$0xff]  ;;  %4859 = vmatpush.bf16.msrb.mxu2 %v4408_v43 }
  0x17   : > { %4456 = vmatmul.msk.bf16.vlgmr.msra.gmra.mxu3 %vm294_vm0, %v5171_v17  ;;  %v5215_v28 = vpack.c.bf16 %v5205_v25, %v5202_v24  ;;  %v5219_v29 = vpack.c.bf16 %v5211_v27, %v5208_v26  ;;  %v5226_v30 = vld [vmem:[%s5151_s15 + $0x60] sm:$0xff]  ;;  %v242_v31 = vld [vmem:[%s5151_s15 + $0x68] sm:$0xff]  ;;  %v243_v33 = vld [vmem:[%s5151_s15 + $0x70] sm:$0xff] }
  0x18   : > { %v5230_v32 = vpack.c.bf16 %v242_v31, %v5226_v30  ;;  %v244_v34 = vld [vmem:[%s5151_s15 + $0x78] sm:$0xff]  ;;  %v245_v36 = vld [vmem:[%s5151_s15 + $0x80] sm:$0xff]  ;;  %v246_v37 = vld [vmem:[%s5151_s15 + $0x88] sm:$0xff] }
  0x19   : > { %v5238_v35 = vpack.c.bf16 %v244_v34, %v243_v33  ;;  %v5246_v38 = vpack.c.bf16 %v246_v37, %v245_v36  ;;  %v247_v39 = vld [vmem:[%s5151_s15 + $0x90] sm:$0xff]  ;;  %v248_v40 = vld [vmem:[%s5151_s15 + $0x98] sm:$0xff]  ;;  %590 = vmatpush.bf16.msra.mxu1 %v4392_v50  ;;  %v249_v54 = vld [vmem:[%s5151_s15 + $0xa0] sm:$0xff] }
  0x1a   : > { %v5260_v44 = vpack.c.bf16 %v248_v40, %v247_v39  ;;  %4860 = vmatpush.bf16.msrb.mxu2 %v4400_v47  ;;  %v250_v55 = vld [vmem:[%s5151_s15 + $0xa8] sm:$0xff]  ;;  %v251_v57 = vld [vmem:[%s5151_s15 + $0xb0] sm:$0xff]  ;;  %v252_v58 = vld [vmem:[%s5151_s15 + $0xb8] sm:$0xff] }
  0x1b   : > { %v5286_v56 = vpack.c.bf16 %v250_v55, %v249_v54  ;;  %v5294_v60 = vpack.c.bf16 %v252_v58, %v251_v57  ;;  %v255_v61 = vld [vmem:[%s5151_s15 + $0xd0] sm:$0xff]  ;;  %v256_v62 = vld [vmem:[%s5151_s15 + $0xd8] sm:$0xff]  ;;  %v253_v31 = vld [vmem:[%s5151_s15 + $0xc0] sm:$0xff] }
  0x1c   : > { %v5298_v63 = vpack.c.bf16 %v256_v62, %v255_v61  ;;  %v254_v33 = vld [vmem:[%s5151_s15 + $0xc8] sm:$0xff]  ;;  %v257_v41 = vld [vmem:[%s5151_s15 + $0xe0] sm:$0xff]  ;;  %v259_v61 = vld [vmem:[%s5151_s15 + $0xf0] sm:$0xff] }
  0x1d   : > { %591 = vmatpush.bf16.msra.mxu1 %v4384_v53  ;;  %v5326_v40 = vpack.c.bf16 %v254_v33, %v253_v31  ;;  %v258_v42 = vld [vmem:[%s5151_s15 + $0xe8] sm:$0xff]  ;;  %v260_v62 = vld [vmem:[%s5151_s15 + $0xf8] sm:$0xff]  ;;  %v4507_v31 = vld [vmem:[%s8058_s1 + $0x50] sm:$0xf] }
  0x1e   : > { %4861 = vmatpush.bf16.msrb.mxu2 %v4392_v50  ;;  %v5330_v45 = vpack.c.bf16 %v258_v42, %v257_v41  ;;  %v4816_v33 = vld [vmem:[%s8058_s1 + $0x68] sm:$0xf0]  ;;  %v4503_v42 = vld [vmem:[%s8058_s1 + $0x18] sm:$0xf] }
  0x1f   : > { %4377 = vmatmul.msk.bf16.vlgmr.msra.gmra.mxu2 %vm294_vm0, %v5298_v63 }
  0x22   : > { %4862 = vmatpush.bf16.msrb.mxu2 %v4384_v53 }
  0x26   : > { %4365 = vmatmul.msk.bf16.gmra.mxu0 %vm294_vm0, %v5191_v22 }
  0x27   : > { %4457 = vmatmul.msk.bf16.gmra.mxu3 %vm294_vm0, %v5195_v23 }
  0x2f   : > { %4378 = vmatmul.msk.bf16.gmra.mxu2 %vm294_vm0, %v5330_v45 }
  0x36   : > { %4366 = vmatmul.msk.bf16.gmra.mxu0 %vm294_vm0, %v5215_v28 }
  0x37   : > { %4458 = vmatmul.msk.bf16.gmra.mxu3 %vm294_vm0, %v5219_v29 }
  0x46   : > { %4367 = vmatmul.msk.bf16.gmra.mxu0 %vm294_vm0, %v5171_v17 }
  0x47   : > { %4459 = vmatmul.msk.bf16.gmra.mxu3 %vm294_vm0, %v5230_v32 }
  0x56   : > { %4368 = vmatmul.msk.bf16.gmra.mxu0 %vm294_vm0, %v5195_v23 }
  0x57   : > { %4460 = vmatmul.msk.bf16.gmra.mxu3 %vm294_vm0, %v5238_v35 }
  0x66   : > { %4369 = vmatmul.msk.bf16.gmra.mxu0 %vm294_vm0, %v5219_v29 }
  0x67   : > { %4461 = vmatmul.msk.bf16.gmra.mxu3 %vm294_vm0, %v5246_v38 }
  0x76   : > { %4370 = vmatmul.msk.bf16.gmra.mxu0 %vm294_vm0, %v5230_v32 }
  0x77   : > { %4462 = vmatmul.msk.bf16.gmra.mxu3 %vm294_vm0, %v5260_v44 }
  0x86   : > { %4371 = vmatmul.msk.bf16.gmra.mxu0 %vm294_vm0, %v5238_v35 }
  0x87   : > { %4463 = vmatmul.msk.bf16.gmra.mxu3 %vm294_vm0, %v5286_v56 }
  0x93   : > { %v352_v59 = vpop.f32.mrf.mxu0 }
  0x94   : > { %v353_v1 = vadd.f32 %v352_v59, %v5305_v0 }
  0x96   : > { %4372 = vmatmul.msk.bf16.gmra.mxu0 %vm294_vm0, %v5246_v38  ;;  %v432_v6 = vmax.f32 %v353_v1, 0.0 }
  0x97   : > { %4464 = vmatmul.msk.bf16.gmra.mxu3 %vm294_vm0, %v5294_v60 }
  0x9a   : > { %v867_v2 = vpop.f32.mrf.mxu3 }
  0x9b   : > { %v354_v3 = vpop.f32.mrf.mxu0  ;;  %v868_v9 = vadd.f32 %v867_v2, %v5315_v4  ;;  %v5350_v2 = vpack.c.bf16 %v260_v62, %v259_v61 }
  0x9c   : > { %v355_v5 = vadd.f32 %v354_v3, %v5305_v0 }
  0x9d   : > { %v938_v36 = vmax.f32 %v868_v9, 0.0  ;;  %4379 = vmatmul.msk.bf16.gmra.mxu2 %vm294_vm0, %v5350_v2 }
  0x9e   : > { %v433_v8 = vmax.f32 %v355_v5, 0.0 }
  0xa0   : > { %v5319_v10 = vpack.c.bf16 %v433_v8, %v432_v6 }
  0xa2   : > { %v869_v34 = vpop.f32.mrf.mxu3  ;;  %4413 = vmatmul.msk.bf16.vlgmr.msra.gmra.mxu1 %vm535_vm1, %v5319_v10 }
  0xa3   : > { %v870_v37 = vadd.f32 %v869_v34, %v5315_v4  ;;  %v357_v39 = vpop.f32.mrf.mxu0 }
  0xa4   : > { %v358_v47 = vadd.f32 %v357_v39, %v5305_v0 }
  0xa5   : > { %v939_v43 = vmax.f32 %v870_v37, 0.0  ;;  %v4508_v37 = vor.u32 %v4816_v33, %v4507_v31 }
  0xa6   : > { %4373 = vmatmul.msk.bf16.gmra.mxu0 %vm294_vm0, %v5260_v44  ;;  %v434_v51 = vmax.f32 %v358_v47, 0.0 }
  0xa7   : > { %v5334_v46 = vpack.c.bf16 %v939_v43, %v938_v36  ;;  %4465 = vmatmul.msk.bf16.gmra.mxu3 %vm294_vm0, %v5326_v40  ;;  %v4815_v43 = vld [vmem:[%s8058_s1 + $0x30] sm:$0xf0]  ;;  %1563 = vrot.lane.b32.xlu1 %v4508_v37, %s5071_s24 }
  0xa8   : > { %1205 = vmatpush.bf16.msrb.mxu3 %v4508_v37 }
  0xaa   : > { %v872_v48 = vpop.f32.mrf.mxu3 }
  0xab   : > { %v359_v49 = vpop.f32.mrf.mxu0  ;;  %v873_v53 = vadd.f32 %v872_v48, %v5315_v4  ;;  %v4504_v48 = vor.u32 %v4815_v43, %v4503_v42 }
  0xac   : > { %v360_v50 = vadd.f32 %v359_v49, %v5305_v0 }
  0xad   : > { %v940_v57 = vmax.f32 %v873_v53, 0.0  ;;  %1206 = vmatpush.bf16.msrb.mxu3 %v4504_v48 }
  0xae   : > { %v435_v52 = vmax.f32 %v360_v50, 0.0 }
  0xaf   : > { %1561 = vrot.lane.b32.xlu1 %v4504_v48, %s5071_s24 }
  0xb0   : > { %v5343_v54 = vpack.c.bf16 %v435_v52, %v434_v51 }
  0xb2   : > { %v874_v55 = vpop.f32.mrf.mxu3  ;;  %4414 = vmatmul.msk.bf16.gmra.mxu1 %vm535_vm1, %v5343_v54 }
  0xb3   : > { %v875_v58 = vadd.f32 %v874_v55, %v5315_v4  ;;  %v362_v59 = vpop.f32.mrf.mxu0 }
  0xb4   : > { %v363_v5 = vadd.f32 %v362_v59, %v5305_v0 }
  0xb5   : > { %v941_v1 = vmax.f32 %v875_v58, 0.0 }
  0xb6   : > { %4374 = vmatmul.msk.bf16.gmra.mxu0 %vm294_vm0, %v5286_v56  ;;  %v436_v34 = vmax.f32 %v363_v5, 0.0 }
  0xb7   : > { %v5354_v3 = vpack.c.bf16 %v941_v1, %v940_v57  ;;  %4466 = vmatmul.msk.bf16.gmra.mxu3 %vm294_vm0, %v5298_v63 }
  0xba   : > { %v877_v6 = vpop.f32.mrf.mxu3 }
  0xbb   : > { %v364_v8 = vpop.f32.mrf.mxu0  ;;  %v878_v39 = vadd.f32 %v877_v6, %v5315_v4 }
  0xbc   : > { %v365_v9 = vadd.f32 %v364_v8, %v5305_v0 }
  0xbd   : > { %v942_v49 = vmax.f32 %v878_v39, 0.0 }
  0xbe   : > { %v437_v36 = vmax.f32 %v365_v9, 0.0 }
  0xc0   : > { %v5369_v41 = vpack.c.bf16 %v437_v36, %v436_v34 }
  0xc2   : > { %v879_v47 = vpop.f32.mrf.mxu3  ;;  %4415 = vmatmul.msk.bf16.gmra.mxu1 %vm535_vm1, %v5369_v41 }
  0xc3   : > { %v880_v50 = vadd.f32 %v879_v47, %v5315_v4  ;;  %v367_v51 = vpop.f32.mrf.mxu0 }
  0xc4   : > { %v368_v55 = vadd.f32 %v367_v51, %v5305_v0 }
  0xc5   : > { %v943_v52 = vmax.f32 %v880_v50, 0.0 }
  0xc6   : > { %4375 = vmatmul.msk.bf16.gmra.mxu0 %vm294_vm0, %v5294_v60  ;;  %v438_v61 = vmax.f32 %v368_v55, 0.0 }
  0xc7   : > { %v5382_v53 = vpack.c.bf16 %v943_v52, %v942_v49  ;;  %4467 = vmatmul.msk.bf16.gmra.mxu3 %vm294_vm0, %v5330_v45 }
  0xca   : > { %v882_v57 = vpop.f32.mrf.mxu3 }
  0xcb   : > { %v369_v58 = vpop.f32.mrf.mxu0  ;;  %v883_v1 = vadd.f32 %v882_v57, %v5315_v4 }
  0xcc   : > { %v370_v59 = vadd.f32 %v369_v58, %v5305_v0 }
  0xcd   : > { %v944_v8 = vmax.f32 %v883_v1, 0.0 }
  0xce   : > { %v439_v62 = vmax.f32 %v370_v59, 0.0 }
  0xd0   : > { %v5389_v5 = vpack.c.bf16 %v439_v62, %v438_v61 }
  0xd2   : > { %v884_v6 = vpop.f32.mrf.mxu3  ;;  %4416 = vmatmul.msk.bf16.gmra.mxu1 %vm535_vm1, %v5389_v5 }
  0xd3   : > { %v885_v9 = vadd.f32 %v884_v6, %v5315_v4  ;;  %v372_v31 = vpop.f32.mrf.mxu0 }
  0xd4   : > { %v373_v36 = vadd.f32 %v372_v31, %v5305_v0 }
  0xd5   : > { %v945_v33 = vmax.f32 %v885_v9, 0.0 }
  0xd6   : > { %4376 = vmatmul.msk.bf16.gmra.mxu0 %vm294_vm0, %v5326_v40  ;;  %v440_v47 = vmax.f32 %v373_v36, 0.0 }
  0xd7   : > { %v5396_v34 = vpack.c.bf16 %v945_v33, %v944_v8  ;;  %4468 = vmatmul.msk.bf16.gmra.mxu3 %vm294_vm0, %v5350_v2 }
  0xda   : > { %v887_v39 = vpop.f32.mrf.mxu3 }
  0xdb   : > { %v374_v42 = vpop.f32.mrf.mxu0  ;;  %v888_v50 = vadd.f32 %v887_v39, %v5315_v4 }
  0xdc   : > { %v375_v43 = vadd.f32 %v374_v42, %v5305_v0 }
  0xdd   : > { %v946_v55 = vmax.f32 %v888_v50, 0.0 }
  0xde   : > { %v441_v49 = vmax.f32 %v375_v43, 0.0 }
  0xe0   : > { %v5403_v51 = vpack.c.bf16 %v441_v49, %v440_v47 }
  0xe2   : > { %v889_v52 = vpop.f32.mrf.mxu3  ;;  %4417 = vmatmul.msk.bf16.gmra.mxu1 %vm535_vm1, %v5403_v51 }
  0xe3   : > { %v890_v57 = vadd.f32 %v889_v52, %v5315_v4  ;;  %v377_v58 = vpop.f32.mrf.mxu0 }
  0xe4   : > { %v378_v62 = vadd.f32 %v377_v58, %v5305_v0 }
  0xe5   : > { %v947_v59 = vmax.f32 %v890_v57, 0.0 }
  0xe6   : > { %v442_v9 = vmax.f32 %v378_v62, 0.0 }
  0xe7   : > { %v5408_v61 = vpack.c.bf16 %v947_v59, %v946_v55  ;;  %4509 = vmatmul.msk.bf16.vlgmr.msrb.gmra.mxu3 %vm294_vm0, %v5164_v15 }
  0xea   : > { %v892_v1 = vpop.f32.mrf.mxu3 }
  0xeb   : > { %v379_v6 = vpop.f32.mrf.mxu0  ;;  %v893_v33 = vadd.f32 %v892_v1, %v5315_v4 }
  0xec   : > { %v380_v8 = vadd.f32 %v379_v6, %v5305_v0 }
  0xed   : > { %v948_v42 = vmax.f32 %v893_v33, 0.0 }
  0xee   : > { %v443_v31 = vmax.f32 %v380_v8, 0.0 }
  0xf0   : > { %v5415_v36 = vpack.c.bf16 %v443_v31, %v442_v9 }
  0xf2   : > { %v894_v39 = vpop.f32.mrf.mxu3  ;;  %4418 = vmatmul.msk.bf16.gmra.mxu1 %vm535_vm1, %v5415_v36 }
  0xf3   : > { %v895_v43 = vadd.f32 %v894_v39, %v5315_v4  ;;  %v382_v47 = vpop.f32.mrf.mxu0 }
  0xf4   : > { %v383_v37 = vadd.f32 %v382_v47, %v5305_v0 }
  0xf5   : > { %v949_v49 = vmax.f32 %v895_v43, 0.0 }
  0xf6   : > { %v444_v58 = vmax.f32 %v383_v37, 0.0 }
  0xf7   : > { %v5420_v50 = vpack.c.bf16 %v949_v49, %v948_v42  ;;  %4510 = vmatmul.msk.bf16.gmra.mxu3 %vm294_vm0, %v5191_v22 }
  0xf9   : > { %8171 = vst [vmem:[#allocation2_spill] sm:$0xff] %v5420_v50 }
  0xfa   : > { %v897_v52 = vpop.f32.mrf.mxu3 }
  0xfb   : > { %v384_v55 = vpop.f32.mrf.mxu0  ;;  %v898_v62 = vadd.f32 %v897_v52, %v5315_v4 }
  0xfc   : > { %v385_v57 = vadd.f32 %v384_v55, %v5305_v0 }
  0xfd   : > { %v950_v48 = vmax.f32 %v898_v62, 0.0 }
  0xfe   : > { %v445_v59 = vmax.f32 %v385_v57, 0.0 }
 0x100   : > { %v5427_v1 = vpack.c.bf16 %v445_v59, %v444_v58 }
 0x102   : > { %v899_v6 = vpop.f32.mrf.mxu3  ;;  %4419 = vmatmul.msk.bf16.gmra.mxu1 %vm535_vm1, %v5427_v1 }
 0x103   : > { %v900_v8 = vadd.f32 %v899_v6, %v5315_v4  ;;  %v387_v9 = vpop.f32.mrf.mxu0 }
 0x104   : > { %v388_v39 = vadd.f32 %v387_v9, %v5305_v0 }
 0x105   : > { %v951_v31 = vmax.f32 %v900_v8, 0.0 }
 0x106   : > { %v446_v49 = vmax.f32 %v388_v39, 0.0 }
 0x107   : > { %v5432_v33 = vpack.c.bf16 %v951_v31, %v950_v48  ;;  %4511 = vmatmul.msk.bf16.gmra.mxu3 %vm294_vm0, %v5215_v28 }
 0x109   : > { %8172 = vst [vmem:[#allocation3_spill] sm:$0xff] %v5432_v33 }
 0x10a   : > { %v902_v42 = vpop.f32.mrf.mxu3 }
 0x10b   : > { %v389_v43 = vpop.f32.mrf.mxu0  ;;  %v903_v52 = vadd.f32 %v902_v42, %v5315_v4 }
 0x10c   : > { %v390_v47 = vadd.f32 %v389_v43, %v5305_v0 }
 0x10d   : > { %v952_v58 = vmax.f32 %v903_v52, 0.0 }
 0x10e   : > { %v447_v37 = vmax.f32 %v390_v47, 0.0 }
 0x110   : > { %v5439_v55 = vpack.c.bf16 %v447_v37, %v446_v49 }
 0x112   : > { %v904_v57 = vpop.f32.mrf.mxu3  ;;  %4420 = vmatmul.msk.bf16.gmra.mxu1 %vm535_vm1, %v5439_v55 }
 0x113   : > { %v905_v59 = vadd.f32 %v904_v57, %v5315_v4  ;;  %v392_v62 = vpop.f32.mrf.mxu0 }
 0x114   : > { %v393_v8 = vadd.f32 %v392_v62, %v5305_v0 }
 0x115   : > { %v953_v6 = vmax.f32 %v905_v59, 0.0 }
 0x116   : > { %v448_v42 = vmax.f32 %v393_v8, 0.0 }
 0x117   : > { %v5444_v48 = vpack.c.bf16 %v953_v6, %v952_v58  ;;  %4512 = vmatmul.msk.bf16.gmra.mxu3 %vm294_vm0, %v5171_v17 }
 0x119   : > { %8173 = vst [vmem:[#allocation4_spill] sm:$0xff] %v5444_v48 }
 0x11a   : > { %v907_v9 = vpop.f32.mrf.mxu3 }
 0x11b   : > { %v394_v31 = vpop.f32.mrf.mxu0  ;;  %v908_v47 = vadd.f32 %v907_v9, %v5315_v4 }
 0x11c   : > { %v395_v39 = vadd.f32 %v394_v31, %v5305_v0 }
 0x11d   : > { %v954_v52 = vmax.f32 %v908_v47, 0.0 }
 0x11e   : > { %v449_v43 = vmax.f32 %v395_v39, 0.0 }
 0x120   : > { %v5451_v49 = vpack.c.bf16 %v449_v43, %v448_v42 }
 0x122   : > { %v909_v37 = vpop.f32.mrf.mxu3  ;;  %4421 = vmatmul.msk.bf16.gmra.mxu1 %vm535_vm1, %v5451_v49 }
 0x123   : > { %v910_v57 = vadd.f32 %v909_v37, %v5315_v4  ;;  %v397_v17 = vpop.f32.mrf.mxu0 }
 0x124   : > { %v398_v62 = vadd.f32 %v397_v17, %v5305_v0 }
 0x125   : > { %v955_v58 = vmax.f32 %v910_v57, 0.0 }
 0x126   : > { %v450_v31 = vmax.f32 %v398_v62, 0.0 }
 0x127   : > { %v5456_v59 = vpack.c.bf16 %v955_v58, %v954_v52  ;;  %4513 = vmatmul.msk.bf16.gmra.mxu3 %vm294_vm0, %v5195_v23 }
 0x129   : > { %8174 = vst [vmem:[#allocation5_spill] sm:$0xff] %v5456_v59 }
 0x12a   : > { %v912_v6 = vpop.f32.mrf.mxu3 }
 0x12b   : > { %v399_v8 = vpop.f32.mrf.mxu0  ;;  %v913_v42 = vadd.f32 %v912_v6, %v5315_v4 }
 0x12c   : > { %v400_v9 = vadd.f32 %v399_v8, %v5305_v0 }
 0x12d   : > { %v956_v37 = vmax.f32 %v913_v42, 0.0 }
 0x12e   : > { %v451_v39 = vmax.f32 %v400_v9, 0.0 }
 0x130   : > { %v5463_v43 = vpack.c.bf16 %v451_v39, %v450_v31 }
 0x132   : > { %v914_v47 = vpop.f32.mrf.mxu3  ;;  %4422 = vmatmul.msk.bf16.gmra.mxu1 %vm535_vm1, %v5463_v43 }
 0x133   : > { %v915_v52 = vadd.f32 %v914_v47, %v5315_v4  ;;  %v402_v23 = vpop.f32.mrf.mxu0 }
 0x134   : > { %v403_v58 = vadd.f32 %v402_v23, %v5305_v0 }
 0x135   : > { %v957_v57 = vmax.f32 %v915_v52, 0.0 }
 0x136   : > { %v452_v9 = vmax.f32 %v403_v58, 0.0  ;;  %v4807_v58 = vld [vmem:[%s8059_s2 + $0x4c] sm:$0xf] }
 0x137   : > { %v5468_v17 = vpack.c.bf16 %v957_v57, %v956_v37  ;;  %4514 = vmatmul.msk.bf16.gmra.mxu3 %vm294_vm0, %v5219_v29 }
 0x139   : > { %8175 = vst [vmem:[#allocation6_spill] sm:$0xff] %v5468_v17 }
 0x13a   : > { %v917_v62 = vpop.f32.mrf.mxu3 }
 0x13b   : > { %v404_v6 = vpop.f32.mrf.mxu0  ;;  %v918_v39 = vadd.f32 %v917_v62, %v5315_v4  ;;  %v4409_v62 = vld [vmem:[%s8059_s2 + $0x54] sm:$0xf0] }
 0x13c   : > { %v405_v8 = vadd.f32 %v404_v6, %v5305_v0  ;;  %v4412_v6 = vor.u32 %v4807_v58, %v4409_v62  ;;  %v4401_v58 = vld [vmem:[%s8059_s2 + $0x3c] sm:$0xf0] }
 0x13d   : > { %v958_v37 = vmax.f32 %v918_v39, 0.0 }
 0x13e   : > { %v453_v31 = vmax.f32 %v405_v8, 0.0  ;;  %677 = vmatpush.bf16.msra.mxu2 %v4412_v6 }
 0x140   : > { %v5475_v42 = vpack.c.bf16 %v453_v31, %v452_v9  ;;  %v5072_v31 = vmov 0  }
 0x141   : > { %4877 = vset.pattern.permute.xlu0 %v5072_v31  ;;  %4879 = vset.pattern.permute.xlu1 %v5072_v31 }
 0x142   : > { %v919_v47 = vpop.f32.mrf.mxu3  ;;  %4423 = vmatmul.msk.bf16.gmra.mxu1 %vm535_vm1, %v5475_v42  ;;  %4878 = vset.pattern.permute.xlu2 %v5072_v31  ;;  %v417_v31 = vpop.f32.mrf.mxu2 }
 0x143   : > { %v920_v52 = vadd.f32 %v919_v47, %v5315_v4  ;;  %v407_v29 = vpop.f32.mrf.mxu0 }
 0x144   : > { %v408_v8 = vadd.f32 %v407_v29, %v5305_v0  ;;  %v4805_v29 = vld [vmem:[%s8059_s2 + $0x34] sm:$0xf] }
 0x145   : > { %v959_v57 = vmax.f32 %v920_v52, 0.0 }
 0x146   : > { %v454_v47 = vmax.f32 %v408_v8, 0.0 }
 0x147   : > { %v5480_v23 = vpack.c.bf16 %v959_v57, %v958_v37  ;;  %4515 = vmatmul.msk.bf16.gmra.mxu3 %vm294_vm0, %v5230_v32 }
 0x149   : > { %8176 = vst [vmem:[#allocation7_spill] sm:$0xff] %v5480_v23 }
 0x14a   : > { %v922_v9 = vpop.f32.mrf.mxu3  ;;  %v419_v48 = vpop.f32.mrf.mxu2 }
 0x14b   : > { %v409_v39 = vpop.f32.mrf.mxu0  ;;  %v923_v52 = vadd.f32 %v922_v9, %v5315_v4  ;;  %v4404_v9 = vor.u32 %v4805_v29, %v4401_v58  ;;  %v4393_v58 = vld [vmem:[%s8059_s2 + $0x24] sm:$0xf0] }
 0x14c   : > { %v410_v32 = vadd.f32 %v409_v39, %v5305_v0 }
 0x14d   : > { %v960_v62 = vmax.f32 %v923_v52, 0.0  ;;  %678 = vmatpush.bf16.msra.mxu2 %v4404_v9  ;;  %v418_v9 = vadd.f32 %v417_v31, %v5305_v0  ;;  %v4385_v31 = vld [vmem:[%s8059_s2 + $0xc] sm:$0xf0] }
 0x14e   : > { %v455_v37 = vmax.f32 %v410_v32, 0.0 }
 0x150   : > { %v5493_v57 = vpack.c.bf16 %v455_v37, %v454_v47 }
 0x152   : > { %v924_v23 = vpop.f32.mrf.mxu3  ;;  %4424 = vmatmul.msk.bf16.gmra.mxu1 %vm535_vm1, %v5493_v57 }
 0x153   : > { %v925_v6 = vadd.f32 %v924_v23, %v5315_v4  ;;  %v412_v8 = vpop.f32.mrf.mxu0 }
 0x154   : > { %v413_v47 = vadd.f32 %v412_v8, %v5305_v0  ;;  %v422_v8 = vpop.f32.mrf.mxu2 }
 0x155   : > { %v961_v39 = vmax.f32 %v925_v6, 0.0 }
 0x156   : > { %v456_v52 = vmax.f32 %v413_v47, 0.0 }
 0x157   : > { %v5504_v32 = vpack.c.bf16 %v961_v39, %v960_v62  ;;  %4516 = vmatmul.msk.bf16.gmra.mxu3 %vm294_vm0, %v5238_v35  ;;  %v4803_v35 = vld [vmem:[%s8059_s2 + $0x1c] sm:$0xf]  ;;  %v420_v39 = vadd.f32 %v419_v48, %v5305_v0 }
 0x15a   : > { %v927_v37 = vpop.f32.mrf.mxu3 }
 0x15b   : > { %v414_v17 = vpop.f32.mrf.mxu0  ;;  %v928_v23 = vadd.f32 %v927_v37, %v5315_v4  ;;  %v458_v37 = vmax.f32 %v418_v9, 0.0 }
 0x15c   : > { %v415_v59 = vadd.f32 %v414_v17, %v5305_v0 }
 0x15d   : > { %v962_v17 = vmax.f32 %v928_v23, 0.0 }
 0x15e   : > { %v457_v33 = vmax.f32 %v415_v59, 0.0  ;;  %v4396_v59 = vor.u32 %v4803_v35, %v4393_v58  ;;  %v423_v35 = vadd.f32 %v422_v8, %v5305_v0 }
 0x160   : > { %v5511_v50 = vpack.c.bf16 %v457_v33, %v456_v52  ;;  %679 = vmatpush.bf16.msra.mxu2 %v4396_v59  ;;  %v459_v52 = vmax.f32 %v420_v39, 0.0 }
 0x162   : > { %v929_v29 = vpop.f32.mrf.mxu3  ;;  %4425 = vmatmul.msk.bf16.vlgmr.msrb.gmra.mxu2 %vm535_vm1, %v5511_v50  ;;  %v5528_v23 = vpack.c.bf16 %v459_v52, %v458_v37 }
 0x163   : > { %v930_v62 = vadd.f32 %v929_v29, %v5315_v4  ;;  %v424_v4 = vpop.f32.mrf.mxu2 }
 0x164   : > { %v425_v58 = vadd.f32 %v424_v4, %v5305_v0 }
 0x165   : > { %v963_v6 = vmax.f32 %v930_v62, 0.0  ;;  %v5544_v62 = vpop.f32.mrf.mxu1 }
 0x166   : > { %v461_v9 = vmax.f32 %v425_v58, 0.0 }
 0x167   : > { %v5522_v33 = vpack.c.bf16 %v963_v6, %v962_v17  ;;  %4517 = vmatmul.msk.bf16.gmra.mxu3 %vm294_vm0, %v5246_v38  ;;  %v4801_v38 = vld [vmem:[%s8059_s2 + $0x4] sm:$0xf]  ;;  %v460_v6 = vmax.f32 %v423_v35, 0.0 }
 0x168   : > { %v4388_v48 = vor.u32 %v4801_v38, %v4385_v31 }
 0x169   : > { %v5546_v39 = vpack.c.bf16 %v461_v9, %v460_v6 }
 0x16a   : > { %v1208_v47 = vpop.f32.mrf.mxu3  ;;  %680 = vmatpush.bf16.msra.mxu2 %v4388_v48 }
 0x16b   : > { %1290 = vperm.xlu0 %4877, %v1208_v47   ;;  %v427_v59 = vpop.f32.mrf.mxu2 }
 0x16e   : > { %849 = vmatpush.bf16.msrb.mxu2 %v5131_v7  ;;  %v5550_v7 = vpop.f32.mrf.mxu1 }
 0x172   : > { %v1210_v29 = vpop.f32.mrf.mxu3  ;;  %4426 = vmatmul.msk.bf16.gmra.mxu2 %vm535_vm1, %v5528_v23 }
 0x173   : > { %1295 = vperm.xlu0 %4877, %v1210_v29   ;;  %850 = vmatpush.bf16.msrb.mxu2 %v5140_v11  ;;  %v428_v11 = vadd.f32 %v427_v59, %v5305_v0 }
 0x175   : > { %v462_v52 = vmax.f32 %v428_v11, 0.0 }
 0x176   : > { %v5556_v29 = vpop.f32.mrf.mxu1 }
 0x177   : > { %4518 = vmatmul.msk.bf16.gmra.mxu3 %vm294_vm0, %v5260_v44  ;;  %v429_v44 = vpop.f32.mrf.mxu2 }
 0x178   : > { %v430_v8 = vadd.f32 %v429_v44, %v5305_v0 }
 0x17a   : > { %v1213_v17 = vpop.f32.mrf.mxu3  ;;  %v463_v4 = vmax.f32 %v430_v8, 0.0 }
 0x17b   : > { %1300 = vperm.xlu2 %4878, %v1213_v17  }
 0x17c   : > { %v5558_v38 = vpack.c.bf16 %v463_v4, %v462_v52  ;;  %v5600_v52 = vld [vmem:[%s8061_s4 + $0x6] ss:$0 sm:$0xff] }
 0x182   : > { %v1215_v47 = vpop.f32.mrf.mxu3  ;;  %4427 = vmatmul.msk.bf16.gmra.mxu2 %vm535_vm1, %v5546_v39 }
 0x183   : > { %1305 = vperm.xlu2 %4878, %v1215_v47  }
 0x187   : > { %4519 = vmatmul.msk.bf16.gmra.mxu3 %vm294_vm0, %v5286_v56  ;;  %v5564_v56 = vpop.f32.mrf.mxu1 }
 0x18a   : > { %v1218_v37 = vpop.f32.mrf.mxu3 }
 0x18b   : > { %1310 = vperm.xlu0 %4877, %v1218_v37  }
 0x18f   : > { %v5568_v35 = vpop.f32.mrf.mxu1 }
 0x192   : > { %v1220_v31 = vpop.f32.mrf.mxu3  ;;  %4428 = vmatmul.msk.bf16.gmra.mxu2 %vm535_vm1, %v5558_v38 }
 0x193   : > { %1315 = vperm.xlu1 %4879, %v1220_v31  }
 0x197   : > { %4520 = vmatmul.msk.bf16.gmra.mxu3 %vm294_vm0, %v5294_v60  ;;  %v5572_v17 = vpop.f32.mrf.mxu1 }
 0x19a   : > { %v1223_v48 = vpop.f32.mrf.mxu3 }
 0x19b   : > { %1320 = vperm.xlu2 %4878, %v1223_v48  }
 0x19f   : > { %v5576_v60 = vpop.f32.mrf.mxu1 }
 0x1a2   : > { %v1225_v0 = vpop.f32.mrf.mxu3  ;;  %4429 = vmatmul.msk.bf16.vlgmr.msra.gmra.mxu2 %vm535_vm1, %v5319_v10 }
 0x1a3   : > { %1325 = vperm.xlu0 %4877, %v1225_v0  }
 0x1a7   : > { %4521 = vmatmul.msk.bf16.gmra.mxu3 %vm294_vm0, %v5326_v40  ;;  %v5580_v6 = vpop.f32.mrf.mxu1  ;;  %v1564_v40 = vpop.permute.xlu1 %1563 }
 0x1a8   : > { %1621 = vmatpush.bf16.msrb.mxu1 %v1564_v40 }
 0x1aa   : > { %v1228_v58 = vpop.f32.mrf.mxu3 }
 0x1ab   : > { %1330 = vperm.xlu1 %4879, %v1228_v58  }
 0x1af   : > { %v1562_v47 = vpop.permute.xlu1 %1561  ;;  %v5586_v44 = vpop.f32.mrf.mxu1 }
 0x1b0   : > { %1622 = vmatpush.bf16.msrb.mxu1 %v1562_v47 }
 0x1b2   : > { %v1230_v59 = vpop.f32.mrf.mxu3  ;;  %4430 = vmatmul.msk.bf16.gmra.mxu2 %vm535_vm1, %v5343_v54 }
 0x1b3   : > { %1335 = vperm.xlu2 %4878, %v1230_v59  }
 0x1b7   : > { %4522 = vmatmul.msk.bf16.gmra.mxu3 %vm294_vm0, %v5298_v63  ;;  %v5590_v11 = vpop.f32.mrf.mxu1 }
 0x1ba   : > { %v1233_v10 = vpop.f32.mrf.mxu3 }
 0x1bb   : > { %1340 = vperm.xlu0 %4877, %v1233_v10  }
 0x1c2   : > { %v1235_v9 = vpop.f32.mrf.mxu3  ;;  %4431 = vmatmul.msk.bf16.gmra.mxu2 %vm535_vm1, %v5369_v41 }
 0x1c3   : > { %1345 = vperm.xlu1 %4879, %v1235_v9  }
 0x1c7   : > { %4523 = vmatmul.msk.bf16.gmra.mxu3 %vm294_vm0, %v5330_v45  ;;  %v5594_v45 = vpop.f32.mrf.mxu1 }
 0x1ca   : > { %v1238_v54 = vpop.f32.mrf.mxu3 }
 0x1cb   : > { %1350 = vperm.xlu2 %4878, %v1238_v54  }
 0x1cf   : > { %v5612_v10 = vpop.f32.mrf.mxu1 }
 0x1d2   : > { %v1240_v63 = vpop.f32.mrf.mxu3  ;;  %4432 = vmatmul.msk.bf16.gmra.mxu2 %vm535_vm1, %v5389_v5 }
 0x1d3   : > { %1355 = vperm.xlu0 %4877, %v1240_v63  }
 0x1d5   : > { %v1301_v4 = vpop.permute.xlu2 %1300 }
 0x1d6   : > { %v1450_v63 = vmul.f32 %v1301_v4, %v5178_v18 }
 0x1d7   : > { %4524 = vmatmul.msk.bf16.gmra.mxu3 %vm294_vm0, %v5350_v2 }
 0x1da   : > { %v1243_v41 = vpop.f32.mrf.mxu3 }
 0x1db   : > { %1360 = vperm.xlu1 %4879, %v1243_v41   ;;  %v1482_v41 = vadd.f32 %v1450_v63, %v5600_v52 }
 0x1dd   : > { %v1291_v8 = vpop.permute.xlu0 %1290 }
 0x1de   : > { %v1448_v37 = vmul.f32 %v1291_v8, %v5154_v12 }
 0x1e0   : > { %v1480_v2 = vadd.f32 %v1448_v37, %v5600_v52  ;;  %v5628_v37 = vpop.f32.mrf.mxu1 }
 0x1e1   : > { %8180 = vst [vmem:[#allocation11_spill] sm:$0xff] %v5628_v37 }
 0x1e2   : > { %v1245_v5 = vpop.f32.mrf.mxu3  ;;  %4433 = vmatmul.msk.bf16.gmra.mxu2 %vm535_vm1, %v5403_v51  ;;  %v5609_v58 = vadd.f32 %v1480_v2, %v5154_v12  ;;  %v1306_v51 = vpop.permute.xlu2 %1305  ;;  %v5633_v2 = vadd.f32 %v1482_v41, %v5178_v18 }
 0x1e3   : > { %1365 = vperm.xlu2 %4878, %v1245_v5   ;;  %v1451_v12 = vmul.f32 %v1306_v51, %v5181_v19 }
 0x1e4   : > { %8178 = vst [vmem:[#allocation9_spill] sm:$0xff] %v5609_v58 }
 0x1e5   : > { %v1296_v31 = vpop.permute.xlu0 %1295  ;;  %v5605_v48 = vpop.f32.mrf.mxu2 }
 0x1e6   : > { %8177 = vst [vmem:[#allocation8_spill] sm:$0xff] %v5605_v48  ;;  %v1449_v0 = vmul.f32 %v1296_v31, %v5157_v13 }
 0x1e8   : > { %v1481_v59 = vadd.f32 %v1449_v0, %v5600_v52 }
 0x1ea   : > { %v5615_v9 = vadd.f32 %v1481_v59, %v5157_v13  ;;  %v1248_v40 = vpop.f32.mrf.mxu3  ;;  %v1483_v13 = vadd.f32 %v1451_v12, %v5600_v52 }
 0x1eb   : > { %1370 = vperm.xlu0 %4877, %v1248_v40   ;;  %v5642_v40 = vpop.f32.mrf.mxu1 }
 0x1ec   : > { %v1545_v54 = vpack.c.bf16 %v5615_v9, %v5609_v58  ;;  %v5636_v4 = vadd.f32 %v1483_v13, %v5181_v19  ;;  %8183 = vst [vmem:[#allocation14_spill] sm:$0xff] %v5642_v40 }
 0x1ed   : > { %v5619_v47 = vpop.f32.mrf.mxu2 }
 0x1ee   : > { %8179 = vst [vmem:[#allocation10_spill] sm:$0xff] %v5619_v47  ;;  %4525 = vmatmul.msk.bf16.vlgmr.msrb.gmra.mxu1 %vm294_vm0, %v1545_v54  ;;  %v1546_v31 = vpack.c.bf16 %v5636_v4, %v5633_v2 }
 0x1f2   : > { %v1250_v8 = vpop.f32.mrf.mxu3  ;;  %4434 = vmatmul.msk.bf16.gmra.mxu2 %vm535_vm1, %v5415_v36 }
 0x1f3   : > { %1375 = vperm.xlu1 %4879, %v1250_v8   ;;  %v5652_v41 = vpop.f32.mrf.mxu1 }
 0x1f4   : > { %8185 = vst [vmem:[#allocation16_spill] sm:$0xff] %v5652_v41 }
 0x1f5   : > { %v5630_v5 = vpop.f32.mrf.mxu2 }
 0x1f6   : > { %8181 = vst [vmem:[#allocation12_spill] sm:$0xff] %v5630_v5 }
 0x1fa   : > { %v1253_v0 = vpop.f32.mrf.mxu3 }
 0x1fb   : > { %1380 = vperm.xlu2 %4878, %v1253_v0  }
 0x1fd   : > { %v5640_v59 = vpop.f32.mrf.mxu2  ;;  %v1311_v36 = vpop.permute.xlu0 %1310 }
 0x1fe   : > { %8182 = vst [vmem:[#allocation13_spill] sm:$0xff] %v5640_v59  ;;  %4526 = vmatmul.msk.bf16.gmra.mxu1 %vm294_vm0, %v1546_v31  ;;  %v1452_v51 = vmul.f32 %v1311_v36, %v5202_v24 }
 0x200   : > { %v1484_v18 = vadd.f32 %v1452_v51, %v5600_v52  ;;  %v1321_v51 = vpop.permute.xlu2 %1320 }
 0x202   : > { %v1255_v54 = vpop.f32.mrf.mxu3  ;;  %4435 = vmatmul.msk.bf16.gmra.mxu2 %vm535_vm1, %v5427_v1  ;;  %v5655_v8 = vadd.f32 %v1484_v18, %v5202_v24 }
 0x203   : > { %1385 = vperm.xlu0 %4877, %v1255_v54   ;;  %v1454_v54 = vmul.f32 %v1321_v51, %v5160_v14 }
 0x205   : > { %v1316_v19 = vpop.permute.xlu1 %1315  ;;  %v5649_v63 = vpop.f32.mrf.mxu2 }
 0x206   : > { %8184 = vst [vmem:[#allocation15_spill] sm:$0xff] %v5649_v63  ;;  %v1453_v12 = vmul.f32 %v1316_v19, %v5205_v25  ;;  %v5667_v19 = vpop.f32.mrf.mxu1 }
 0x207   : > { %8187 = vst [vmem:[#allocation18_spill] sm:$0xff] %v5667_v19  ;;  %v8252_v19 = vld [vmem:[#allocation6_spill] sm:$0xff] }
 0x208   : > { %v1485_v13 = vadd.f32 %v1453_v12, %v5600_v52 }
 0x20a   : > { %v5659_v31 = vadd.f32 %v1485_v13, %v5205_v25  ;;  %v1258_v0 = vpop.f32.mrf.mxu3  ;;  %v1486_v25 = vadd.f32 %v1454_v54, %v5600_v52 }
 0x20b   : > { %1390 = vperm.xlu1 %4879, %v1258_v0  }
 0x20c   : > { %v1547_v1 = vpack.c.bf16 %v5659_v31, %v5655_v8  ;;  %v5676_v0 = vadd.f32 %v1486_v25, %v5160_v14 }
 0x20d   : > { %v5663_v36 = vpop.f32.mrf.mxu2 }
 0x20e   : > { %8186 = vst [vmem:[#allocation17_spill] sm:$0xff] %v5663_v36  ;;  %4527 = vmatmul.msk.bf16.gmra.mxu1 %vm294_vm0, %v1547_v1  ;;  %v1336_v36 = vpop.permute.xlu2 %1335 }
 0x20f   : > { %v1457_v25 = vmul.f32 %v1336_v36, %v5187_v21 }
 0x212   : > { %v1260_v24 = vpop.f32.mrf.mxu3  ;;  %4436 = vmatmul.msk.bf16.gmra.mxu2 %vm535_vm1, %v5439_v55  ;;  %v5682_v55 = vpop.f32.mrf.mxu1 }
 0x213   : > { %1395 = vperm.xlu2 %4878, %v1260_v24   ;;  %8189 = vst [vmem:[#allocation20_spill] sm:$0xff] %v5682_v55 }
 0x215   : > { %v1326_v18 = vpop.permute.xlu0 %1325  ;;  %v5672_v12 = vpop.f32.mrf.mxu2 }
 0x216   : > { %8188 = vst [vmem:[#allocation19_spill] sm:$0xff] %v5672_v12  ;;  %v1455_v13 = vmul.f32 %v1326_v18, %v5167_v16 }
 0x218   : > { %v1487_v1 = vadd.f32 %v1455_v13, %v5600_v52 }
 0x21a   : > { %v5680_v51 = vadd.f32 %v1487_v1, %v5167_v16  ;;  %v1263_v58 = vpop.f32.mrf.mxu3  ;;  %v5697_v1 = vpop.f32.mrf.mxu1 }
 0x21b   : > { %1400 = vperm.xlu0 %4877, %v1263_v58   ;;  %v1489_v58 = vadd.f32 %v1457_v25, %v5600_v52  ;;  %8192 = vst [vmem:[#allocation23_spill] sm:$0xff] %v5697_v1 }
 0x21c   : > { %v1548_v54 = vpack.c.bf16 %v5680_v51, %v5676_v0 }
 0x21d   : > { %v5686_v24 = vpop.f32.mrf.mxu2  ;;  %v1331_v12 = vpop.permute.xlu1 %1330 }
 0x21e   : > { %8190 = vst [vmem:[#allocation21_spill] sm:$0xff] %v5686_v24  ;;  %4528 = vmatmul.msk.bf16.gmra.mxu1 %vm294_vm0, %v1548_v54  ;;  %v1456_v14 = vmul.f32 %v1331_v12, %v5184_v20  ;;  %v5703_v12 = vadd.f32 %v1489_v58, %v5187_v21 }
 0x220   : > { %v1488_v16 = vadd.f32 %v1456_v14, %v5600_v52 }
 0x222   : > { %v1265_v18 = vpop.f32.mrf.mxu3  ;;  %4437 = vmatmul.msk.bf16.gmra.mxu2 %vm535_vm1, %v5451_v49  ;;  %v5700_v24 = vadd.f32 %v1488_v16, %v5184_v20  ;;  %v5710_v25 = vpop.f32.mrf.mxu1 }
 0x223   : > { %1405 = vperm.xlu1 %4879, %v1265_v18   ;;  %8194 = vst [vmem:[#allocation25_spill] sm:$0xff] %v5710_v25 }
 0x224   : > { %v1549_v36 = vpack.c.bf16 %v5703_v12, %v5700_v24 }
 0x225   : > { %v5695_v13 = vpop.f32.mrf.mxu2 }
 0x226   : > { %8191 = vst [vmem:[#allocation22_spill] sm:$0xff] %v5695_v13 }
 0x22a   : > { %v1268_v54 = vpop.f32.mrf.mxu3  ;;  %v5723_v59 = vpop.f32.mrf.mxu1 }
 0x22b   : > { %1410 = vperm.xlu2 %4878, %v1268_v54   ;;  %8196 = vst [vmem:[#allocation27_spill] sm:$0xff] %v5723_v59 }
 0x22d   : > { %v5707_v49 = vpop.f32.mrf.mxu2  ;;  %v1341_v14 = vpop.permute.xlu0 %1340 }
 0x22e   : > { %8193 = vst [vmem:[#allocation24_spill] sm:$0xff] %v5707_v49  ;;  %4529 = vmatmul.msk.bf16.gmra.mxu1 %vm294_vm0, %v1549_v36  ;;  %v1458_v18 = vmul.f32 %v1341_v14, %v5208_v26 }
 0x230   : > { %v1490_v20 = vadd.f32 %v1458_v18, %v5600_v52  ;;  %v1351_v18 = vpop.permute.xlu2 %1350 }
 0x232   : > { %v1270_v63 = vpop.f32.mrf.mxu3  ;;  %4438 = vmatmul.msk.bf16.gmra.mxu2 %vm535_vm1, %v5463_v43  ;;  %v5720_v54 = vadd.f32 %v1490_v20, %v5208_v26  ;;  %v1460_v26 = vmul.f32 %v1351_v18, %v5226_v30  ;;  %v5008_v18 = vld [vmem:[%s5151_s15 + $0x68] sm:$0xff] }
 0x233   : > { %1415 = vperm.xlu0 %4877, %v1270_v63  }
 0x235   : > { %v1346_v21 = vpop.permute.xlu1 %1345  ;;  %v5716_v16 = vpop.f32.mrf.mxu2 }
 0x236   : > { %8195 = vst [vmem:[#allocation26_spill] sm:$0xff] %v5716_v16  ;;  %v1459_v58 = vmul.f32 %v1346_v21, %v5211_v27  ;;  %v5742_v21 = vpop.f32.mrf.mxu1 }
 0x237   : > { %8198 = vst [vmem:[#allocation29_spill] sm:$0xff] %v5742_v21 }
 0x238   : > { %v1491_v36 = vadd.f32 %v1459_v58, %v5600_v52  ;;  %v1492_v58 = vadd.f32 %v1460_v26, %v5600_v52 }
 0x23a   : > { %v5726_v14 = vadd.f32 %v1491_v36, %v5211_v27  ;;  %v1273_v5 = vpop.f32.mrf.mxu3  ;;  %v4483_v27 = vld [vmem:[%s8059_s2 + $0x50] sm:$0xf] }
 0x23b   : > { %1420 = vperm.xlu1 %4879, %v1273_v5   ;;  %v4814_v5 = vld [vmem:[%s8059_s2 + $0x58] sm:$0xf0] }
 0x23c   : > { %v1550_v43 = vpack.c.bf16 %v5726_v14, %v5720_v54  ;;  %v4484_v36 = vor.u32 %v4814_v5, %v4483_v27 }
 0x23d   : > { %v5730_v63 = vpop.f32.mrf.mxu2  ;;  %v1366_v21 = vpop.permute.xlu2 %1365 }
 0x23e   : > { %8197 = vst [vmem:[#allocation28_spill] sm:$0xff] %v5730_v63  ;;  %4530 = vmatmul.msk.bf16.gmra.mxu1 %vm294_vm0, %v1550_v43  ;;  %1065 = vmatpush.bf16.msrb.mxu0 %v4484_v36 }
 0x242   : > { %v1275_v20 = vpop.f32.mrf.mxu3  ;;  %4439 = vmatmul.msk.bf16.gmra.mxu2 %vm535_vm1, %v5475_v42 }
 0x243   : > { %1425 = vperm.xlu2 %4878, %v1275_v20   ;;  %v5009_v20 = vld [vmem:[%s5151_s15 + $0x60] sm:$0xff] }
 0x244   : > { %v5749_v47 = vadd.f32 %v5009_v20, %v1492_v58  ;;  %v5761_v20 = vpop.f32.mrf.mxu1 }
 0x245   : > { %v1356_v43 = vpop.permute.xlu0 %1355  ;;  %v5745_v30 = vpop.f32.mrf.mxu2  ;;  %8201 = vst [vmem:[#allocation32_spill] sm:$0xff] %v5761_v20 }
 0x246   : > { %8199 = vst [vmem:[#allocation30_spill] sm:$0xff] %v5745_v30  ;;  %v1461_v42 = vmul.f32 %v5008_v18, %v1356_v43  ;;  %v5010_v43 = vld [vmem:[%s5151_s15 + $0x70] sm:$0xff]  ;;  %v5011_v30 = vld [vmem:[%s5151_s15 + $0x78] sm:$0xff] }
 0x247   : > { %v1463_v58 = vmul.f32 %v5011_v30, %v1366_v21 }
 0x248   : > { %v1493_v48 = vadd.f32 %v1461_v42, %v5600_v52 }
 0x24a   : > { %v5752_v59 = vadd.f32 %v5008_v18, %v1493_v48  ;;  %v1278_v25 = vpop.f32.mrf.mxu3  ;;  %v1495_v18 = vadd.f32 %v1463_v58, %v5600_v52  ;;  %v5012_v58 = vld [vmem:[%s5151_s15 + $0x80] sm:$0xff] }
 0x24b   : > { %1430 = vperm.xlu0 %4877, %v1278_v25  }
 0x24c   : > { %v1551_v26 = vpack.c.bf16 %v5752_v59, %v5749_v47 }
 0x24d   : > { %v5756_v27 = vpop.f32.mrf.mxu2  ;;  %v1361_v5 = vpop.permute.xlu1 %1360 }
 0x24e   : > { %8200 = vst [vmem:[#allocation31_spill] sm:$0xff] %v5756_v27  ;;  %4531 = vmatmul.msk.bf16.gmra.mxu1 %vm294_vm0, %v1551_v26  ;;  %v1462_v36 = vmul.f32 %v5010_v43, %v1361_v5  ;;  %v5771_v26 = vadd.f32 %v5011_v30, %v1495_v18  ;;  %v5773_v5 = vpop.f32.mrf.mxu1 }
 0x24f   : > { %8204 = vst [vmem:[#allocation35_spill] sm:$0xff] %v5773_v5 }
 0x250   : > { %v1494_v25 = vadd.f32 %v1462_v36, %v5600_v52  ;;  %8203 = vst [vmem:[#allocation34_spill] sm:$0xff] %v5771_v26 }
 0x252   : > { %v1280_v48 = vpop.f32.mrf.mxu3  ;;  %4440 = vmatmul.msk.bf16.gmra.mxu2 %vm535_vm1, %v5493_v57  ;;  %v5769_v27 = vadd.f32 %v5010_v43, %v1494_v25 }
 0x253   : > { %1435 = vperm.xlu1 %4879, %v1280_v48  }
 0x254   : > { %v1552_v21 = vpack.c.bf16 %v5771_v26, %v5769_v27 }
 0x255   : > { %v5767_v42 = vpop.f32.mrf.mxu2 }
 0x256   : > { %8202 = vst [vmem:[#allocation33_spill] sm:$0xff] %v5767_v42  ;;  %v5783_v30 = vpop.f32.mrf.mxu1 }
 0x257   : > { %8206 = vst [vmem:[#allocation37_spill] sm:$0xff] %v5783_v30  ;;  %v5014_v30 = vld [vmem:[%s5151_s15 + $0x90] sm:$0xff] }
 0x25a   : > { %v1283_v20 = vpop.f32.mrf.mxu3 }
 0x25b   : > { %1440 = vperm.xlu2 %4878, %v1283_v20   ;;  %v5013_v20 = vld [vmem:[%s5151_s15 + $0x88] sm:$0xff] }
 0x25d   : > { %v5777_v57 = vpop.f32.mrf.mxu2  ;;  %v1371_v36 = vpop.permute.xlu0 %1370 }
 0x25e   : > { %8205 = vst [vmem:[#allocation36_spill] sm:$0xff] %v5777_v57  ;;  %4532 = vmatmul.msk.bf16.gmra.mxu1 %vm294_vm0, %v1552_v21  ;;  %v1464_v48 = vmul.f32 %v5012_v58, %v1371_v36 }
 0x260   : > { %v1496_v43 = vadd.f32 %v1464_v48, %v5600_v52  ;;  %v1381_v48 = vpop.permute.xlu2 %1380 }
 0x262   : > { %v1285_v42 = vpop.f32.mrf.mxu3  ;;  %4441 = vmatmul.msk.bf16.gmra.mxu2 %vm535_vm1, %v5511_v50  ;;  %v5789_v57 = vadd.f32 %v5012_v58, %v1496_v43 }
 0x263   : > { %1445 = vperm.xlu0 %4877, %v1285_v42  }
 0x264   : > { %8208 = vst [vmem:[#allocation39_spill] sm:$0xff] %v5789_v57 }
 0x265   : > { %v1376_v25 = vpop.permute.xlu1 %1375  ;;  %v5786_v18 = vpop.f32.mrf.mxu2 }
 0x266   : > { %8207 = vst [vmem:[#allocation38_spill] sm:$0xff] %v5786_v18  ;;  %v1465_v5 = vmul.f32 %v5013_v20, %v1376_v25  ;;  %v1466_v18 = vmul.f32 %v5014_v30, %v1381_v48 }
 0x268   : > { %v1497_v21 = vadd.f32 %v1465_v5, %v5600_v52  ;;  %v1498_v5 = vadd.f32 %v1466_v18, %v5600_v52  ;;  %v4479_v18 = vld [vmem:[%s8059_s2 + $0x38] sm:$0xf] }
 0x26a   : > { %v5792_v36 = vadd.f32 %v5013_v20, %v1497_v21  ;;  %v5015_v20 = vld [vmem:[%s5151_s15 + $0x98] sm:$0xff]  ;;  %v5806_v21 = vadd.f32 %v5014_v30, %v1498_v5 }
 0x26b   : > { %v1624_v1 = vpop.f32.mrf.mxu1 }
 0x26c   : > { %v1553_v50 = vpack.c.bf16 %v5792_v36, %v5789_v57  ;;  %1706 = vperm.xlu1 %4879, %v1624_v1   ;;  %8211 = vst [vmem:[#allocation42_spill] sm:$0xff] %v5806_v21 }
 0x26d   : > { %v5796_v42 = vpop.f32.mrf.mxu2  ;;  %v1396_v55 = vpop.permute.xlu2 %1395 }
 0x26e   : > { %8209 = vst [vmem:[#allocation40_spill] sm:$0xff] %v5796_v42  ;;  %4533 = vmatmul.msk.bf16.gmra.mxu1 %vm294_vm0, %v1553_v50 }
 0x272   : > { %4442 = vmatmul.msk.bf16.gmra.mxu2 %vm535_vm1, %v5528_v23 }
 0x273   : > { %v1626_v58 = vpop.f32.mrf.mxu1 }
 0x274   : > { %1711 = vperm.xlu2 %4878, %v1626_v58   ;;  %v4813_v58 = vld [vmem:[%s8059_s2 + $0x40] sm:$0xf0] }
 0x275   : > { %v1386_v43 = vpop.permute.xlu0 %1385  ;;  %v5803_v25 = vpop.f32.mrf.mxu2 }
 0x276   : > { %8210 = vst [vmem:[#allocation41_spill] sm:$0xff] %v5803_v25  ;;  %v1467_v1 = vmul.f32 %v5015_v20, %v1386_v43  ;;  %v4480_v43 = vor.u32 %v4813_v58, %v4479_v18 }
 0x278   : > { %v1499_v50 = vadd.f32 %v1467_v1, %v5600_v52  ;;  %1066 = vmatpush.bf16.msrb.mxu0 %v4480_v43 }
 0x27a   : > { %v5809_v42 = vadd.f32 %v5015_v20, %v1499_v50  ;;  %v5016_v20 = vld [vmem:[%s5151_s15 + $0xa0] sm:$0xff]  ;;  %v5017_v50 = vld [vmem:[%s5151_s15 + $0xa8] sm:$0xff] }
 0x27b   : > { %v1629_v48 = vpop.f32.mrf.mxu1  ;;  %v1469_v25 = vmul.f32 %v5017_v50, %v1396_v55 }
 0x27c   : > { %8212 = vst [vmem:[#allocation43_spill] sm:$0xff] %v5809_v42  ;;  %v1554_v23 = vpack.c.bf16 %v5809_v42, %v5806_v21  ;;  %1716 = vperm.xlu0 %4877, %v1629_v48  }
 0x27d   : > { %v5819_v30 = vpop.f32.mrf.mxu2  ;;  %v1391_v5 = vpop.permute.xlu1 %1390  ;;  %v1501_v16 = vadd.f32 %v1469_v25, %v5600_v52  ;;  %v5018_v25 = vld [vmem:[%s5151_s15 + $0xb0] sm:$0xff] }
 0x27e   : > { %8213 = vst [vmem:[#allocation44_spill] sm:$0xff] %v5819_v30  ;;  %4534 = vmatmul.msk.bf16.gmra.mxu1 %vm294_vm0, %v1554_v23  ;;  %v1468_v1 = vmul.f32 %v5016_v20, %v1391_v5 }
 0x27f   : > { %v5832_v23 = vadd.f32 %v5017_v50, %v1501_v16  ;;  %v5019_v50 = vld [vmem:[%s5151_s15 + $0xb8] sm:$0xff] }
 0x280   : > { %v1500_v63 = vadd.f32 %v1468_v1, %v5600_v52 }
 0x281   : > { %8216 = vst [vmem:[#allocation47_spill] sm:$0xff] %v5832_v23 }
 0x282   : > { %4443 = vmatmul.msk.bf16.gmra.mxu2 %vm535_vm1, %v5546_v39  ;;  %v5830_v18 = vadd.f32 %v5016_v20, %v1500_v63 }
 0x283   : > { %v1631_v48 = vpop.f32.mrf.mxu1 }
 0x284   : > { %1721 = vperm.xlu1 %4879, %v1631_v48   ;;  %8215 = vst [vmem:[#allocation46_spill] sm:$0xff] %v5830_v18  ;;  %v1555_v55 = vpack.c.bf16 %v5832_v23, %v5830_v18 }
 0x285   : > { %v5828_v30 = vpop.f32.mrf.mxu2 }
 0x286   : > { %8214 = vst [vmem:[#allocation45_spill] sm:$0xff] %v5828_v30 }
 0x28b   : > { %v1634_v58 = vpop.f32.mrf.mxu1 }
 0x28c   : > { %1726 = vperm.xlu2 %4878, %v1634_v58  }
 0x28d   : > { %v5836_v5 = vpop.f32.mrf.mxu2  ;;  %v1401_v39 = vpop.permute.xlu0 %1400 }
 0x28e   : > { %8217 = vst [vmem:[#allocation48_spill] sm:$0xff] %v5836_v5  ;;  %4535 = vmatmul.msk.bf16.gmra.mxu1 %vm294_vm0, %v1555_v55  ;;  %v1470_v43 = vmul.f32 %v5018_v25, %v1401_v39 }
 0x290   : > { %v1502_v16 = vadd.f32 %v1470_v43, %v5600_v52  ;;  %v1411_v43 = vpop.permute.xlu2 %1410 }
 0x292   : > { %4444 = vmatmul.msk.bf16.gmra.mxu2 %vm535_vm1, %v5558_v38  ;;  %v5846_v58 = vadd.f32 %v5018_v25, %v1502_v16 }
 0x293   : > { %v1636_v63 = vpop.f32.mrf.mxu1 }
 0x294   : > { %1731 = vperm.xlu0 %4877, %v1636_v63   ;;  %8219 = vst [vmem:[#allocation50_spill] sm:$0xff] %v5846_v58  ;;  %v5020_v63 = vld [vmem:[%s5151_s15 + $0xc0] sm:$0xff] }
 0x295   : > { %v1406_v20 = vpop.permute.xlu1 %1405  ;;  %v5843_v1 = vpop.f32.mrf.mxu2 }
 0x296   : > { %8218 = vst [vmem:[#allocation49_spill] sm:$0xff] %v5843_v1  ;;  %v1471_v48 = vmul.f32 %v5019_v50, %v1406_v20  ;;  %v1472_v1 = vmul.f32 %v5020_v63, %v1411_v43 }
 0x298   : > { %v1503_v5 = vadd.f32 %v1471_v48, %v5600_v52  ;;  %v1504_v16 = vadd.f32 %v1472_v1, %v5600_v52  ;;  %v4475_v1 = vld [vmem:[%s8059_s2 + $0x20] sm:$0xf] }
 0x29a   : > { %v5849_v55 = vadd.f32 %v5019_v50, %v1503_v5  ;;  %v5021_v50 = vld [vmem:[%s5151_s15 + $0xc8] sm:$0xff] }
 0x29b   : > { %v1639_v39 = vpop.f32.mrf.mxu1 }
 0x29c   : > { %8220 = vst [vmem:[#allocation51_spill] sm:$0xff] %v5849_v55  ;;  %v1556_v38 = vpack.c.bf16 %v5849_v55, %v5846_v58  ;;  %1736 = vperm.xlu1 %4879, %v1639_v39   ;;  %v5863_v39 = vadd.f32 %v5020_v63, %v1504_v16 }
 0x29d   : > { %v5853_v30 = vpop.f32.mrf.mxu2  ;;  %v1426_v58 = vpop.permute.xlu2 %1425 }
 0x29e   : > { %8221 = vst [vmem:[#allocation52_spill] sm:$0xff] %v5853_v30  ;;  %4536 = vmatmul.msk.bf16.gmra.mxu1 %vm294_vm0, %v1556_v38 }
 0x29f   : > { %8223 = vst [vmem:[#allocation54_spill] sm:$0xff] %v5863_v39 }
 0x2a2   : > { %4453 = vmatmul.msk.bf16.vlgmr.msrb.gmra.mxu2 %vm294_vm0, %v5164_v15 }
 0x2a3   : > { %v1641_v25 = vpop.f32.mrf.mxu1 }
 0x2a4   : > { %1741 = vperm.xlu2 %4878, %v1641_v25   ;;  %v4812_v25 = vld [vmem:[%s8059_s2 + $0x28] sm:$0xf0] }
 0x2a5   : > { %v1416_v5 = vpop.permute.xlu0 %1415  ;;  %v5860_v20 = vpop.f32.mrf.mxu2 }
 0x2a6   : > { %8222 = vst [vmem:[#allocation53_spill] sm:$0xff] %v5860_v20  ;;  %v1473_v48 = vmul.f32 %v5021_v50, %v1416_v5  ;;  %v4476_v5 = vor.u32 %v4812_v25, %v4475_v1 }
 0x2a8   : > { %v1505_v38 = vadd.f32 %v1473_v48, %v5600_v52  ;;  %1067 = vmatpush.bf16.msrb.mxu0 %v4476_v5 }
 0x2aa   : > { %v5866_v30 = vadd.f32 %v5021_v50, %v1505_v38  ;;  %v5022_v50 = vld [vmem:[%s5151_s15 + $0xd0] sm:$0xff]  ;;  %v5023_v38 = vld [vmem:[%s5151_s15 + $0xd8] sm:$0xff] }
 0x2ab   : > { %v1644_v43 = vpop.f32.mrf.mxu1  ;;  %v1475_v20 = vmul.f32 %v5023_v38, %v1426_v58 }
 0x2ac   : > { %8224 = vst [vmem:[#allocation55_spill] sm:$0xff] %v5866_v30  ;;  %v1557_v15 = vpack.c.bf16 %v5866_v30, %v5863_v39  ;;  %1746 = vperm.xlu0 %4877, %v1644_v43  }
 0x2ad   : > { %v5876_v63 = vpop.f32.mrf.mxu2  ;;  %v1421_v16 = vpop.permute.xlu1 %1420  ;;  %v1507_v39 = vadd.f32 %v1475_v20, %v5600_v52  ;;  %v5024_v20 = vld [vmem:[%s5151_s15 + $0xe0] sm:$0xff] }
 0x2ae   : > { %8225 = vst [vmem:[#allocation56_spill] sm:$0xff] %v5876_v63  ;;  %4537 = vmatmul.msk.bf16.gmra.mxu1 %vm294_vm0, %v1557_v15  ;;  %v1474_v48 = vmul.f32 %v5022_v50, %v1421_v16 }
 0x2af   : > { %v5889_v15 = vadd.f32 %v5023_v38, %v1507_v39  ;;  %v5025_v38 = vld [vmem:[%s5151_s15 + $0xe8] sm:$0xff] }
 0x2b0   : > { %v1506_v30 = vadd.f32 %v1474_v48, %v5600_v52 }
 0x2b1   : > { %8228 = vst [vmem:[#allocation59_spill] sm:$0xff] %v5889_v15 }
 0x2b2   : > { %4454 = vmatmul.msk.bf16.gmra.mxu2 %vm294_vm0, %v5191_v22  ;;  %v5887_v1 = vadd.f32 %v5022_v50, %v1506_v30 }
 0x2b3   : > { %v1646_v43 = vpop.f32.mrf.mxu1 }
 0x2b4   : > { %1751 = vperm.xlu1 %4879, %v1646_v43   ;;  %8227 = vst [vmem:[#allocation58_spill] sm:$0xff] %v5887_v1  ;;  %v1558_v58 = vpack.c.bf16 %v5889_v15, %v5887_v1 }
 0x2b5   : > { %v5885_v63 = vpop.f32.mrf.mxu2 }
 0x2b6   : > { %8226 = vst [vmem:[#allocation57_spill] sm:$0xff] %v5885_v63 }
 0x2bb   : > { %v1649_v25 = vpop.f32.mrf.mxu1 }
 0x2bc   : > { %1756 = vperm.xlu2 %4878, %v1649_v25  }
 0x2bd   : > { %v5893_v16 = vpop.f32.mrf.mxu2  ;;  %v1431_v22 = vpop.permute.xlu0 %1430 }
 0x2be   : > { %8229 = vst [vmem:[#allocation60_spill] sm:$0xff] %v5893_v16  ;;  %4538 = vmatmul.msk.bf16.gmra.mxu1 %vm294_vm0, %v1558_v58  ;;  %v1476_v5 = vmul.f32 %v5024_v20, %v1431_v22 }
 0x2c0   : > { %v1508_v39 = vadd.f32 %v1476_v5, %v5600_v52  ;;  %v1441_v5 = vpop.permute.xlu2 %1440 }
 0x2c2   : > { %4455 = vmatmul.msk.bf16.gmra.mxu2 %vm294_vm0, %v5215_v28  ;;  %v5903_v25 = vadd.f32 %v5024_v20, %v1508_v39 }
 0x2c3   : > { %v1651_v30 = vpop.f32.mrf.mxu1 }
 0x2c4   : > { %1761 = vperm.xlu0 %4877, %v1651_v30   ;;  %8231 = vst [vmem:[#allocation62_spill] sm:$0xff] %v5903_v25  ;;  %v5026_v30 = vld [vmem:[%s5151_s15 + $0xf0] sm:$0xff] }
 0x2c5   : > { %v1436_v50 = vpop.permute.xlu1 %1435  ;;  %v5900_v48 = vpop.f32.mrf.mxu2 }
 0x2c6   : > { %8230 = vst [vmem:[#allocation61_spill] sm:$0xff] %v5900_v48  ;;  %v1477_v43 = vmul.f32 %v5025_v38, %v1436_v50  ;;  %v1478_v48 = vmul.f32 %v5026_v30, %v1441_v5 }
 0x2c8   : > { %v1509_v58 = vadd.f32 %v1477_v43, %v5600_v52  ;;  %v1510_v20 = vadd.f32 %v1478_v48, %v5600_v52  ;;  %v4471_v48 = vld [vmem:[%s8059_s2 + $0x8] sm:$0xf] }
 0x2ca   : > { %v5906_v16 = vadd.f32 %v5025_v38, %v1509_v58  ;;  %v5027_v38 = vld [vmem:[%s5151_s15 + $0xf8] sm:$0xff]  ;;  %v5918_v15 = vadd.f32 %v5026_v30, %v1510_v20  ;;  %v4811_v30 = vld [vmem:[%s8059_s2 + $0x10] sm:$0xf0] }
 0x2cb   : > { %v1654_v22 = vpop.f32.mrf.mxu1 }
 0x2cc   : > { %8232 = vst [vmem:[#allocation63_spill] sm:$0xff] %v5906_v16  ;;  %v1559_v28 = vpack.c.bf16 %v5906_v16, %v5903_v25  ;;  %1766 = vperm.xlu1 %4879, %v1654_v22  }
 0x2cd   : > { %v5910_v63 = vpop.f32.mrf.mxu2  ;;  %8235 = vst [vmem:[#allocation66_spill] sm:$0xff] %v5918_v15 }
 0x2ce   : > { %8233 = vst [vmem:[#allocation64_spill] sm:$0xff] %v5910_v63  ;;  %4539 = vmatmul.msk.bf16.gmra.mxu1 %vm294_vm0, %v1559_v28 }
 0x2d3   : > { %v1656_v50 = vpop.f32.mrf.mxu1 }
 0x2d4   : > { %1771 = vperm.xlu2 %4878, %v1656_v50  }
 0x2d5   : > { %v1446_v39 = vpop.permute.xlu0 %1445  ;;  %v5915_v43 = vpop.f32.mrf.mxu2 }
 0x2d6   : > { %8234 = vst [vmem:[#allocation65_spill] sm:$0xff] %v5915_v43  ;;  %v1479_v58 = vmul.f32 %v5027_v38, %v1446_v39 }
 0x2d8   : > { %v1511_v22 = vadd.f32 %v1479_v58, %v5600_v52  ;;  %v4472_v52 = vor.u32 %v4811_v30, %v4471_v48 }
 0x2da   : > { %v5921_v16 = vadd.f32 %v5027_v38, %v1511_v22  ;;  %1068 = vmatpush.bf16.msrb.mxu0 %v4472_v52 }
 0x2db   : > { %v1659_v63 = vpop.f32.mrf.mxu1 }
 0x2dc   : > { %8236 = vst [vmem:[#allocation67_spill] sm:$0xff] %v5921_v16  ;;  %v1560_v28 = vpack.c.bf16 %v5921_v16, %v5918_v15  ;;  %1776 = vperm.xlu0 %4877, %v1659_v63  }
 0x2dd   : > { %v5925_v5 = vpop.f32.mrf.mxu2 }
 0x2de   : > { %8237 = vst [vmem:[#allocation68_spill] sm:$0xff] %v5925_v5  ;;  %4540 = vmatmul.msk.bf16.gmra.mxu1 %vm294_vm0, %v1560_v28 }
 0x2e3   : > { %v1661_v50 = vpop.f32.mrf.mxu1 }
 0x2e4   : > { %1781 = vperm.xlu1 %4879, %v1661_v50  }
 0x2e5   : > { %v5934_v20 = vpop.f32.mrf.mxu2 }
 0x2e6   : > { %8238 = vst [vmem:[#allocation69_spill] sm:$0xff] %v5934_v20 }
 0x2eb   : > { %v1664_v39 = vpop.f32.mrf.mxu1 }
 0x2ec   : > { %1786 = vperm.xlu2 %4878, %v1664_v39   ;;  %v4819_v39 = vld [vmem:[%s8058_s1 + $0x3c] sm:$0xf] }
 0x2ed   : > { %v5936_v63 = vpop.f32.mrf.mxu2 }
 0x2ee   : > { %8239 = vst [vmem:[#allocation70_spill] sm:$0xff] %v5936_v63 }
 0x2f3   : > { %v1666_v38 = vpop.f32.mrf.mxu1 }
 0x2f4   : > { %1791 = vperm.xlu0 %4877, %v1666_v38   ;;  %v4553_v38 = vld [vmem:[%s8058_s1 + $0x54] sm:$0xf0] }
 0x2f5   : > { %v5938_v58 = vpop.f32.mrf.mxu2  ;;  %v4556_v15 = vor.u32 %v4819_v39, %v4553_v38 }
 0x2f6   : > { %8240 = vst [vmem:[#allocation71_spill] sm:$0xff] %v5938_v58  ;;  %v5028_v58 = vld [vmem:[%s8061_s4 + $0x1] ss:$0 sm:$0xff] }
 0x2f7   : > { %2143 = vmatpush.bf16.msra.mxu0 %v4556_v15 }
 0x2fb   : > { %v1669_v22 = vpop.f32.mrf.mxu1 }
 0x2fc   : > { %1796 = vperm.xlu1 %4879, %v1669_v22  }
 0x2fd   : > { %v5940_v28 = vpop.f32.mrf.mxu2 }
 0x2fe   : > { %8241 = vst [vmem:[#allocation72_spill] sm:$0xff] %v5940_v28 }
 0x303   : > { %v1671_v16 = vpop.f32.mrf.mxu1 }
 0x304   : > { %1801 = vperm.xlu2 %4878, %v1671_v16  }
 0x305   : > { %v5942_v48 = vpop.f32.mrf.mxu2 }
 0x306   : > { %8242 = vst [vmem:[#allocation73_spill] sm:$0xff] %v5942_v48 }
 0x30b   : > { %v1674_v30 = vpop.f32.mrf.mxu1 }
 0x30c   : > { %1806 = vperm.xlu0 %4877, %v1674_v30  }
 0x30d   : > { %v5944_v52 = vpop.f32.mrf.mxu2 }
 0x30e   : > { %8243 = vst [vmem:[#allocation74_spill] sm:$0xff] %v5944_v52 }
 0x313   : > { %v1676_v50 = vpop.f32.mrf.mxu1 }
 0x314   : > { %1811 = vperm.xlu1 %4879, %v1676_v50  }
 0x315   : > { %v5952_v22 = vpop.f32.mrf.mxu2 }
 0x316   : > { %8244 = vst [vmem:[#allocation75_spill] sm:$0xff] %v5952_v22 }
 0x31b   : > { %v1679_v16 = vpop.f32.mrf.mxu1 }
 0x31c   : > { %1816 = vperm.xlu2 %4878, %v1679_v16  }
 0x31d   : > { %v5954_v48 = vpop.f32.mrf.mxu2 }
 0x31e   : > { %8245 = vst [vmem:[#allocation76_spill] sm:$0xff] %v5954_v48 }
 0x323   : > { %v1681_v30 = vpop.f32.mrf.mxu1 }
 0x324   : > { %1821 = vperm.xlu0 %4877, %v1681_v30  }
 0x325   : > { %v852_v52 = vpop.f32.mrf.mxu2 }
 0x326   : > { %v853_v63 = vadd.f32 %v5028_v58, %v852_v52 }
 0x328   : > { %v932_v5 = vmax.f32 %v853_v63, 0.0 }
 0x32b   : > { %v1684_v28 = vpop.f32.mrf.mxu1 }
 0x32c   : > { %1826 = vperm.xlu1 %4879, %v1684_v28  }
 0x32d   : > { %v854_v20 = vpop.f32.mrf.mxu2 }
 0x32e   : > { %v855_v50 = vadd.f32 %v5028_v58, %v854_v20 }
 0x330   : > { %v933_v22 = vmax.f32 %v855_v50, 0.0 }
 0x332   : > { %v964_v39 = vpack.c.bf16 %v933_v22, %v932_v5 }
 0x333   : > { %v1686_v15 = vpop.f32.mrf.mxu1 }
 0x334   : > { %4485 = vmatmul.msk.bf16.vlgmr.msrb.gmra.mxu0 %vm535_vm1, %v964_v39  ;;  %1831 = vperm.xlu2 %4878, %v1686_v15  }
 0x335   : > { %v857_v38 = vpop.f32.mrf.mxu2 }
 0x336   : > { %v858_v30 = vadd.f32 %v5028_v58, %v857_v38 }
 0x338   : > { %v934_v25 = vmax.f32 %v858_v30, 0.0  ;;  %v4543_v30 = vld [vmem:[%s8058_s1] sm:$0xf] }
 0x33b   : > { %v1689_v16 = vpop.f32.mrf.mxu1 }
 0x33c   : > { %1836 = vperm.xlu0 %4877, %v1689_v16  }
 0x33d   : > { %v859_v48 = vpop.f32.mrf.mxu2 }
 0x33e   : > { %v860_v43 = vadd.f32 %v5028_v58, %v859_v48 }
 0x340   : > { %v935_v1 = vmax.f32 %v860_v43, 0.0 }
 0x342   : > { %v965_v23 = vpack.c.bf16 %v935_v1, %v934_v25  ;;  %v4545_v25 = vld [vmem:[%s8058_s1 + $0x1c] sm:$0xf0] }
 0x343   : > { %v1691_v52 = vpop.f32.mrf.mxu1 }
 0x344   : > { %4486 = vmatmul.msk.bf16.gmra.mxu0 %vm535_vm1, %v965_v23  ;;  %1841 = vperm.xlu1 %4879, %v1691_v52   ;;  %v4817_v23 = vld [vmem:[%s8058_s1 + $0x4] sm:$0xf]  ;;  %v4818_v52 = vld [vmem:[%s8058_s1 + $0x18] sm:$0xf0] }
 0x345   : > { %v862_v20 = vpop.f32.mrf.mxu2  ;;  %v4548_v43 = vor.u32 %v4817_v23, %v4545_v25  ;;  %v6016_v23 = vpop.permute.xlu2 %1711 }
 0x346   : > { %v863_v5 = vadd.f32 %v5028_v58, %v862_v20  ;;  %v4544_v20 = vor.u32 %v4818_v52, %v4543_v30 }
 0x347   : > { %2144 = vmatpush.bf16.msra.mxu0 %v4548_v43 }
 0x348   : > { %v936_v50 = vmax.f32 %v863_v5, 0.0  ;;  %v4836_v5 = vld [vmem:[%s8060_s3 + $0xf4] sm:$0xf0] }
 0x34b   : > { %v1694_v63 = vpop.f32.mrf.mxu1 }
 0x34c   : > { %1846 = vperm.xlu2 %4878, %v1694_v63   ;;  %v4651_v63 = vld [vmem:[%s8060_s3 + $0xf0] sm:$0xf] }
 0x34d   : > { %v864_v28 = vpop.f32.mrf.mxu2 }
 0x34e   : > { %v865_v22 = vadd.f32 %v5028_v58, %v864_v28  ;;  %v4820_v58 = vld [vmem:[%s8058_s1 + $0x50] sm:$0xf0]  ;;  %v4652_v28 = vor.u32 %v4836_v5, %v4651_v63  ;;  %v8247_v63 = vld [vmem:[#allocation3_spill] sm:$0xff]  ;;  %v6036_v5 = vpop.permute.xlu1 %1706 }
 0x350   : > { %v937_v39 = vmax.f32 %v865_v22, 0.0  ;;  %2540 = vmatpush.bf16.msra.mxu1 %v4652_v28  ;;  %v6005_v22 = vld [vmem:[%s8061_s4 + $0x3] ss:$0 sm:$0xff] }
 0x352   : > { %v966_v15 = vpack.c.bf16 %v937_v39, %v936_v50 }
 0x353   : > { %v1696_v38 = vpop.f32.mrf.mxu1 }
 0x354   : > { %1851 = vperm.xlu0 %4877, %v1696_v38   ;;  %4487 = vmatmul.msk.bf16.gmra.mxu0 %vm535_vm1, %v966_v15  ;;  %v8246_v38 = vld [vmem:[#allocation2_spill] sm:$0xff] }
 0x355   : > { %8248 = vst [vmem:[#allocation2_spill] sm:$0xff] %v6036_v5 }
 0x35b   : > { %v1699_v48 = vpop.f32.mrf.mxu1 }
 0x35c   : > { %1856 = vperm.xlu1 %4879, %v1699_v48   ;;  %v4615_v48 = vld [vmem:[%s8060_s3 + $0x60] sm:$0xf] }
 0x363   : > { %v1701_v1 = vpop.f32.mrf.mxu1 }
 0x364   : > { %1861 = vperm.xlu2 %4878, %v1701_v1   ;;  %4488 = vmatmul.msk.bf16.gmra.mxu0 %vm535_vm1, %v5334_v46  ;;  %v4619_v46 = vld [vmem:[%s8060_s3 + $0x70] sm:$0xf] }
 0x374   : > { %4489 = vmatmul.msk.bf16.gmra.mxu0 %vm535_vm1, %v5354_v3  ;;  %v4828_v3 = vld [vmem:[%s8060_s3 + $0x74] sm:$0xf0] }
 0x384   : > { %4490 = vmatmul.msk.bf16.gmra.mxu0 %vm535_vm1, %v5382_v53  ;;  %v4620_v53 = vor.u32 %v4828_v3, %v4619_v46 }
 0x386   : > { %2451 = vmatpush.bf16.msra.mxu3 %v4620_v53  ;;  %v4647_v53 = vld [vmem:[%s8060_s3 + $0xe0] sm:$0xf] }
 0x394   : > { %4491 = vmatmul.msk.bf16.gmra.mxu0 %vm535_vm1, %v5396_v34  ;;  %v4551_v34 = vld [vmem:[%s8058_s1 + $0x38] sm:$0xf] }
 0x395   : > { %v4552_v16 = vor.u32 %v4820_v58, %v4551_v34  ;;  %v4835_v34 = vld [vmem:[%s8060_s3 + $0xe4] sm:$0xf0] }
 0x396   : > { %v4648_v58 = vor.u32 %v4835_v34, %v4647_v53  ;;  %v4611_v53 = vld [vmem:[%s8060_s3 + $0x50] sm:$0xf]  ;;  %v4826_v34 = vld [vmem:[%s8060_s3 + $0x54] sm:$0xf0] }
 0x397   : > { %2054 = vmatpush.bf16.msra.mxu2 %v4552_v16  ;;  %v6029_v16 = vpop.permute.xlu2 %1726 }
 0x398   : > { %2541 = vmatpush.bf16.msra.mxu1 %v4648_v58  ;;  %v4612_v58 = vor.u32 %v4826_v34, %v4611_v53 }
 0x39b   : > { %2055 = vmatpush.bf16.msra.mxu2 %v4544_v20 }
 0x3a4   : > { %4492 = vmatmul.msk.bf16.gmra.mxu0 %vm535_vm1, %v5408_v61  ;;  %v4827_v61 = vld [vmem:[%s8060_s3 + $0x64] sm:$0xf0] }
 0x3a5   : > { %v4616_v1 = vor.u32 %v4827_v61, %v4615_v48  ;;  %v6045_v48 = vpop.permute.xlu1 %1721 }
 0x3a7   : > { %2452 = vmatpush.bf16.msra.mxu3 %v4616_v1 }
 0x3ab   : > { %2453 = vmatpush.bf16.msra.mxu3 %v4612_v58 }
 0x3b1   : > { %v1070_v50 = vpop.f32.mrf.mxu0 }
 0x3b2   : > { %v1071_v39 = vadd.f32 %v1070_v50, %v6005_v22  ;;  %v6039_v50 = vpop.permute.xlu2 %1741 }
 0x3b4   : > { %v1150_v15 = vmax.f32 %v1071_v39, 0.0  ;;  %4493 = vmatmul.msk.bf16.gmra.mxu0 %vm535_vm1, %v8246_v38 }
 0x3b6   : > { %3938 = vrot.lane.b32.xlu0 %v1150_v15, %s5073_s28 }
 0x3b9   : > { %v1072_v25 = vpop.f32.mrf.mxu0 }
 0x3ba   : > { %v1073_v46 = vadd.f32 %v1072_v25, %v6005_v22  ;;  %v6050_v25 = vpop.permute.xlu2 %1756 }
 0x3bc   : > { %v1151_v43 = vmax.f32 %v1073_v46, 0.0 }
 0x3be   : > { %v6020_v3 = vpack.c.bf16 %v1151_v43, %v1150_v15  ;;  %3940 = vrot.lane.b32.xlu1 %v1151_v43, %s5073_s28  ;;  %v8249_v43 = vld [vmem:[#allocation4_spill] sm:$0xff] }
 0x3c0   : > { %4557 = vmatmul.msk.bf16.vlgmr.msra.gmra.mxu2 %vm294_vm0, %v6020_v3 }
 0x3c1   : > { %v1075_v30 = vpop.f32.mrf.mxu0 }
 0x3c2   : > { %v1076_v52 = vadd.f32 %v1075_v30, %v6005_v22  ;;  %v6061_v30 = vpop.permute.xlu0 %1716 }
 0x3c4   : > { %v1152_v20 = vmax.f32 %v1076_v52, 0.0  ;;  %4494 = vmatmul.msk.bf16.gmra.mxu0 %vm535_vm1, %v8247_v63 }
 0x3c6   : > { %3942 = vrot.lane.b32.xlu2 %v1152_v20, %s5073_s28 }
 0x3c9   : > { %v1077_v28 = vpop.f32.mrf.mxu0 }
 0x3ca   : > { %v1078_v39 = vadd.f32 %v1077_v28, %v6005_v22  ;;  %v6079_v34 = vpop.permute.xlu0 %1731 }
 0x3cc   : > { %v1153_v15 = vmax.f32 %v1078_v39, 0.0  ;;  %v6066_v39 = vpop.permute.xlu2 %1771 }
 0x3ce   : > { %v6042_v38 = vpack.c.bf16 %v1153_v15, %v1152_v20  ;;  %3944 = vrot.lane.b32.xlu0 %v1153_v15, %s5073_s28  ;;  %v6063_v20 = vpop.permute.xlu1 %1736 }
 0x3d0   : > { %4558 = vmatmul.msk.bf16.gmra.mxu2 %vm294_vm0, %v6042_v38 }
 0x3d1   : > { %v1080_v61 = vpop.f32.mrf.mxu0 }
 0x3d2   : > { %v1081_v1 = vadd.f32 %v1080_v61, %v6005_v22  ;;  %v4643_v61 = vld [vmem:[%s8060_s3 + $0xd0] sm:$0xf]  ;;  %v6090_v5 = vpop.permute.xlu0 %1746 }
 0x3d4   : > { %v1154_v46 = vmax.f32 %v1081_v1, 0.0  ;;  %4495 = vmatmul.msk.bf16.gmra.mxu0 %vm535_vm1, %v8249_v43  ;;  %v4834_v1 = vld [vmem:[%s8060_s3 + $0xd4] sm:$0xf0] }
 0x3d5   : > { %v4644_v43 = vor.u32 %v4834_v1, %v4643_v61 }
 0x3d6   : > { %3946 = vrot.lane.b32.xlu1 %v1154_v46, %s5073_s28  ;;  %v6082_v58 = vpop.permute.xlu1 %1751 }
 0x3d7   : > { %2542 = vmatpush.bf16.msra.mxu1 %v4644_v43 }
 0x3d9   : > { %v1082_v52 = vpop.f32.mrf.mxu0 }
 0x3da   : > { %v1083_v63 = vadd.f32 %v1082_v52, %v6005_v22 }
 0x3dc   : > { %v1155_v28 = vmax.f32 %v1083_v63, 0.0  ;;  %v8250_v63 = vld [vmem:[#allocation5_spill] sm:$0xff] }
 0x3de   : > { %v6068_v15 = vpack.c.bf16 %v1155_v28, %v1154_v46  ;;  %3948 = vrot.lane.b32.xlu2 %v1155_v28, %s5073_s28  ;;  %v6087_v28 = vpop.permute.xlu2 %1786  ;;  %v6092_v55 = vpop.permute.xlu1 %1766 }
 0x3e0   : > { %4559 = vmatmul.msk.bf16.gmra.mxu2 %vm294_vm0, %v6068_v15 }
 0x3e1   : > { %v1085_v53 = vpop.f32.mrf.mxu0 }
 0x3e2   : > { %v1086_v46 = vadd.f32 %v1085_v53, %v6005_v22 }
 0x3e4   : > { %v1156_v52 = vmax.f32 %v1086_v46, 0.0  ;;  %4496 = vmatmul.msk.bf16.gmra.mxu0 %vm535_vm1, %v8250_v63 }
 0x3e6   : > { %3950 = vrot.lane.b32.xlu0 %v1156_v52, %s5073_s28  ;;  %v6099_v46 = vpop.permute.xlu2 %1801 }
 0x3e7   : > { %8251 = vst [vmem:[#allocation3_spill] sm:$0xff] %v6099_v46  ;;  %v6113_v46 = vpop.permute.xlu1 %1781 }
 0x3e9   : > { %v1087_v61 = vpop.f32.mrf.mxu0 }
 0x3ea   : > { %v1088_v1 = vadd.f32 %v1087_v61, %v6005_v22  ;;  %v4607_v61 = vld [vmem:[%s8060_s3 + $0x40] sm:$0xf] }
 0x3ec   : > { %v1157_v43 = vmax.f32 %v1088_v1, 0.0 }
 0x3ee   : > { %v6094_v42 = vpack.c.bf16 %v1157_v43, %v1156_v52  ;;  %3952 = vrot.lane.b32.xlu1 %v1157_v43, %s5073_s28  ;;  %v4825_v52 = vld [vmem:[%s8060_s3 + $0x44] sm:$0xf0]  ;;  %v6110_v43 = vpop.permute.xlu0 %1761 }
 0x3ef   : > { %v4608_v1 = vor.u32 %v4825_v52, %v4607_v61  ;;  %v4639_v61 = vld [vmem:[%s8060_s3 + $0xc0] sm:$0xf]  ;;  %v4833_v52 = vld [vmem:[%s8060_s3 + $0xc4] sm:$0xf0] }
 0x3f0   : > { %4560 = vmatmul.msk.bf16.gmra.mxu2 %vm294_vm0, %v6094_v42 }
 0x3f1   : > { %v1090_v53 = vpop.f32.mrf.mxu0  ;;  %2454 = vmatpush.bf16.msra.mxu3 %v4608_v1  ;;  %v4640_v1 = vor.u32 %v4833_v52, %v4639_v61 }
 0x3f2   : > { %v1091_v63 = vadd.f32 %v1090_v53, %v6005_v22 }
 0x3f3   : > { %2543 = vmatpush.bf16.msra.mxu1 %v4640_v1 }
 0x3f4   : > { %v1158_v21 = vmax.f32 %v1091_v63, 0.0  ;;  %4497 = vmatmul.msk.bf16.gmra.mxu0 %vm535_vm1, %v8252_v19  ;;  %v6116_v19 = vpop.permute.xlu2 %1816 }
 0x3f5   : > { %8253 = vst [vmem:[#allocation4_spill] sm:$0xff] %v6116_v19  ;;  %v8255_v19 = vld [vmem:[#allocation7_spill] sm:$0xff] }
 0x3f6   : > { %3954 = vrot.lane.b32.xlu2 %v1158_v21, %s5073_s28  ;;  %v6127_v13 = vpop.permute.xlu0 %1776 }
 0x3f9   : > { %v1092_v53 = vpop.f32.mrf.mxu0 }
 0x3fa   : > { %v1093_v63 = vadd.f32 %v1092_v53, %v6005_v22 }
 0x3fc   : > { %v1159_v41 = vmax.f32 %v1093_v63, 0.0  ;;  %v6136_v18 = vpop.permute.xlu2 %1831 }
 0x3fd   : > { %8256 = vst [vmem:[#allocation6_spill] sm:$0xff] %v6136_v18 }
 0x3fe   : > { %v6118_v49 = vpack.c.bf16 %v1159_v41, %v1158_v21  ;;  %3956 = vrot.lane.b32.xlu0 %v1159_v41, %s5073_s28  ;;  %v6131_v21 = vpop.permute.xlu1 %1796  ;;  %v6139_v52 = vpop.permute.xlu0 %1791 }
 0x3ff   : > { %8254 = vst [vmem:[#allocation5_spill] sm:$0xff] %v6131_v21 }
 0x400   : > { %4561 = vmatmul.msk.bf16.gmra.mxu2 %vm294_vm0, %v6118_v49 }
 0x401   : > { %v1095_v53 = vpop.f32.mrf.mxu0 }
 0x402   : > { %v1096_v41 = vadd.f32 %v1095_v53, %v6005_v22 }
 0x404   : > { %v1160_v63 = vmax.f32 %v1096_v41, 0.0  ;;  %4498 = vmatmul.msk.bf16.gmra.mxu0 %vm535_vm1, %v8255_v19  ;;  %v6147_v53 = vpop.permute.xlu2 %1846 }
 0x405   : > { %8258 = vst [vmem:[#allocation77_spill] sm:$0xff] %v6147_v53 }
 0x406   : > { %3958 = vrot.lane.b32.xlu1 %v1160_v63, %s5073_s28  ;;  %v6142_v40 = vpop.permute.xlu1 %1811  ;;  %v6152_v18 = vpop.permute.xlu0 %1806 }
 0x407   : > { %8257 = vst [vmem:[#allocation7_spill] sm:$0xff] %v6142_v40 }
 0x408   : > { %8259 = vst [vmem:[#allocation78_spill] sm:$0xff] %v6152_v18 }
 0x409   : > { %v1097_v61 = vpop.f32.mrf.mxu0 }
 0x40a   : > { %v1098_v57 = vadd.f32 %v1097_v61, %v6005_v22 }
 0x40c   : > { %v1161_v1 = vmax.f32 %v1098_v57, 0.0  ;;  %v4603_v57 = vld [vmem:[%s8060_s3 + $0x30] sm:$0xf] }
 0x40e   : > { %v6144_v21 = vpack.c.bf16 %v1161_v1, %v1160_v63  ;;  %3960 = vrot.lane.b32.xlu2 %v1161_v1, %s5073_s28  ;;  %v4824_v63 = vld [vmem:[%s8060_s3 + $0x34] sm:$0xf0]  ;;  %v6162_v1 = vpop.permute.xlu1 %1826 }
 0x40f   : > { %v4604_v61 = vor.u32 %v4824_v63, %v4603_v57  ;;  %8260 = vst [vmem:[#allocation79_spill] sm:$0xff] %v6162_v1  ;;  %v6176_v1 = vpop.permute.xlu0 %1821 }
 0x410   : > { %4562 = vmatmul.msk.bf16.gmra.mxu2 %vm294_vm0, %v6144_v21  ;;  %8262 = vst [vmem:[#allocation81_spill] sm:$0xff] %v6176_v1  ;;  %v4599_v1 = vld [vmem:[%s8060_s3 + $0x20] sm:$0xf] }
 0x411   : > { %v1100_v19 = vpop.f32.mrf.mxu0  ;;  %2455 = vmatpush.bf16.msra.mxu3 %v4604_v61  ;;  %v4832_v61 = vld [vmem:[%s8060_s3 + $0xb4] sm:$0xf0] }
 0x412   : > { %v1101_v41 = vadd.f32 %v1100_v19, %v6005_v22  ;;  %v5029_v19 = vld [vmem:[%s5151_s15 + $0x10] sm:$0xff] }
 0x413   : > { %v1866_v53 = vmul.f32 %v5029_v19, %v6061_v30  ;;  %v4635_v30 = vld [vmem:[%s8060_s3 + $0xb0] sm:$0xf] }
 0x414   : > { %v1162_v37 = vmax.f32 %v1101_v41, 0.0  ;;  %4499 = vmatmul.msk.bf16.gmra.mxu0 %vm535_vm1, %v5504_v32  ;;  %v6170_v32 = vld [vmem:[%s8061_s4 + $0x7] ss:$0 sm:$0xff]  ;;  %v6172_v41 = vpop.permute.xlu2 %1861 }
 0x415   : > { %8261 = vst [vmem:[#allocation80_spill] sm:$0xff] %v6172_v41  ;;  %v1898_v57 = vadd.f32 %v1866_v53, %v6170_v32 }
 0x416   : > { %3962 = vrot.lane.b32.xlu0 %v1162_v37, %s5073_s28  ;;  %v6188_v53 = vpop.permute.xlu1 %1841 }
 0x417   : > { %v1930_v19 = vadd.f32 %v1898_v57, %v5633_v2  ;;  %8263 = vst [vmem:[#allocation82_spill] sm:$0xff] %v6188_v53  ;;  %v4823_v2 = vld [vmem:[%s8060_s3 + $0x24] sm:$0xf0] }
 0x419   : > { %v1102_v40 = vpop.f32.mrf.mxu0 }
 0x41a   : > { %v1103_v18 = vadd.f32 %v1102_v40, %v6005_v22  ;;  %v4636_v40 = vor.u32 %v4832_v61, %v4635_v30  ;;  %v4600_v30 = vor.u32 %v4823_v2, %v4599_v1  ;;  %v5030_v61 = vld [vmem:[%s5151_s15 + $0x8] sm:$0xff] }
 0x41c   : > { %v1163_v63 = vmax.f32 %v1103_v18, 0.0  ;;  %2544 = vmatpush.bf16.msra.mxu1 %v4636_v40  ;;  %2456 = vmatpush.bf16.msra.mxu3 %v4600_v30  ;;  %v4595_v40 = vld [vmem:[%s8060_s3 + $0x10] sm:$0xf]  ;;  %v4591_v30 = vld [vmem:[%s8060_s3] sm:$0xf] }
 0x41e   : > { %v6178_v26 = vpack.c.bf16 %v1163_v63, %v1162_v37  ;;  %3964 = vrot.lane.b32.xlu1 %v1163_v63, %s5073_s28 }
 0x420   : > { %4563 = vmatmul.msk.bf16.gmra.mxu2 %vm294_vm0, %v6178_v26  ;;  %v3943_v37 = vpop.permute.xlu2 %3942 }
 0x421   : > { %v6193_v18 = vsel %vm294_vm0, %v1930_v19, %v3943_v37  ;;  %v1105_v63 = vpop.f32.mrf.mxu0  ;;  %v1865_v19 = vmul.f32 %v5030_v61, %v6016_v23  ;;  %v4822_v37 = vld [vmem:[%s8060_s3 + $0x14] sm:$0xf0]  ;;  %v4821_v61 = vld [vmem:[%s8060_s3 + $0x4] sm:$0xf0] }
 0x422   : > { %8264 = vst [vmem:[#allocation83_spill] sm:$0xff] %v6193_v18  ;;  %v1106_v41 = vadd.f32 %v1105_v63, %v6005_v22  ;;  %v6215_v63 = vpop.permute.xlu1 %1856  ;;  %v4592_v53 = vor.u32 %v4821_v61, %v4591_v30 }
 0x423   : > { %8266 = vst [vmem:[#allocation85_spill] sm:$0xff] %v6215_v63  ;;  %v1897_v23 = vadd.f32 %v1865_v19, %v6170_v32 }
 0x424   : > { %v1164_v57 = vmax.f32 %v1106_v41, 0.0  ;;  %4500 = vmatmul.msk.bf16.gmra.mxu0 %vm535_vm1, %v5522_v33  ;;  %v6213_v41 = vpop.permute.xlu0 %1836  ;;  %v4596_v33 = vor.u32 %v4822_v37, %v4595_v40  ;;  %v5031_v37 = vld [vmem:[%s5151_s15 + $0x28] sm:$0xff] }
 0x425   : > { %8265 = vst [vmem:[#allocation84_spill] sm:$0xff] %v6213_v41  ;;  %v1929_v40 = vadd.f32 %v1897_v23, %v5615_v9  ;;  %v1869_v19 = vmul.f32 %v5031_v37, %v6079_v34  ;;  %v5032_v34 = vld [vmem:[%s5151_s15 + $0x18] sm:$0xff] }
 0x426   : > { %3966 = vrot.lane.b32.xlu2 %v1164_v57, %s5073_s28  ;;  %2457 = vmatpush.bf16.msra.mxu3 %v4596_v33  ;;  %v1867_v23 = vmul.f32 %v5032_v34, %v6045_v48  ;;  %v4831_v48 = vld [vmem:[%s8060_s3 + $0xa4] sm:$0xf0] }
 0x429   : > { %v1107_v1 = vpop.f32.mrf.mxu0 }
 0x42a   : > { %v1108_v2 = vadd.f32 %v1107_v1, %v6005_v22  ;;  %2458 = vmatpush.bf16.msra.mxu3 %v4592_v53 }
 0x42c   : > { %v1165_v18 = vmax.f32 %v1108_v2, 0.0  ;;  %v6231_v33 = vpop.permute.xlu0 %1851 }
 0x42d   : > { %8267 = vst [vmem:[#allocation86_spill] sm:$0xff] %v6231_v33 }
 0x42e   : > { %v6225_v41 = vpack.c.bf16 %v1165_v18, %v1164_v57  ;;  %3968 = vrot.lane.b32.xlu0 %v1165_v18, %s5073_s28  ;;  %v1901_v18 = vadd.f32 %v1869_v19, %v6170_v32 }
 0x430   : > { %4564 = vmatmul.msk.bf16.gmra.mxu2 %vm294_vm0, %v6225_v41  ;;  %v3941_v1 = vpop.permute.xlu1 %3940  ;;  %v1933_v9 = vadd.f32 %v1901_v18, %v5659_v31  ;;  %v4631_v31 = vld [vmem:[%s8060_s3 + $0xa0] sm:$0xf] }
 0x431   : > { %v6236_v2 = vsel %vm294_vm0, %v1929_v40, %v3941_v1  ;;  %v1110_v57 = vpop.f32.mrf.mxu0  ;;  %v6265_v18 = vld [vmem:[%s8061_s4 + $0x2] ss:$8 sm:$0x3] }
 0x432   : > { %8268 = vst [vmem:[#allocation87_spill] sm:$0xff] %v6236_v2  ;;  %v1111_v30 = vadd.f32 %v1110_v57, %v6005_v22  ;;  %v1899_v57 = vadd.f32 %v1867_v23, %v6170_v32  ;;  %v4632_v23 = vor.u32 %v4831_v48, %v4631_v31  ;;  %v4840_v31 = vld [vmem:[%s8058_s1 + $0x58] sm:$0xf0] }
 0x434   : > { %v1166_v53 = vmax.f32 %v1111_v30, 0.0  ;;  %4573 = vmatmul.msk.bf16.vlgmr.msra.gmra.mxu0 %vm294_vm0, %v6020_v3  ;;  %v6246_v61 = vpop.permute.xlu0 %3938  ;;  %2545 = vmatpush.bf16.msra.mxu1 %v4632_v23 }
 0x435   : > { %8269 = vst [vmem:[#allocation88_spill] sm:$0xff] %v6246_v61 }
 0x436   : > { %3970 = vrot.lane.b32.xlu1 %v1166_v53, %s5073_s28 }
 0x438   : > { %v3949_v40 = vpop.permute.xlu2 %3948 }
 0x439   : > { %v6249_v37 = vsel %vm294_vm0, %v1933_v9, %v3949_v40  ;;  %v1112_v1 = vpop.f32.mrf.mxu0  ;;  %v5033_v9 = vld [vmem:[%s5151_s15 + $0x20] sm:$0xff] }
 0x43a   : > { %8270 = vst [vmem:[#allocation89_spill] sm:$0xff] %v6249_v37  ;;  %v1113_v19 = vadd.f32 %v1112_v1, %v6005_v22  ;;  %v1868_v34 = vmul.f32 %v5033_v9, %v6029_v16 }
 0x43c   : > { %v1167_v3 = vmax.f32 %v1113_v19, 0.0  ;;  %v1900_v16 = vadd.f32 %v1868_v34, %v6170_v32 }
 0x43e   : > { %v6253_v30 = vpack.c.bf16 %v1167_v3, %v1166_v53  ;;  %3972 = vrot.lane.b32.xlu2 %v1167_v3, %s5073_s28  ;;  %v1931_v53 = vadd.f32 %v1899_v57, %v5636_v4  ;;  %v6276_v3 = vperm.slane %v6265_v18, 0  ;;  %v4695_v57 = vld [vmem:[%s8058_s1 + $0x40] sm:$0xf] }
 0x43f   : > { %v4696_v48 = vor.u32 %v4840_v31, %v4695_v57 }
 0x440   : > { %4565 = vmatmul.msk.bf16.gmra.mxu2 %vm294_vm0, %v6253_v30  ;;  %v3945_v40 = vpop.permute.xlu0 %3944  ;;  %v6294_v34 = vadd.f32 %v5550_v7, %v6276_v3 }
 0x441   : > { %v6273_v1 = vsel %vm294_vm0, %v1931_v53, %v3945_v40  ;;  %v1115_v19 = vpop.f32.mrf.mxu0  ;;  %v6290_v53 = vadd.f32 %v5544_v62, %v6276_v3  ;;  %3331 = vmatpush.bf16.msrb.mxu2 %v4696_v48 }
 0x442   : > { %8271 = vst [vmem:[#allocation90_spill] sm:$0xff] %v6273_v1  ;;  %v1116_v33 = vadd.f32 %v1115_v19, %v6005_v22  ;;  %v8092_v31 = vmax.f32 %v6294_v34, 0.0 }
 0x443   : > { %v2057_v9 = vpop.f32.mrf.mxu2  ;;  %v8093_v62 = vmax.f32 %v6290_v53, 0.0 }
 0x444   : > { %v1168_v4 = vmax.f32 %v1116_v33, 0.0  ;;  %4574 = vmatmul.msk.bf16.gmra.mxu0 %vm294_vm0, %v6042_v38  ;;  %v1932_v38 = vadd.f32 %v1900_v16, %v5655_v8  ;;  %v5034_v33 = vld [vmem:[%s5151_s15 + $0x40] sm:$0xff] }
 0x445   : > { %v1872_v23 = vmul.f32 %v5034_v33, %v6090_v5  ;;  %v2226_v8 = vmul.f32 %v2057_v9, %v8093_v62 }
 0x446   : > { %3974 = vrot.lane.b32.xlu0 %v1168_v4, %s5073_s28 }
 0x447   : > { %v1904_v63 = vadd.f32 %v1872_v23, %v6170_v32 }
 0x448   : > { %v3947_v40 = vpop.permute.xlu1 %3946 }
 0x449   : > { %v6301_v19 = vsel %vm294_vm0, %v1932_v38, %v3947_v40  ;;  %v1117_v57 = vpop.f32.mrf.mxu0  ;;  %v1936_v33 = vadd.f32 %v1904_v63, %v5700_v24  ;;  %v5035_v40 = vld [vmem:[%s5151_s15 + $0x30] sm:$0xff]  ;;  %v4839_v24 = vld [vmem:[%s8058_s1 + $0x44] sm:$0xf] }
 0x44a   : > { %8272 = vst [vmem:[#allocation91_spill] sm:$0xff] %v6301_v19  ;;  %v1118_v7 = vadd.f32 %v1117_v57, %v6005_v22  ;;  %v1870_v57 = vmul.f32 %v5035_v40, %v6063_v20  ;;  %v4697_v20 = vld [vmem:[%s8058_s1 + $0x5c] sm:$0xf0] }
 0x44b   : > { %v2059_v37 = vpop.f32.mrf.mxu2  ;;  %v4700_v63 = vor.u32 %v4839_v24, %v4697_v20 }
 0x44c   : > { %v1169_v5 = vmax.f32 %v1118_v7, 0.0  ;;  %v2228_v16 = vmul.f32 %v2059_v37, %v8092_v31  ;;  %v1902_v7 = vadd.f32 %v1870_v57, %v6170_v32  ;;  %v8300_v31 = vld [vmem:[#allocation43_spill] sm:$0xff] }
 0x44d   : > { %3420 = vmatpush.bf16.msrb.mxu0 %v4700_v63 }
 0x44e   : > { %v6311_v48 = vpack.c.bf16 %v1169_v5, %v1168_v4  ;;  %v2290_v38 = vpack.c.bf16 %v2228_v16, %v2226_v8  ;;  %3976 = vrot.lane.b32.xlu1 %v1169_v5, %s5073_s28  ;;  %v6334_v16 = vadd.f32 %v5556_v29, %v6276_v3  ;;  %v1934_v40 = vadd.f32 %v1902_v7, %v5676_v0 }
 0x450   : > { %4566 = vmatmul.msk.bf16.gmra.mxu2 %vm294_vm0, %v6311_v48  ;;  %v3955_v23 = vpop.permute.xlu2 %3954  ;;  %2459 = vmatmul.bf16.vlgmr.msra.gmra.mxu3 %v2290_v38  ;;  %v6338_v38 = vadd.f32 %v5564_v56, %v6276_v3  ;;  %v8091_v29 = vmax.f32 %v6334_v16, 0.0 }
 0x451   : > { %v6320_v9 = vsel %vm294_vm0, %v1936_v33, %v3955_v23  ;;  %v1120_v37 = vpop.f32.mrf.mxu0 }
 0x452   : > { %8273 = vst [vmem:[#allocation92_spill] sm:$0xff] %v6320_v9  ;;  %v1121_v4 = vadd.f32 %v1120_v37, %v6005_v22 }
 0x453   : > { %v2062_v8 = vpop.f32.mrf.mxu2 }
 0x454   : > { %v1170_v5 = vmax.f32 %v1121_v4, 0.0  ;;  %4575 = vmatmul.msk.bf16.gmra.mxu0 %vm294_vm0, %v6068_v15  ;;  %v5036_v15 = vld [vmem:[%s5151_s15 + $0x38] sm:$0xff]  ;;  %v8090_v4 = vmax.f32 %v6338_v38, 0.0 }
 0x455   : > { %v1871_v33 = vmul.f32 %v5036_v15, %v6039_v50  ;;  %v2230_v50 = vmul.f32 %v2062_v8, %v8091_v29  ;;  %v5037_v8 = vld [vmem:[%s5151_s15 + $0x58] sm:$0xff] }
 0x456   : > { %3978 = vrot.lane.b32.xlu2 %v1170_v5, %s5073_s28 }
 0x457   : > { %v1903_v24 = vadd.f32 %v1871_v33, %v6170_v32  ;;  %v4830_v33 = vld [vmem:[%s8060_s3 + $0x94] sm:$0xf0] }
 0x458   : > { %v3951_v57 = vpop.permute.xlu0 %3950 }
 0x459   : > { %v6345_v23 = vsel %vm294_vm0, %v1934_v40, %v3951_v57  ;;  %v1122_v37 = vpop.f32.mrf.mxu0  ;;  %v4627_v40 = vld [vmem:[%s8060_s3 + $0x90] sm:$0xf]  ;;  %v1935_v57 = vadd.f32 %v1903_v24, %v5680_v51 }
 0x45a   : > { %8274 = vst [vmem:[#allocation93_spill] sm:$0xff] %v6345_v23  ;;  %v1123_v56 = vadd.f32 %v1122_v37, %v6005_v22  ;;  %v1875_v37 = vmul.f32 %v5037_v8, %v6110_v43  ;;  %v6378_v43 = vadd.f32 %v5568_v35, %v6276_v3 }
 0x45b   : > { %v2064_v20 = vpop.f32.mrf.mxu2 }
 0x45c   : > { %v1171_v0 = vmax.f32 %v1123_v56, 0.0  ;;  %v2232_v7 = vmul.f32 %v2064_v20, %v8090_v4  ;;  %v4628_v56 = vor.u32 %v4830_v33, %v4627_v40  ;;  %v5038_v33 = vld [vmem:[%s5151_s15 + $0x48] sm:$0xff]  ;;  %v8089_v35 = vmax.f32 %v6378_v43, 0.0 }
 0x45e   : > { %v6355_v63 = vpack.c.bf16 %v1171_v0, %v1170_v5  ;;  %v2292_v15 = vpack.c.bf16 %v2232_v7, %v2230_v50  ;;  %3980 = vrot.lane.b32.xlu0 %v1171_v0, %s5073_s28  ;;  %2546 = vmatpush.bf16.msra.mxu1 %v4628_v56  ;;  %v1907_v7 = vadd.f32 %v1875_v37, %v6170_v32 }
 0x460   : > { %4567 = vmatmul.msk.bf16.gmra.mxu2 %vm294_vm0, %v6355_v63  ;;  %v3953_v5 = vpop.permute.xlu1 %3952  ;;  %2464 = vmatmul.bf16.gmra.mxu3 %v2292_v15  ;;  %v6382_v15 = vadd.f32 %v5572_v17, %v6276_v3  ;;  %v1939_v40 = vadd.f32 %v1907_v7, %v5726_v14 }
 0x461   : > { %v6370_v20 = vsel %vm294_vm0, %v1935_v57, %v3953_v5  ;;  %v1125_v50 = vpop.f32.mrf.mxu0  ;;  %v1873_v57 = vmul.f32 %v5038_v33, %v6082_v58  ;;  %v5039_v33 = vld [vmem:[%s5151_s15 + $0x50] sm:$0xff] }
 0x462   : > { %8275 = vst [vmem:[#allocation94_spill] sm:$0xff] %v6370_v20  ;;  %v1126_v0 = vadd.f32 %v1125_v50, %v6005_v22  ;;  %v8088_v56 = vmax.f32 %v6382_v15, 0.0  ;;  %v4791_v20 = vld [vmem:[%s8060_s3 + $0xe4] sm:$0xf] }
 0x463   : > { %v2067_v51 = vpop.f32.mrf.mxu2  ;;  %v1905_v5 = vadd.f32 %v1873_v57, %v6170_v32 }
 0x464   : > { %v1172_v24 = vmax.f32 %v1126_v0, 0.0  ;;  %4576 = vmatmul.msk.bf16.gmra.mxu0 %vm294_vm0, %v6094_v42  ;;  %v2234_v14 = vmul.f32 %v2067_v51, %v8089_v35 }
 0x466   : > { %3982 = vrot.lane.b32.xlu1 %v1172_v24, %s5073_s28 }
 0x468   : > { %v3961_v8 = vpop.permute.xlu2 %3960 }
 0x469   : > { %v6389_v37 = vsel %vm294_vm0, %v1939_v40, %v3961_v8  ;;  %v1127_v42 = vpop.f32.mrf.mxu0  ;;  %v1874_v8 = vmul.f32 %v5039_v33, %v6050_v25  ;;  %v6420_v25 = vadd.f32 %v5580_v6, %v6276_v3 }
 0x46a   : > { %8276 = vst [vmem:[#allocation95_spill] sm:$0xff] %v6389_v37  ;;  %v1128_v17 = vadd.f32 %v1127_v42, %v6005_v22  ;;  %v1937_v42 = vadd.f32 %v1905_v5, %v5703_v12  ;;  %v6416_v12 = vadd.f32 %v5576_v60, %v6276_v3 }
 0x46b   : > { %v2069_v50 = vpop.f32.mrf.mxu2 }
 0x46c   : > { %v1173_v0 = vmax.f32 %v1128_v17, 0.0  ;;  %v2236_v58 = vmul.f32 %v2069_v50, %v8088_v56  ;;  %v1906_v50 = vadd.f32 %v1874_v8, %v6170_v32  ;;  %v8085_v60 = vmax.f32 %v6416_v12, 0.0 }
 0x46e   : > { %v6399_v7 = vpack.c.bf16 %v1173_v0, %v1172_v24  ;;  %v2294_v40 = vpack.c.bf16 %v2236_v58, %v2234_v14  ;;  %3984 = vrot.lane.b32.xlu2 %v1173_v0, %s5073_s28  ;;  %v1938_v5 = vadd.f32 %v1906_v50, %v5720_v54  ;;  %v5040_v58 = vld [vmem:[%s5151_s15 + $0x70] sm:$0xff] }
 0x470   : > { %4568 = vmatmul.msk.bf16.gmra.mxu2 %vm294_vm0, %v6399_v7  ;;  %v3957_v57 = vpop.permute.xlu0 %3956  ;;  %2469 = vmatmul.bf16.gmra.mxu3 %v2294_v40  ;;  %v1878_v40 = vmul.f32 %v5040_v58, %v6127_v13  ;;  %v4623_v58 = vld [vmem:[%s8060_s3 + $0x80] sm:$0xf] }
 0x471   : > { %v6408_v51 = vsel %vm294_vm0, %v1937_v42, %v3957_v57  ;;  %v1130_v17 = vpop.f32.mrf.mxu0  ;;  %v8084_v42 = vmax.f32 %v6420_v25, 0.0 }
 0x472   : > { %8277 = vst [vmem:[#allocation96_spill] sm:$0xff] %v6408_v51  ;;  %v1131_v24 = vadd.f32 %v1130_v17, %v6005_v22  ;;  %v1910_v57 = vadd.f32 %v1878_v40, %v6170_v32  ;;  %v4829_v40 = vld [vmem:[%s8060_s3 + $0x84] sm:$0xf0] }
 0x473   : > { %v2072_v14 = vpop.f32.mrf.mxu2 }
 0x474   : > { %v1174_v0 = vmax.f32 %v1131_v24, 0.0  ;;  %4577 = vmatmul.msk.bf16.gmra.mxu0 %vm294_vm0, %v6118_v49  ;;  %v2238_v54 = vmul.f32 %v2072_v14, %v8085_v60  ;;  %v5041_v14 = vld [vmem:[%s5151_s15 + $0x60] sm:$0xff]  ;;  %v5047_v60 = vld [vmem:[%s5151_s15 + $0x90] sm:$0xff] }
 0x476   : > { %3986 = vrot.lane.b32.xlu0 %v1174_v0, %s5073_s28 }
 0x478   : > { %v3959_v33 = vpop.permute.xlu1 %3958 }
 0x479   : > { %v6427_v8 = vsel %vm294_vm0, %v1938_v5, %v3959_v33  ;;  %v1132_v49 = vpop.f32.mrf.mxu0  ;;  %v1942_v33 = vadd.f32 %v1910_v57, %v5769_v27 }
 0x47a   : > { %8278 = vst [vmem:[#allocation97_spill] sm:$0xff] %v6427_v8  ;;  %v1133_v6 = vadd.f32 %v1132_v49, %v6005_v22  ;;  %v1876_v49 = vmul.f32 %v5041_v14, %v6092_v55  ;;  %v6460_v55 = vadd.f32 %v5586_v44, %v6276_v3 }
 0x47b   : > { %v2074_v17 = vpop.f32.mrf.mxu2 }
 0x47c   : > { %v1175_v24 = vmax.f32 %v1133_v6, 0.0  ;;  %v2240_v13 = vmul.f32 %v2074_v17, %v8084_v42  ;;  %v4624_v6 = vor.u32 %v4829_v40, %v4623_v58  ;;  %v5042_v58 = vld [vmem:[%s5151_s15 + $0x68] sm:$0xff]  ;;  %v8083_v44 = vmax.f32 %v6460_v55, 0.0 }
 0x47d   : > { %v1877_v40 = vmul.f32 %v5042_v58, %v6066_v39 }
 0x47e   : > { %v6437_v50 = vpack.c.bf16 %v1175_v24, %v1174_v0  ;;  %v2296_v5 = vpack.c.bf16 %v2240_v13, %v2238_v54  ;;  %3988 = vrot.lane.b32.xlu1 %v1175_v24, %s5073_s28  ;;  %2547 = vmatpush.bf16.msra.mxu1 %v4624_v6  ;;  %v1908_v13 = vadd.f32 %v1876_v49, %v6170_v32 }
 0x480   : > { %4569 = vmatmul.msk.bf16.gmra.mxu2 %vm294_vm0, %v6437_v50  ;;  %v3967_v0 = vpop.permute.xlu2 %3966  ;;  %2474 = vmatmul.bf16.gmra.mxu3 %v2296_v5  ;;  %v6464_v5 = vadd.f32 %v5590_v11, %v6276_v3 }
 0x481   : > { %v6452_v17 = vsel %vm294_vm0, %v1942_v33, %v3967_v0  ;;  %v1135_v54 = vpop.f32.mrf.mxu0  ;;  %v1940_v33 = vadd.f32 %v1908_v13, %v5749_v47  ;;  %v1909_v0 = vadd.f32 %v1877_v40, %v6170_v32 }
 0x482   : > { %8279 = vst [vmem:[#allocation98_spill] sm:$0xff] %v6452_v17  ;;  %v1136_v24 = vadd.f32 %v1135_v54, %v6005_v22  ;;  %v8080_v6 = vmax.f32 %v6464_v5, 0.0  ;;  %v8313_v17 = vld [vmem:[#allocation47_spill] sm:$0xff] }
 0x483   : > { %v2077_v27 = vpop.f32.mrf.mxu2 }
 0x484   : > { %v1176_v57 = vmax.f32 %v1136_v24, 0.0  ;;  %4578 = vmatmul.msk.bf16.gmra.mxu0 %vm294_vm0, %v6144_v21  ;;  %v2242_v39 = vmul.f32 %v2077_v27, %v8083_v44 }
 0x486   : > { %3990 = vrot.lane.b32.xlu2 %v1176_v57, %s5073_s28 }
 0x488   : > { %v3963_v14 = vpop.permute.xlu0 %3962 }
 0x489   : > { %v6471_v49 = vsel %vm294_vm0, %v1940_v33, %v3963_v14  ;;  %v1137_v21 = vpop.f32.mrf.mxu0  ;;  %v1941_v33 = vadd.f32 %v1909_v0, %v5752_v59  ;;  %v5043_v14 = vld [vmem:[%s5151_s15 + $0x88] sm:$0xff]  ;;  %v6498_v59 = vadd.f32 %v5594_v45, %v6276_v3 }
 0x48a   : > { %8280 = vst [vmem:[#allocation99_spill] sm:$0xff] %v6471_v49  ;;  %v1138_v11 = vadd.f32 %v1137_v21, %v6005_v22  ;;  %v1881_v21 = vmul.f32 %v5043_v14, %v6139_v52  ;;  %v6502_v52 = vadd.f32 %v5612_v10, %v6276_v3 }
 0x48b   : > { %v2079_v54 = vpop.f32.mrf.mxu2  ;;  %v8082_v45 = vmax.f32 %v6498_v59, 0.0 }
 0x48c   : > { %v1177_v24 = vmax.f32 %v1138_v11, 0.0  ;;  %v2244_v47 = vmul.f32 %v2079_v54, %v8080_v6  ;;  %v1913_v54 = vadd.f32 %v1881_v21, %v6170_v32  ;;  %v8081_v21 = vmax.f32 %v6502_v52, 0.0  ;;  %v8283_v6 = vld [vmem:[#allocation34_spill] sm:$0xff] }
 0x48e   : > { %v6481_v13 = vpack.c.bf16 %v1177_v24, %v1176_v57  ;;  %v2298_v58 = vpack.c.bf16 %v2244_v47, %v2242_v39  ;;  %3992 = vrot.lane.b32.xlu0 %v1177_v24, %s5073_s28  ;;  %v1945_v0 = vadd.f32 %v1913_v54, %v5792_v36  ;;  %v5044_v47 = vld [vmem:[%s5151_s15 + $0x78] sm:$0xff] }
 0x490   : > { %4570 = vmatmul.msk.bf16.gmra.mxu2 %vm294_vm0, %v6481_v13  ;;  %v3965_v40 = vpop.permute.xlu1 %3964  ;;  %2479 = vmatmul.bf16.gmra.mxu3 %v2298_v58  ;;  %v1879_v58 = vmul.f32 %v5044_v47, %v6113_v46  ;;  %v5045_v47 = vld [vmem:[%s5151_s15 + $0x80] sm:$0xff] }
 0x491   : > { %v6490_v27 = vsel %vm294_vm0, %v1941_v33, %v3965_v40  ;;  %v1140_v11 = vpop.f32.mrf.mxu0 }
 0x492   : > { %8281 = vst [vmem:[#allocation100_spill] sm:$0xff] %v6490_v27  ;;  %v1141_v57 = vadd.f32 %v1140_v11, %v6005_v22  ;;  %v1911_v40 = vadd.f32 %v1879_v58, %v6170_v32 }
 0x493   : > { %v2082_v39 = vpop.f32.mrf.mxu2 }
 0x494   : > { %v1178_v24 = vmax.f32 %v1141_v57, 0.0  ;;  %4579 = vmatmul.msk.bf16.gmra.mxu0 %vm294_vm0, %v6178_v26  ;;  %v2246_v36 = vmul.f32 %v2082_v39, %v8082_v45 }
 0x496   : > { %3994 = vrot.lane.b32.xlu1 %v1178_v24, %s5073_s28 }
 0x498   : > { %v3973_v33 = vpop.permute.xlu2 %3972 }
 0x499   : > { %v6509_v14 = vsel %vm294_vm0, %v1945_v0, %v3973_v33  ;;  %v1142_v26 = vpop.f32.mrf.mxu0  ;;  %v1880_v33 = vmul.f32 %v5045_v47, %v6087_v28  ;;  %v8285_v28 = vld [vmem:[#allocation11_spill] sm:$0xff] }
 0x49a   : > { %8282 = vst [vmem:[#allocation101_spill] sm:$0xff] %v6509_v14  ;;  %v1143_v10 = vadd.f32 %v1142_v26, %v6005_v22  ;;  %v1943_v26 = vadd.f32 %v1911_v40, %v8283_v6  ;;  %v6536_v6 = vadd.f32 %v8285_v28, %v6276_v3  ;;  %v8286_v40 = vld [vmem:[#allocation14_spill] sm:$0xff]  ;;  %v8301_v14 = vld [vmem:[#allocation81_spill] sm:$0xff] }
 0x49b   : > { %v2084_v11 = vpop.f32.mrf.mxu2 }
 0x49c   : > { %v1179_v57 = vmax.f32 %v1143_v10, 0.0  ;;  %v2248_v46 = vmul.f32 %v2084_v11, %v8081_v21  ;;  %v1912_v11 = vadd.f32 %v1880_v33, %v6170_v32  ;;  %v8087_v28 = vmax.f32 %v6536_v6, 0.0 }
 0x49e   : > { %v6519_v54 = vpack.c.bf16 %v1179_v57, %v1178_v24  ;;  %v2300_v0 = vpack.c.bf16 %v2248_v46, %v2246_v36  ;;  %3996 = vrot.lane.b32.xlu2 %v1179_v57, %s5073_s28  ;;  %v6540_v46 = vadd.f32 %v8286_v40, %v6276_v3 }
 0x4a0   : > { %4571 = vmatmul.msk.bf16.gmra.mxu2 %vm294_vm0, %v6519_v54  ;;  %v3969_v58 = vpop.permute.xlu0 %3968  ;;  %2484 = vmatmul.bf16.gmra.mxu3 %v2300_v0  ;;  %v8287_v0 = vld [vmem:[#allocation39_spill] sm:$0xff]  ;;  %v8086_v21 = vmax.f32 %v6540_v46, 0.0 }
 0x4a1   : > { %v6528_v39 = vsel %vm294_vm0, %v1943_v26, %v3969_v58  ;;  %v1145_v10 = vpop.f32.mrf.mxu0  ;;  %v1944_v47 = vadd.f32 %v1912_v11, %v8287_v0  ;;  %v5046_v26 = vld [vmem:[%s5151_s15 + $0xa0] sm:$0xff] }
 0x4a2   : > { %8284 = vst [vmem:[#allocation34_spill] sm:$0xff] %v6528_v39  ;;  %v1146_v24 = vadd.f32 %v1145_v10, %v6005_v22  ;;  %v8288_v58 = vld [vmem:[#allocation78_spill] sm:$0xff] }
 0x4a3   : > { %v2087_v36 = vpop.f32.mrf.mxu2  ;;  %v1884_v33 = vmul.f32 %v5046_v26, %v8288_v58 }
 0x4a4   : > { %v1180_v57 = vmax.f32 %v1146_v24, 0.0  ;;  %4580 = vmatmul.msk.bf16.gmra.mxu0 %vm294_vm0, %v6225_v41  ;;  %v2250_v11 = vmul.f32 %v2087_v36, %v8087_v28 }
 0x4a5   : > { %v1916_v45 = vadd.f32 %v1884_v33, %v6170_v32  ;;  %v6564_v33 = vperm.slane %v6265_v18, 1 }
 0x4a6   : > { %3998 = vrot.lane.b32.xlu0 %v1180_v57, %s5073_s28 }
 0x4a8   : > { %v3971_v10 = vpop.permute.xlu1 %3970 }
 0x4a9   : > { %v6547_v24 = vsel %vm294_vm0, %v1944_v47, %v3971_v10  ;;  %v1147_v41 = vpop.f32.mrf.mxu0  ;;  %v8290_v10 = vld [vmem:[#allocation46_spill] sm:$0xff] }
 0x4aa   : > { %8289 = vst [vmem:[#allocation11_spill] sm:$0xff] %v6547_v24  ;;  %v1148_v40 = vadd.f32 %v1147_v41, %v6005_v22  ;;  %v1948_v42 = vadd.f32 %v1916_v45, %v8290_v10  ;;  %v8291_v22 = vld [vmem:[#allocation5_spill] sm:$0xff]  ;;  %v8293_v45 = vld [vmem:[#allocation22_spill] sm:$0xff]  ;;  %v8312_v24 = vld [vmem:[#allocation4_spill] sm:$0xff] }
 0x4ab   : > { %v2089_v44 = vpop.f32.mrf.mxu2  ;;  %v1882_v41 = vmul.f32 %v5047_v60, %v8291_v22  ;;  %v8294_v60 = vld [vmem:[#allocation24_spill] sm:$0xff]  ;;  %v5048_v22 = vld [vmem:[%s5151_s15 + $0x98] sm:$0xff] }
 0x4ac   : > { %v1181_v0 = vmax.f32 %v1148_v40, 0.0  ;;  %v2252_v26 = vmul.f32 %v2089_v44, %v8086_v21  ;;  %v6578_v18 = vadd.f32 %v8294_v60, %v6564_v33 }
 0x4ad   : > { %v1914_v40 = vadd.f32 %v1882_v41, %v6170_v32  ;;  %v8297_v41 = vld [vmem:[#allocation3_spill] sm:$0xff] }
 0x4ae   : > { %v6557_v58 = vpack.c.bf16 %v1181_v0, %v1180_v57  ;;  %v2302_v47 = vpack.c.bf16 %v2252_v26, %v2250_v11  ;;  %4000 = vrot.lane.b32.xlu1 %v1181_v0, %s5073_s28  ;;  %v6574_v0 = vadd.f32 %v8293_v45, %v6564_v33  ;;  %v8295_v26 = vld [vmem:[#allocation16_spill] sm:$0xff]  ;;  %v8298_v45 = vld [vmem:[#allocation42_spill] sm:$0xff]  ;;  %v8097_v60 = vmax.f32 %v6578_v18, 0.0 }
 0x4af   : > { %v1946_v21 = vadd.f32 %v1914_v40, %v8298_v45 }
 0x4b0   : > { %4572 = vmatmul.msk.bf16.gmra.mxu2 %vm294_vm0, %v6557_v58  ;;  %v3979_v36 = vpop.permute.xlu2 %3978  ;;  %2489 = vmatmul.bf16.gmra.mxu3 %v2302_v47  ;;  %v6584_v47 = vadd.f32 %v8295_v26, %v6276_v3  ;;  %v8094_v28 = vmax.f32 %v6574_v0, 0.0 }
 0x4b1   : > { %v6569_v44 = vsel %vm294_vm0, %v1948_v42, %v3979_v36  ;;  %v2146_v57 = vpop.f32.mrf.mxu0  ;;  %v8296_v42 = vld [vmem:[#allocation18_spill] sm:$0xff]  ;;  %v1883_v36 = vmul.f32 %v5048_v22, %v8297_v41 }
 0x4b2   : > { %8292 = vst [vmem:[#allocation14_spill] sm:$0xff] %v6569_v44  ;;  %v6588_v10 = vadd.f32 %v8296_v42, %v6276_v3  ;;  %v8096_v35 = vmax.f32 %v6584_v47, 0.0  ;;  %v2227_v4 = vmul.f32 %v2146_v57, %v8094_v28  ;;  %v5049_v44 = vld [vmem:[%s5151_s15 + $0xb8] sm:$0xff] }
 0x4b3   : > { %v2092_v11 = vpop.f32.mrf.mxu2  ;;  %v1915_v22 = vadd.f32 %v1883_v36, %v6170_v32  ;;  %v1887_v57 = vmul.f32 %v5049_v44, %v8301_v14  ;;  %v4838_v14 = vld [vmem:[%s8058_s1 + $0x20] sm:$0xf0]  ;;  %v8305_v44 = vld [vmem:[#allocation20_spill] sm:$0xff] }
 0x4b4   : > { %4581 = vmatmul.msk.bf16.gmra.mxu0 %vm294_vm0, %v6253_v30  ;;  %v8095_v42 = vmax.f32 %v6588_v10, 0.0  ;;  %v2254_v45 = vmul.f32 %v2092_v11, %v8096_v35 }
 0x4b5   : > { %v1947_v62 = vadd.f32 %v1915_v22, %v8300_v31  ;;  %v1919_v11 = vadd.f32 %v1887_v57, %v6170_v32  ;;  %v6634_v22 = vadd.f32 %v8305_v44, %v6276_v3 }
 0x4b7   : > { %8306 = vst [vmem:[#allocation46_spill] sm:$0xff] %v6634_v22 }
 0x4b8   : > { %v3975_v56 = vpop.permute.xlu0 %3974 }
 0x4b9   : > { %v6596_v30 = vsel %vm294_vm0, %v1946_v21, %v3975_v56  ;;  %v2148_v26 = vpop.f32.mrf.mxu0 }
 0x4ba   : > { %8299 = vst [vmem:[#allocation39_spill] sm:$0xff] %v6596_v30  ;;  %v2229_v40 = vmul.f32 %v2148_v26, %v8097_v60  ;;  %v8100_v60 = vmax.f32 %v6634_v22, 0.0 }
 0x4bb   : > { %v2094_v41 = vpop.f32.mrf.mxu2 }
 0x4bc   : > { %v2291_v29 = vpack.c.bf16 %v2229_v40, %v2227_v4  ;;  %v2256_v56 = vmul.f32 %v2094_v41, %v8095_v42  ;;  %v8303_v40 = vld [vmem:[#allocation26_spill] sm:$0xff] }
 0x4bd   : > { %v6618_v41 = vadd.f32 %v8303_v40, %v6564_v33  ;;  %v8310_v40 = vld [vmem:[#allocation7_spill] sm:$0xff] }
 0x4be   : > { %v2304_v21 = vpack.c.bf16 %v2256_v56, %v2254_v45  ;;  %2548 = vmatmul.bf16.vlgmr.msra.gmra.mxu1 %v2291_v29  ;;  %v8304_v29 = vld [vmem:[#allocation28_spill] sm:$0xff]  ;;  %v8307_v45 = vld [vmem:[#allocation23_spill] sm:$0xff] }
 0x4bf   : > { %v6622_v31 = vadd.f32 %v8304_v29, %v6564_v33  ;;  %v6638_v56 = vadd.f32 %v8307_v45, %v6276_v3  ;;  %v8098_v42 = vmax.f32 %v6618_v41, 0.0 }
 0x4c0   : > { %v3977_v28 = vpop.permute.xlu1 %3976  ;;  %2494 = vmatmul.bf16.gmra.mxu3 %v2304_v21  ;;  %v8309_v21 = vld [vmem:[#allocation51_spill] sm:$0xff] }
 0x4c1   : > { %v6613_v36 = vsel %vm294_vm0, %v1947_v62, %v3977_v28  ;;  %v2151_v26 = vpop.f32.mrf.mxu0  ;;  %v4687_v62 = vld [vmem:[%s8058_s1 + $0x8] sm:$0xf]  ;;  %8308 = vst [vmem:[#allocation5_spill] sm:$0xff] %v6638_v56  ;;  %v1951_v57 = vadd.f32 %v1919_v11, %v8309_v21  ;;  %v8101_v35 = vmax.f32 %v6622_v31, 0.0  ;;  %v8099_v45 = vmax.f32 %v6638_v56, 0.0 }
 0x4c2   : > { %8302 = vst [vmem:[#allocation78_spill] sm:$0xff] %v6613_v36  ;;  %v4688_v28 = vor.u32 %v4838_v14, %v4687_v62  ;;  %v2231_v11 = vmul.f32 %v2151_v26, %v8098_v42 }
 0x4c3   : > { %v2097_v4 = vpop.f32.mrf.mxu2 }
 0x4c4   : > { %4582 = vmatmul.msk.bf16.gmra.mxu0 %vm294_vm0, %v6311_v48  ;;  %v5050_v48 = vld [vmem:[%s5151_s15 + $0xa8] sm:$0xff]  ;;  %3332 = vmatpush.bf16.msrb.mxu2 %v4688_v28 }
 0x4c5   : > { %v1885_v29 = vmul.f32 %v5050_v48, %v8310_v40  ;;  %v2258_v40 = vmul.f32 %v2097_v4, %v8100_v60  ;;  %v4837_v4 = vld [vmem:[%s8058_s1 + $0xc] sm:$0xf] }
 0x4c7   : > { %v1917_v21 = vadd.f32 %v1885_v29, %v6170_v32 }
 0x4c8   : > { %v3985_v62 = vpop.permute.xlu2 %3984 }
 0x4c9   : > { %v6646_v14 = vsel %vm294_vm0, %v1951_v57, %v3985_v62  ;;  %v2153_v44 = vpop.f32.mrf.mxu0  ;;  %v1949_v26 = vadd.f32 %v1917_v21, %v8313_v17  ;;  %v8315_v17 = vld [vmem:[#allocation30_spill] sm:$0xff] }
 0x4ca   : > { %8311 = vst [vmem:[#allocation22_spill] sm:$0xff] %v6646_v14  ;;  %v2233_v28 = vmul.f32 %v2153_v44, %v8101_v35  ;;  %v5051_v14 = vld [vmem:[%s5151_s15 + $0xb0] sm:$0xff] }
 0x4cb   : > { %v2099_v48 = vpop.f32.mrf.mxu2  ;;  %v1886_v30 = vmul.f32 %v5051_v14, %v8312_v24 }
 0x4cc   : > { %v2293_v36 = vpack.c.bf16 %v2233_v28, %v2231_v11  ;;  %v2260_v57 = vmul.f32 %v2099_v48, %v8099_v45  ;;  %v6674_v28 = vadd.f32 %v8315_v17, %v6564_v33  ;;  %v4763_v48 = vld [vmem:[%s8060_s3 + $0x74] sm:$0xf] }
 0x4cd   : > { %v1918_v11 = vadd.f32 %v1886_v30, %v6170_v32  ;;  %v4848_v30 = vld [vmem:[%s8060_s3 + $0x78] sm:$0xf0]  ;;  %v5052_v17 = vld [vmem:[%s5151_s15 + $0xd0] sm:$0xff] }
 0x4ce   : > { %v2306_v62 = vpack.c.bf16 %v2260_v57, %v2258_v40  ;;  %2553 = vmatmul.bf16.gmra.mxu1 %v2293_v36  ;;  %v4689_v36 = vld [vmem:[%s8058_s1 + $0x24] sm:$0xf0]  ;;  %v4764_v40 = vor.u32 %v4848_v30, %v4763_v48  ;;  %v8317_v57 = vld [vmem:[#allocation25_spill] sm:$0xff]  ;;  %v8103_v60 = vmax.f32 %v6674_v28, 0.0 }
 0x4cf   : > { %v4692_v14 = vor.u32 %v4837_v4, %v4689_v36  ;;  %v8321_v36 = vld [vmem:[#allocation50_spill] sm:$0xff] }
 0x4d0   : > { %v3981_v42 = vpop.permute.xlu0 %3980  ;;  %2499 = vmatmul.bf16.gmra.mxu3 %v2306_v62  ;;  %v6690_v62 = vadd.f32 %v8317_v57, %v6276_v3 }
 0x4d1   : > { %v6663_v44 = vsel %vm294_vm0, %v1949_v26, %v3981_v42  ;;  %v2156_v29 = vpop.f32.mrf.mxu0  ;;  %v8316_v42 = vld [vmem:[#allocation31_spill] sm:$0xff]  ;;  %3421 = vmatpush.bf16.msrb.mxu0 %v4692_v14  ;;  %3728 = vmatpush.bf16.msrb.mxu3 %v4764_v40 }
 0x4d2   : > { %8314 = vst [vmem:[#allocation24_spill] sm:$0xff] %v6663_v44  ;;  %v6678_v21 = vadd.f32 %v8316_v42, %v6564_v33  ;;  %v8319_v26 = vld [vmem:[#allocation27_spill] sm:$0xff]  ;;  %v8322_v42 = vld [vmem:[#allocation84_spill] sm:$0xff]  ;;  %v8105_v57 = vmax.f32 %v6690_v62, 0.0 }
 0x4d3   : > { %v2102_v24 = vpop.f32.mrf.mxu2  ;;  %8318 = vst [vmem:[#allocation16_spill] sm:$0xff] %v6690_v62  ;;  %v6694_v4 = vadd.f32 %v8319_v26, %v6276_v3  ;;  %v1890_v45 = vmul.f32 %v5052_v17, %v8322_v42  ;;  %v4795_v44 = vld [vmem:[%s8060_s3 + $0xf4] sm:$0xf] }
 0x4d4   : > { %4583 = vmatmul.msk.bf16.gmra.mxu0 %vm294_vm0, %v6355_v63  ;;  %v1950_v63 = vadd.f32 %v1918_v11, %v8321_v36  ;;  %v8102_v35 = vmax.f32 %v6678_v21, 0.0  ;;  %v2235_v11 = vmul.f32 %v2156_v29, %v8103_v60  ;;  %v2262_v42 = vmul.f32 %v2102_v24, %v8105_v57  ;;  %v4856_v29 = vld [vmem:[%s8060_s3 + $0xf8] sm:$0xf0]  ;;  %v8325_v60 = vld [vmem:[#allocation79_spill] sm:$0xff] }
 0x4d5   : > { %8320 = vst [vmem:[#allocation18_spill] sm:$0xff] %v6694_v4  ;;  %v8104_v26 = vmax.f32 %v6694_v4, 0.0  ;;  %v1922_v36 = vadd.f32 %v1890_v45, %v6170_v32 }
 0x4d8   : > { %v3983_v14 = vpop.permute.xlu1 %3982 }
 0x4d9   : > { %v6702_v48 = vsel %vm294_vm0, %v1950_v63, %v3983_v14  ;;  %v2158_v30 = vpop.f32.mrf.mxu0 }
 0x4da   : > { %8323 = vst [vmem:[#allocation3_spill] sm:$0xff] %v6702_v48  ;;  %v2237_v40 = vmul.f32 %v2158_v30, %v8102_v35  ;;  %v8324_v30 = vld [vmem:[#allocation58_spill] sm:$0xff] }
 0x4db   : > { %v2104_v17 = vpop.f32.mrf.mxu2  ;;  %v1954_v45 = vadd.f32 %v1922_v36, %v8324_v30  ;;  %v5053_v35 = vld [vmem:[%s5151_s15 + $0xc0] sm:$0xff]  ;;  %v8328_v36 = vld [vmem:[#allocation36_spill] sm:$0xff] }
 0x4dc   : > { %v2295_v63 = vpack.c.bf16 %v2237_v40, %v2235_v11  ;;  %v2264_v14 = vmul.f32 %v2104_v17, %v8104_v26  ;;  %v1888_v24 = vmul.f32 %v5053_v35, %v8325_v60  ;;  %v4796_v11 = vor.u32 %v4856_v29, %v4795_v44  ;;  %v8327_v26 = vld [vmem:[#allocation33_spill] sm:$0xff]  ;;  %v8331_v44 = vld [vmem:[#allocation32_spill] sm:$0xff]  ;;  %v5054_v29 = vld [vmem:[%s5151_s15 + $0xc8] sm:$0xff] }
 0x4dd   : > { %v6730_v57 = vadd.f32 %v8327_v26, %v6564_v33  ;;  %v6734_v30 = vadd.f32 %v8328_v36, %v6564_v33  ;;  %v8329_v35 = vld [vmem:[#allocation29_spill] sm:$0xff]  ;;  %v8334_v26 = vld [vmem:[#allocation54_spill] sm:$0xff] }
 0x4de   : > { %v2308_v48 = vpack.c.bf16 %v2264_v14, %v2262_v42  ;;  %2558 = vmatmul.bf16.gmra.mxu1 %v2295_v63  ;;  %v1920_v63 = vadd.f32 %v1888_v24, %v6170_v32  ;;  %v6740_v60 = vadd.f32 %v8329_v35, %v6276_v3 }
 0x4df   : > { %3817 = vmatpush.bf16.msrb.mxu1 %v4796_v11  ;;  %v8106_v36 = vmax.f32 %v6734_v30, 0.0 }
 0x4e0   : > { %v3991_v40 = vpop.permute.xlu2 %3990  ;;  %2504 = vmatmul.bf16.gmra.mxu3 %v2308_v48  ;;  %8330 = vst [vmem:[#allocation43_spill] sm:$0xff] %v6740_v60  ;;  %v6744_v48 = vadd.f32 %v8331_v44, %v6276_v3  ;;  %v1952_v11 = vadd.f32 %v1920_v63, %v8334_v26  ;;  %v8109_v35 = vmax.f32 %v6740_v60, 0.0 }
 0x4e1   : > { %v6725_v17 = vsel %vm294_vm0, %v1954_v45, %v3991_v40  ;;  %v2161_v42 = vpop.f32.mrf.mxu0  ;;  %v8333_v45 = vld [vmem:[#allocation6_spill] sm:$0xff]  ;;  %v8107_v40 = vmax.f32 %v6730_v57, 0.0 }
 0x4e2   : > { %8326 = vst [vmem:[#allocation42_spill] sm:$0xff] %v6725_v17  ;;  %v1889_v24 = vmul.f32 %v5054_v29, %v8333_v45  ;;  %v8108_v39 = vmax.f32 %v6744_v48, 0.0 }
 0x4e3   : > { %v2107_v14 = vpop.f32.mrf.mxu2  ;;  %8332 = vst [vmem:[#allocation81_spill] sm:$0xff] %v6744_v48  ;;  %v2239_v44 = vmul.f32 %v2161_v42, %v8107_v40 }
 0x4e4   : > { %4584 = vmatmul.msk.bf16.gmra.mxu0 %vm294_vm0, %v6399_v7  ;;  %v1921_v63 = vadd.f32 %v1889_v24, %v6170_v32  ;;  %v2266_v26 = vmul.f32 %v2107_v14, %v8109_v35  ;;  %v8339_v14 = vld [vmem:[#allocation40_spill] sm:$0xff] }
 0x4e8   : > { %v3987_v17 = vpop.permute.xlu0 %3986 }
 0x4e9   : > { %v6752_v7 = vsel %vm294_vm0, %v1952_v11, %v3987_v17  ;;  %v2163_v27 = vpop.f32.mrf.mxu0 }
 0x4ea   : > { %8335 = vst [vmem:[#allocation26_spill] sm:$0xff] %v6752_v7  ;;  %v2241_v29 = vmul.f32 %v2163_v27, %v8106_v36  ;;  %v8336_v7 = vld [vmem:[#allocation55_spill] sm:$0xff]  ;;  %v8338_v36 = vld [vmem:[#allocation38_spill] sm:$0xff] }
 0x4eb   : > { %v2109_v45 = vpop.f32.mrf.mxu2  ;;  %v1953_v8 = vadd.f32 %v1921_v63, %v8336_v7  ;;  %v6771_v40 = vadd.f32 %v8338_v36, %v6564_v33  ;;  %v8340_v7 = vld [vmem:[#allocation35_spill] sm:$0xff] }
 0x4ec   : > { %v2297_v37 = vpack.c.bf16 %v2241_v29, %v2239_v44  ;;  %v2268_v17 = vmul.f32 %v2109_v45, %v8108_v39  ;;  %v6775_v44 = vadd.f32 %v8339_v14, %v6564_v33  ;;  %v6787_v36 = vadd.f32 %v8340_v7, %v6276_v3  ;;  %v8342_v29 = vld [vmem:[#allocation37_spill] sm:$0xff]  ;;  %v6799_v7 = vpop.f32.mrf.mxu3 }
 0x4ed   : > { %v6791_v63 = vadd.f32 %v8342_v29, %v6276_v3  ;;  %v5055_v45 = vld [vmem:[%s5151_s15 + $0xd8] sm:$0xff] }
 0x4ee   : > { %v2310_v11 = vpack.c.bf16 %v2268_v17, %v2266_v26  ;;  %2563 = vmatmul.bf16.gmra.mxu1 %v2297_v37  ;;  %v4759_v37 = vld [vmem:[%s8060_s3 + $0x64] sm:$0xf]  ;;  %8341 = vst [vmem:[#allocation20_spill] sm:$0xff] %v6787_v36  ;;  %v8111_v17 = vmax.f32 %v6771_v40, 0.0 }
 0x4ef   : > { %8343 = vst [vmem:[#allocation23_spill] sm:$0xff] %v6791_v63  ;;  %v8344_v26 = vld [vmem:[#allocation82_spill] sm:$0xff] }
 0x4f0   : > { %v3989_v49 = vpop.permute.xlu1 %3988  ;;  %2509 = vmatmul.bf16.gmra.mxu3 %v2310_v11  ;;  %v8110_v11 = vmax.f32 %v6775_v44, 0.0 }
 0x4f1   : > { %v6767_v42 = vsel %vm294_vm0, %v1953_v8, %v3989_v49  ;;  %v2166_v27 = vpop.f32.mrf.mxu0  ;;  %v4847_v8 = vld [vmem:[%s8060_s3 + $0x68] sm:$0xf0] }
 0x4f2   : > { %8337 = vst [vmem:[#allocation28_spill] sm:$0xff] %v6767_v42  ;;  %v4760_v49 = vor.u32 %v4847_v8, %v4759_v37  ;;  %v8113_v37 = vmax.f32 %v6787_v36, 0.0  ;;  %v8112_v8 = vmax.f32 %v6791_v63, 0.0  ;;  %v2243_v29 = vmul.f32 %v2166_v27, %v8111_v17  ;;  %v4855_v27 = vld [vmem:[%s8060_s3 + $0xe8] sm:$0xf0] }
 0x4f3   : > { %v2112_v24 = vpop.f32.mrf.mxu2  ;;  %v8346_v17 = vld [vmem:[#allocation59_spill] sm:$0xff] }
 0x4f4   : > { %4585 = vmatmul.msk.bf16.gmra.mxu0 %vm294_vm0, %v6437_v50  ;;  %v1891_v50 = vmul.f32 %v5055_v45, %v8344_v26  ;;  %3729 = vmatpush.bf16.msrb.mxu3 %v4760_v49  ;;  %v2270_v26 = vmul.f32 %v2112_v24, %v8113_v37  ;;  %v4792_v24 = vor.u32 %v4855_v27, %v4791_v20  ;;  %v8349_v37 = vld [vmem:[#allocation44_spill] sm:$0xff] }
 0x4f6   : > { %v1923_v49 = vadd.f32 %v1891_v50, %v6170_v32  ;;  %v8345_v50 = vld [vmem:[#allocation77_spill] sm:$0xff]  ;;  %3818 = vmatpush.bf16.msrb.mxu1 %v4792_v24 }
 0x4f8   : > { %v1955_v51 = vadd.f32 %v1923_v49, %v8346_v17  ;;  %v6831_v17 = vpop.f32.mrf.mxu3 }
 0x4f9   : > { %v2168_v14 = vpop.f32.mrf.mxu0 }
 0x4fa   : > { %v2245_v39 = vmul.f32 %v2168_v14, %v8110_v11  ;;  %v5056_v14 = vld [vmem:[%s5151_s15 + $0xe0] sm:$0xff] }
 0x4fb   : > { %v2114_v45 = vpop.f32.mrf.mxu2  ;;  %v1892_v11 = vmul.f32 %v5056_v14, %v8345_v50  ;;  %v6829_v14 = vadd.f32 %v8349_v37, %v6564_v33 }
 0x4fc   : > { %v2299_v35 = vpack.c.bf16 %v2245_v39, %v2243_v29  ;;  %v2272_v42 = vmul.f32 %v2114_v45, %v8112_v8 }
 0x4fd   : > { %v8115_v37 = vmax.f32 %v6829_v14, 0.0 }
 0x4fe   : > { %v2312_v9 = vpack.c.bf16 %v2272_v42, %v2270_v26  ;;  %2568 = vmatmul.bf16.gmra.mxu1 %v2299_v35  ;;  %v1924_v42 = vadd.f32 %v1892_v11, %v6170_v32  ;;  %v8348_v26 = vld [vmem:[#allocation41_spill] sm:$0xff]  ;;  %v8352_v32 = vld [vmem:[#allocation10_spill] sm:$0xff] }
 0x4ff   : > { %v6825_v8 = vadd.f32 %v8348_v26, %v6564_v33  ;;  %v8354_v11 = vld [vmem:[#allocation62_spill] sm:$0xff] }
 0x500   : > { %v3993_v39 = vpop.permute.xlu0 %3992  ;;  %2514 = vmatmul.bf16.gmra.mxu3 %v2312_v9  ;;  %v8350_v9 = vld [vmem:[#allocation8_spill] sm:$0xff]  ;;  %v1956_v49 = vadd.f32 %v1924_v42, %v8354_v11 }
 0x501   : > { %v6820_v29 = vsel %vm294_vm0, %v1955_v51, %v3993_v39  ;;  %v2171_v35 = vpop.f32.mrf.mxu0  ;;  %v6837_v20 = vadd.f32 %v8350_v9, %v6276_v3  ;;  %v6841_v51 = vadd.f32 %v8352_v32, %v6276_v3  ;;  %v8114_v27 = vmax.f32 %v6825_v8, 0.0 }
 0x502   : > { %8347 = vst [vmem:[#allocation51_spill] sm:$0xff] %v6820_v29 }
 0x503   : > { %v2117_v45 = vpop.f32.mrf.mxu2  ;;  %8351 = vst [vmem:[#allocation7_spill] sm:$0xff] %v6837_v20  ;;  %v8116_v26 = vmax.f32 %v6841_v51, 0.0  ;;  %v2247_v9 = vmul.f32 %v2171_v35, %v8114_v27  ;;  %v8356_v35 = vld [vmem:[#allocation45_spill] sm:$0xff] }
 0x504   : > { %4586 = vmatmul.msk.bf16.gmra.mxu0 %vm294_vm0, %v6481_v13  ;;  %8353 = vst [vmem:[#allocation4_spill] sm:$0xff] %v6841_v51  ;;  %v8117_v13 = vmax.f32 %v6837_v20, 0.0  ;;  %v6863_v27 = vadd.f32 %v8356_v35, %v6564_v33 }
 0x506   : > { %v2274_v11 = vmul.f32 %v2117_v45, %v8117_v13  ;;  %v4755_v45 = vld [vmem:[%s8060_s3 + $0x54] sm:$0xf] }
 0x508   : > { %v3995_v50 = vpop.permute.xlu1 %3994 }
 0x509   : > { %v6847_v24 = vsel %vm294_vm0, %v1956_v49, %v3995_v50  ;;  %v2173_v39 = vpop.f32.mrf.mxu0  ;;  %v6859_v50 = vpop.f32.mrf.mxu3 }
 0x50a   : > { %8355 = vst [vmem:[#allocation47_spill] sm:$0xff] %v6847_v24  ;;  %v2249_v32 = vmul.f32 %v2173_v39, %v8115_v37  ;;  %v8357_v39 = vld [vmem:[#allocation48_spill] sm:$0xff] }
 0x50b   : > { %v2119_v42 = vpop.f32.mrf.mxu2  ;;  %v6867_v37 = vadd.f32 %v8357_v39, %v6564_v33 }
 0x50c   : > { %v2301_v29 = vpack.c.bf16 %v2249_v32, %v2247_v9  ;;  %v2276_v49 = vmul.f32 %v2119_v42, %v8116_v26  ;;  %v8358_v9 = vld [vmem:[#allocation12_spill] sm:$0xff]  ;;  %v8360_v42 = vld [vmem:[#allocation13_spill] sm:$0xff] }
 0x50d   : > { %v6879_v32 = vadd.f32 %v8358_v9, %v6276_v3 }
 0x50e   : > { %v2314_v24 = vpack.c.bf16 %v2276_v49, %v2274_v11  ;;  %2573 = vmatmul.bf16.gmra.mxu1 %v2301_v29  ;;  %v4846_v29 = vld [vmem:[%s8060_s3 + $0x58] sm:$0xf0]  ;;  %v6883_v11 = vadd.f32 %v8360_v42, %v6276_v3  ;;  %v8121_v49 = vmax.f32 %v6867_v37, 0.0 }
 0x50f   : > { %8359 = vst [vmem:[#allocation30_spill] sm:$0xff] %v6879_v32  ;;  %v8123_v26 = vmax.f32 %v6879_v32, 0.0 }
 0x510   : > { %2519 = vmatmul.bf16.gmra.mxu3 %v2314_v24  ;;  %v4756_v24 = vor.u32 %v4846_v29, %v4755_v45  ;;  %8361 = vst [vmem:[#allocation31_spill] sm:$0xff] %v6883_v11  ;;  %v8122_v45 = vmax.f32 %v6883_v11, 0.0 }
 0x511   : > { %v2176_v19 = vpop.f32.mrf.mxu0  ;;  %v6887_v35 = vpop.f32.mrf.mxu3 }
 0x512   : > { %3730 = vmatpush.bf16.msrb.mxu3 %v4756_v24 }
 0x513   : > { %v2122_v23 = vpop.f32.mrf.mxu2 }
 0x514   : > { %4587 = vmatmul.msk.bf16.gmra.mxu0 %vm294_vm0, %v6519_v54  ;;  %v8120_v54 = vmax.f32 %v6863_v27, 0.0  ;;  %v2278_v24 = vmul.f32 %v2122_v23, %v8123_v26  ;;  %v8364_v23 = vld [vmem:[#allocation15_spill] sm:$0xff] }
 0x516   : > { %v2251_v29 = vmul.f32 %v2176_v19, %v8120_v54  ;;  %v8362_v19 = vld [vmem:[#allocation49_spill] sm:$0xff] }
 0x517   : > { %v6903_v54 = vadd.f32 %v8362_v19, %v6564_v33 }
 0x519   : > { %v2178_v39 = vpop.f32.mrf.mxu0  ;;  %v6899_v51 = vpop.f32.mrf.mxu3 }
 0x51a   : > { %v2253_v9 = vmul.f32 %v2178_v39, %v8121_v49  ;;  %v8363_v39 = vld [vmem:[#allocation52_spill] sm:$0xff] }
 0x51b   : > { %v2124_v42 = vpop.f32.mrf.mxu2  ;;  %v6907_v49 = vadd.f32 %v8363_v39, %v6564_v33 }
 0x51c   : > { %v2303_v13 = vpack.c.bf16 %v2253_v9, %v2251_v29  ;;  %v2280_v2 = vmul.f32 %v2124_v42, %v8122_v45  ;;  %v8128_v29 = vmax.f32 %v6903_v54, 0.0 }
 0x51d   : > { %v8129_v9 = vmax.f32 %v6907_v49, 0.0 }
 0x51e   : > { %v2316_v1 = vpack.c.bf16 %v2280_v2, %v2278_v24  ;;  %2578 = vmatmul.bf16.gmra.mxu1 %v2303_v13  ;;  %v6913_v2 = vadd.f32 %v8364_v23, %v6276_v3 }
 0x520   : > { %2524 = vmatmul.bf16.gmra.mxu3 %v2316_v1  ;;  %8365 = vst [vmem:[#allocation25_spill] sm:$0xff] %v6913_v2  ;;  %v8366_v1 = vld [vmem:[#allocation17_spill] sm:$0xff]  ;;  %v8132_v24 = vmax.f32 %v6913_v2, 0.0  ;;  %v8371_v2 = vld [vmem:[#allocation19_spill] sm:$0xff] }
 0x521   : > { %v2181_v61 = vpop.f32.mrf.mxu0  ;;  %v6917_v13 = vadd.f32 %v8366_v1, %v6276_v3  ;;  %v6927_v45 = vpop.f32.mrf.mxu3 }
 0x523   : > { %v2127_v20 = vpop.f32.mrf.mxu2  ;;  %8367 = vst [vmem:[#allocation27_spill] sm:$0xff] %v6917_v13  ;;  %v8131_v19 = vmax.f32 %v6917_v13, 0.0 }
 0x524   : > { %4588 = vmatmul.msk.bf16.gmra.mxu0 %vm294_vm0, %v6557_v58  ;;  %v2255_v58 = vmul.f32 %v2181_v61, %v8128_v29  ;;  %v2282_v1 = vmul.f32 %v2127_v20, %v8132_v24  ;;  %v8368_v61 = vld [vmem:[#allocation53_spill] sm:$0xff]  ;;  %v6943_v20 = vadd.f32 %v8371_v2, %v6276_v3  ;;  %v4787_v2 = vld [vmem:[%s8060_s3 + $0xd4] sm:$0xf] }
 0x525   : > { %v6935_v29 = vadd.f32 %v8368_v61, %v6564_v33 }
 0x526   : > { %8372 = vst [vmem:[#allocation84_spill] sm:$0xff] %v6943_v20  ;;  %v8375_v48 = vmax.f32 %v6943_v20, 0.0 }
 0x527   : > { %8369 = vst [vmem:[#allocation50_spill] sm:$0xff] %v6935_v29 }
 0x529   : > { %v2183_v42 = vpop.f32.mrf.mxu0 }
 0x52a   : > { %v2257_v39 = vmul.f32 %v2183_v42, %v8129_v9  ;;  %v8370_v42 = vld [vmem:[#allocation56_spill] sm:$0xff] }
 0x52b   : > { %v2129_v23 = vpop.f32.mrf.mxu2  ;;  %v6939_v9 = vadd.f32 %v8370_v42, %v6564_v33 }
 0x52c   : > { %v2305_v26 = vpack.c.bf16 %v2257_v39, %v2255_v58  ;;  %v2284_v11 = vmul.f32 %v2129_v23, %v8131_v19  ;;  %v8373_v58 = vld [vmem:[#allocation21_spill] sm:$0xff]  ;;  %v6956_v23 = vld [vmem:[%s8061_s4 + $0x4] ss:$0 sm:$0xff] }
 0x52d   : > { %v6947_v39 = vadd.f32 %v8373_v58, %v6276_v3  ;;  %v4854_v3 = vld [vmem:[%s8060_s3 + $0xd8] sm:$0xf0] }
 0x52e   : > { %v2318_v32 = vpack.c.bf16 %v2284_v11, %v2282_v1  ;;  %2583 = vmatmul.bf16.gmra.mxu1 %v2305_v26  ;;  %v6949_v26 = vpop.f32.mrf.mxu3  ;;  %v8145_v11 = vmax.f32 %v6939_v9, 0.0  ;;  %v4788_v24 = vor.u32 %v4854_v3, %v4787_v2  ;;  %v2461_v1 = vadd.f32 %v6799_v7, %v6956_v23 }
 0x52f   : > { %8374 = vst [vmem:[#allocation58_spill] sm:$0xff] %v6947_v39  ;;  %v8142_v42 = vmax.f32 %v6947_v39, 0.0  ;;  %v2463_v7 = vadd.f32 %v6831_v17, %v6956_v23 }
 0x530   : > { %2529 = vmatmul.bf16.gmra.mxu3 %v2318_v32  ;;  %v8141_v32 = vmax.f32 %v6935_v29, 0.0  ;;  %3819 = vmatpush.bf16.msrb.mxu1 %v4788_v24 }
 0x531   : > { %v2186_v63 = vpop.f32.mrf.mxu0 }
 0x532   : > { %v2259_v58 = vmul.f32 %v2186_v63, %v8141_v32 }
 0x533   : > { %v2132_v36 = vpop.f32.mrf.mxu2 }
 0x534   : > { %v2286_v60 = vmul.f32 %v2132_v36, %v8375_v48  ;;  %v8376_v48 = vld [vmem:[#allocation57_spill] sm:$0xff] }
 0x535   : > { %v6982_v36 = vadd.f32 %v8376_v48, %v6564_v33 }
 0x536   : > { %v6976_v32 = vpop.f32.mrf.mxu3 }
 0x537   : > { %8377 = vst [vmem:[#allocation79_spill] sm:$0xff] %v6982_v36 }
 0x539   : > { %v2188_v61 = vpop.f32.mrf.mxu0 }
 0x53a   : > { %v2261_v19 = vmul.f32 %v2188_v61, %v8145_v11 }
 0x53b   : > { %v2134_v13 = vpop.f32.mrf.mxu2  ;;  %v2549_v56 = vpop.f32.mrf.mxu1 }
 0x53c   : > { %v2307_v4 = vpack.c.bf16 %v2261_v19, %v2259_v58  ;;  %v2288_v62 = vmul.f32 %v2134_v13, %v8142_v42  ;;  %v2550_v22 = vadd.f32 %v2549_v56, %v2461_v1  ;;  %v8378_v13 = vld [vmem:[#allocation60_spill] sm:$0xff]  ;;  %v2466_v1 = vadd.f32 %v6859_v50, %v6956_v23 }
 0x53d   : > { %v6986_v24 = vadd.f32 %v8378_v13, %v6564_v33 }
 0x53e   : > { %v2320_v29 = vpack.c.bf16 %v2288_v62, %v2286_v60  ;;  %2588 = vmatmul.bf16.gmra.mxu1 %v2307_v4  ;;  %v4653_v63 = vmul.f32 -1.442695, %v2550_v22  ;;  %v8144_v60 = vmax.f32 %v6982_v36, 0.0  ;;  %v6992_v19 = vpop.f32.mrf.mxu3  ;;  %v2471_v36 = vadd.f32 %v6899_v51, %v6956_v23 }
 0x53f   : > { %8379 = vst [vmem:[#allocation33_spill] sm:$0xff] %v6986_v24 }
 0x540   : > { %2534 = vmatmul.bf16.gmra.mxu3 %v2320_v29  ;;  %4880 = vpow2.f32 %v4653_v63  ;;  %v8143_v29 = vmax.f32 %v6986_v24, 0.0  ;;  %v4751_v63 = vld [vmem:[%s8060_s3 + $0x44] sm:$0xf] }
 0x541   : > { %v2191_v61 = vpop.f32.mrf.mxu0 }
 0x542   : > { %v2263_v3 = vmul.f32 %v2191_v61, %v8144_v60 }
 0x543   : > { %v2551_v2 = vpop.f32.mrf.mxu1 }
 0x544   : > { %v2552_v56 = vadd.f32 %v2551_v2, %v2463_v7  ;;  %v4845_v7 = vld [vmem:[%s8060_s3 + $0x48] sm:$0xf0] }
 0x545   : > { %v4752_v48 = vor.u32 %v4845_v7, %v4751_v63  ;;  %v8382_v7 = vld [vmem:[#allocation64_spill] sm:$0xff] }
 0x546   : > { %v4881_v62 = vpop.eup %4880  ;;  %v4654_v22 = vmul.f32 -1.442695, %v2552_v56 }
 0x547   : > { %v6988_v4 = vadd.f32 1.0, %v4881_v62  ;;  %3731 = vmatpush.bf16.msrb.mxu3 %v4752_v48  ;;  %v7027_v48 = vpop.f32.mrf.mxu3 }
 0x548   : > { %4882 = vpow2.f32 %v4654_v22 }
 0x549   : > { %v2193_v17 = vpop.f32.mrf.mxu0  ;;  %4884 = vrcp.f32 %v6988_v4  ;;  %vm2762_vm2 = vweird.f32 %v6988_v4 }
 0x54a   : > { %v2265_v58 = vmul.f32 %v2193_v17, %v8143_v29  ;;  %v2468_v29 = vadd.f32 %v6887_v35, %v6956_v23 }
 0x54b   : > { %v2554_v2 = vpop.f32.mrf.mxu1 }
 0x54c   : > { %v2309_v13 = vpack.c.bf16 %v2265_v58, %v2263_v3  ;;  %v2555_v56 = vadd.f32 %v2554_v2, %v2466_v1  ;;  %v4783_v1 = vld [vmem:[%s8060_s3 + $0xc4] sm:$0xf]  ;;  %v4853_v3 = vld [vmem:[%s8060_s3 + $0xc8] sm:$0xf0]  ;;  %v8380_v58 = vld [vmem:[#allocation61_spill] sm:$0xff]  ;;  %v7025_v2 = vadd.f32 %v8382_v7, %v6564_v33 }
 0x54d   : > { %v7021_v63 = vadd.f32 %v8380_v58, %v6564_v33 }
 0x54e   : > { %v4883_v50 = vpop.eup %4882  ;;  %v4655_v62 = vmul.f32 -1.442695, %v2555_v56  ;;  %2593 = vmatmul.bf16.gmra.mxu1 %v2309_v13  ;;  %8383 = vst [vmem:[#allocation29_spill] sm:$0xff] %v7025_v2  ;;  %v4784_v13 = vor.u32 %v4853_v3, %v4783_v1  ;;  %v8152_v58 = vmax.f32 %v7025_v2, 0.0 }
 0x54f   : > { %v7007_v61 = vpop.eup %4884  ;;  %v2726_v22 = vadd.f32 1.0, %v4883_v50  ;;  %8381 = vst [vmem:[#allocation36_spill] sm:$0xff] %v7021_v63  ;;  %v8150_v39 = vmax.f32 %v7021_v63, 0.0  ;;  %v7046_v2 = vpop.f32.mrf.mxu3 }
 0x550   : > { %v2758_v17 = vmul.f32 %v7007_v61, %v6988_v4  ;;  %4886 = vpow2.f32 %v4655_v62  ;;  %3820 = vmatpush.bf16.msrb.mxu1 %v4784_v13  ;;  %vm2763_vm3 = vweird.f32 %v7007_v61  ;;  %v2768_v13 = vand.u32 2147483648, %v6988_v4 }
 0x551   : > { %v2196_v42 = vpop.f32.mrf.mxu0  ;;  %4888 = vrcp.f32 %v2726_v22  ;;  %v2783_v51 = vand.u32 2147483648, %v2726_v22  ;;  %vm7048_vm5 = vmor %vm2762_vm2, %vm2763_vm3  ;;  %vm2777_vm6 = vweird.f32 %v2726_v22 }
 0x552   : > { %v2759_v60 = vsub.f32 1.0, %v2758_v17 }
 0x553   : > { %v2556_v35 = vpop.f32.mrf.mxu1 }
 0x554   : > { %v2557_v56 = vadd.f32 %v2556_v35, %v2468_v29  ;;  %v2760_v62 = vmul.f32 %v7007_v61, %v2759_v60  ;;  %v2267_v29 = vmul.f32 %v2196_v42, %v8150_v39  ;;  %v2766_v35 = vand.u32 2147483647, %v6988_v4 }
 0x555   : > { %v2781_v42 = vand.u32 2147483647, %v2726_v22 }
 0x556   : > { %v4887_v50 = vpop.eup %4886  ;;  %v4656_v17 = vmul.f32 -1.442695, %v2557_v56  ;;  %v2761_v1 = vadd.f32 %v7007_v61, %v2760_v62  ;;  %vm2767_vm7 = vcmp.eq.f32.partialorder %v2766_v35, 8.507059e+37 }
 0x557   : > { %v4889_v11 = vpop.eup %4888  ;;  %v7032_v20 = vadd.f32 1.0, %v4887_v50  ;;  %vm2782_vm9 = vcmp.eq.f32.partialorder %v2781_v42, 8.507059e+37 }
 0x558   : > { %v2773_v24 = vmul.f32 %v4889_v11, %v2726_v22  ;;  %4890 = vpow2.f32 %v4656_v17  ;;  %vm2778_vm4 = vweird.f32 %v4889_v11  ;;  %v2473_v22 = vadd.f32 %v6927_v45, %v6956_v23 }
 0x559   : > { %v2198_v7 = vpop.f32.mrf.mxu0  ;;  %4892 = vrcp.f32 %v7032_v20  ;;  %vm2779_vm8 = vmor %vm2777_vm6, %vm2778_vm4  ;;  %vm2792_vm10 = vweird.f32 %v7032_v20 }
 0x55a   : > { %v2269_v60 = vmul.f32 %v2198_v7, %v8152_v58  ;;  %v2774_v3 = vsub.f32 1.0, %v2773_v24  ;;  %v2765_v24 = vsel %vm7048_vm5, %v7007_v61, %v2761_v1 }
 0x55b   : > { %v2559_v50 = vpop.f32.mrf.mxu1 }
 0x55c   : > { %v2311_v56 = vpack.c.bf16 %v2269_v60, %v2267_v29  ;;  %v2775_v17 = vmul.f32 %v4889_v11, %v2774_v3  ;;  %v2560_v39 = vadd.f32 %v2559_v50, %v2471_v36  ;;  %v2769_v60 = vor.u32 1.1754944e-38, %v2768_v13  ;;  %v8386_v13 = vld [vmem:[#allocation65_spill] sm:$0xff] }
 0x55d   : > { %v2784_v36 = vor.u32 1.1754944e-38, %v2783_v51  ;;  %v7066_v51 = vadd.f32 %v8386_v13, %v6564_v33 }
 0x55e   : > { %v4891_v7 = vpop.eup %4890  ;;  %v2776_v58 = vadd.f32 %v4889_v11, %v2775_v17  ;;  %v4657_v4 = vmul.f32 -1.442695, %v2560_v39  ;;  %2598 = vmatmul.bf16.gmra.mxu1 %v2311_v56  ;;  %v2770_v61 = vsel %vm2767_vm7, %v2769_v60, %v2765_v24  ;;  %v7077_v60 = vpop.f32.mrf.mxu3 }
 0x55f   : > { %v7055_v29 = vpop.eup %4892  ;;  %v7057_v3 = vadd.f32 1.0, %v4891_v7  ;;  %8387 = vst [vmem:[#allocation32_spill] sm:$0xff] %v7066_v51  ;;  %v8155_v24 = vmax.f32 %v7066_v51, 0.0 }
 0x560   : > { %v2780_v50 = vsel %vm2779_vm8, %v4889_v11, %v2776_v58  ;;  %v2788_v63 = vmul.f32 %v7055_v29, %v7032_v20  ;;  %4894 = vpow2.f32 %v4657_v4  ;;  %v8388_v11 = vld [vmem:[#allocation68_spill] sm:$0xff]  ;;  %vm2793_vm11 = vweird.f32 %v7055_v29 }
 0x561   : > { %v2201_v62 = vpop.f32.mrf.mxu0  ;;  %4896 = vrcp.f32 %v7057_v3  ;;  %v2785_v39 = vsel %vm2782_vm9, %v2784_v36, %v2780_v50  ;;  %v7070_v58 = vadd.f32 %v8388_v11, %v6564_v33  ;;  %v2476_v50 = vadd.f32 %v6949_v26, %v6956_v23  ;;  %v4747_v26 = vld [vmem:[%s8060_s3 + $0x34] sm:$0xf]  ;;  %vm7102_vm13 = vmor %vm2792_vm10, %vm2793_vm11 }
 0x562   : > { %v2789_v1 = vsub.f32 1.0, %v2788_v63  ;;  %v3237_v35 = vpack.c.bf16 %v2785_v39, %v2770_v61  ;;  %vm2807_vm14 = vweird.f32 %v7057_v3 }
 0x563   : > { %8389 = vst [vmem:[#allocation6_spill] sm:$0xff] %v7070_v58  ;;  %v2561_v56 = vpop.f32.mrf.mxu1  ;;  %v8154_v4 = vmax.f32 %v7070_v58, 0.0 }
 0x564   : > { %v2562_v17 = vadd.f32 %v2561_v56, %v2473_v22  ;;  %4701 = vmatmul.msk.bf16.vlgmr.msrb.gmra.mxu2 %vm294_vm0, %v3237_v35  ;;  %4717 = vmatmul.msk.bf16.vlgmr.msrb.gmra.mxu0 %vm294_vm0, %v3237_v35  ;;  %v2790_v45 = vmul.f32 %v7055_v29, %v2789_v1  ;;  %v2271_v22 = vmul.f32 %v2201_v62, %v8155_v24  ;;  %v2796_v35 = vand.u32 2147483647, %v7032_v20  ;;  %v4844_v62 = vld [vmem:[%s8060_s3 + $0x38] sm:$0xf0] }
 0x566   : > { %v4895_v42 = vpop.eup %4894  ;;  %v4658_v7 = vmul.f32 -1.442695, %v2562_v17  ;;  %v2791_v11 = vadd.f32 %v7055_v29, %v2790_v45  ;;  %vm2797_vm15 = vcmp.eq.f32.partialorder %v2796_v35, 8.507059e+37  ;;  %v7116_v24 = vpop.f32.mrf.mxu3 }
 0x567   : > { %v4897_v63 = vpop.eup %4896  ;;  %v7079_v36 = vadd.f32 1.0, %v4895_v42  ;;  %v2798_v42 = vand.u32 2147483648, %v7032_v20 }
 0x568   : > { %v2803_v61 = vmul.f32 %v4897_v63, %v7057_v3  ;;  %4898 = vpow2.f32 %v4658_v7  ;;  %v2813_v7 = vand.u32 2147483648, %v7057_v3  ;;  %vm2808_vm12 = vweird.f32 %v4897_v63 }
 0x569   : > { %v2203_v39 = vpop.f32.mrf.mxu0  ;;  %4900 = vrcp.f32 %v7079_v36  ;;  %v2795_v20 = vsel %vm7102_vm13, %v7055_v29, %v2791_v11  ;;  %vm2809_vm2 = vmor %vm2807_vm14, %vm2808_vm12  ;;  %vm2822_vm4 = vweird.f32 %v7079_v36 }
 0x56a   : > { %v2273_v1 = vmul.f32 %v2203_v39, %v8154_v4  ;;  %v2804_v13 = vsub.f32 1.0, %v2803_v61  ;;  %v4748_v61 = vor.u32 %v4844_v62, %v4747_v26  ;;  %v2811_v4 = vand.u32 2147483647, %v7057_v3 }
 0x56b   : > { %v2564_v17 = vpop.f32.mrf.mxu1  ;;  %v2814_v26 = vor.u32 1.1754944e-38, %v2813_v7  ;;  %v8393_v7 = vld [vmem:[#allocation70_spill] sm:$0xff] }
 0x56c   : > { %v2313_v56 = vpack.c.bf16 %v2273_v1, %v2271_v22  ;;  %v2565_v45 = vadd.f32 %v2564_v17, %v2476_v50  ;;  %v2805_v39 = vmul.f32 %v4897_v63, %v2804_v13  ;;  %3732 = vmatpush.bf16.msrb.mxu3 %v4748_v61  ;;  %v2799_v13 = vor.u32 1.1754944e-38, %v2798_v42  ;;  %v4779_v42 = vld [vmem:[%s8060_s3 + $0xb4] sm:$0xf] }
 0x56d   : > { %vm2812_vm3 = vcmp.eq.f32.partialorder %v2811_v4, 8.507059e+37  ;;  %v7133_v61 = vadd.f32 %v8393_v7, %v6564_v33 }
 0x56e   : > { %v4899_v58 = vpop.eup %4898  ;;  %v4659_v51 = vmul.f32 -1.442695, %v2565_v45  ;;  %2603 = vmatmul.bf16.gmra.mxu1 %v2313_v56  ;;  %v2806_v22 = vadd.f32 %v4897_v63, %v2805_v39  ;;  %v2800_v29 = vsel %vm2797_vm15, %v2799_v13, %v2795_v20  ;;  %v7153_v7 = vpop.f32.mrf.mxu3 }
 0x56f   : > { %v7110_v50 = vpop.eup %4900  ;;  %v7112_v1 = vadd.f32 1.0, %v4899_v58  ;;  %v2478_v58 = vadd.f32 %v6976_v32, %v6956_v23  ;;  %8394 = vst [vmem:[#allocation54_spill] sm:$0xff] %v7133_v61 }
 0x570   : > { %v2818_v62 = vmul.f32 %v7110_v50, %v7079_v36  ;;  %4902 = vpow2.f32 %v4659_v51  ;;  %v2810_v17 = vsel %vm2809_vm2, %v4897_v63, %v2806_v22  ;;  %v4852_v51 = vld [vmem:[%s8060_s3 + $0xb8] sm:$0xf0]  ;;  %vm2823_vm5 = vweird.f32 %v7110_v50 }
 0x571   : > { %v2206_v56 = vpop.f32.mrf.mxu0  ;;  %4904 = vrcp.f32 %v7112_v1  ;;  %v2815_v3 = vsel %vm2812_vm3, %v2814_v26, %v2810_v17  ;;  %v8392_v63 = vld [vmem:[#allocation69_spill] sm:$0xff]  ;;  %v4780_v32 = vor.u32 %v4852_v51, %v4779_v42  ;;  %v8158_v17 = vmax.f32 %v7133_v61, 0.0  ;;  %vm7159_vm7 = vmor %vm2822_vm4, %vm2823_vm5 }
 0x572   : > { %v2819_v35 = vsub.f32 1.0, %v2818_v62  ;;  %v3238_v11 = vpack.c.bf16 %v2815_v3, %v2800_v29  ;;  %v7129_v4 = vadd.f32 %v8392_v63, %v6564_v33  ;;  %v2481_v42 = vadd.f32 %v6992_v19, %v6956_v23 }
 0x573   : > { %v2566_v45 = vpop.f32.mrf.mxu1  ;;  %3821 = vmatpush.bf16.msrb.mxu1 %v4780_v32  ;;  %v2826_v19 = vand.u32 2147483647, %v7079_v36  ;;  %vm2837_vm8 = vweird.f32 %v7112_v1 }
 0x574   : > { %v2567_v39 = vadd.f32 %v2566_v45, %v2478_v58  ;;  %4702 = vmatmul.msk.bf16.gmra.mxu2 %vm294_vm0, %v3238_v11  ;;  %4718 = vmatmul.msk.bf16.gmra.mxu0 %vm294_vm0, %v3238_v11  ;;  %v2820_v13 = vmul.f32 %v7110_v50, %v2819_v35  ;;  %v8159_v62 = vmax.f32 %v7129_v4, 0.0 }
 0x575   : > { %vm2827_vm9 = vcmp.eq.f32.partialorder %v2826_v19, 8.507059e+37  ;;  %v8397_v19 = vld [vmem:[#allocation71_spill] sm:$0xff] }
 0x576   : > { %v4903_v20 = vpop.eup %4902  ;;  %v4660_v22 = vmul.f32 -1.442695, %v2567_v39  ;;  %v2275_v11 = vmul.f32 %v2206_v56, %v8159_v62  ;;  %v2821_v63 = vadd.f32 %v7110_v50, %v2820_v13  ;;  %v2828_v39 = vand.u32 2147483648, %v7079_v36 }
 0x577   : > { %v4905_v26 = vpop.eup %4904  ;;  %v7140_v29 = vadd.f32 1.0, %v4903_v20  ;;  %v2843_v56 = vand.u32 2147483648, %v7112_v1 }
 0x578   : > { %v2833_v3 = vmul.f32 %v4905_v26, %v7112_v1  ;;  %4906 = vpow2.f32 %v4660_v22  ;;  %vm2838_vm6 = vweird.f32 %v4905_v26 }
 0x579   : > { %v2208_v58 = vpop.f32.mrf.mxu0  ;;  %4908 = vrcp.f32 %v7140_v29  ;;  %vm2839_vm10 = vmor %vm2837_vm8, %vm2838_vm6  ;;  %vm2852_vm12 = vweird.f32 %v7140_v29 }
 0x57a   : > { %v2277_v35 = vmul.f32 %v2208_v58, %v8158_v17  ;;  %v2834_v51 = vsub.f32 1.0, %v2833_v3  ;;  %v2841_v3 = vand.u32 2147483647, %v7112_v1  ;;  %v2483_v1 = vadd.f32 %v7027_v48, %v6956_v23 }
 0x57b   : > { %v2569_v32 = vpop.f32.mrf.mxu1 }
 0x57c   : > { %v2315_v45 = vpack.c.bf16 %v2277_v35, %v2275_v11  ;;  %v2570_v20 = vadd.f32 %v2569_v32, %v2481_v42  ;;  %v2835_v22 = vmul.f32 %v4905_v26, %v2834_v51  ;;  %v2825_v11 = vsel %vm7159_vm7, %v7110_v50, %v2821_v63 }
 0x57d   : > { %v2829_v51 = vor.u32 1.1754944e-38, %v2828_v39  ;;  %v2844_v32 = vor.u32 1.1754944e-38, %v2843_v56  ;;  %vm2842_vm11 = vcmp.eq.f32.partialorder %v2841_v3, 8.507059e+37  ;;  %v7178_v39 = vadd.f32 %v8397_v19, %v6564_v33  ;;  %v8399_v56 = vld [vmem:[#allocation72_spill] sm:$0xff]  ;;  %v7186_v3 = vpop.f32.mrf.mxu3 }
 0x57e   : > { %v4907_v58 = vpop.eup %4906  ;;  %v4661_v17 = vmul.f32 -1.442695, %v2570_v20  ;;  %2608 = vmatmul.bf16.gmra.mxu1 %v2315_v45  ;;  %v2836_v35 = vadd.f32 %v4905_v26, %v2835_v22  ;;  %v2856_v19 = vand.u32 2147483647, %v7140_v29 }
 0x57f   : > { %v7167_v36 = vpop.eup %4908  ;;  %v7169_v42 = vadd.f32 1.0, %v4907_v58  ;;  %v2830_v50 = vsel %vm2827_vm9, %v2829_v51, %v2825_v11  ;;  %8398 = vst [vmem:[#allocation55_spill] sm:$0xff] %v7178_v39  ;;  %v7182_v58 = vadd.f32 %v8399_v56, %v6564_v33  ;;  %v8161_v51 = vmax.f32 %v7178_v39, 0.0 }
 0x580   : > { %v2848_v62 = vmul.f32 %v7167_v36, %v7140_v29  ;;  %4910 = vpow2.f32 %v4661_v17  ;;  %v2840_v20 = vsel %vm2839_vm10, %v4905_v26, %v2836_v35  ;;  %vm2853_vm13 = vweird.f32 %v7167_v36 }
 0x581   : > { %v2211_v45 = vpop.f32.mrf.mxu0  ;;  %4912 = vrcp.f32 %v7169_v42  ;;  %v2845_v63 = vsel %vm2842_vm11, %v2844_v32, %v2840_v20  ;;  %8400 = vst [vmem:[#allocation38_spill] sm:$0xff] %v7182_v58  ;;  %v8160_v32 = vmax.f32 %v7182_v58, 0.0  ;;  %vm7214_vm15 = vmor %vm2852_vm12, %vm2853_vm13  ;;  %vm2867_vm2 = vweird.f32 %v7169_v42 }
 0x582   : > { %v2849_v22 = vsub.f32 1.0, %v2848_v62  ;;  %v3239_v13 = vpack.c.bf16 %v2845_v63, %v2830_v50  ;;  %v2486_v50 = vadd.f32 %v7046_v2, %v6956_v23  ;;  %v4743_v2 = vld [vmem:[%s8060_s3 + $0x24] sm:$0xf]  ;;  %vm2857_vm3 = vcmp.eq.f32.partialorder %v2856_v19, 8.507059e+37 }
 0x583   : > { %v2571_v17 = vpop.f32.mrf.mxu1 }
 0x584   : > { %v2572_v26 = vadd.f32 %v2571_v17, %v2483_v1  ;;  %4703 = vmatmul.msk.bf16.gmra.mxu2 %vm294_vm0, %v3239_v13  ;;  %4719 = vmatmul.msk.bf16.gmra.mxu0 %vm294_vm0, %v3239_v13  ;;  %v2850_v62 = vmul.f32 %v7167_v36, %v2849_v22  ;;  %v2279_v13 = vmul.f32 %v2211_v45, %v8161_v51  ;;  %v4843_v45 = vld [vmem:[%s8060_s3 + $0x28] sm:$0xf0]  ;;  %v2871_v51 = vand.u32 2147483647, %v7169_v42 }
 0x586   : > { %v4911_v11 = vpop.eup %4910  ;;  %v4662_v48 = vmul.f32 -1.442695, %v2572_v26  ;;  %v2851_v17 = vadd.f32 %v7167_v36, %v2850_v62  ;;  %vm2872_vm5 = vcmp.eq.f32.partialorder %v2871_v51, 8.507059e+37 }
 0x587   : > { %v4913_v35 = vpop.eup %4912  ;;  %v7191_v20 = vadd.f32 1.0, %v4911_v11 }
 0x588   : > { %v2863_v63 = vmul.f32 %v4913_v35, %v7169_v42  ;;  %4914 = vpow2.f32 %v4662_v48  ;;  %v2858_v48 = vand.u32 2147483648, %v7140_v29  ;;  %vm2868_vm14 = vweird.f32 %v4913_v35 }
 0x589   : > { %v2213_v1 = vpop.f32.mrf.mxu0  ;;  %4916 = vrcp.f32 %v7191_v20  ;;  %v2855_v29 = vsel %vm7214_vm15, %v7167_v36, %v2851_v17  ;;  %vm2869_vm4 = vmor %vm2867_vm2, %vm2868_vm14  ;;  %vm2882_vm6 = vweird.f32 %v7191_v20 }
 0x58a   : > { %v2281_v22 = vmul.f32 %v2213_v1, %v8160_v32  ;;  %v2864_v56 = vsub.f32 1.0, %v2863_v63  ;;  %v2873_v63 = vand.u32 2147483648, %v7169_v42  ;;  %v4744_v1 = vor.u32 %v4843_v45, %v4743_v2 }
 0x58b   : > { %v2574_v11 = vpop.f32.mrf.mxu1  ;;  %v2859_v2 = vor.u32 1.1754944e-38, %v2858_v48  ;;  %v8404_v48 = vld [vmem:[#allocation74_spill] sm:$0xff] }
 0x58c   : > { %v2317_v26 = vpack.c.bf16 %v2281_v22, %v2279_v13  ;;  %v2575_v62 = vadd.f32 %v2574_v11, %v2486_v50  ;;  %v2865_v32 = vmul.f32 %v4913_v35, %v2864_v56  ;;  %3733 = vmatpush.bf16.msrb.mxu3 %v4744_v1  ;;  %v7224_v22 = vpop.f32.mrf.mxu3  ;;  %v2874_v45 = vor.u32 1.1754944e-38, %v2873_v63  ;;  %v4775_v11 = vld [vmem:[%s8060_s3 + $0xa4] sm:$0xf] }
 0x58d   : > { %v2860_v42 = vsel %vm2857_vm3, %v2859_v2, %v2855_v29  ;;  %v7246_v63 = vadd.f32 %v8404_v48, %v6564_v33 }
 0x58e   : > { %v4915_v39 = vpop.eup %4914  ;;  %v4663_v61 = vmul.f32 -1.442695, %v2575_v62  ;;  %2613 = vmatmul.bf16.gmra.mxu1 %v2317_v26  ;;  %v2866_v13 = vadd.f32 %v4913_v35, %v2865_v32 }
 0x58f   : > { %v7222_v50 = vpop.eup %4916  ;;  %v7226_v56 = vadd.f32 1.0, %v4915_v39  ;;  %v2488_v39 = vadd.f32 %v7077_v60, %v6956_v23 }
 0x590   : > { %v2878_v26 = vmul.f32 %v7222_v50, %v7191_v20  ;;  %4918 = vpow2.f32 %v4663_v61  ;;  %v2870_v36 = vsel %vm2869_vm4, %v4913_v35, %v2866_v13  ;;  %v4851_v61 = vld [vmem:[%s8060_s3 + $0xa8] sm:$0xf0]  ;;  %v8403_v35 = vld [vmem:[#allocation73_spill] sm:$0xff]  ;;  %vm2883_vm7 = vweird.f32 %v7222_v50 }
 0x591   : > { %v2216_v58 = vpop.f32.mrf.mxu0  ;;  %4920 = vrcp.f32 %v7226_v56  ;;  %v2875_v32 = vsel %vm2872_vm5, %v2874_v45, %v2870_v36  ;;  %v7242_v51 = vadd.f32 %v8403_v35, %v6564_v33  ;;  %v4776_v60 = vor.u32 %v4851_v61, %v4775_v11  ;;  %vm7272_vm9 = vmor %vm2882_vm6, %vm2883_vm7 }
 0x592   : > { %v2879_v17 = vsub.f32 1.0, %v2878_v26  ;;  %v3240_v19 = vpack.c.bf16 %v2875_v32, %v2860_v42  ;;  %v8165_v36 = vmax.f32 %v7246_v63, 0.0  ;;  %v2491_v11 = vadd.f32 %v7116_v24, %v6956_v23 }
 0x593   : > { %v2576_v1 = vpop.f32.mrf.mxu1  ;;  %3822 = vmatpush.bf16.msrb.mxu1 %v4776_v60  ;;  %v8166_v26 = vmax.f32 %v7242_v51, 0.0  ;;  %v2886_v24 = vand.u32 2147483647, %v7191_v20  ;;  %vm2897_vm10 = vweird.f32 %v7226_v56 }
 0x594   : > { %v2577_v62 = vadd.f32 %v2576_v1, %v2488_v39  ;;  %4704 = vmatmul.msk.bf16.gmra.mxu2 %vm294_vm0, %v3240_v19  ;;  %4720 = vmatmul.msk.bf16.gmra.mxu0 %vm294_vm0, %v3240_v19  ;;  %v2880_v2 = vmul.f32 %v7222_v50, %v2879_v17  ;;  %v7258_v19 = vpop.f32.mrf.mxu3 }
 0x595   : > { %v2283_v17 = vmul.f32 %v2216_v58, %v8166_v26  ;;  %vm2887_vm11 = vcmp.eq.f32.partialorder %v2886_v24, 8.507059e+37  ;;  %v8407_v24 = vld [vmem:[#allocation75_spill] sm:$0xff] }
 0x596   : > { %v4919_v29 = vpop.eup %4918  ;;  %v4664_v13 = vmul.f32 -1.442695, %v2577_v62  ;;  %v2881_v48 = vadd.f32 %v7222_v50, %v2880_v2  ;;  %v2888_v62 = vand.u32 2147483648, %v7191_v20 }
 0x597   : > { %v4921_v45 = vpop.eup %4920  ;;  %v7253_v42 = vadd.f32 1.0, %v4919_v29  ;;  %v2903_v29 = vand.u32 2147483648, %v7226_v56 }
 0x598   : > { %v2893_v32 = vmul.f32 %v4921_v45, %v7226_v56  ;;  %4922 = vpow2.f32 %v4664_v13  ;;  %vm2898_vm8 = vweird.f32 %v4921_v45 }
 0x599   : > { %v2218_v39 = vpop.f32.mrf.mxu0  ;;  %4924 = vrcp.f32 %v7253_v42  ;;  %vm2899_vm12 = vmor %vm2897_vm10, %vm2898_vm8  ;;  %vm2912_vm14 = vweird.f32 %v7253_v42 }
 0x59a   : > { %v2285_v61 = vmul.f32 %v2218_v39, %v8165_v36  ;;  %v2894_v35 = vsub.f32 1.0, %v2893_v32  ;;  %v2901_v39 = vand.u32 2147483647, %v7226_v56  ;;  %v2493_v56 = vadd.f32 %v7153_v7, %v6956_v23 }
 0x59b   : > { %v2579_v60 = vpop.f32.mrf.mxu1 }
 0x59c   : > { %v2319_v1 = vpack.c.bf16 %v2285_v61, %v2283_v17  ;;  %v2580_v13 = vadd.f32 %v2579_v60, %v2491_v11  ;;  %v2895_v58 = vmul.f32 %v4921_v45, %v2894_v35  ;;  %v2885_v17 = vsel %vm7272_vm9, %v7222_v50, %v2881_v48 }
 0x59d   : > { %v2889_v35 = vor.u32 1.1754944e-38, %v2888_v62  ;;  %v2904_v60 = vor.u32 1.1754944e-38, %v2903_v29  ;;  %vm2902_vm13 = vcmp.eq.f32.partialorder %v2901_v39, 8.507059e+37  ;;  %v7291_v62 = vadd.f32 %v8407_v24, %v6564_v33  ;;  %v8409_v29 = vld [vmem:[#allocation76_spill] sm:$0xff] }
 0x59e   : > { %v4923_v2 = vpop.eup %4922  ;;  %v4665_v36 = vmul.f32 -1.442695, %v2580_v13  ;;  %2618 = vmatmul.bf16.gmra.mxu1 %v2319_v1  ;;  %v2896_v61 = vadd.f32 %v4921_v45, %v2895_v58 }
 0x59f   : > { %v7280_v20 = vpop.eup %4924  ;;  %v7282_v11 = vadd.f32 1.0, %v4923_v2  ;;  %v2890_v50 = vsel %vm2887_vm11, %v2889_v35, %v2885_v17  ;;  %8408 = vst [vmem:[#allocation40_spill] sm:$0xff] %v7291_v62  ;;  %v7295_v2 = vadd.f32 %v8409_v29, %v6564_v33  ;;  %v8168_v35 = vmax.f32 %v7291_v62, 0.0 }
 0x5a0   : > { %v2908_v26 = vmul.f32 %v7280_v20, %v7253_v42  ;;  %4926 = vpow2.f32 %v4665_v36  ;;  %v2900_v13 = vsel %vm2899_vm12, %v4921_v45, %v2896_v61  ;;  %v7297_v36 = vpop.f32.mrf.mxu3  ;;  %v2496_v33 = vadd.f32 %v7186_v3, %v6956_v23  ;;  %v4739_v3 = vld [vmem:[%s8060_s3 + $0x14] sm:$0xf] }
 0x5a1   : > { %v2221_v1 = vpop.f32.mrf.mxu0  ;;  %4928 = vrcp.f32 %v7282_v11  ;;  %v2905_v48 = vsel %vm2902_vm13, %v2904_v60, %v2900_v13  ;;  %8410 = vst [vmem:[#allocation35_spill] sm:$0xff] %v7295_v2  ;;  %v8167_v60 = vmax.f32 %v7295_v2, 0.0  ;;  %vm2913_vm15 = vweird.f32 %v7280_v20 }
 0x5a2   : > { %v2909_v58 = vsub.f32 1.0, %v2908_v26  ;;  %v3241_v32 = vpack.c.bf16 %v2905_v48, %v2890_v50  ;;  %vm7329_vm3 = vmor %vm2912_vm14, %vm2913_vm15  ;;  %vm2927_vm4 = vweird.f32 %v7282_v11 }
 0x5a3   : > { %v2581_v45 = vpop.f32.mrf.mxu1 }
 0x5a4   : > { %v2582_v39 = vadd.f32 %v2581_v45, %v2493_v56  ;;  %4705 = vmatmul.msk.bf16.gmra.mxu2 %vm294_vm0, %v3241_v32  ;;  %4721 = vmatmul.msk.bf16.gmra.mxu0 %vm294_vm0, %v3241_v32  ;;  %v2910_v26 = vmul.f32 %v7280_v20, %v2909_v58  ;;  %v2287_v56 = vmul.f32 %v2221_v1, %v8168_v35  ;;  %v2916_v32 = vand.u32 2147483647, %v7253_v42  ;;  %v4842_v1 = vld [vmem:[%s8060_s3 + $0x18] sm:$0xf0] }
 0x5a6   : > { %v4927_v17 = vpop.eup %4926  ;;  %v4666_v7 = vmul.f32 -1.442695, %v2582_v39  ;;  %v2911_v29 = vadd.f32 %v7280_v20, %v2910_v26  ;;  %vm2917_vm5 = vcmp.eq.f32.partialorder %v2916_v32, 8.507059e+37  ;;  %v4850_v32 = vld [vmem:[%s8060_s3 + $0x98] sm:$0xf0] }
 0x5a7   : > { %v4929_v61 = vpop.eup %4928  ;;  %v7304_v13 = vadd.f32 1.0, %v4927_v17  ;;  %v2918_v17 = vand.u32 2147483648, %v7253_v42 }
 0x5a8   : > { %v2923_v50 = vmul.f32 %v4929_v61, %v7282_v11  ;;  %4930 = vpow2.f32 %v4666_v7  ;;  %v2933_v7 = vand.u32 2147483648, %v7282_v11  ;;  %vm2928_vm2 = vweird.f32 %v4929_v61  ;;  %v7327_v35 = vpop.f32.mrf.mxu3 }
 0x5a9   : > { %v2223_v48 = vpop.f32.mrf.mxu0  ;;  %4932 = vrcp.f32 %v7304_v13  ;;  %v2915_v42 = vsel %vm7329_vm3, %v7280_v20, %v2911_v29  ;;  %vm2929_vm6 = vmor %vm2927_vm4, %vm2928_vm2  ;;  %vm2942_vm9 = vweird.f32 %v7304_v13 }
 0x5aa   : > { %v2289_v58 = vmul.f32 %v2223_v48, %v8167_v60  ;;  %v2924_v24 = vsub.f32 1.0, %v2923_v50  ;;  %v4740_v50 = vor.u32 %v4842_v1, %v4739_v3  ;;  %v2931_v60 = vand.u32 2147483647, %v7282_v11 }
 0x5ab   : > { %v2584_v39 = vpop.f32.mrf.mxu1  ;;  %v2919_v3 = vor.u32 1.1754944e-38, %v2918_v17  ;;  %v2934_v1 = vor.u32 1.1754944e-38, %v2933_v7  ;;  %v2498_v11 = vadd.f32 %v7224_v22, %v6956_v23 }
 0x5ac   : > { %v2321_v45 = vpack.c.bf16 %v2289_v58, %v2287_v56  ;;  %v2585_v26 = vadd.f32 %v2584_v39, %v2496_v33  ;;  %v2925_v48 = vmul.f32 %v4929_v61, %v2924_v24  ;;  %3734 = vmatpush.bf16.msrb.mxu3 %v4740_v50  ;;  %vm2932_vm7 = vcmp.eq.f32.partialorder %v2931_v60, 8.507059e+37 }
 0x5ad   : > { %v2920_v2 = vsel %vm2917_vm5, %v2919_v3, %v2915_v42  ;;  %v2501_v3 = vadd.f32 %v7258_v19, %v6956_v23 }
 0x5ae   : > { %v4931_v62 = vpop.eup %4930  ;;  %v4667_v56 = vmul.f32 -1.442695, %v2585_v26  ;;  %2623 = vmatmul.bf16.gmra.mxu1 %v2321_v45  ;;  %v2926_v58 = vadd.f32 %v4929_v61, %v2925_v48 }
 0x5af   : > { %v7337_v33 = vpop.eup %4932  ;;  %v2738_v24 = vadd.f32 1.0, %v4931_v62  ;;  %v4771_v62 = vld [vmem:[%s8060_s3 + $0x94] sm:$0xf] }
 0x5b0   : > { %v2938_v39 = vmul.f32 %v7337_v33, %v7304_v13  ;;  %4934 = vpow2.f32 %v4667_v56  ;;  %v2930_v45 = vsel %vm2929_vm6, %v4929_v61, %v2926_v58  ;;  %v4772_v7 = vor.u32 %v4850_v32, %v4771_v62  ;;  %v7353_v56 = vpop.f32.mrf.mxu3 }
 0x5b1   : > { %4936 = vrcp.f32 %v2738_v24  ;;  %v2935_v20 = vsel %vm2932_vm7, %v2934_v1, %v2930_v45  ;;  %vm2943_vm8 = vweird.f32 %v7337_v33  ;;  %v2961_v62 = vand.u32 2147483647, %v2738_v24 }
 0x5b2   : > { %v2939_v29 = vsub.f32 1.0, %v2938_v39  ;;  %v3242_v50 = vpack.c.bf16 %v2935_v20, %v2920_v2  ;;  %3823 = vmatpush.bf16.msrb.mxu1 %v4772_v7  ;;  %v2946_v2 = vand.u32 2147483647, %v7304_v13  ;;  %v2948_v20 = vand.u32 2147483648, %v7304_v13  ;;  %vm7365_vm11 = vmor %vm2942_vm9, %vm2943_vm8 }
 0x5b3   : > { %v2586_v17 = vpop.f32.mrf.mxu1  ;;  %vm2957_vm12 = vweird.f32 %v2738_v24  ;;  %vm2962_vm15 = vcmp.eq.f32.partialorder %v2961_v62, 8.507059e+37 }
 0x5b4   : > { %v2587_v61 = vadd.f32 %v2586_v17, %v2498_v11  ;;  %4706 = vmatmul.msk.bf16.gmra.mxu2 %vm294_vm0, %v3242_v50  ;;  %4722 = vmatmul.msk.bf16.gmra.mxu0 %vm294_vm0, %v3242_v50  ;;  %v2940_v26 = vmul.f32 %v7337_v33, %v2939_v29  ;;  %v2963_v11 = vand.u32 2147483648, %v2738_v24  ;;  %vm2947_vm13 = vcmp.eq.f32.partialorder %v2946_v2, 8.507059e+37 }
 0x5b6   : > { %v4935_v60 = vpop.eup %4934  ;;  %v4668_v22 = vmul.f32 -1.442695, %v2587_v61  ;;  %v2941_v39 = vadd.f32 %v7337_v33, %v2940_v26  ;;  %v2964_v26 = vor.u32 1.1754944e-38, %v2963_v11 }
 0x5b7   : > { %v4937_v48 = vpop.eup %4936  ;;  %v7355_v42 = vadd.f32 1.0, %v4935_v60 }
 0x5b8   : > { %v2953_v58 = vmul.f32 %v4937_v48, %v2738_v24  ;;  %4938 = vpow2.f32 %v4668_v22  ;;  %vm2958_vm10 = vweird.f32 %v4937_v48  ;;  %v2945_v7 = vsel %vm7365_vm11, %v7337_v33, %v2941_v39 }
 0x5b9   : > { %4940 = vrcp.f32 %v7355_v42  ;;  %v2949_v22 = vor.u32 1.1754944e-38, %v2948_v20  ;;  %vm2959_vm14 = vmor %vm2957_vm12, %vm2958_vm10  ;;  %v2503_v39 = vadd.f32 %v7297_v36, %v6956_v23  ;;  %v2976_v36 = vand.u32 2147483647, %v7355_v42 }
 0x5ba   : > { %v2954_v1 = vsub.f32 1.0, %v2953_v58  ;;  %vm2972_vm3 = vweird.f32 %v7355_v42 }
 0x5bb   : > { %v2589_v45 = vpop.f32.mrf.mxu1  ;;  %v2950_v33 = vsel %vm2947_vm13, %v2949_v22, %v2945_v7  ;;  %v2506_v7 = vadd.f32 %v7327_v35, %v6956_v23  ;;  %v2978_v23 = vand.u32 2147483648, %v7355_v42  ;;  %vm2977_vm7 = vcmp.eq.f32.partialorder %v2976_v36, 8.507059e+37 }
 0x5bc   : > { %v2590_v29 = vadd.f32 %v2589_v45, %v2501_v3  ;;  %v2955_v50 = vmul.f32 %v4937_v48, %v2954_v1  ;;  %v7378_v1 = vpop.f32.mrf.mxu3 }
 0x5be   : > { %v4939_v19 = vpop.eup %4938  ;;  %v4669_v17 = vmul.f32 -1.442695, %v2590_v29  ;;  %v2956_v61 = vadd.f32 %v4937_v48, %v2955_v50 }
 0x5bf   : > { %v7372_v60 = vpop.eup %4940  ;;  %v7374_v13 = vadd.f32 1.0, %v4939_v19 }
 0x5c0   : > { %v2968_v58 = vmul.f32 %v7372_v60, %v7355_v42  ;;  %4942 = vpow2.f32 %v4669_v17  ;;  %v2960_v3 = vsel %vm2959_vm14, %v4937_v48, %v2956_v61  ;;  %vm2973_vm2 = vweird.f32 %v7372_v60 }
 0x5c1   : > { %4944 = vrcp.f32 %v7374_v13  ;;  %v2965_v24 = vsel %vm2962_vm15, %v2964_v26, %v2960_v3  ;;  %v2991_v17 = vand.u32 2147483647, %v7374_v13  ;;  %v4735_v26 = vld [vmem:[%s8060_s3 + $0x4] sm:$0xf]  ;;  %v2993_v35 = vand.u32 2147483648, %v7374_v13  ;;  %vm7415_vm5 = vmor %vm2972_vm3, %vm2973_vm2 }
 0x5c2   : > { %v2969_v45 = vsub.f32 1.0, %v2968_v58  ;;  %v3243_v2 = vpack.c.bf16 %v2965_v24, %v2950_v33  ;;  %v4841_v58 = vld [vmem:[%s8060_s3 + $0x8] sm:$0xf0]  ;;  %vm2987_vm6 = vweird.f32 %v7374_v13 }
 0x5c3   : > { %v2591_v20 = vpop.f32.mrf.mxu1  ;;  %v4736_v24 = vor.u32 %v4841_v58, %v4735_v26  ;;  %v2979_v26 = vor.u32 1.1754944e-38, %v2978_v23  ;;  %v2994_v58 = vor.u32 1.1754944e-38, %v2993_v35  ;;  %vm2992_vm9 = vcmp.eq.f32.partialorder %v2991_v17, 8.507059e+37 }
 0x5c4   : > { %v2592_v29 = vadd.f32 %v2591_v20, %v2503_v39  ;;  %4707 = vmatmul.msk.bf16.gmra.mxu2 %vm294_vm0, %v3243_v2  ;;  %4723 = vmatmul.msk.bf16.gmra.mxu0 %vm294_vm0, %v3243_v2  ;;  %v2970_v50 = vmul.f32 %v7372_v60, %v2969_v45  ;;  %v7402_v3 = vpop.f32.mrf.mxu3  ;;  %v4767_v39 = vld [vmem:[%s8060_s3 + $0x84] sm:$0xf]  ;;  %v4849_v45 = vld [vmem:[%s8060_s3 + $0x88] sm:$0xf0] }
 0x5c5   : > { %3735 = vmatpush.bf16.msrb.mxu3 %v4736_v24 }
 0x5c6   : > { %v4943_v11 = vpop.eup %4942  ;;  %v4670_v48 = vmul.f32 -1.442695, %v2592_v29  ;;  %v2971_v22 = vadd.f32 %v7372_v60, %v2970_v50  ;;  %v4768_v29 = vor.u32 %v4849_v45, %v4767_v39 }
 0x5c7   : > { %v4945_v62 = vpop.eup %4944  ;;  %v7386_v32 = vadd.f32 1.0, %v4943_v11 }
 0x5c8   : > { %v2983_v19 = vmul.f32 %v4945_v62, %v7374_v13  ;;  %4946 = vpow2.f32 %v4670_v48  ;;  %vm2988_vm4 = vweird.f32 %v4945_v62  ;;  %v2975_v50 = vsel %vm7415_vm5, %v7372_v60, %v2971_v22  ;;  %3824 = vmatpush.bf16.msrb.mxu1 %v4768_v29  ;;  %v7430_v13 = vld [vmem:[%s8061_s4 + $0x4] ss:$0 sm:$0xff] }
 0x5c9   : > { %4948 = vrcp.f32 %v7386_v32  ;;  %vm2989_vm8 = vmor %vm2987_vm6, %vm2988_vm4  ;;  %v2980_v39 = vsel %vm2977_vm7, %v2979_v26, %v2975_v50  ;;  %v2508_v36 = vadd.f32 %v7430_v13, %v7353_v56  ;;  %v2511_v56 = vadd.f32 %v7430_v13, %v7378_v1 }
 0x5ca   : > { %v2984_v61 = vsub.f32 1.0, %v2983_v19  ;;  %vm3002_vm11 = vweird.f32 %v7386_v32  ;;  %v3006_v26 = vand.u32 2147483647, %v7386_v32 }
 0x5cb   : > { %v2594_v33 = vpop.f32.mrf.mxu1 }
 0x5cc   : > { %v2595_v2 = vadd.f32 %v2594_v33, %v2506_v7  ;;  %v2985_v20 = vmul.f32 %v4945_v62, %v2984_v61  ;;  %vm3007_vm15 = vcmp.eq.f32.partialorder %v3006_v26, 8.507059e+37 }
 0x5ce   : > { %v4947_v42 = vpop.eup %4946  ;;  %v4671_v48 = vmul.f32 -1.442695, %v2595_v2  ;;  %v2986_v19 = vadd.f32 %v4945_v62, %v2985_v20 }
 0x5cf   : > { %v7423_v7 = vpop.eup %4948  ;;  %v2742_v61 = vadd.f32 1.0, %v4947_v42 }
 0x5d0   : > { %v2998_v33 = vmul.f32 %v7423_v7, %v7386_v32  ;;  %4950 = vpow2.f32 %v4671_v48  ;;  %v2990_v24 = vsel %vm2989_vm8, %v4945_v62, %v2986_v19  ;;  %v2515_v62 = vpop.f32.mrf.mxu3  ;;  %vm3003_vm10 = vweird.f32 %v7423_v7 }
 0x5d1   : > { %4952 = vrcp.f32 %v2742_v61  ;;  %v2995_v60 = vsel %vm2992_vm9, %v2994_v58, %v2990_v24  ;;  %v3008_v58 = vand.u32 2147483648, %v7386_v32  ;;  %vm7447_vm13 = vmor %vm3002_vm11, %vm3003_vm10  ;;  %vm3017_vm14 = vweird.f32 %v2742_v61 }
 0x5d2   : > { %v2999_v22 = vsub.f32 1.0, %v2998_v33  ;;  %v3244_v23 = vpack.c.bf16 %v2995_v60, %v2980_v39  ;;  %v3023_v33 = vand.u32 2147483648, %v2742_v61  ;;  %v3021_v60 = vand.u32 2147483647, %v2742_v61 }
 0x5d3   : > { %v2596_v35 = vpop.f32.mrf.mxu1 }
 0x5d4   : > { %v2597_v45 = vadd.f32 %v2596_v35, %v2508_v36  ;;  %4708 = vmatmul.msk.bf16.gmra.mxu2 %vm294_vm0, %v3244_v23  ;;  %4724 = vmatmul.msk.bf16.gmra.mxu0 %vm294_vm0, %v3244_v23  ;;  %v3000_v20 = vmul.f32 %v7423_v7, %v2999_v22  ;;  %vm3022_vm3 = vcmp.eq.f32.partialorder %v3021_v60, 8.507059e+37 }
 0x5d6   : > { %v4951_v17 = vpop.eup %4950  ;;  %v4672_v2 = vmul.f32 -1.442695, %v2597_v45  ;;  %v3001_v50 = vadd.f32 %v7423_v7, %v3000_v20  ;;  %v3024_v20 = vor.u32 1.1754944e-38, %v3023_v33 }
 0x5d7   : > { %v4953_v29 = vpop.eup %4952  ;;  %v7437_v11 = vadd.f32 1.0, %v4951_v17 }
 0x5d8   : > { %v3013_v42 = vmul.f32 %v4953_v29, %v2742_v61  ;;  %4954 = vpow2.f32 %v4672_v2  ;;  %vm3018_vm12 = vweird.f32 %v4953_v29  ;;  %v3005_v23 = vsel %vm7447_vm13, %v7423_v7, %v3001_v50  ;;  %v7456_v32 = vpop.f32.mrf.mxu3 }
 0x5d9   : > { %4956 = vrcp.f32 %v7437_v11  ;;  %v3009_v2 = vor.u32 1.1754944e-38, %v3008_v58  ;;  %vm3019_vm2 = vmor %vm3017_vm14, %vm3018_vm12  ;;  %v2513_v61 = vadd.f32 %v7430_v13, %v7402_v3  ;;  %vm3032_vm5 = vweird.f32 %v7437_v11 }
 0x5da   : > { %v3014_v48 = vsub.f32 1.0, %v3013_v42 }
 0x5db   : > { %v2599_v19 = vpop.f32.mrf.mxu1  ;;  %v3010_v7 = vsel %vm3007_vm15, %v3009_v2, %v3005_v23  ;;  %v3036_v2 = vand.u32 2147483647, %v7437_v11 }
 0x5dc   : > { %v2600_v24 = vadd.f32 %v2599_v19, %v2511_v56  ;;  %v3015_v39 = vmul.f32 %v4953_v29, %v3014_v48 }
 0x5dd   : > { %vm7484_vm8 = vcmp.eq.f32.partialorder %v3036_v2, 8.507059e+37 }
 0x5de   : > { %v4955_v1 = vpop.eup %4954  ;;  %v4673_v22 = vmul.f32 -1.442695, %v2600_v24  ;;  %v3016_v35 = vadd.f32 %v4953_v29, %v3015_v39 }
 0x5df   : > { %v7454_v45 = vpop.eup %4956  ;;  %v2744_v17 = vadd.f32 1.0, %v4955_v1 }
 0x5e0   : > { %v3028_v42 = vmul.f32 %v7454_v45, %v7437_v11  ;;  %4958 = vpow2.f32 %v4673_v22  ;;  %v3020_v56 = vsel %vm3019_vm2, %v4953_v29, %v3016_v35  ;;  %v2516_v22 = vadd.f32 %v7430_v13, %v2515_v62  ;;  %v2520_v3 = vpop.f32.mrf.mxu3 }
 0x5e1   : > { %4960 = vrcp.f32 %v2744_v17  ;;  %v3423_v48 = vpop.f32.mrf.mxu0  ;;  %v3025_v50 = vsel %vm3022_vm3, %v3024_v20, %v3020_v56  ;;  %vm3033_vm4 = vweird.f32 %v7454_v45  ;;  %v3038_v20 = vand.u32 2147483648, %v7437_v11 }
 0x5e2   : > { %v3029_v19 = vsub.f32 1.0, %v3028_v42  ;;  %v3245_v24 = vpack.c.bf16 %v3025_v50, %v3010_v7  ;;  %v8419_v56 = vmax.f32 %v6574_v0, 0.0  ;;  %v8420_v50 = vmax.f32 %v6578_v18, 0.0  ;;  %vm7480_vm7 = vmor %vm3032_vm5, %vm3033_vm4 }
 0x5e3   : > { %v2601_v39 = vpop.f32.mrf.mxu1  ;;  %v3039_v18 = vor.u32 1.1754944e-38, %v3038_v20  ;;  %vm3047_vm9 = vweird.f32 %v2744_v17 }
 0x5e4   : > { %v2602_v26 = vadd.f32 %v2601_v39, %v2513_v61  ;;  %4709 = vmatmul.msk.bf16.gmra.mxu2 %vm294_vm0, %v3245_v24  ;;  %4725 = vmatmul.msk.bf16.gmra.mxu0 %vm294_vm0, %v3245_v24  ;;  %v3030_v29 = vmul.f32 %v7454_v45, %v3029_v19  ;;  %v3504_v7 = vmul.f32 %v3423_v48, %v8419_v56  ;;  %v3051_v24 = vand.u32 2147483647, %v2744_v17 }
 0x5e5   : > { %v3053_v39 = vand.u32 2147483648, %v2744_v17  ;;  %v8425_v56 = vmax.f32 %v6290_v53, 0.0 }
 0x5e6   : > { %v4959_v58 = vpop.eup %4958  ;;  %v4674_v33 = vmul.f32 -1.442695, %v2602_v26  ;;  %v3031_v62 = vadd.f32 %v7454_v45, %v3030_v29  ;;  %vm3052_vm11 = vcmp.eq.f32.partialorder %v3051_v24, 8.507059e+37 }
 0x5e7   : > { %v4961_v60 = vpop.eup %4960  ;;  %v7465_v36 = vadd.f32 1.0, %v4959_v58  ;;  %v3334_v1 = vpop.f32.mrf.mxu2  ;;  %v3054_v20 = vor.u32 1.1754944e-38, %v3053_v39 }
 0x5e8   : > { %v3043_v23 = vmul.f32 %v4961_v60, %v2744_v17  ;;  %4962 = vpow2.f32 %v4674_v33  ;;  %vm3048_vm6 = vweird.f32 %v4961_v60  ;;  %v3035_v11 = vsel %vm7480_vm7, %v7454_v45, %v3031_v62 }
 0x5e9   : > { %4964 = vrcp.f32 %v7465_v36  ;;  %v3425_v35 = vpop.f32.mrf.mxu0  ;;  %v3503_v2 = vmul.f32 %v3334_v1, %v8425_v56  ;;  %vm3049_vm10 = vmor %vm3047_vm9, %vm3048_vm6  ;;  %v2518_v1 = vadd.f32 %v7430_v13, %v7456_v32  ;;  %v2521_v32 = vadd.f32 %v7430_v13, %v2520_v3 }
 0x5ea   : > { %v3044_v42 = vsub.f32 1.0, %v3043_v23  ;;  %v3506_v61 = vmul.f32 %v3425_v35, %v8420_v50  ;;  %v3066_v56 = vand.u32 2147483647, %v7465_v36  ;;  %vm3062_vm13 = vweird.f32 %v7465_v36 }
 0x5eb   : > { %v2604_v19 = vpop.f32.mrf.mxu1 }
 0x5ec   : > { %v3568_v26 = vpack.c.bf16 %v3506_v61, %v3504_v7  ;;  %v2605_v58 = vadd.f32 %v2604_v19, %v2516_v22  ;;  %v3045_v33 = vmul.f32 %v4961_v60, %v3044_v42  ;;  %v8426_v61 = vmax.f32 %v6294_v34, 0.0 }
 0x5ed   : > { %v3040_v19 = vsel %vm7484_vm8, %v3039_v18, %v3035_v11  ;;  %vm7531_vm2 = vcmp.eq.f32.partialorder %v3066_v56, 8.507059e+37 }
 0x5ee   : > { %v4963_v48 = vpop.eup %4962  ;;  %v4675_v29 = vmul.f32 -1.442695, %v2605_v58  ;;  %3825 = vmatmul.bf16.vlgmr.msrb.gmra.mxu1 %v3568_v26  ;;  %v3046_v22 = vadd.f32 %v4961_v60, %v3045_v33  ;;  %v2522_v58 = vpop.f32.mrf.mxu3 }
 0x5ef   : > { %v7491_v35 = vpop.eup %4964  ;;  %v7493_v42 = vadd.f32 1.0, %v4963_v48  ;;  %v3336_v7 = vpop.f32.mrf.mxu2 }
 0x5f0   : > { %v3058_v50 = vmul.f32 %v7491_v35, %v7465_v36  ;;  %4966 = vpow2.f32 %v4675_v29  ;;  %v3505_v45 = vmul.f32 %v3336_v7, %v8426_v61  ;;  %v3050_v62 = vsel %vm3049_vm10, %v4961_v60, %v3046_v22 }
 0x5f1   : > { %4968 = vrcp.f32 %v7493_v42  ;;  %v3428_v17 = vpop.f32.mrf.mxu0  ;;  %v3055_v53 = vsel %vm3052_vm11, %v3054_v20, %v3050_v62  ;;  %vm3063_vm12 = vweird.f32 %v7491_v35  ;;  %v8427_v20 = vmax.f32 %v6618_v41, 0.0 }
 0x5f2   : > { %v3059_v24 = vsub.f32 1.0, %v3058_v50  ;;  %v3567_v39 = vpack.c.bf16 %v3505_v45, %v3503_v2  ;;  %v3246_v26 = vpack.c.bf16 %v3055_v53, %v3040_v19  ;;  %v3068_v2 = vand.u32 2147483648, %v7465_v36  ;;  %vm7527_vm15 = vmor %vm3062_vm13, %vm3063_vm12 }
 0x5f3   : > { %v2606_v33 = vpop.f32.mrf.mxu1  ;;  %v3508_v50 = vmul.f32 %v3428_v17, %v8427_v20  ;;  %v8428_v61 = vmax.f32 %v6622_v31, 0.0  ;;  %v3081_v19 = vand.u32 2147483647, %v7493_v42  ;;  %v3083_v53 = vand.u32 2147483648, %v7493_v42 }
 0x5f4   : > { %v2607_v23 = vadd.f32 %v2606_v33, %v2518_v1  ;;  %4710 = vmatmul.msk.bf16.gmra.mxu2 %vm294_vm0, %v3246_v26  ;;  %4726 = vmatmul.msk.bf16.gmra.mxu0 %vm294_vm0, %v3246_v26  ;;  %v3060_v0 = vmul.f32 %v7491_v35, %v3059_v24  ;;  %v3069_v36 = vor.u32 1.1754944e-38, %v3068_v2  ;;  %vm3077_vm3 = vweird.f32 %v7493_v42 }
 0x5f5   : > { %3736 = vmatmul.bf16.vlgmr.msrb.gmra.mxu3 %v3567_v39  ;;  %vm3082_vm5 = vcmp.eq.f32.partialorder %v3081_v19, 8.507059e+37  ;;  %v3084_v56 = vor.u32 1.1754944e-38, %v3083_v53 }
 0x5f6   : > { %v4967_v34 = vpop.eup %4966  ;;  %v4676_v60 = vmul.f32 -1.442695, %v2607_v23  ;;  %v3061_v3 = vadd.f32 %v7491_v35, %v3060_v0  ;;  %v2525_v26 = vpop.f32.mrf.mxu3 }
 0x5f7   : > { %v4969_v18 = vpop.eup %4968  ;;  %v7509_v48 = vadd.f32 1.0, %v4967_v34  ;;  %v3339_v29 = vpop.f32.mrf.mxu2 }
 0x5f8   : > { %v3073_v11 = vmul.f32 %v4969_v18, %v7493_v42  ;;  %4970 = vpow2.f32 %v4676_v60  ;;  %vm3078_vm14 = vweird.f32 %v4969_v18  ;;  %v3065_v23 = vsel %vm7527_vm15, %v7491_v35, %v3061_v3 }
 0x5f9   : > { %4972 = vrcp.f32 %v7509_v48  ;;  %v3430_v22 = vpop.f32.mrf.mxu0  ;;  %vm3079_vm4 = vmor %vm3077_vm3, %vm3078_vm14  ;;  %v8434_v35 = vmax.f32 %v6338_v38, 0.0  ;;  %vm3092_vm7 = vweird.f32 %v7509_v48 }
 0x5fa   : > { %v3074_v7 = vsub.f32 1.0, %v3073_v11  ;;  %v3510_v45 = vmul.f32 %v3430_v22, %v8428_v61 }
 0x5fb   : > { %v2609_v62 = vpop.f32.mrf.mxu1 }
 0x5fc   : > { %v3570_v1 = vpack.c.bf16 %v3510_v45, %v3508_v50  ;;  %v2610_v24 = vadd.f32 %v2609_v62, %v2521_v32  ;;  %v3075_v39 = vmul.f32 %v4969_v18, %v3074_v7  ;;  %v8433_v32 = vmax.f32 %v6334_v16, 0.0 }
 0x5fd   : > { %v3070_v16 = vsel %vm7531_vm2, %v3069_v36, %v3065_v23  ;;  %v2523_v50 = vadd.f32 %v7430_v13, %v2522_v58  ;;  %v2526_v58 = vadd.f32 %v7430_v13, %v2525_v26 }
 0x5fe   : > { %v4971_v17 = vpop.eup %4970  ;;  %v4677_v33 = vmul.f32 -1.442695, %v2610_v24  ;;  %3830 = vmatmul.bf16.gmra.mxu1 %v3570_v1  ;;  %v3076_v34 = vadd.f32 %v4969_v18, %v3075_v39  ;;  %v3507_v11 = vmul.f32 %v3339_v29, %v8433_v32  ;;  %v2527_v24 = vpop.f32.mrf.mxu3 }
 0x5ff   : > { %v7539_v60 = vpop.eup %4972  ;;  %v7541_v0 = vadd.f32 1.0, %v4971_v17  ;;  %v3341_v22 = vpop.f32.mrf.mxu2  ;;  %v3096_v17 = vand.u32 2147483647, %v7509_v48 }
 0x600   : > { %v3088_v2 = vmul.f32 %v7539_v60, %v7509_v48  ;;  %4974 = vpow2.f32 %v4677_v33  ;;  %v3509_v7 = vmul.f32 %v3341_v22, %v8434_v35  ;;  %v3080_v42 = vsel %vm3079_vm4, %v4969_v18, %v3076_v34 }
 0x601   : > { %4976 = vrcp.f32 %v7541_v0  ;;  %v3433_v20 = vpop.f32.mrf.mxu0  ;;  %v3085_v29 = vsel %vm3082_vm5, %v3084_v56, %v3080_v42  ;;  %vm3093_vm6 = vweird.f32 %v7539_v60  ;;  %v3098_v33 = vand.u32 2147483648, %v7509_v48 }
 0x602   : > { %v3089_v61 = vsub.f32 1.0, %v3088_v2  ;;  %v3569_v45 = vpack.c.bf16 %v3509_v7, %v3507_v11  ;;  %v3247_v3 = vpack.c.bf16 %v3085_v29, %v3070_v16  ;;  %v8435_v34 = vmax.f32 %v6674_v28, 0.0  ;;  %vm7575_vm9 = vmor %vm3092_vm7, %vm3093_vm6 }
 0x603   : > { %v2611_v62 = vpop.f32.mrf.mxu1  ;;  %v8436_v11 = vmax.f32 %v6678_v21, 0.0  ;;  %v3111_v2 = vand.u32 2147483647, %v7541_v0  ;;  %v3113_v35 = vand.u32 2147483648, %v7541_v0  ;;  %vm7579_vm10 = vcmp.eq.f32.partialorder %v3096_v17, 8.507059e+37 }
 0x604   : > { %v2612_v19 = vadd.f32 %v2611_v62, %v2523_v50  ;;  %4711 = vmatmul.msk.bf16.gmra.mxu2 %vm294_vm0, %v3247_v3  ;;  %4727 = vmatmul.msk.bf16.gmra.mxu0 %vm294_vm0, %v3247_v3  ;;  %v3090_v53 = vmul.f32 %v7539_v60, %v3089_v61  ;;  %v3512_v32 = vmul.f32 %v3433_v20, %v8435_v34  ;;  %v3099_v20 = vor.u32 1.1754944e-38, %v3098_v33 }
 0x605   : > { %3741 = vmatmul.bf16.gmra.mxu3 %v3569_v45  ;;  %vm3107_vm11 = vweird.f32 %v7541_v0  ;;  %v8441_v62 = vmax.f32 %v6378_v43, 0.0  ;;  %vm3112_vm13 = vcmp.eq.f32.partialorder %v3111_v2, 8.507059e+37  ;;  %v2528_v17 = vadd.f32 %v7430_v13, %v2527_v24 }
 0x606   : > { %v4975_v38 = vpop.eup %4974  ;;  %v4678_v18 = vmul.f32 -1.442695, %v2612_v19  ;;  %v3091_v26 = vadd.f32 %v7539_v60, %v3090_v53  ;;  %v8443_v21 = vmax.f32 %v6730_v57, 0.0 }
 0x607   : > { %v4977_v1 = vpop.eup %4976  ;;  %v7557_v39 = vadd.f32 1.0, %v4975_v38  ;;  %v3344_v41 = vpop.f32.mrf.mxu2 }
 0x608   : > { %v3103_v31 = vmul.f32 %v4977_v1, %v7541_v0  ;;  %4978 = vpow2.f32 %v4678_v18  ;;  %vm3108_vm8 = vweird.f32 %v4977_v1  ;;  %v3095_v50 = vsel %vm7575_vm9, %v7539_v60, %v3091_v26  ;;  %v2530_v0 = vpop.f32.mrf.mxu3 }
 0x609   : > { %4980 = vrcp.f32 %v7557_v39  ;;  %v3435_v36 = vpop.f32.mrf.mxu0  ;;  %v3511_v19 = vmul.f32 %v3344_v41, %v8441_v62  ;;  %vm3109_vm12 = vmor %vm3107_vm11, %vm3108_vm8  ;;  %v3114_v18 = vor.u32 1.1754944e-38, %v3113_v35  ;;  %v8442_v60 = vmax.f32 %v6382_v15, 0.0 }
 0x60a   : > { %v3104_v23 = vsub.f32 1.0, %v3103_v31  ;;  %v3514_v22 = vmul.f32 %v3435_v36, %v8436_v11  ;;  %v3100_v43 = vsel %vm7579_vm10, %v3099_v20, %v3095_v50  ;;  %v2531_v24 = vadd.f32 %v7430_v13, %v2530_v0 }
 0x60b   : > { %v2614_v56 = vpop.f32.mrf.mxu1  ;;  %vm3122_vm15 = vweird.f32 %v7557_v39 }
 0x60c   : > { %v3572_v7 = vpack.c.bf16 %v3514_v22, %v3512_v32  ;;  %v2615_v42 = vadd.f32 %v2614_v56, %v2526_v58  ;;  %v3105_v16 = vmul.f32 %v4977_v1, %v3104_v23 }
 0x60e   : > { %v4979_v48 = vpop.eup %4978  ;;  %v4679_v29 = vmul.f32 -1.442695, %v2615_v42  ;;  %3835 = vmatmul.bf16.gmra.mxu1 %v3572_v7  ;;  %v3106_v61 = vadd.f32 %v4977_v1, %v3105_v16  ;;  %v3126_v42 = vand.u32 2147483647, %v7557_v39  ;;  %v3128_v16 = vand.u32 2147483648, %v7557_v39 }
 0x60f   : > { %v7587_v45 = vpop.eup %4980  ;;  %v7589_v3 = vadd.f32 1.0, %v4979_v48  ;;  %v3346_v38 = vpop.f32.mrf.mxu2  ;;  %v8444_v48 = vmax.f32 %v6734_v30, 0.0 }
 0x610   : > { %v3118_v53 = vmul.f32 %v7587_v45, %v7557_v39  ;;  %4982 = vpow2.f32 %v4679_v29  ;;  %v3513_v58 = vmul.f32 %v3346_v38, %v8442_v60  ;;  %v3110_v31 = vsel %vm3109_vm12, %v4977_v1, %v3106_v61  ;;  %v2532_v61 = vpop.f32.mrf.mxu3 }
 0x611   : > { %4984 = vrcp.f32 %v7589_v3  ;;  %v3438_v36 = vpop.f32.mrf.mxu0  ;;  %v3115_v41 = vsel %vm3112_vm13, %v3114_v18, %v3110_v31  ;;  %vm3123_vm14 = vweird.f32 %v7587_v45  ;;  %v3143_v38 = vand.u32 2147483648, %v7589_v3 }
 0x612   : > { %v3119_v33 = vsub.f32 1.0, %v3118_v53  ;;  %v3571_v23 = vpack.c.bf16 %v3513_v58, %v3511_v19  ;;  %v3248_v34 = vpack.c.bf16 %v3115_v41, %v3100_v43  ;;  %v3516_v20 = vmul.f32 %v3438_v36, %v8443_v21  ;;  %vm7622_vm3 = vmor %vm3122_vm15, %vm3123_vm14 }
 0x613   : > { %v2616_v32 = vpop.f32.mrf.mxu1  ;;  %v3141_v19 = vand.u32 2147483647, %v7589_v3  ;;  %vm7626_vm4 = vcmp.eq.f32.partialorder %v3126_v42, 8.507059e+37  ;;  %v3129_v58 = vor.u32 1.1754944e-38, %v3128_v16  ;;  %vm3137_vm5 = vweird.f32 %v7589_v3 }
 0x614   : > { %v2617_v11 = vadd.f32 %v2616_v32, %v2528_v17  ;;  %4712 = vmatmul.msk.bf16.gmra.mxu2 %vm294_vm0, %v3248_v34  ;;  %4728 = vmatmul.msk.bf16.gmra.mxu0 %vm294_vm0, %v3248_v34  ;;  %v3120_v22 = vmul.f32 %v7587_v45, %v3119_v33  ;;  %v8449_v17 = vmax.f32 %v6416_v12, 0.0  ;;  %v3144_v34 = vor.u32 1.1754944e-38, %v3143_v38 }
 0x615   : > { %3746 = vmatmul.bf16.gmra.mxu3 %v3571_v23  ;;  %vm3142_vm7 = vcmp.eq.f32.partialorder %v3141_v19, 8.507059e+37 }
 0x616   : > { %v4983_v15 = vpop.eup %4982  ;;  %v4680_v1 = vmul.f32 -1.442695, %v2617_v11  ;;  %v3121_v50 = vadd.f32 %v7587_v45, %v3120_v22  ;;  %v2533_v22 = vadd.f32 %v7430_v13, %v2532_v61 }
 0x617   : > { %v4985_v26 = vpop.eup %4984  ;;  %v7604_v56 = vadd.f32 1.0, %v4983_v15  ;;  %v3349_v2 = vpop.f32.mrf.mxu2 }
 0x618   : > { %v3133_v35 = vmul.f32 %v4985_v26, %v7589_v3  ;;  %4986 = vpow2.f32 %v4680_v1  ;;  %vm3138_vm2 = vweird.f32 %v4985_v26  ;;  %v3125_v0 = vsel %vm7622_vm3, %v7587_v45, %v3121_v50 }
 0x619   : > { %4988 = vrcp.f32 %v7604_v56  ;;  %v3440_v7 = vpop.f32.mrf.mxu0  ;;  %v3515_v33 = vmul.f32 %v3349_v2, %v8449_v17  ;;  %vm3139_vm6 = vmor %vm3137_vm5, %vm3138_vm2  ;;  %v8450_v45 = vmax.f32 %v6420_v25, 0.0  ;;  %v3130_v1 = vsel %vm7626_vm4, %v3129_v58, %v3125_v0  ;;  %v2535_v25 = vpop.f32.mrf.mxu3 }
 0x61a   : > { %v3134_v28 = vsub.f32 1.0, %v3133_v35  ;;  %v3518_v29 = vmul.f32 %v3440_v7, %v8444_v48  ;;  %v3158_v19 = vand.u32 2147483648, %v7604_v56  ;;  %vm3152_vm9 = vweird.f32 %v7604_v56 }
 0x61b   : > { %v2619_v62 = vpop.f32.mrf.mxu1 }
 0x61c   : > { %v3574_v18 = vpack.c.bf16 %v3518_v29, %v3516_v20  ;;  %v2620_v53 = vadd.f32 %v2619_v62, %v2531_v24  ;;  %v3135_v60 = vmul.f32 %v4985_v26, %v3134_v28  ;;  %v2536_v29 = vadd.f32 %v7430_v13, %v2535_v25 }
 0x61d   : > { %v3156_v62 = vand.u32 2147483647, %v7604_v56 }
 0x61e   : > { %v4987_v39 = vpop.eup %4986  ;;  %v4681_v31 = vmul.f32 -1.442695, %v2620_v53  ;;  %3840 = vmatmul.bf16.gmra.mxu1 %v3574_v18  ;;  %v3136_v36 = vadd.f32 %v4985_v26, %v3135_v60  ;;  %v8451_v18 = vmax.f32 %v6771_v40, 0.0  ;;  %v8452_v60 = vmax.f32 %v6775_v44, 0.0 }
 0x61f   : > { %v7634_v43 = vpop.eup %4988  ;;  %v7636_v41 = vadd.f32 1.0, %v4987_v39  ;;  %v3351_v23 = vpop.f32.mrf.mxu2  ;;  %vm7673_vm12 = vcmp.eq.f32.partialorder %v3156_v62, 8.507059e+37 }
 0x620   : > { %v3148_v32 = vmul.f32 %v7634_v43, %v7604_v56  ;;  %4990 = vpow2.f32 %v4681_v31  ;;  %v3517_v11 = vmul.f32 %v3351_v23, %v8450_v45  ;;  %v3140_v15 = vsel %vm3139_vm6, %v4985_v26, %v3136_v36 }
 0x621   : > { %4992 = vrcp.f32 %v7636_v41  ;;  %v3443_v3 = vpop.f32.mrf.mxu0  ;;  %v3145_v12 = vsel %vm3142_vm7, %v3144_v34, %v3140_v15  ;;  %vm3153_vm8 = vweird.f32 %v7634_v43  ;;  %v3171_v39 = vand.u32 2147483647, %v7636_v41 }
 0x622   : > { %v3149_v2 = vsub.f32 1.0, %v3148_v32  ;;  %v3573_v24 = vpack.c.bf16 %v3517_v11, %v3515_v33  ;;  %v3249_v35 = vpack.c.bf16 %v3145_v12, %v3130_v1  ;;  %v3520_v53 = vmul.f32 %v3443_v3, %v8451_v18  ;;  %vm7669_vm11 = vmor %vm3152_vm9, %vm3153_vm8  ;;  %v2537_v11 = vpop.f32.mrf.mxu3 }
 0x623   : > { %v2621_v7 = vpop.f32.mrf.mxu1  ;;  %v3173_v31 = vand.u32 2147483648, %v7636_v41  ;;  %v3159_v33 = vor.u32 1.1754944e-38, %v3158_v19  ;;  %vm3167_vm13 = vweird.f32 %v7636_v41  ;;  %v8457_v3 = vmax.f32 %v6460_v55, 0.0 }
 0x624   : > { %v2622_v42 = vadd.f32 %v2621_v7, %v2533_v22  ;;  %4713 = vmatmul.msk.bf16.gmra.mxu2 %vm294_vm0, %v3249_v35  ;;  %4729 = vmatmul.msk.bf16.gmra.mxu0 %vm294_vm0, %v3249_v35  ;;  %v3150_v28 = vmul.f32 %v7634_v43, %v3149_v2  ;;  %vm3172_vm15 = vcmp.eq.f32.partialorder %v3171_v39, 8.507059e+37 }
 0x625   : > { %3751 = vmatmul.bf16.gmra.mxu3 %v3573_v24  ;;  %v3174_v22 = vor.u32 1.1754944e-38, %v3173_v31 }
 0x626   : > { %v4991_v26 = vpop.eup %4990  ;;  %v4682_v16 = vmul.f32 -1.442695, %v2622_v42  ;;  %v3151_v30 = vadd.f32 %v7634_v43, %v3150_v28  ;;  %v2538_v42 = vadd.f32 %v7430_v13, %v2537_v11 }
 0x627   : > { %v4993_v21 = vpop.eup %4992  ;;  %v7651_v20 = vadd.f32 1.0, %v4991_v26  ;;  %v3354_v48 = vpop.f32.mrf.mxu2 }
 0x628   : > { %v3163_v50 = vmul.f32 %v4993_v21, %v7636_v41  ;;  %4994 = vpow2.f32 %v4682_v16  ;;  %vm3168_vm10 = vweird.f32 %v4993_v21  ;;  %v3155_v34 = vsel %vm7669_vm11, %v7634_v43, %v3151_v30 }
 0x629   : > { %4996 = vrcp.f32 %v7651_v20  ;;  %v3445_v61 = vpop.f32.mrf.mxu0  ;;  %v3519_v1 = vmul.f32 %v3354_v48, %v8457_v3  ;;  %vm3169_vm14 = vmor %vm3167_vm13, %vm3168_vm10  ;;  %v8458_v43 = vmax.f32 %v6464_v5, 0.0  ;;  %v3160_v7 = vsel %vm7673_vm12, %v3159_v33, %v3155_v34 }
 0x62a   : > { %v3164_v38 = vsub.f32 1.0, %v3163_v50  ;;  %v3522_v57 = vmul.f32 %v3445_v61, %v8452_v60  ;;  %v3188_v39 = vand.u32 2147483648, %v7651_v20  ;;  %vm3182_vm3 = vweird.f32 %v7651_v20 }
 0x62b   : > { %v2624_v58 = vpop.f32.mrf.mxu1  ;;  %v8465_v3 = vmax.f32 %v6498_v59, 0.0 }
 0x62c   : > { %v3576_v0 = vpack.c.bf16 %v3522_v57, %v3520_v53  ;;  %v2625_v36 = vadd.f32 %v2624_v58, %v2536_v29  ;;  %v3165_v17 = vmul.f32 %v4993_v21, %v3164_v38  ;;  %v3186_v38 = vand.u32 2147483647, %v7651_v20 }
 0x62d   : > { %v8459_v53 = vmax.f32 %v6825_v8, 0.0  ;;  %v8460_v57 = vmax.f32 %v6829_v14, 0.0  ;;  %v3189_v34 = vor.u32 1.1754944e-38, %v3188_v39 }
 0x62e   : > { %v4995_v56 = vpop.eup %4994  ;;  %v4683_v23 = vmul.f32 -1.442695, %v2625_v36  ;;  %3845 = vmatmul.bf16.gmra.mxu1 %v3576_v0  ;;  %v3166_v32 = vadd.f32 %v4993_v21, %v3165_v17  ;;  %vm7715_vm6 = vcmp.eq.f32.partialorder %v3186_v38, 8.507059e+37 }
 0x62f   : > { %v7681_v45 = vpop.eup %4996  ;;  %v2754_v15 = vadd.f32 1.0, %v4995_v56  ;;  %v3356_v12 = vpop.f32.mrf.mxu2 }
 0x630   : > { %v3178_v2 = vmul.f32 %v7681_v45, %v7651_v20  ;;  %4998 = vpow2.f32 %v4683_v23  ;;  %v3521_v24 = vmul.f32 %v3356_v12, %v8458_v43  ;;  %v3170_v41 = vsel %vm3169_vm14, %v4993_v21, %v3166_v32 }
 0x631   : > { %5000 = vrcp.f32 %v2754_v15  ;;  %v3448_v35 = vpop.f32.mrf.mxu0  ;;  %v3175_v55 = vsel %vm3172_vm15, %v3174_v22, %v3170_v41  ;;  %vm3183_vm2 = vweird.f32 %v7681_v45  ;;  %v3201_v31 = vand.u32 2147483647, %v2754_v15 }
 0x632   : > { %v3179_v25 = vsub.f32 1.0, %v3178_v2  ;;  %v3575_v26 = vpack.c.bf16 %v3521_v24, %v3519_v1  ;;  %v3250_v16 = vpack.c.bf16 %v3175_v55, %v3160_v7  ;;  %v3524_v60 = vmul.f32 %v3448_v35, %v8459_v53  ;;  %vm7708_vm5 = vmor %vm3182_vm3, %vm3183_vm2 }
 0x633   : > { %v2626_v28 = vpop.f32.mrf.mxu1  ;;  %v3203_v0 = vand.u32 2147483648, %v2754_v15  ;;  %vm3197_vm7 = vweird.f32 %v2754_v15  ;;  %vm3202_vm9 = vcmp.eq.f32.partialorder %v3201_v31, 8.507059e+37 }
 0x634   : > { %v2627_v48 = vadd.f32 %v2626_v28, %v2538_v42  ;;  %4714 = vmatmul.msk.bf16.gmra.mxu2 %vm294_vm0, %v3250_v16  ;;  %4730 = vmatmul.msk.bf16.gmra.mxu0 %vm294_vm0, %v3250_v16  ;;  %v3180_v29 = vmul.f32 %v7681_v45, %v3179_v25  ;;  %v8468_v28 = vmax.f32 %v6867_v37, 0.0 }
 0x635   : > { %3756 = vmatmul.bf16.gmra.mxu3 %v3575_v26  ;;  %v3204_v32 = vor.u32 1.1754944e-38, %v3203_v0  ;;  %v8467_v26 = vmax.f32 %v6863_v27, 0.0 }
 0x636   : > { %v4999_v5 = vpop.eup %4998  ;;  %v4684_v21 = vmul.f32 -1.442695, %v2627_v48  ;;  %v3181_v58 = vadd.f32 %v7681_v45, %v3180_v29 }
 0x637   : > { %v5001_v50 = vpop.eup %5000  ;;  %v7696_v61 = vadd.f32 1.0, %v4999_v5  ;;  %v3359_v62 = vpop.f32.mrf.mxu2 }
 0x638   : > { %v3193_v19 = vmul.f32 %v5001_v50, %v2754_v15  ;;  %5002 = vpow2.f32 %v4684_v21  ;;  %vm3198_vm4 = vweird.f32 %v5001_v50  ;;  %v3185_v14 = vsel %vm7708_vm5, %v7681_v45, %v3181_v58 }
 0x639   : > { %5004 = vrcp.f32 %v7696_v61  ;;  %v3450_v13 = vpop.f32.mrf.mxu0  ;;  %vm3199_vm8 = vmor %vm3197_vm7, %vm3198_vm4  ;;  %v3523_v1 = vmul.f32 %v3359_v62, %v8465_v3  ;;  %v8466_v45 = vmax.f32 %v6502_v52, 0.0  ;;  %v3190_v15 = vsel %vm7715_vm6, %v3189_v34, %v3185_v14 }
 0x63a   : > { %v3194_v18 = vsub.f32 1.0, %v3193_v19  ;;  %v3526_v30 = vmul.f32 %v3450_v13, %v8460_v57  ;;  %vm3212_vm11 = vweird.f32 %v7696_v61  ;;  %v3216_v21 = vand.u32 2147483647, %v7696_v61 }
 0x63b   : > { %v3218_v29 = vand.u32 2147483648, %v7696_v61  ;;  %vm4226_vm4 = vcmask 785408  }
 0x63c   : > { %v3578_v36 = vpack.c.bf16 %v3526_v30, %v3524_v60  ;;  %v3195_v17 = vmul.f32 %v5001_v50, %v3194_v18  ;;  %vm3217_vm15 = vcmp.eq.f32.partialorder %v3216_v21, 8.507059e+37  ;;  %v8471_v60 = vmax.f32 %v6536_v6, 0.0 }
 0x63d   : > { %v3219_v53 = vor.u32 1.1754944e-38, %v3218_v29  ;;  %v8472_v30 = vmax.f32 %v6540_v46, 0.0  ;;  %v8473_v6 = vmax.f32 %v6903_v54, 0.0  ;;  %v8474_v46 = vmax.f32 %v6907_v49, 0.0 }
 0x63e   : > { %v5003_v8 = vpop.eup %5002  ;;  %3850 = vmatmul.bf16.gmra.mxu1 %v3578_v36  ;;  %v3196_v33 = vadd.f32 %v5001_v50, %v3195_v17  ;;  %v8479_v49 = vmax.f32 %v6939_v9, 0.0 }
 0x63f   : > { %v5005_v56 = vpop.eup %5004  ;;  %v2756_v20 = vadd.f32 1.0, %v5003_v8  ;;  %v3361_v23 = vpop.f32.mrf.mxu2 }
 0x640   : > { %v3208_v11 = vmul.f32 %v5005_v56, %v7696_v61  ;;  %v3525_v12 = vmul.f32 %v3361_v23, %v8466_v45  ;;  %v3200_v22 = vsel %vm3199_vm8, %v5001_v50, %v3196_v33  ;;  %vm3213_vm10 = vweird.f32 %v5005_v56 }
 0x641   : > { %5006 = vrcp.f32 %v2756_v20  ;;  %v3453_v2 = vpop.f32.mrf.mxu0  ;;  %v3205_v43 = vsel %vm3202_vm9, %v3204_v32, %v3200_v22  ;;  %v3233_v50 = vand.u32 2147483648, %v2756_v20  ;;  %v3231_v13 = vand.u32 2147483647, %v2756_v20  ;;  %vm7735_vm13 = vmor %vm3212_vm11, %vm3213_vm10  ;;  %v8477_v22 = vld [vmem:[#allocation50_spill] sm:$0xff] }
 0x642   : > { %v3209_v24 = vsub.f32 1.0, %v3208_v11  ;;  %v3577_v41 = vpack.c.bf16 %v3525_v12, %v3523_v1  ;;  %v3251_v35 = vpack.c.bf16 %v3205_v43, %v3190_v15  ;;  %v3528_v16 = vmul.f32 %v3453_v2, %v8467_v26  ;;  %v7766_v26 = vld [vmem:[%s8061_s4 + $0x5] ss:$0 sm:$0xff] }
 0x643   : > { %vm3227_vm14 = vweird.f32 %v2756_v20  ;;  %v3234_v61 = vor.u32 1.1754944e-38, %v3233_v50  ;;  %vm3232_vm3 = vcmp.eq.f32.partialorder %v3231_v13, 8.507059e+37  ;;  %v8475_v23 = vmax.f32 %v6584_v47, 0.0  ;;  %v8480_v47 = vld [vmem:[#allocation46_spill] sm:$0xff]  ;;  %v8486_v50 = vld [vmem:[#allocation33_spill] sm:$0xff] }
 0x644   : > { %4715 = vmatmul.msk.bf16.gmra.mxu2 %vm294_vm0, %v3251_v35  ;;  %4731 = vmatmul.msk.bf16.gmra.mxu0 %vm294_vm0, %v3251_v35  ;;  %v3210_v59 = vmul.f32 %v5005_v56, %v3209_v24  ;;  %v8476_v32 = vmax.f32 %v6588_v10, 0.0  ;;  %v8478_v54 = vmax.f32 %v8477_v22, 0.0  ;;  %v8481_v35 = vmax.f32 %v8480_v47, 0.0  ;;  %v8482_v10 = vld [vmem:[#allocation5_spill] sm:$0xff] }
 0x645   : > { %3761 = vmatmul.bf16.gmra.mxu3 %v3577_v41  ;;  %v8498_v22 = vld [vmem:[#allocation81_spill] sm:$0xff] }
 0x646   : > { %v3211_v5 = vadd.f32 %v5005_v56, %v3210_v59 }
 0x647   : > { %v5007_v7 = vpop.eup %5006  ;;  %v3364_v55 = vpop.f32.mrf.mxu2 }
 0x648   : > { %v3223_v52 = vmul.f32 %v5007_v7, %v2756_v20  ;;  %vm3228_vm12 = vweird.f32 %v5007_v7  ;;  %v3215_v27 = vsel %vm7735_vm13, %v5005_v56, %v3211_v5  ;;  %v3527_v57 = vmul.f32 %v3364_v55, %v8471_v60  ;;  %v8484_v5 = vld [vmem:[#allocation79_spill] sm:$0xff]  ;;  %v8490_v60 = vld [vmem:[#allocation18_spill] sm:$0xff] }
 0x649   : > { %v3455_v42 = vpop.f32.mrf.mxu0  ;;  %vm3229_vm2 = vmor %vm3227_vm14, %vm3228_vm12  ;;  %v3220_v0 = vsel %vm3217_vm15, %v3219_v53, %v3215_v27  ;;  %v8485_v21 = vmax.f32 %v8484_v5, 0.0 }
 0x64a   : > { %v3224_v25 = vsub.f32 1.0, %v3223_v52  ;;  %v3530_v48 = vmul.f32 %v3455_v42, %v8468_v28 }
 0x64c   : > { %v3580_v62 = vpack.c.bf16 %v3530_v48, %v3528_v16  ;;  %v3225_v19 = vmul.f32 %v5007_v7, %v3224_v25 }
 0x64e   : > { %3855 = vmatmul.bf16.gmra.mxu1 %v3580_v62  ;;  %v3226_v37 = vadd.f32 %v5007_v7, %v3225_v19  ;;  %v8487_v62 = vmax.f32 %v8486_v50, 0.0 }
 0x64f   : > { %v3366_v18 = vpop.f32.mrf.mxu2 }
 0x650   : > { %v3529_v58 = vmul.f32 %v3366_v18, %v8472_v30  ;;  %v3230_v39 = vsel %vm3229_vm2, %v5007_v7, %v3226_v37  ;;  %v8483_v7 = vmax.f32 %v8482_v10, 0.0  ;;  %v8488_v18 = vld [vmem:[#allocation16_spill] sm:$0xff] }
 0x651   : > { %v3458_v31 = vpop.f32.mrf.mxu0  ;;  %v3235_v36 = vsel %vm3232_vm3, %v3234_v61, %v3230_v39  ;;  %v8489_v53 = vmax.f32 %v8488_v18, 0.0 }
 0x652   : > { %v3579_v17 = vpack.c.bf16 %v3529_v58, %v3527_v57  ;;  %v3252_v40 = vpack.c.bf16 %v3235_v36, %v3220_v0  ;;  %v3532_v44 = vmul.f32 %v3458_v31, %v8473_v6  ;;  %v8491_v57 = vmax.f32 %v8490_v60, 0.0 }
 0x654   : > { %4716 = vmatmul.msk.bf16.gmra.mxu2 %vm294_vm0, %v3252_v40  ;;  %4732 = vmatmul.msk.bf16.gmra.mxu0 %vm294_vm0, %v3252_v40 }
 0x655   : > { %3766 = vmatmul.bf16.gmra.mxu3 %v3579_v17 }
 0x657   : > { %v3369_v8 = vpop.f32.mrf.mxu2 }
 0x658   : > { %v3531_v34 = vmul.f32 %v3369_v8, %v8475_v23 }
 0x659   : > { %v3460_v14 = vpop.f32.mrf.mxu0 }
 0x65a   : > { %v3534_v33 = vmul.f32 %v3460_v14, %v8474_v46 }
 0x65c   : > { %v3582_v56 = vpack.c.bf16 %v3534_v33, %v3532_v44  ;;  %v8492_v44 = vld [vmem:[#allocation36_spill] sm:$0xff] }
 0x65d   : > { %v8493_v46 = vmax.f32 %v8492_v44, 0.0 }
 0x65e   : > { %3860 = vmatmul.bf16.gmra.mxu1 %v3582_v56  ;;  %v8494_v56 = vld [vmem:[#allocation29_spill] sm:$0xff] }
 0x65f   : > { %v3371_v20 = vpop.f32.mrf.mxu2 }
 0x660   : > { %v3533_v11 = vmul.f32 %v3371_v20, %v8476_v32  ;;  %v8495_v20 = vmax.f32 %v8494_v56, 0.0 }
 0x661   : > { %v3463_v3 = vpop.f32.mrf.mxu0 }
 0x662   : > { %v3581_v1 = vpack.c.bf16 %v3533_v11, %v3531_v34  ;;  %v3536_v2 = vmul.f32 %v3463_v3, %v8478_v54  ;;  %v8499_v54 = vmax.f32 %v8498_v22, 0.0 }
 0x665   : > { %3771 = vmatmul.bf16.gmra.mxu3 %v3581_v1  ;;  %v8496_v1 = vld [vmem:[#allocation43_spill] sm:$0xff] }
 0x667   : > { %v3374_v45 = vpop.f32.mrf.mxu2 }
 0x668   : > { %v3535_v59 = vmul.f32 %v3374_v45, %v8481_v35  ;;  %v8497_v45 = vmax.f32 %v8496_v1, 0.0 }
 0x669   : > { %v3465_v12 = vpop.f32.mrf.mxu0 }
 0x66a   : > { %v3538_v15 = vmul.f32 %v3465_v12, %v8479_v49 }
 0x66b   : > { %v3826_v43 = vpop.f32.mrf.mxu1 }
 0x66c   : > { %v3584_v24 = vpack.c.bf16 %v3538_v15, %v3536_v2 }
 0x66e   : > { %3865 = vmatmul.bf16.gmra.mxu1 %v3584_v24 }
 0x66f   : > { %v3376_v41 = vpop.f32.mrf.mxu2 }
 0x670   : > { %v3537_v55 = vmul.f32 %v3376_v41, %v8483_v7 }
 0x671   : > { %v3468_v52 = vpop.f32.mrf.mxu0 }
 0x672   : > { %v3583_v42 = vpack.c.bf16 %v3537_v55, %v3535_v59  ;;  %v3540_v29 = vmul.f32 %v3468_v52, %v8485_v21  ;;  %v8500_v55 = vld [vmem:[#allocation32_spill] sm:$0xff] }
 0x673   : > { %v3828_v25 = vpop.f32.mrf.mxu1  ;;  %v8501_v52 = vmax.f32 %v8500_v55, 0.0  ;;  %v8519_v55 = vld [vmem:[#allocation30_spill] sm:$0xff] }
 0x675   : > { %3776 = vmatmul.bf16.gmra.mxu3 %v3583_v42 }
 0x677   : > { %v3379_v9 = vpop.f32.mrf.mxu2 }
 0x678   : > { %v3737_v16 = vpop.f32.mrf.mxu3  ;;  %v3539_v61 = vmul.f32 %v3379_v9, %v8489_v53 }
 0x679   : > { %v3738_v28 = vadd.f32 %v3737_v16, %v7766_v26  ;;  %v3470_v48 = vpop.f32.mrf.mxu0 }
 0x67a   : > { %v3542_v19 = vmul.f32 %v3470_v48, %v8487_v62 }
 0x67b   : > { %v3827_v13 = vadd.f32 %v3826_v43, %v3738_v28  ;;  %v3831_v38 = vpop.f32.mrf.mxu1 }
 0x67c   : > { %v3586_v27 = vpack.c.bf16 %v3542_v19, %v3540_v29  ;;  %v8504_v29 = vld [vmem:[#allocation20_spill] sm:$0xff]  ;;  %v8506_v19 = vld [vmem:[#allocation23_spill] sm:$0xff] }
 0x67d   : > { %4066 = vrot.lane.b32.xlu2 %v3827_v13, %s5074_s26  ;;  %v8505_v50 = vmax.f32 %v8504_v29, 0.0  ;;  %v8507_v13 = vmax.f32 %v8506_v19, 0.0 }
 0x67e   : > { %3870 = vmatmul.bf16.gmra.mxu1 %v3586_v27 }
 0x67f   : > { %v3381_v37 = vpop.f32.mrf.mxu2 }
 0x680   : > { %v3541_v30 = vmul.f32 %v3381_v37, %v8491_v57  ;;  %v3739_v58 = vpop.f32.mrf.mxu3 }
 0x681   : > { %v3740_v39 = vadd.f32 %v3739_v58, %v7766_v26  ;;  %v3473_v31 = vpop.f32.mrf.mxu0 }
 0x682   : > { %v3585_v0 = vpack.c.bf16 %v3541_v30, %v3539_v61  ;;  %v3544_v33 = vmul.f32 %v3473_v31, %v8493_v46  ;;  %v8508_v31 = vmax.f32 %v7129_v4, 0.0  ;;  %v8511_v46 = vld [vmem:[#allocation7_spill] sm:$0xff] }
 0x683   : > { %v3829_v36 = vadd.f32 %v3828_v25, %v3740_v39  ;;  %v3833_v17 = vpop.f32.mrf.mxu1  ;;  %v8502_v25 = vld [vmem:[#allocation6_spill] sm:$0xff] }
 0x684   : > { %v8503_v9 = vmax.f32 %v8502_v25, 0.0  ;;  %v8521_v25 = vld [vmem:[#allocation31_spill] sm:$0xff] }
 0x685   : > { %4068 = vrot.lane.b32.xlu0 %v3829_v36, %s5074_s26  ;;  %3781 = vmatmul.bf16.gmra.mxu3 %v3585_v0  ;;  %v8509_v36 = vld [vmem:[#allocation54_spill] sm:$0xff] }
 0x687   : > { %v3384_v40 = vpop.f32.mrf.mxu2 }
 0x688   : > { %v3742_v8 = vpop.f32.mrf.mxu3  ;;  %v3543_v12 = vmul.f32 %v3384_v40, %v8497_v45 }
 0x689   : > { %v3743_v14 = vadd.f32 %v3742_v8, %v7766_v26  ;;  %v3475_v6 = vpop.f32.mrf.mxu0 }
 0x68a   : > { %v3546_v23 = vmul.f32 %v3475_v6, %v8495_v20  ;;  %v8513_v20 = vld [vmem:[#allocation4_spill] sm:$0xff] }
 0x68b   : > { %v3832_v34 = vadd.f32 %v3831_v38, %v3743_v14  ;;  %v3836_v32 = vpop.f32.mrf.mxu1 }
 0x68c   : > { %v3588_v11 = vpack.c.bf16 %v3546_v23, %v3544_v33  ;;  %v8512_v33 = vmax.f32 %v8511_v46, 0.0  ;;  %v8514_v23 = vmax.f32 %v8513_v20, 0.0 }
 0x68d   : > { %4070 = vrot.lane.b32.xlu1 %v3832_v34, %s5074_s26 }
 0x68e   : > { %3875 = vmatmul.bf16.gmra.mxu1 %v3588_v11 }
 0x68f   : > { %v3386_v3 = vpop.f32.mrf.mxu2 }
 0x690   : > { %v3545_v2 = vmul.f32 %v3386_v3, %v8499_v54  ;;  %v3744_v49 = vpop.f32.mrf.mxu3 }
 0x691   : > { %v3745_v15 = vadd.f32 %v3744_v49, %v7766_v26  ;;  %v3478_v43 = vpop.f32.mrf.mxu0  ;;  %v8515_v49 = vld [vmem:[#allocation55_spill] sm:$0xff] }
 0x692   : > { %v3587_v24 = vpack.c.bf16 %v3545_v2, %v3543_v12  ;;  %v3548_v42 = vmul.f32 %v3478_v43, %v8501_v52  ;;  %v8520_v52 = vmax.f32 %v8519_v55, 0.0  ;;  %v8536_v55 = vld [vmem:[#allocation84_spill] sm:$0xff] }
 0x693   : > { %v3834_v41 = vadd.f32 %v3833_v17, %v3745_v15  ;;  %v3838_v47 = vpop.f32.mrf.mxu1  ;;  %v8510_v17 = vmax.f32 %v8509_v36, 0.0  ;;  %v8516_v15 = vmax.f32 %v8515_v49, 0.0  ;;  %v8526_v36 = vld [vmem:[#allocation25_spill] sm:$0xff]  ;;  %v8532_v49 = vld [vmem:[#allocation40_spill] sm:$0xff] }
 0x695   : > { %4072 = vrot.lane.b32.xlu2 %v3834_v41, %s5074_s26  ;;  %3786 = vmatmul.bf16.gmra.mxu3 %v3587_v24  ;;  %v8517_v24 = vld [vmem:[#allocation38_spill] sm:$0xff] }
 0x696   : > { %v8518_v41 = vmax.f32 %v8517_v24, 0.0  ;;  %v8534_v24 = vld [vmem:[#allocation35_spill] sm:$0xff] }
 0x697   : > { %v3389_v35 = vpop.f32.mrf.mxu2 }
 0x698   : > { %v3747_v59 = vpop.f32.mrf.mxu3  ;;  %v3547_v62 = vmul.f32 %v3389_v35, %v8505_v50 }
 0x699   : > { %v3748_v10 = vadd.f32 %v3747_v59, %v7766_v26  ;;  %v3480_v7 = vpop.f32.mrf.mxu0 }
 0x69a   : > { %v3550_v16 = vmul.f32 %v3480_v7, %v8503_v9  ;;  %v8522_v9 = vmax.f32 %v8521_v25, 0.0  ;;  %v8538_v25 = vld [vmem:[#allocation58_spill] sm:$0xff] }
 0x69b   : > { %v3837_v28 = vadd.f32 %v3836_v32, %v3748_v10  ;;  %v3841_v48 = vpop.f32.mrf.mxu1 }
 0x69c   : > { %v3590_v5 = vpack.c.bf16 %v3550_v16, %v3548_v42 }
 0x69d   : > { %4074 = vrot.lane.b32.xlu0 %v3837_v28, %s5074_s26 }
 0x69e   : > { %3880 = vmatmul.bf16.gmra.mxu1 %v3590_v5 }
 0x69f   : > { %v3391_v21 = vpop.f32.mrf.mxu2 }
 0x6a0   : > { %v3549_v38 = vmul.f32 %v3391_v21, %v8507_v13  ;;  %v3749_v27 = vpop.f32.mrf.mxu3 }
 0x6a1   : > { %v3750_v37 = vadd.f32 %v3749_v27, %v7766_v26  ;;  %v3483_v18 = vpop.f32.mrf.mxu0  ;;  %v8523_v27 = vmax.f32 %v7242_v51, 0.0 }
 0x6a2   : > { %v3589_v53 = vpack.c.bf16 %v3549_v38, %v3547_v62  ;;  %v3552_v0 = vmul.f32 %v3483_v18, %v8508_v31  ;;  %v8524_v18 = vmax.f32 %v7246_v63, 0.0  ;;  %v7836_v31 = vpop.permute.xlu2 %3996 }
 0x6a3   : > { %v3839_v61 = vadd.f32 %v3838_v47, %v3750_v37  ;;  %v3843_v60 = vpop.f32.mrf.mxu1 }
 0x6a5   : > { %4076 = vrot.lane.b32.xlu1 %v3839_v61, %s5074_s26  ;;  %3791 = vmatmul.bf16.gmra.mxu3 %v3589_v53 }
 0x6a7   : > { %v3394_v57 = vpop.f32.mrf.mxu2 }
 0x6a8   : > { %v3752_v30 = vpop.f32.mrf.mxu3  ;;  %v3551_v56 = vmul.f32 %v3394_v57, %v8512_v33 }
 0x6a9   : > { %v3753_v58 = vadd.f32 %v3752_v30, %v7766_v26  ;;  %v3485_v39 = vpop.f32.mrf.mxu0  ;;  %v5058_v30 = vld [vmem:[%s5151_s15] sm:$0xff] }
 0x6aa   : > { %v3554_v40 = vmul.f32 %v3485_v39, %v8510_v17  ;;  %v8527_v17 = vmax.f32 %v8526_v36, 0.0 }
 0x6ab   : > { %v3842_v8 = vadd.f32 %v3841_v48, %v3753_v58  ;;  %v3846_v14 = vpop.f32.mrf.mxu1  ;;  %v8525_v58 = vld [vmem:[#allocation2_spill] sm:$0xff] }
 0x6ac   : > { %v3592_v6 = vpack.c.bf16 %v3554_v40, %v3552_v0  ;;  %v1864_v39 = vmul.f32 %v5058_v30, %v8525_v58  ;;  %v8528_v40 = vld [vmem:[#allocation27_spill] sm:$0xff]  ;;  %v7885_v58 = vpop.permute.xlu1 %4000 }
 0x6ad   : > { %4078 = vrot.lane.b32.xlu2 %v3842_v8, %s5074_s26  ;;  %v8529_v8 = vmax.f32 %v8528_v40, 0.0 }
 0x6ae   : > { %3885 = vmatmul.bf16.gmra.mxu1 %v3592_v6  ;;  %v7845_v6 = vld [vmem:[%s8061_s4 + $0x7] ss:$0 sm:$0xff] }
 0x6af   : > { %v3396_v44 = vpop.f32.mrf.mxu2 }
 0x6b0   : > { %v3553_v34 = vmul.f32 %v3396_v44, %v8514_v23  ;;  %v3754_v32 = vpop.f32.mrf.mxu3  ;;  %v1896_v44 = vadd.f32 %v7845_v6, %v1864_v39 }
 0x6b1   : > { %v3755_v4 = vadd.f32 %v3754_v32, %v7766_v26  ;;  %v3488_v11 = vpop.f32.mrf.mxu0 }
 0x6b2   : > { %v3591_v3 = vpack.c.bf16 %v3553_v34, %v3551_v56  ;;  %v3556_v43 = vmul.f32 %v3488_v11, %v8516_v15  ;;  %v8530_v34 = vld [vmem:[#allocation9_spill] sm:$0xff]  ;;  %v8533_v15 = vmax.f32 %v8532_v49, 0.0 }
 0x6b3   : > { %v3844_v1 = vadd.f32 %v3843_v60, %v3755_v4  ;;  %v3848_v45 = vpop.f32.mrf.mxu1  ;;  %v1928_v32 = vadd.f32 %v1896_v44, %v8530_v34  ;;  %v8531_v4 = vld [vmem:[#allocation88_spill] sm:$0xff]  ;;  %v8542_v44 = vld [vmem:[#allocation83_spill] sm:$0xff] }
 0x6b5   : > { %4080 = vrot.lane.b32.xlu0 %v3844_v1, %s5074_s26  ;;  %3796 = vmatmul.bf16.gmra.mxu3 %v3591_v3  ;;  %v4162_v11 = vsel %vm294_vm0, %v1928_v32, %v8531_v4  ;;  %v8543_v4 = vld [vmem:[#allocation93_spill] sm:$0xff] }
 0x6b7   : > { %v3399_v12 = vpop.f32.mrf.mxu2 }
 0x6b8   : > { %v3757_v22 = vpop.f32.mrf.mxu3  ;;  %v3555_v42 = vmul.f32 %v3399_v12, %v8520_v52  ;;  %v8537_v52 = vmax.f32 %v8536_v55, 0.0 }
 0x6b9   : > { %v3758_v54 = vadd.f32 %v3757_v22, %v7766_v26  ;;  %v3490_v2 = vpop.f32.mrf.mxu0 }
 0x6ba   : > { %v3558_v47 = vmul.f32 %v3490_v2, %v8518_v41  ;;  %v8535_v41 = vmax.f32 %v8534_v24, 0.0 }
 0x6bb   : > { %v3847_v35 = vadd.f32 %v3846_v14, %v3758_v54  ;;  %v3851_v59 = vpop.f32.mrf.mxu1 }
 0x6bc   : > { %v3594_v10 = vpack.c.bf16 %v3558_v47, %v3556_v43 }
 0x6bd   : > { %4082 = vrot.lane.b32.xlu1 %v3847_v35, %s5074_s26 }
 0x6be   : > { %3890 = vmatmul.bf16.gmra.mxu1 %v3594_v10 }
 0x6bf   : > { %v3401_v7 = vpop.f32.mrf.mxu2 }
 0x6c0   : > { %v3557_v16 = vmul.f32 %v3401_v7, %v8522_v9  ;;  %v3759_v28 = vpop.f32.mrf.mxu3  ;;  %v8539_v9 = vmax.f32 %v8538_v25, 0.0 }
 0x6c1   : > { %v3760_v48 = vadd.f32 %v3759_v28, %v7766_v26  ;;  %v3493_v5 = vpop.f32.mrf.mxu0 }
 0x6c2   : > { %v3593_v21 = vpack.c.bf16 %v3557_v16, %v3555_v42  ;;  %v3560_v37 = vmul.f32 %v3493_v5, %v8523_v27 }
 0x6c3   : > { %v3849_v29 = vadd.f32 %v3848_v45, %v3760_v48  ;;  %v3853_v50 = vpop.f32.mrf.mxu1 }
 0x6c5   : > { %4084 = vrot.lane.b32.xlu2 %v3849_v29, %s5074_s26  ;;  %3801 = vmatmul.bf16.gmra.mxu3 %v3593_v21 }
 0x6c7   : > { %v3404_v62 = vpop.f32.mrf.mxu2 }
 0x6c8   : > { %v3762_v19 = vpop.f32.mrf.mxu3  ;;  %v3559_v51 = vmul.f32 %v3404_v62, %v8527_v17 }
 0x6c9   : > { %v3763_v13 = vadd.f32 %v3762_v19, %v7766_v26  ;;  %v3495_v38 = vpop.f32.mrf.mxu0 }
 0x6ca   : > { %v3562_v53 = vmul.f32 %v3495_v38, %v8524_v18  ;;  %v7877_v38 = vpop.permute.xlu0 %3998 }
 0x6cb   : > { %v3852_v61 = vadd.f32 %v3851_v59, %v3763_v13  ;;  %v3856_v60 = vpop.f32.mrf.mxu1 }
 0x6cc   : > { %v3596_v57 = vpack.c.bf16 %v3562_v53, %v3560_v37  ;;  %v8540_v37 = vld [vmem:[#allocation90_spill] sm:$0xff] }
 0x6cd   : > { %4086 = vrot.lane.b32.xlu0 %v3852_v61, %s5074_s26 }
 0x6ce   : > { %3895 = vmatmul.bf16.gmra.mxu1 %v3596_v57 }
 0x6cf   : > { %v3406_v0 = vpop.f32.mrf.mxu2 }
 0x6d0   : > { %v3561_v63 = vmul.f32 %v3406_v0, %v8529_v8  ;;  %v3764_v14 = vpop.f32.mrf.mxu3  ;;  %v8541_v0 = vld [vmem:[#allocation87_spill] sm:$0xff] }
 0x6d1   : > { %v3765_v46 = vadd.f32 %v3764_v14, %v7766_v26  ;;  %v3498_v33 = vpop.f32.mrf.mxu0 }
 0x6d2   : > { %v3595_v56 = vpack.c.bf16 %v3561_v63, %v3559_v51  ;;  %v3564_v43 = vmul.f32 %v3498_v33, %v8533_v15 }
 0x6d3   : > { %v3854_v20 = vadd.f32 %v3853_v50, %v3765_v46  ;;  %v3858_v23 = vpop.f32.mrf.mxu1 }
 0x6d5   : > { %4088 = vrot.lane.b32.xlu1 %v3854_v20, %s5074_s26  ;;  %3806 = vmatmul.bf16.gmra.mxu3 %v3595_v56 }
 0x6d7   : > { %v4067_v3 = vpop.permute.xlu2 %4066  ;;  %v3409_v1 = vpop.f32.mrf.mxu2 }
 0x6d8   : > { %v4194_v45 = vsel %vm535_vm1, %v4162_v11, %v4067_v3  ;;  %v3767_v12 = vpop.f32.mrf.mxu3  ;;  %v3563_v42 = vmul.f32 %v3409_v1, %v8537_v52 }
 0x6d9   : > { %v4227_v22 = vsel %vm4226_vm4, %v4194_v45, 0.0  ;;  %v3768_v54 = vadd.f32 %v3767_v12, %v7766_v26  ;;  %v3500_v2 = vpop.f32.mrf.mxu0 }
 0x6da   : > { %4259 = vst [vmem:[%s7858_s7] sm:$0xff] %v4227_v22  ;;  %v3566_v47 = vmul.f32 %v3500_v2, %v8535_v41  ;;  %v8544_v2 = vld [vmem:[#allocation91_spill] sm:$0xff] }
 0x6db   : > { %v3857_v35 = vadd.f32 %v3856_v60, %v3768_v54  ;;  %v3861_v59 = vpop.f32.mrf.mxu1 }
 0x6dc   : > { %v3598_v10 = vpack.c.bf16 %v3566_v47, %v3564_v43 }
 0x6dd   : > { %4090 = vrot.lane.b32.xlu2 %v3857_v35, %s5074_s26 }
 0x6de   : > { %3900 = vmatmul.bf16.gmra.mxu1 %v3598_v10 }
 0x6df   : > { %v3411_v7 = vpop.f32.mrf.mxu2 }
 0x6e0   : > { %v3565_v16 = vmul.f32 %v3411_v7, %v8539_v9  ;;  %v3769_v28 = vpop.f32.mrf.mxu3 }
 0x6e1   : > { %v3770_v48 = vadd.f32 %v3769_v28, %v7766_v26 }
 0x6e2   : > { %v3597_v5 = vpack.c.bf16 %v3565_v16, %v3563_v42  ;;  %v8546_v16 = vld [vmem:[#allocation96_spill] sm:$0xff] }
 0x6e3   : > { %v3859_v21 = vadd.f32 %v3858_v23, %v3770_v48  ;;  %v3863_v29 = vpop.f32.mrf.mxu1 }
 0x6e5   : > { %4092 = vrot.lane.b32.xlu0 %v3859_v21, %s5074_s26  ;;  %3811 = vmatmul.bf16.gmra.mxu3 %v3597_v5 }
 0x6e8   : > { %v3772_v50 = vpop.f32.mrf.mxu3 }
 0x6e9   : > { %v3773_v62 = vadd.f32 %v3772_v50, %v7766_v26 }
 0x6eb   : > { %v3862_v19 = vadd.f32 %v3861_v59, %v3773_v62  ;;  %v3866_v13 = vpop.f32.mrf.mxu1  ;;  %v8545_v59 = vld [vmem:[#allocation89_spill] sm:$0xff] }
 0x6ed   : > { %4094 = vrot.lane.b32.xlu1 %v3862_v19, %s5074_s26  ;;  %v8547_v19 = vld [vmem:[#allocation94_spill] sm:$0xff] }
 0x6ef   : > { %v4073_v27 = vpop.permute.xlu2 %4072 }
 0x6f0   : > { %v4197_v18 = vsel %vm535_vm1, %v8540_v37, %v4073_v27  ;;  %v3774_v53 = vpop.f32.mrf.mxu3 }
 0x6f1   : > { %v4230_v61 = vsel %vm4226_vm4, %v4197_v18, 0.0  ;;  %v3775_v60 = vadd.f32 %v3774_v53, %v7766_v26 }
 0x6f2   : > { %4262 = vst [vmem:[%s7858_s7 + $0x18] sm:$0xff] %v4230_v61 }
 0x6f3   : > { %v3864_v57 = vadd.f32 %v3863_v29, %v3775_v60  ;;  %v3868_v30 = vpop.f32.mrf.mxu1 }
 0x6f5   : > { %4096 = vrot.lane.b32.xlu2 %v3864_v57, %s5074_s26  ;;  %v8548_v57 = vld [vmem:[#allocation92_spill] sm:$0xff] }
 0x6f7   : > { %v4069_v39 = vpop.permute.xlu0 %4068 }
 0x6f8   : > { %v4195_v36 = vsel %vm535_vm1, %v8541_v0, %v4069_v39  ;;  %v3777_v17 = vpop.f32.mrf.mxu3 }
 0x6f9   : > { %v4228_v51 = vsel %vm4226_vm4, %v4195_v36, 0.0  ;;  %v3778_v40 = vadd.f32 %v3777_v17, %v7766_v26 }
 0x6fa   : > { %4260 = vst [vmem:[%s7858_s7 + $0x8] sm:$0xff] %v4228_v51 }
 0x6fb   : > { %v3867_v8 = vadd.f32 %v3866_v13, %v3778_v40  ;;  %v3871_v63 = vpop.f32.mrf.mxu1 }
 0x6fd   : > { %4098 = vrot.lane.b32.xlu0 %v3867_v8, %s5074_s26  ;;  %v8549_v8 = vld [vmem:[#allocation99_spill] sm:$0xff] }
 0x6ff   : > { %v4071_v14 = vpop.permute.xlu1 %4070 }
 0x700   : > { %v4196_v46 = vsel %vm535_vm1, %v8542_v44, %v4071_v14  ;;  %v3779_v33 = vpop.f32.mrf.mxu3 }
 0x701   : > { %v4229_v56 = vsel %vm4226_vm4, %v4196_v46, 0.0  ;;  %v3780_v20 = vadd.f32 %v3779_v33, %v7766_v26 }
 0x702   : > { %4261 = vst [vmem:[%s7858_s7 + $0x10] sm:$0xff] %v4229_v56 }
 0x703   : > { %v3869_v23 = vadd.f32 %v3868_v30, %v3780_v20  ;;  %v3873_v34 = vpop.f32.mrf.mxu1 }
 0x705   : > { %4100 = vrot.lane.b32.xlu1 %v3869_v23, %s5074_s26  ;;  %v8550_v23 = vld [vmem:[#allocation97_spill] sm:$0xff] }
 0x707   : > { %v4079_v32 = vpop.permute.xlu2 %4078 }
 0x708   : > { %v4200_v11 = vsel %vm535_vm1, %v8543_v4, %v4079_v32  ;;  %v3782_v3 = vpop.f32.mrf.mxu3 }
 0x709   : > { %v4233_v1 = vsel %vm4226_vm4, %v4200_v11, 0.0  ;;  %v3783_v45 = vadd.f32 %v3782_v3, %v7766_v26 }
 0x70a   : > { %4265 = vst [vmem:[%s7858_s7 + $0x30] sm:$0xff] %v4233_v1 }
 0x70b   : > { %v3872_v12 = vadd.f32 %v3871_v63, %v3783_v45  ;;  %v3876_v22 = vpop.f32.mrf.mxu1  ;;  %v8551_v45 = vld [vmem:[#allocation95_spill] sm:$0xff] }
 0x70d   : > { %4102 = vrot.lane.b32.xlu2 %v3872_v12, %s5074_s26 }
 0x70f   : > { %v4075_v54 = vpop.permute.xlu0 %4074 }
 0x710   : > { %v4198_v49 = vsel %vm535_vm1, %v8544_v2, %v4075_v54  ;;  %v3784_v15 = vpop.f32.mrf.mxu3 }
 0x711   : > { %v4231_v43 = vsel %vm4226_vm4, %v4198_v49, 0.0  ;;  %v3785_v24 = vadd.f32 %v3784_v15, %v7766_v26 }
 0x712   : > { %4263 = vst [vmem:[%s7858_s7 + $0x20] sm:$0xff] %v4231_v43 }
 0x713   : > { %v3874_v41 = vadd.f32 %v3873_v34, %v3785_v24  ;;  %v3878_v47 = vpop.f32.mrf.mxu1  ;;  %v8552_v24 = vld [vmem:[#allocation34_spill] sm:$0xff] }
 0x715   : > { %4104 = vrot.lane.b32.xlu0 %v3874_v41, %s5074_s26 }
 0x717   : > { %v4077_v35 = vpop.permute.xlu1 %4076 }
 0x718   : > { %v4199_v10 = vsel %vm535_vm1, %v8545_v59, %v4077_v35  ;;  %v3787_v7 = vpop.f32.mrf.mxu3 }
 0x719   : > { %v4232_v55 = vsel %vm4226_vm4, %v4199_v10, 0.0  ;;  %v3788_v52 = vadd.f32 %v3787_v7, %v7766_v26 }
 0x71a   : > { %4264 = vst [vmem:[%s7858_s7 + $0x28] sm:$0xff] %v4232_v55 }
 0x71b   : > { %v3877_v42 = vadd.f32 %v3876_v22, %v3788_v52  ;;  %v3881_v25 = vpop.f32.mrf.mxu1  ;;  %v8553_v52 = vld [vmem:[#allocation100_spill] sm:$0xff] }
 0x71d   : > { %4106 = vrot.lane.b32.xlu1 %v3877_v42, %s5074_s26 }
 0x71f   : > { %v4085_v9 = vpop.permute.xlu2 %4084 }
 0x720   : > { %v4203_v28 = vsel %vm535_vm1, %v8546_v16, %v4085_v9  ;;  %v3789_v48 = vpop.f32.mrf.mxu3 }
 0x721   : > { %v4236_v5 = vsel %vm4226_vm4, %v4203_v28, 0.0  ;;  %v3790_v21 = vadd.f32 %v3789_v48, %v7766_v26 }
 0x722   : > { %4268 = vst [vmem:[%s7858_s7 + $0x48] sm:$0xff] %v4236_v5 }
 0x723   : > { %v3879_v29 = vadd.f32 %v3878_v47, %v3790_v21  ;;  %v3883_v50 = vpop.f32.mrf.mxu1  ;;  %v8554_v21 = vld [vmem:[#allocation98_spill] sm:$0xff] }
 0x725   : > { %4108 = vrot.lane.b32.xlu2 %v3879_v29, %s5074_s26 }
 0x727   : > { %v4081_v62 = vpop.permute.xlu0 %4080 }
 0x728   : > { %v4201_v13 = vsel %vm535_vm1, %v8547_v19, %v4081_v62  ;;  %v3792_v27 = vpop.f32.mrf.mxu3 }
 0x729   : > { %v4234_v37 = vsel %vm4226_vm4, %v4201_v13, 0.0  ;;  %v3793_v18 = vadd.f32 %v3792_v27, %v7766_v26 }
 0x72a   : > { %4266 = vst [vmem:[%s7858_s7 + $0x38] sm:$0xff] %v4234_v37 }
 0x72b   : > { %v3882_v53 = vadd.f32 %v3881_v25, %v3793_v18  ;;  %v3886_v61 = vpop.f32.mrf.mxu1  ;;  %v8555_v18 = vld [vmem:[#allocation39_spill] sm:$0xff] }
 0x72d   : > { %4110 = vrot.lane.b32.xlu0 %v3882_v53, %s5074_s26 }
 0x72f   : > { %v4083_v60 = vpop.permute.xlu1 %4082 }
 0x730   : > { %v4202_v30 = vsel %vm535_vm1, %v8548_v57, %v4083_v60  ;;  %v3794_v39 = vpop.f32.mrf.mxu3 }
 0x731   : > { %v4235_v0 = vsel %vm4226_vm4, %v4202_v30, 0.0  ;;  %v3795_v36 = vadd.f32 %v3794_v39, %v7766_v26 }
 0x732   : > { %4267 = vst [vmem:[%s7858_s7 + $0x40] sm:$0xff] %v4235_v0  ;;  %v8556_v0 = vld [vmem:[#allocation11_spill] sm:$0xff] }
 0x733   : > { %v3884_v17 = vadd.f32 %v3883_v50, %v3795_v36  ;;  %v3888_v51 = vpop.f32.mrf.mxu1 }
 0x735   : > { %4112 = vrot.lane.b32.xlu1 %v3884_v17, %s5074_s26 }
 0x737   : > { %v4091_v40 = vpop.permute.xlu2 %4090 }
 0x738   : > { %v4206_v63 = vsel %vm535_vm1, %v8549_v8, %v4091_v40  ;;  %v3797_v14 = vpop.f32.mrf.mxu3 }
 0x739   : > { %v4239_v44 = vsel %vm4226_vm4, %v4206_v63, 0.0  ;;  %v3798_v46 = vadd.f32 %v3797_v14, %v7766_v26 }
 0x73a   : > { %4271 = vst [vmem:[%s7858_s7 + $0x60] sm:$0xff] %v4239_v44  ;;  %v8557_v44 = vld [vmem:[#allocation101_spill] sm:$0xff] }
 0x73b   : > { %v3887_v33 = vadd.f32 %v3886_v61, %v3798_v46  ;;  %v3891_v20 = vpop.f32.mrf.mxu1 }
 0x73d   : > { %4114 = vrot.lane.b32.xlu2 %v3887_v33, %s5074_s26 }
 0x73f   : > { %v4087_v56 = vpop.permute.xlu0 %4086 }
 0x740   : > { %v4204_v34 = vsel %vm535_vm1, %v8550_v23, %v4087_v56  ;;  %v3799_v32 = vpop.f32.mrf.mxu3 }
 0x741   : > { %v4237_v4 = vsel %vm4226_vm4, %v4204_v34, 0.0  ;;  %v3800_v11 = vadd.f32 %v3799_v32, %v7766_v26  ;;  %v8559_v32 = vld [vmem:[#allocation78_spill] sm:$0xff] }
 0x742   : > { %4269 = vst [vmem:[%s7858_s7 + $0x50] sm:$0xff] %v4237_v4 }
 0x743   : > { %v3889_v3 = vadd.f32 %v3888_v51, %v3800_v11  ;;  %v3893_v49 = vpop.f32.mrf.mxu1 }
 0x745   : > { %4116 = vrot.lane.b32.xlu0 %v3889_v3, %s5074_s26 }
 0x747   : > { %v4089_v1 = vpop.permute.xlu1 %4088 }
 0x748   : > { %v4205_v12 = vsel %vm535_vm1, %v8551_v45, %v4089_v1  ;;  %v3802_v22 = vpop.f32.mrf.mxu3  ;;  %v8560_v1 = vld [vmem:[#allocation14_spill] sm:$0xff] }
 0x749   : > { %v4238_v54 = vsel %vm4226_vm4, %v4205_v12, 0.0  ;;  %v3803_v2 = vadd.f32 %v3802_v22, %v7766_v26 }
 0x74a   : > { %4270 = vst [vmem:[%s7858_s7 + $0x58] sm:$0xff] %v4238_v54  ;;  %v8561_v54 = vld [vmem:[#allocation26_spill] sm:$0xff] }
 0x74b   : > { %v3892_v15 = vadd.f32 %v3891_v20, %v3803_v2  ;;  %v3896_v7 = vpop.f32.mrf.mxu1  ;;  %v8558_v20 = vld [vmem:[#allocation24_spill] sm:$0xff] }
 0x74d   : > { %4118 = vrot.lane.b32.xlu1 %v3892_v15, %s5074_s26 }
 0x74f   : > { %v4097_v43 = vpop.permute.xlu2 %4096 }
 0x750   : > { %v4209_v41 = vsel %vm535_vm1, %v8552_v24, %v4097_v43  ;;  %v3804_v47 = vpop.f32.mrf.mxu3  ;;  %v8562_v43 = vld [vmem:[#allocation3_spill] sm:$0xff] }
 0x751   : > { %v4242_v35 = vsel %vm4226_vm4, %v4209_v41, 0.0  ;;  %v3805_v59 = vadd.f32 %v3804_v47, %v7766_v26 }
 0x752   : > { %4274 = vst [vmem:[%s7858_s7 + $0x78] sm:$0xff] %v4242_v35  ;;  %v8563_v35 = vld [vmem:[#allocation22_spill] sm:$0xff] }
 0x753   : > { %v3894_v10 = vadd.f32 %v3893_v49, %v3805_v59  ;;  %v3898_v48 = vpop.f32.mrf.mxu1 }
 0x755   : > { %4120 = vrot.lane.b32.xlu2 %v3894_v10, %s5074_s26 }
 0x757   : > { %v4093_v55 = vpop.permute.xlu0 %4092 }
 0x758   : > { %v4207_v42 = vsel %vm535_vm1, %v8553_v52, %v4093_v55  ;;  %v3807_v25 = vpop.f32.mrf.mxu3  ;;  %v8564_v55 = vld [vmem:[#allocation51_spill] sm:$0xff] }
 0x759   : > { %v4240_v9 = vsel %vm4226_vm4, %v4207_v42, 0.0  ;;  %v3808_v16 = vadd.f32 %v3807_v25, %v7766_v26 }
 0x75a   : > { %4272 = vst [vmem:[%s7858_s7 + $0x68] sm:$0xff] %v4240_v9  ;;  %v8565_v9 = vld [vmem:[#allocation28_spill] sm:$0xff] }
 0x75b   : > { %v3897_v28 = vadd.f32 %v3896_v7, %v3808_v16  ;;  %v3901_v37 = vpop.f32.mrf.mxu1 }
 0x75d   : > { %4122 = vrot.lane.b32.xlu0 %v3897_v28, %s5074_s26 }
 0x75f   : > { %v4095_v5 = vpop.permute.xlu1 %4094 }
 0x760   : > { %v4208_v29 = vsel %vm535_vm1, %v8554_v21, %v4095_v5  ;;  %v3809_v50 = vpop.f32.mrf.mxu3  ;;  %v8566_v5 = vld [vmem:[#allocation85_spill] sm:$0xff] }
 0x761   : > { %v4241_v62 = vsel %vm4226_vm4, %v4208_v29, 0.0  ;;  %v3810_v19 = vadd.f32 %v3809_v50, %v7766_v26  ;;  %v8567_v50 = vld [vmem:[#allocation42_spill] sm:$0xff] }
 0x762   : > { %4273 = vst [vmem:[%s7858_s7 + $0x70] sm:$0xff] %v4241_v62 }
 0x763   : > { %v3899_v13 = vadd.f32 %v3898_v48, %v3810_v19  ;;  %v3903_v8 = vpop.f32.mrf.mxu1  ;;  %v5060_v48 = vld [vmem:[%s5151_s15 + $0xf0] sm:$0xff] }
 0x764   : > { %v1894_v21 = vmul.f32 %v5060_v48, %v8566_v5 }
 0x765   : > { %4124 = vrot.lane.b32.xlu1 %v3899_v13, %s5074_s26 }
 0x766   : > { %v1926_v19 = vadd.f32 %v7845_v6, %v1894_v21 }
 0x767   : > { %v4103_v27 = vpop.permute.xlu2 %4102 }
 0x768   : > { %v4212_v53 = vsel %vm535_vm1, %v8555_v18, %v4103_v27  ;;  %v3812_v61 = vpop.f32.mrf.mxu3  ;;  %v8568_v27 = vld [vmem:[#allocation66_spill] sm:$0xff] }
 0x769   : > { %v4245_v60 = vsel %vm4226_vm4, %v4212_v53, 0.0  ;;  %v3813_v57 = vadd.f32 %v3812_v61, %v7766_v26 }
 0x76a   : > { %4277 = vst [vmem:[%s7858_s7 + $0x90] sm:$0xff] %v4245_v60 }
 0x76b   : > { %v3902_v30 = vadd.f32 %v3901_v37, %v3813_v57  ;;  %v1958_v37 = vadd.f32 %v1926_v19, %v8568_v27  ;;  %v5061_v57 = vld [vmem:[%s5151_s15 + $0xe8] sm:$0xff] }
 0x76d   : > { %4126 = vrot.lane.b32.xlu2 %v3902_v30, %s5074_s26  ;;  %v4192_v18 = vsel %vm294_vm0, %v1958_v37, %v7877_v38  ;;  %v8569_v30 = vld [vmem:[#allocation86_spill] sm:$0xff]  ;;  %v8571_v38 = vld [vmem:[#allocation63_spill] sm:$0xff] }
 0x76f   : > { %v4099_v39 = vpop.permute.xlu0 %4098 }
 0x770   : > { %v4210_v36 = vsel %vm535_vm1, %v8556_v0, %v4099_v39  ;;  %v3814_v17 = vpop.f32.mrf.mxu3  ;;  %v1893_v39 = vmul.f32 %v5061_v57, %v8569_v30 }
 0x771   : > { %v4243_v51 = vsel %vm4226_vm4, %v4210_v36, 0.0  ;;  %v3815_v40 = vadd.f32 %v3814_v17, %v7766_v26  ;;  %v8570_v36 = vld [vmem:[#allocation47_spill] sm:$0xff] }
 0x772   : > { %4275 = vst [vmem:[%s7858_s7 + $0x80] sm:$0xff] %v4243_v51  ;;  %v1925_v51 = vadd.f32 %v7845_v6, %v1893_v39 }
 0x773   : > { %v3904_v63 = vadd.f32 %v3903_v8, %v3815_v40 }
 0x774   : > { %v1957_v8 = vadd.f32 %v1925_v51, %v8571_v38 }
 0x775   : > { %4128 = vrot.lane.b32.xlu0 %v3904_v63, %s5074_s26 }
 0x776   : > { %v4191_v63 = vsel %vm294_vm0, %v1957_v8, %v7836_v31 }
 0x777   : > { %v4101_v14 = vpop.permute.xlu1 %4100 }
 0x778   : > { %v4211_v46 = vsel %vm535_vm1, %v8557_v44, %v4101_v14 }
 0x779   : > { %v4244_v33 = vsel %vm4226_vm4, %v4211_v46, 0.0 }
 0x77a   : > { %4276 = vst [vmem:[%s7858_s7 + $0x88] sm:$0xff] %v4244_v33  ;;  %v5062_v33 = vld [vmem:[%s5151_s15 + $0xf8] sm:$0xff] }
 0x77f   : > { %v4109_v56 = vpop.permute.xlu2 %4108 }
 0x780   : > { %v4215_v23 = vsel %vm535_vm1, %v8558_v20, %v4109_v56  ;;  %v8572_v56 = vld [vmem:[#allocation80_spill] sm:$0xff] }
 0x781   : > { %v4248_v26 = vsel %vm4226_vm4, %v4215_v23, 0.0  ;;  %v1895_v20 = vmul.f32 %v5062_v33, %v8572_v56 }
 0x782   : > { %4280 = vst [vmem:[%s7858_s7 + $0xa8] sm:$0xff] %v4248_v26  ;;  %v8573_v26 = vld [vmem:[#allocation67_spill] sm:$0xff] }
 0x783   : > { %v1927_v23 = vadd.f32 %v7845_v6, %v1895_v20 }
 0x787   : > { %v4105_v34 = vpop.permute.xlu0 %4104 }
 0x788   : > { %v4213_v4 = vsel %vm535_vm1, %v8559_v32, %v4105_v34  ;;  %v1959_v34 = vadd.f32 %v1927_v23, %v8573_v26 }
 0x789   : > { %v4246_v11 = vsel %vm4226_vm4, %v4213_v4, 0.0 }
 0x78a   : > { %4278 = vst [vmem:[%s7858_s7 + $0x98] sm:$0xff] %v4246_v11  ;;  %v4193_v32 = vsel %vm294_vm0, %v1959_v34, %v7885_v58 }
 0x78f   : > { %v4107_v3 = vpop.permute.xlu1 %4106 }
 0x790   : > { %v4214_v45 = vsel %vm535_vm1, %v8560_v1, %v4107_v3 }
 0x791   : > { %v4247_v12 = vsel %vm4226_vm4, %v4214_v45, 0.0 }
 0x792   : > { %4279 = vst [vmem:[%s7858_s7 + $0xa0] sm:$0xff] %v4247_v12 }
 0x797   : > { %v4115_v22 = vpop.permute.xlu2 %4114 }
 0x798   : > { %v4218_v2 = vsel %vm535_vm1, %v8561_v54, %v4115_v22 }
 0x799   : > { %v4251_v49 = vsel %vm4226_vm4, %v4218_v2, 0.0 }
 0x79a   : > { %4283 = vst [vmem:[%s7858_s7 + $0xc0] sm:$0xff] %v4251_v49 }
 0x79f   : > { %v4111_v15 = vpop.permute.xlu0 %4110 }
 0x7a0   : > { %v4216_v24 = vsel %vm535_vm1, %v8562_v43, %v4111_v15 }
 0x7a1   : > { %v4249_v41 = vsel %vm4226_vm4, %v4216_v24, 0.0 }
 0x7a2   : > { %4281 = vst [vmem:[%s7858_s7 + $0xb0] sm:$0xff] %v4249_v41 }
 0x7a7   : > { %v4113_v47 = vpop.permute.xlu1 %4112 }
 0x7a8   : > { %v4217_v59 = vsel %vm535_vm1, %v8563_v35, %v4113_v47 }
 0x7a9   : > { %v4250_v10 = vsel %vm4226_vm4, %v4217_v59, 0.0 }
 0x7aa   : > { %4282 = vst [vmem:[%s7858_s7 + $0xb8] sm:$0xff] %v4250_v10 }
 0x7af   : > { %v4121_v7 = vpop.permute.xlu2 %4120 }
 0x7b0   : > { %v4221_v52 = vsel %vm535_vm1, %v8564_v55, %v4121_v7 }
 0x7b1   : > { %v4254_v42 = vsel %vm4226_vm4, %v4221_v52, 0.0 }
 0x7b2   : > { %4286 = vst [vmem:[%s7858_s7 + $0xd8] sm:$0xff] %v4254_v42 }
 0x7b7   : > { %v4117_v25 = vpop.permute.xlu0 %4116 }
 0x7b8   : > { %v4219_v16 = vsel %vm535_vm1, %v8565_v9, %v4117_v25 }
 0x7b9   : > { %v4252_v28 = vsel %vm4226_vm4, %v4219_v16, 0.0 }
 0x7ba   : > { %4284 = vst [vmem:[%s7858_s7 + $0xc8] sm:$0xff] %v4252_v28 }
 0x7bf   : > { %v4119_v29 = vpop.permute.xlu1 %4118 }
 0x7c0   : > { %v4220_v62 = vsel %vm535_vm1, %v8567_v50, %v4119_v29 }
 0x7c1   : > { %v4253_v13 = vsel %vm4226_vm4, %v4220_v62, 0.0 }
 0x7c2   : > { %4285 = vst [vmem:[%s7858_s7 + $0xd0] sm:$0xff] %v4253_v13 }
 0x7c7   : > { %v4127_v53 = vpop.permute.xlu2 %4126 }
 0x7c8   : > { %v4224_v61 = vsel %vm535_vm1, %v4192_v18, %v4127_v53 }
 0x7c9   : > { %v4257_v60 = vsel %vm4226_vm4, %v4224_v61, 0.0 }
 0x7ca   : > { %4289 = vst [vmem:[%s7858_s7 + $0xf0] sm:$0xff] %v4257_v60 }
 0x7cf   : > { %v4123_v0 = vpop.permute.xlu0 %4122 }
 0x7d0   : > { %v4222_v17 = vsel %vm535_vm1, %v8570_v36, %v4123_v0 }
 0x7d1   : > { %v4255_v40 = vsel %vm4226_vm4, %v4222_v17, 0.0 }
 0x7d2   : > { %4287 = vst [vmem:[%s7858_s7 + $0xe0] sm:$0xff] %v4255_v40 }
 0x7d7   : > { %v4125_v14 = vpop.permute.xlu1 %4124 }
 0x7d8   : > { %v4223_v44 = vsel %vm535_vm1, %v4191_v63, %v4125_v14 }
 0x7d9   : > { %v4256_v46 = vsel %vm4226_vm4, %v4223_v44, 0.0 }
 0x7da   : > { %4288 = vst [vmem:[%s7858_s7 + $0xe8] sm:$0xff] %v4256_v46 }
 0x7e7   : > { %v4129_v4 = vpop.permute.xlu0 %4128 }
 0x7e8   : > { %v4225_v11 = vsel %vm535_vm1, %v4193_v32, %v4129_v4 }
 0x7e9   : > { %v4258_v31 = vsel %vm4226_vm4, %v4225_v11, 0.0 }
 0x7ea   : > { %4290 = vst [vmem:[%s7858_s7 + $0xf8] sm:$0xff] %v4258_v31 }
 0x7eb PF: > { %s15_s18 = sadd.s32 1, %s5069_s18  }
 0x7ec   : > { %p12_p4 = scmp.ge.s32.totalorder %s15_s18, 6  }
 0x7ee   :  { %14 = sbr.rel (!%p12_p4) target bundleno = 1 (0x1), region = 71 }

</bundles_post_ra>
